<compile_context>
chip_gen: v5e
topology: v5e:2x2
jax: 0.10.0
libtpu: 0.0.40
codegen_flags: <defaults>
</compile_context>

<pallas_src>
import functools

import numpy as np
import jax
import jax.numpy as jnp
from jax.experimental import pallas as pl
from jax.experimental.pallas import tpu as pltpu

IMAGE_SIZE = (1, 28, 28)
LATENT_DIM = 96
LATENT_PAD = 128                       # latent zero-padded to one full lane group
HIDDEN = (128, 256, 512, 1024)
OUT_DIM = int(np.prod(IMAGE_SIZE))     # 784 = 6*128 + 16 (only the tail store is masked)
BN_EPS = 1e-5
_INV_SQRT2 = 1.0 / np.sqrt(2.0)


def _gelu_exact(x):
    # PyTorch default GELU: 0.5 * x * (1 + erf(x / sqrt(2)))
    return 0.5 * x * (1.0 + jax.lax.erf(x * _INV_SQRT2))


def _bn_gelu(acc, gamma, beta, groups):
    """Train-mode BatchNorm1d (biased per-group batch stats) + exact GELU.

    acc: (rows, dout) f32 with rows == groups * group_rows.  Statistics are taken
    independently over each contiguous block of group_rows rows (group_rows is a
    multiple of 8, so the reshape only regroups whole sublane tiles)."""
    if groups == 1:
        mean = jnp.mean(acc, axis=0, keepdims=True)
        var = jnp.mean(jnp.square(acc - mean), axis=0, keepdims=True)
        return _gelu_exact(gamma * (acc - mean) * jax.lax.rsqrt(var + BN_EPS) + beta)
    rows, dout = acc.shape
    g_rows = rows // groups
    x = acc.reshape(groups, g_rows, dout)          # splits the sublane-major axis only
    mean = jnp.mean(x, axis=1, keepdims=True)
    var = jnp.mean(jnp.square(x - mean), axis=1, keepdims=True)
    y = _gelu_exact(gamma * (x - mean) * jax.lax.rsqrt(var + BN_EPS) + beta)
    return y.reshape(rows, dout)


def generator_kernel(z_ref,
                     w1_ref, p1_ref, w2_ref, p2_ref,
                     w3_ref, p3_ref, w4_ref, p4_ref,
                     w5_ref, b5_ref, out_ref, *, groups_per_step):
    # Hidden-layer Linear biases are omitted: a per-column constant added before
    # train-mode BatchNorm is exactly cancelled by the mean subtraction.
    h = z_ref[...].astype(jnp.bfloat16)                       # (rows, 128)
    for w_ref, p_ref in ((w1_ref, p1_ref), (w2_ref, p2_ref),
                         (w3_ref, p3_ref), (w4_ref, p4_ref)):
        acc = jnp.dot(h, w_ref[...], preferred_element_type=jnp.float32)
        p = p_ref[...]                                        # (2, dout): [gamma; beta]
        h = _bn_gelu(acc, p[0:1, :], p[1:2, :], groups_per_step).astype(jnp.bfloat16)
    acc = jnp.dot(h, w5_ref[...], preferred_element_type=jnp.float32) + b5_ref[...]
    out_ref[...] = jax.nn.sigmoid(acc)                        # (rows, 784) f32, mostly lane-dense


def init_params(key):
    """Synthetic parameters with the same shapes/semantics as the PyTorch module.

    Returns (kernel_params, hidden_biases):
      kernel_params -- flat tuple consumed by the Pallas kernel:
        per hidden layer: W (din, dout) bf16 (layer-1 rows zero-padded 96->128)
                          and the BN affine packed as (2, dout) f32 [gamma; beta];
        output head:      W5 (1024, 784) bf16 and b5 (1, 784) f32.
      hidden_biases -- the four nn.Linear biases.  They are mathematically
        cancelled by train-mode BatchNorm, so the kernel never loads them; the
        pure-JAX reference applies them (PyTorch op order) to verify that."""
    keys = jax.random.split(key, 4 * len(HIDDEN) + 2)
    ki = iter(range(len(keys)))
    kparams, biases = [], []
    din = LATENT_DIM
    for dout in HIDDEN:
        w = jax.random.normal(keys[next(ki)], (din, dout), jnp.float32) * 0.02
        if din == LATENT_DIM:
            w = jnp.pad(w, ((0, LATENT_PAD - LATENT_DIM), (0, 0)))   # zero rows 96..127
        bias = jax.random.normal(keys[next(ki)], (1, dout), jnp.float32) * 0.01
        gamma = 1.0 + jax.random.normal(keys[next(ki)], (1, dout), jnp.float32) * 0.1
        beta = jax.random.normal(keys[next(ki)], (1, dout), jnp.float32) * 0.1
        kparams += [w.astype(jnp.bfloat16), jnp.concatenate([gamma, beta], axis=0)]
        biases.append(bias)
        din = dout
    w5 = jax.random.normal(keys[next(ki)], (din, OUT_DIM), jnp.float32) * 0.02
    b5 = jax.random.normal(keys[next(ki)], (1, OUT_DIM), jnp.float32) * 0.01
    kparams += [w5.astype(jnp.bfloat16), b5]
    return tuple(kparams), tuple(biases)


def generator_forward(z, kernel_params, *, bn_group=None, rows_per_step=256):
    """z: (B, 96) f32.

    bn_group=None -> one BatchNorm group over the whole batch (exact single-call
      PyTorch semantics); the whole batch is processed in one fat grid step.
    bn_group=g (multiple of 8, divides B) -> B//g independent forward passes,
      each with its own batch statistics (== repeated PyTorch calls).  As many
      whole groups as fit in `rows_per_step` rows are packed into each grid step
      (segmented BN reduction in-kernel), so the MXU M dimension stays full and
      the ~0.35 us/step overhead is amortized; weights use a constant index_map
      and stay VMEM-resident across steps."""
    B = z.shape[0]
    if bn_group is None:
        bn_group = B
    assert B % bn_group == 0 and bn_group % 8 == 0, (B, bn_group)
    num_groups = B // bn_group
    rows_cap = max(rows_per_step, bn_group)
    groups_per_step = max(g for g in range(1, num_groups + 1)
                          if num_groups % g == 0 and g * bn_group <= rows_cap)
    rows = groups_per_step * bn_group
    num_steps = num_groups // groups_per_step

    # Lane-align the latent (96 -> 128); w1 rows were zero-padded to match.
    zp = jnp.pad(z, ((0, 0), (0, LATENT_PAD - LATENT_DIM)))

    dims_in = (LATENT_PAD,) + HIDDEN
    dims_out = HIDDEN + (OUT_DIM,)
    flops = int(2 * B * sum(di * do for di, do in zip(dims_in, dims_out)))
    weight_bytes = int(sum(int(np.prod(p.shape)) * p.dtype.itemsize
                           for p in kernel_params))
    bytes_accessed = int(weight_bytes + B * LATENT_PAD * 4 + B * OUT_DIM * 4)
    transcendentals = int(B * (sum(HIDDEN) + OUT_DIM))

    io_map = lambda n: (n, 0)         # per-step row block of z / out
    w_map = lambda n: (0, 0)          # constant block index -> weights resident

    in_specs = [pl.BlockSpec((rows, LATENT_PAD), io_map)]
    in_specs += [pl.BlockSpec(p.shape, w_map) for p in kernel_params]

    kernel = functools.partial(generator_kernel, groups_per_step=groups_per_step)

    # Output is emitted as (B, 784) directly (no 896-wide pad and no post-kernel
    # slice copy); the reshape below is a free bitcast.
    flat = pl.pallas_call(
        kernel,
        out_shape=jax.ShapeDtypeStruct((B, OUT_DIM), jnp.float32),
        grid=(num_steps,),
        in_specs=in_specs,
        out_specs=pl.BlockSpec((rows, OUT_DIM), io_map),
        compiler_params=pltpu.CompilerParams(
            dimension_semantics=("parallel",),
            vmem_limit_bytes=32 << 20),
        cost_estimate=pl.CostEstimate(
            flops=flops,
            transcendentals=transcendentals,
            bytes_accessed=bytes_accessed),
    )(zp, *kernel_params)
    return flat.reshape(B, *IMAGE_SIZE)


def generator_reference(z, kernel_params, hidden_biases, *, bn_group=None):
    """Pure-JAX reference in PyTorch op order (Linear *with* bias -> BN(train)
    -> GELU, ..., Linear -> Sigmoid), using the same bf16 matmul inputs / f32
    accumulation as the kernel.  The hidden biases are applied here even though
    the kernel skips them, verifying the BN cancellation."""
    B = z.shape[0]
    bn_group = B if bn_group is None else bn_group
    w1, p1, w2, p2, w3, p3, w4, p4, w5, b5 = kernel_params
    zp = jnp.pad(z, ((0, 0), (0, LATENT_PAD - LATENT_DIM)))

    def one_group(zg):
        h = zg
        for (w, p), b in zip(((w1, p1), (w2, p2), (w3, p3), (w4, p4)),
                             hidden_biases):
            acc = jnp.dot(h.astype(jnp.bfloat16), w,
                          preferred_element_type=jnp.float32) + b
            mean = jnp.mean(acc, axis=0, keepdims=True)
            var = jnp.mean(jnp.square(acc - mean), axis=0, keepdims=True)
            h = _gelu_exact(p[0:1, :] * (acc - mean) * jax.lax.rsqrt(var + BN_EPS)
                            + p[1:2, :])
        acc = jnp.dot(h.astype(jnp.bfloat16), w5,
                      preferred_element_type=jnp.float32) + b5
        return jax.nn.sigmoid(acc)

    groups = [one_group(zp[i * bn_group:(i + 1) * bn_group])
              for i in range(B // bn_group)]
    return jnp.concatenate(groups, axis=0).reshape(B, *IMAGE_SIZE)


if __name__ == "__main__":
    key = jax.random.PRNGKey(0)
    k_z, k_p = jax.random.split(key)
    kernel_params, hidden_biases = init_params(k_p)

    # 1) Single BN group over the whole batch (exact single-call PyTorch
    #    semantics); one fat grid step.
    B = 8  # BatchNorm1d in training mode needs batch > 1
    z = jax.random.normal(k_z, (B, LATENT_DIM), jnp.float32)
    img = jax.block_until_ready(generator_forward(z, kernel_params))
    assert img.shape == (B, *IMAGE_SIZE), img.shape
    ref = generator_reference(z, kernel_params, hidden_biases)
    np.testing.assert_allclose(np.asarray(img), np.asarray(ref),
                               rtol=5e-3, atol=5e-3)

    # 2) 8 independent BN groups of 8, all packed into ONE grid step: the
    #    in-kernel segmented BN reduction keeps 64 MXU rows per matmul.
    zb = jax.random.normal(jax.random.PRNGKey(1), (64, LATENT_DIM), jnp.float32)
    imgb = jax.block_until_ready(generator_forward(zb, kernel_params, bn_group=8))
    refb = generator_reference(zb, kernel_params, hidden_biases, bn_group=8)
    np.testing.assert_allclose(np.asarray(imgb), np.asarray(refb),
                               rtol=5e-3, atol=5e-3)

    # 3) Same batch forced onto a 4-step grid (2 groups / 16 rows per step):
    #    exercises VMEM-resident weights across steps and the "parallel" grid
    #    axis (sharded across both TensorCores on v7x).
    imgc = jax.block_until_ready(
        generator_forward(zb, kernel_params, bn_group=8, rows_per_step=16))
    np.testing.assert_allclose(np.asarray(imgc), np.asarray(refb),
                               rtol=5e-3, atol=5e-3)

    print("KERNEL_OK")
</pallas_src>

<mosaic_0001>
module attributes {stable_mosaic.version = 11 : i64} {
  func.func @generator_kernel(%arg0: i32, %arg1: memref<8x128xf32, #tpu.memory_space<vmem>>, %arg2: memref<128x128xbf16, #tpu.memory_space<vmem>>, %arg3: memref<2x128xf32, #tpu.memory_space<vmem>>, %arg4: memref<128x256xbf16, #tpu.memory_space<vmem>>, %arg5: memref<2x256xf32, #tpu.memory_space<vmem>>, %arg6: memref<256x512xbf16, #tpu.memory_space<vmem>>, %arg7: memref<2x512xf32, #tpu.memory_space<vmem>>, %arg8: memref<512x1024xbf16, #tpu.memory_space<vmem>>, %arg9: memref<2x1024xf32, #tpu.memory_space<vmem>>, %arg10: memref<1024x784xbf16, #tpu.memory_space<vmem>>, %arg11: memref<1x784xf32, #tpu.memory_space<vmem>>, %arg12: memref<8x784xf32, #tpu.memory_space<vmem>>) attributes {dimension_semantics = [#tpu.dimension_semantics<parallel>], iteration_bounds = array<i64: 1>, scalar_prefetch = 0 : i64, scratch_operands = 0 : i64, tpu.core_type = #tpu.core_type<tc>, window_params = [{transform_indices = @transform_0, window_bounds = array<i64: 8, 128>}, {pipeline_mode = #tpu.pipeline_mode<synchronous>, transform_indices = @transform_1, window_bounds = array<i64: 128, 128>}, {pipeline_mode = #tpu.pipeline_mode<synchronous>, transform_indices = @transform_2, window_bounds = array<i64: 2, 128>}, {pipeline_mode = #tpu.pipeline_mode<synchronous>, transform_indices = @transform_3, window_bounds = array<i64: 128, 256>}, {pipeline_mode = #tpu.pipeline_mode<synchronous>, transform_indices = @transform_4, window_bounds = array<i64: 2, 256>}, {pipeline_mode = #tpu.pipeline_mode<synchronous>, transform_indices = @transform_5, window_bounds = array<i64: 256, 512>}, {pipeline_mode = #tpu.pipeline_mode<synchronous>, transform_indices = @transform_6, window_bounds = array<i64: 2, 512>}, {pipeline_mode = #tpu.pipeline_mode<synchronous>, transform_indices = @transform_7, window_bounds = array<i64: 512, 1024>}, {pipeline_mode = #tpu.pipeline_mode<synchronous>, transform_indices = @transform_8, window_bounds = array<i64: 2, 1024>}, {pipeline_mode = #tpu.pipeline_mode<synchronous>, transform_indices = @transform_9, window_bounds = array<i64: 1024, 784>}, {pipeline_mode = #tpu.pipeline_mode<synchronous>, transform_indices = @transform_10, window_bounds = array<i64: 1, 784>}, {transform_indices = @transform_11, window_bounds = array<i64: 8, 784>}]} {
    %c0 = arith.constant 0 : index
    %c0_0 = arith.constant 0 : index
    %0 = vector.load %arg1[%c0, %c0_0] : memref<8x128xf32, #tpu.memory_space<vmem>>, vector<8x128xf32>
    %1 = arith.truncf %0 : vector<8x128xf32> to vector<8x128xbf16>
    %c0_1 = arith.constant 0 : index
    %c0_2 = arith.constant 0 : index
    %2 = vector.load %arg2[%c0_1, %c0_2] : memref<128x128xbf16, #tpu.memory_space<vmem>>, vector<128x128xbf16>
    %cst = arith.constant dense<0.000000e+00> : vector<8x128xf32>
    %3 = tpu.matmul %1, %2, %cst {dimension_numbers = #tpu.dot_dimension_numbers<[1], [0], [0], [1], [0, 0, 1, 1], [], []>} : vector<8x128xbf16>, vector<128x128xbf16>, vector<8x128xf32> -> vector<8x128xf32>
    %c0_3 = arith.constant 0 : index
    %c0_4 = arith.constant 0 : index
    %4 = vector.load %arg3[%c0_3, %c0_4] : memref<2x128xf32, #tpu.memory_space<vmem>>, vector<2x128xf32>
    %5 = vector.extract_strided_slice %4 {offsets = [0, 0], sizes = [1, 128], strides = [1, 1]} : vector<2x128xf32> to vector<1x128xf32>
    %6 = vector.extract_strided_slice %4 {offsets = [1, 0], sizes = [1, 128], strides = [1, 1]} : vector<2x128xf32> to vector<1x128xf32>
    %cst_5 = arith.constant dense<0.000000e+00> : vector<128xf32>
    %7 = vector.multi_reduction <add>, %3, %cst_5 [0] : vector<8x128xf32> to vector<128xf32>
    %8 = vector.shape_cast %7 : vector<128xf32> to vector<1x128xf32>
    %cst_6 = arith.constant 8.000000e+00 : f32
    %9 = vector.broadcast %cst_6 : f32 to vector<1x128xf32>
    %10 = arith.divf %8, %9 : vector<1x128xf32>
    %11 = vector.broadcast %10 : vector<1x128xf32> to vector<8x128xf32>
    %12 = arith.subf %3, %11 : vector<8x128xf32>
    %13 = arith.mulf %12, %12 : vector<8x128xf32>
    %cst_7 = arith.constant dense<0.000000e+00> : vector<128xf32>
    %14 = vector.multi_reduction <add>, %13, %cst_7 [0] : vector<8x128xf32> to vector<128xf32>
    %15 = vector.shape_cast %14 : vector<128xf32> to vector<1x128xf32>
    %cst_8 = arith.constant 8.000000e+00 : f32
    %16 = vector.broadcast %cst_8 : f32 to vector<1x128xf32>
    %17 = arith.divf %15, %16 : vector<1x128xf32>
    %18 = vector.broadcast %10 : vector<1x128xf32> to vector<8x128xf32>
    %19 = arith.subf %3, %18 : vector<8x128xf32>
    %20 = vector.broadcast %5 : vector<1x128xf32> to vector<8x128xf32>
    %21 = arith.mulf %20, %19 : vector<8x128xf32>
    %cst_9 = arith.constant 9.99999974E-6 : f32
    %22 = vector.broadcast %cst_9 : f32 to vector<1x128xf32>
    %23 = arith.addf %17, %22 : vector<1x128xf32>
    %24 = math.rsqrt %23 : vector<1x128xf32>
    %25 = vector.broadcast %24 : vector<1x128xf32> to vector<8x128xf32>
    %26 = arith.mulf %21, %25 : vector<8x128xf32>
    %27 = vector.broadcast %6 : vector<1x128xf32> to vector<8x128xf32>
    %28 = arith.addf %26, %27 : vector<8x128xf32>
    %cst_10 = arith.constant 5.000000e-01 : f32
    %29 = vector.broadcast %cst_10 : f32 to vector<8x128xf32>
    %30 = arith.mulf %29, %28 : vector<8x128xf32>
    %cst_11 = arith.constant 0.707106769 : f32
    %31 = vector.broadcast %cst_11 : f32 to vector<8x128xf32>
    %32 = arith.mulf %28, %31 : vector<8x128xf32>
    %33 = math.erf %32 : vector<8x128xf32>
    %cst_12 = arith.constant 1.000000e+00 : f32
    %34 = vector.broadcast %cst_12 : f32 to vector<8x128xf32>
    %35 = arith.addf %34, %33 : vector<8x128xf32>
    %36 = arith.mulf %30, %35 : vector<8x128xf32>
    %37 = arith.truncf %36 : vector<8x128xf32> to vector<8x128xbf16>
    %c0_13 = arith.constant 0 : index
    %c0_14 = arith.constant 0 : index
    %38 = vector.load %arg4[%c0_13, %c0_14] : memref<128x256xbf16, #tpu.memory_space<vmem>>, vector<128x256xbf16>
    %cst_15 = arith.constant dense<0.000000e+00> : vector<8x256xf32>
    %39 = tpu.matmul %37, %38, %cst_15 {dimension_numbers = #tpu.dot_dimension_numbers<[1], [0], [0], [1], [0, 0, 1, 1], [], []>} : vector<8x128xbf16>, vector<128x256xbf16>, vector<8x256xf32> -> vector<8x256xf32>
    %c0_16 = arith.constant 0 : index
    %c0_17 = arith.constant 0 : index
    %40 = vector.load %arg5[%c0_16, %c0_17] : memref<2x256xf32, #tpu.memory_space<vmem>>, vector<2x256xf32>
    %41 = vector.extract_strided_slice %40 {offsets = [0, 0], sizes = [1, 256], strides = [1, 1]} : vector<2x256xf32> to vector<1x256xf32>
    %42 = vector.extract_strided_slice %40 {offsets = [1, 0], sizes = [1, 256], strides = [1, 1]} : vector<2x256xf32> to vector<1x256xf32>
    %cst_18 = arith.constant dense<0.000000e+00> : vector<256xf32>
    %43 = vector.multi_reduction <add>, %39, %cst_18 [0] : vector<8x256xf32> to vector<256xf32>
    %44 = vector.shape_cast %43 : vector<256xf32> to vector<1x256xf32>
    %cst_19 = arith.constant 8.000000e+00 : f32
    %45 = vector.broadcast %cst_19 : f32 to vector<1x256xf32>
    %46 = arith.divf %44, %45 : vector<1x256xf32>
    %47 = vector.broadcast %46 : vector<1x256xf32> to vector<8x256xf32>
    %48 = arith.subf %39, %47 : vector<8x256xf32>
    %49 = arith.mulf %48, %48 : vector<8x256xf32>
    %cst_20 = arith.constant dense<0.000000e+00> : vector<256xf32>
    %50 = vector.multi_reduction <add>, %49, %cst_20 [0] : vector<8x256xf32> to vector<256xf32>
    %51 = vector.shape_cast %50 : vector<256xf32> to vector<1x256xf32>
    %cst_21 = arith.constant 8.000000e+00 : f32
    %52 = vector.broadcast %cst_21 : f32 to vector<1x256xf32>
    %53 = arith.divf %51, %52 : vector<1x256xf32>
    %54 = vector.broadcast %46 : vector<1x256xf32> to vector<8x256xf32>
    %55 = arith.subf %39, %54 : vector<8x256xf32>
    %56 = vector.broadcast %41 : vector<1x256xf32> to vector<8x256xf32>
    %57 = arith.mulf %56, %55 : vector<8x256xf32>
    %cst_22 = arith.constant 9.99999974E-6 : f32
    %58 = vector.broadcast %cst_22 : f32 to vector<1x256xf32>
    %59 = arith.addf %53, %58 : vector<1x256xf32>
    %60 = math.rsqrt %59 : vector<1x256xf32>
    %61 = vector.broadcast %60 : vector<1x256xf32> to vector<8x256xf32>
    %62 = arith.mulf %57, %61 : vector<8x256xf32>
    %63 = vector.broadcast %42 : vector<1x256xf32> to vector<8x256xf32>
    %64 = arith.addf %62, %63 : vector<8x256xf32>
    %cst_23 = arith.constant 5.000000e-01 : f32
    %65 = vector.broadcast %cst_23 : f32 to vector<8x256xf32>
    %66 = arith.mulf %65, %64 : vector<8x256xf32>
    %cst_24 = arith.constant 0.707106769 : f32
    %67 = vector.broadcast %cst_24 : f32 to vector<8x256xf32>
    %68 = arith.mulf %64, %67 : vector<8x256xf32>
    %69 = math.erf %68 : vector<8x256xf32>
    %cst_25 = arith.constant 1.000000e+00 : f32
    %70 = vector.broadcast %cst_25 : f32 to vector<8x256xf32>
    %71 = arith.addf %70, %69 : vector<8x256xf32>
    %72 = arith.mulf %66, %71 : vector<8x256xf32>
    %73 = arith.truncf %72 : vector<8x256xf32> to vector<8x256xbf16>
    %c0_26 = arith.constant 0 : index
    %c0_27 = arith.constant 0 : index
    %74 = vector.load %arg6[%c0_26, %c0_27] : memref<256x512xbf16, #tpu.memory_space<vmem>>, vector<256x512xbf16>
    %cst_28 = arith.constant dense<0.000000e+00> : vector<8x512xf32>
    %75 = tpu.matmul %73, %74, %cst_28 {dimension_numbers = #tpu.dot_dimension_numbers<[1], [0], [0], [1], [0, 0, 1, 1], [], []>} : vector<8x256xbf16>, vector<256x512xbf16>, vector<8x512xf32> -> vector<8x512xf32>
    %c0_29 = arith.constant 0 : index
    %c0_30 = arith.constant 0 : index
    %76 = vector.load %arg7[%c0_29, %c0_30] : memref<2x512xf32, #tpu.memory_space<vmem>>, vector<2x512xf32>
    %77 = vector.extract_strided_slice %76 {offsets = [0, 0], sizes = [1, 512], strides = [1, 1]} : vector<2x512xf32> to vector<1x512xf32>
    %78 = vector.extract_strided_slice %76 {offsets = [1, 0], sizes = [1, 512], strides = [1, 1]} : vector<2x512xf32> to vector<1x512xf32>
    %cst_31 = arith.constant dense<0.000000e+00> : vector<512xf32>
    %79 = vector.multi_reduction <add>, %75, %cst_31 [0] : vector<8x512xf32> to vector<512xf32>
    %80 = vector.shape_cast %79 : vector<512xf32> to vector<1x512xf32>
    %cst_32 = arith.constant 8.000000e+00 : f32
    %81 = vector.broadcast %cst_32 : f32 to vector<1x512xf32>
    %82 = arith.divf %80, %81 : vector<1x512xf32>
    %83 = vector.broadcast %82 : vector<1x512xf32> to vector<8x512xf32>
    %84 = arith.subf %75, %83 : vector<8x512xf32>
    %85 = arith.mulf %84, %84 : vector<8x512xf32>
    %cst_33 = arith.constant dense<0.000000e+00> : vector<512xf32>
    %86 = vector.multi_reduction <add>, %85, %cst_33 [0] : vector<8x512xf32> to vector<512xf32>
    %87 = vector.shape_cast %86 : vector<512xf32> to vector<1x512xf32>
    %cst_34 = arith.constant 8.000000e+00 : f32
    %88 = vector.broadcast %cst_34 : f32 to vector<1x512xf32>
    %89 = arith.divf %87, %88 : vector<1x512xf32>
    %90 = vector.broadcast %82 : vector<1x512xf32> to vector<8x512xf32>
    %91 = arith.subf %75, %90 : vector<8x512xf32>
    %92 = vector.broadcast %77 : vector<1x512xf32> to vector<8x512xf32>
    %93 = arith.mulf %92, %91 : vector<8x512xf32>
    %cst_35 = arith.constant 9.99999974E-6 : f32
    %94 = vector.broadcast %cst_35 : f32 to vector<1x512xf32>
    %95 = arith.addf %89, %94 : vector<1x512xf32>
    %96 = math.rsqrt %95 : vector<1x512xf32>
    %97 = vector.broadcast %96 : vector<1x512xf32> to vector<8x512xf32>
    %98 = arith.mulf %93, %97 : vector<8x512xf32>
    %99 = vector.broadcast %78 : vector<1x512xf32> to vector<8x512xf32>
    %100 = arith.addf %98, %99 : vector<8x512xf32>
    %cst_36 = arith.constant 5.000000e-01 : f32
    %101 = vector.broadcast %cst_36 : f32 to vector<8x512xf32>
    %102 = arith.mulf %101, %100 : vector<8x512xf32>
    %cst_37 = arith.constant 0.707106769 : f32
    %103 = vector.broadcast %cst_37 : f32 to vector<8x512xf32>
    %104 = arith.mulf %100, %103 : vector<8x512xf32>
    %105 = math.erf %104 : vector<8x512xf32>
    %cst_38 = arith.constant 1.000000e+00 : f32
    %106 = vector.broadcast %cst_38 : f32 to vector<8x512xf32>
    %107 = arith.addf %106, %105 : vector<8x512xf32>
    %108 = arith.mulf %102, %107 : vector<8x512xf32>
    %109 = arith.truncf %108 : vector<8x512xf32> to vector<8x512xbf16>
    %c0_39 = arith.constant 0 : index
    %c0_40 = arith.constant 0 : index
    %110 = vector.load %arg8[%c0_39, %c0_40] : memref<512x1024xbf16, #tpu.memory_space<vmem>>, vector<512x1024xbf16>
    %cst_41 = arith.constant dense<0.000000e+00> : vector<8x1024xf32>
    %111 = tpu.matmul %109, %110, %cst_41 {dimension_numbers = #tpu.dot_dimension_numbers<[1], [0], [0], [1], [0, 0, 1, 1], [], []>} : vector<8x512xbf16>, vector<512x1024xbf16>, vector<8x1024xf32> -> vector<8x1024xf32>
    %c0_42 = arith.constant 0 : index
    %c0_43 = arith.constant 0 : index
    %112 = vector.load %arg9[%c0_42, %c0_43] : memref<2x1024xf32, #tpu.memory_space<vmem>>, vector<2x1024xf32>
    %113 = vector.extract_strided_slice %112 {offsets = [0, 0], sizes = [1, 1024], strides = [1, 1]} : vector<2x1024xf32> to vector<1x1024xf32>
    %114 = vector.extract_strided_slice %112 {offsets = [1, 0], sizes = [1, 1024], strides = [1, 1]} : vector<2x1024xf32> to vector<1x1024xf32>
    %cst_44 = arith.constant dense<0.000000e+00> : vector<1024xf32>
    %115 = vector.multi_reduction <add>, %111, %cst_44 [0] : vector<8x1024xf32> to vector<1024xf32>
    %116 = vector.shape_cast %115 : vector<1024xf32> to vector<1x1024xf32>
    %cst_45 = arith.constant 8.000000e+00 : f32
    %117 = vector.broadcast %cst_45 : f32 to vector<1x1024xf32>
    %118 = arith.divf %116, %117 : vector<1x1024xf32>
    %119 = vector.broadcast %118 : vector<1x1024xf32> to vector<8x1024xf32>
    %120 = arith.subf %111, %119 : vector<8x1024xf32>
    %121 = arith.mulf %120, %120 : vector<8x1024xf32>
    %cst_46 = arith.constant dense<0.000000e+00> : vector<1024xf32>
    %122 = vector.multi_reduction <add>, %121, %cst_46 [0] : vector<8x1024xf32> to vector<1024xf32>
    %123 = vector.shape_cast %122 : vector<1024xf32> to vector<1x1024xf32>
    %cst_47 = arith.constant 8.000000e+00 : f32
    %124 = vector.broadcast %cst_47 : f32 to vector<1x1024xf32>
    %125 = arith.divf %123, %124 : vector<1x1024xf32>
    %126 = vector.broadcast %118 : vector<1x1024xf32> to vector<8x1024xf32>
    %127 = arith.subf %111, %126 : vector<8x1024xf32>
    %128 = vector.broadcast %113 : vector<1x1024xf32> to vector<8x1024xf32>
    %129 = arith.mulf %128, %127 : vector<8x1024xf32>
    %cst_48 = arith.constant 9.99999974E-6 : f32
    %130 = vector.broadcast %cst_48 : f32 to vector<1x1024xf32>
    %131 = arith.addf %125, %130 : vector<1x1024xf32>
    %132 = math.rsqrt %131 : vector<1x1024xf32>
    %133 = vector.broadcast %132 : vector<1x1024xf32> to vector<8x1024xf32>
    %134 = arith.mulf %129, %133 : vector<8x1024xf32>
    %135 = vector.broadcast %114 : vector<1x1024xf32> to vector<8x1024xf32>
    %136 = arith.addf %134, %135 : vector<8x1024xf32>
    %cst_49 = arith.constant 5.000000e-01 : f32
    %137 = vector.broadcast %cst_49 : f32 to vector<8x1024xf32>
    %138 = arith.mulf %137, %136 : vector<8x1024xf32>
    %cst_50 = arith.constant 0.707106769 : f32
    %139 = vector.broadcast %cst_50 : f32 to vector<8x1024xf32>
    %140 = arith.mulf %136, %139 : vector<8x1024xf32>
    %141 = math.erf %140 : vector<8x1024xf32>
    %cst_51 = arith.constant 1.000000e+00 : f32
    %142 = vector.broadcast %cst_51 : f32 to vector<8x1024xf32>
    %143 = arith.addf %142, %141 : vector<8x1024xf32>
    %144 = arith.mulf %138, %143 : vector<8x1024xf32>
    %145 = arith.truncf %144 : vector<8x1024xf32> to vector<8x1024xbf16>
    %c0_52 = arith.constant 0 : index
    %c0_53 = arith.constant 0 : index
    %146 = vector.load %arg10[%c0_52, %c0_53] : memref<1024x784xbf16, #tpu.memory_space<vmem>>, vector<1024x784xbf16>
    %cst_54 = arith.constant dense<0.000000e+00> : vector<8x784xf32>
    %147 = tpu.matmul %145, %146, %cst_54 {dimension_numbers = #tpu.dot_dimension_numbers<[1], [0], [0], [1], [0, 0, 1, 1], [], []>} : vector<8x1024xbf16>, vector<1024x784xbf16>, vector<8x784xf32> -> vector<8x784xf32>
    %c0_55 = arith.constant 0 : index
    %c0_56 = arith.constant 0 : index
    %148 = vector.load %arg11[%c0_55, %c0_56] : memref<1x784xf32, #tpu.memory_space<vmem>>, vector<1x784xf32>
    %149 = vector.broadcast %148 : vector<1x784xf32> to vector<8x784xf32>
    %150 = arith.addf %147, %149 : vector<8x784xf32>
    %151 = arith.negf %150 : vector<8x784xf32>
    %152 = math.exp %151 : vector<8x784xf32>
    %cst_57 = arith.constant 1.000000e+00 : f32
    %153 = vector.broadcast %cst_57 : f32 to vector<8x784xf32>
    %154 = arith.addf %153, %152 : vector<8x784xf32>
    %155 = arith.divf %153, %154 : vector<8x784xf32>
    %c0_58 = arith.constant 0 : index
    %c0_59 = arith.constant 0 : index
    %156 = vector.load %arg12[%c0_58, %c0_59] : memref<8x784xf32, #tpu.memory_space<vmem>>, vector<8x784xf32>
    tpu.vector_store %arg12[%c0_58, %c0_59], %155 {strides = array<i32>} : memref<8x784xf32, #tpu.memory_space<vmem>>, vector<8x784xf32>,
    return
  }
  func.func @transform_0(%arg0: i32) -> (i32, i32) {
    %c0_i32 = arith.constant 0 : i32
    %c0_i32_0 = arith.constant 0 : i32
    return %arg0, %c0_i32 : i32, i32
  }
  func.func @transform_1(%arg0: i32) -> (i32, i32) {
    %c0_i32 = arith.constant 0 : i32
    %c0_i32_0 = arith.constant 0 : i32
    %c0_i32_1 = arith.constant 0 : i32
    return %c0_i32, %c0_i32_0 : i32, i32
  }
  func.func @transform_2(%arg0: i32) -> (i32, i32) {
    %c0_i32 = arith.constant 0 : i32
    %c0_i32_0 = arith.constant 0 : i32
    %c0_i32_1 = arith.constant 0 : i32
    return %c0_i32, %c0_i32_0 : i32, i32
  }
  func.func @transform_3(%arg0: i32) -> (i32, i32) {
    %c0_i32 = arith.constant 0 : i32
    %c0_i32_0 = arith.constant 0 : i32
    %c0_i32_1 = arith.constant 0 : i32
    return %c0_i32, %c0_i32_0 : i32, i32
  }
  func.func @transform_4(%arg0: i32) -> (i32, i32) {
    %c0_i32 = arith.constant 0 : i32
    %c0_i32_0 = arith.constant 0 : i32
    %c0_i32_1 = arith.constant 0 : i32
    return %c0_i32, %c0_i32_0 : i32, i32
  }
  func.func @transform_5(%arg0: i32) -> (i32, i32) {
    %c0_i32 = arith.constant 0 : i32
    %c0_i32_0 = arith.constant 0 : i32
    %c0_i32_1 = arith.constant 0 : i32
    return %c0_i32, %c0_i32_0 : i32, i32
  }
  func.func @transform_6(%arg0: i32) -> (i32, i32) {
    %c0_i32 = arith.constant 0 : i32
    %c0_i32_0 = arith.constant 0 : i32
    %c0_i32_1 = arith.constant 0 : i32
    return %c0_i32, %c0_i32_0 : i32, i32
  }
  func.func @transform_7(%arg0: i32) -> (i32, i32) {
    %c0_i32 = arith.constant 0 : i32
    %c0_i32_0 = arith.constant 0 : i32
    %c0_i32_1 = arith.constant 0 : i32
    return %c0_i32, %c0_i32_0 : i32, i32
  }
  func.func @transform_8(%arg0: i32) -> (i32, i32) {
    %c0_i32 = arith.constant 0 : i32
    %c0_i32_0 = arith.constant 0 : i32
    %c0_i32_1 = arith.constant 0 : i32
    return %c0_i32, %c0_i32_0 : i32, i32
  }
  func.func @transform_9(%arg0: i32) -> (i32, i32) {
    %c0_i32 = arith.constant 0 : i32
    %c0_i32_0 = arith.constant 0 : i32
    %c0_i32_1 = arith.constant 0 : i32
    return %c0_i32, %c0_i32_0 : i32, i32
  }
  func.func @transform_10(%arg0: i32) -> (i32, i32) {
    %c0_i32 = arith.constant 0 : i32
    %c0_i32_0 = arith.constant 0 : i32
    %c0_i32_1 = arith.constant 0 : i32
    return %c0_i32, %c0_i32_0 : i32, i32
  }
  func.func @transform_11(%arg0: i32) -> (i32, i32) {
    %c0_i32 = arith.constant 0 : i32
    %c0_i32_0 = arith.constant 0 : i32
    return %arg0, %c0_i32 : i32, i32
  }
}

</mosaic_0001>

<bundles_post_ra>
// kernel: tpu_custom_call.1
= control target key start
LH: loop header
LB: loop body
LE: loop exit
PB: predicated region body
PF: predicated region fallthrough
CT: control target
= control target key end

     0   :  { %s17749_s0 = inlined_call_operand.vmem [shape: f32[8,128], index: 0, kind: input, shape index: {}]   ;;  %s17750_s1 = inlined_call_operand.vmem [shape: bf16[128,128], index: 1, kind: input, shape index: {}]   ;;  %s17751_s2 = inlined_call_operand.vmem [shape: f32[2,128], index: 2, kind: input, shape index: {}]   ;;  %s17752_s3 = inlined_call_operand.vmem [shape: bf16[128,256], index: 3, kind: input, shape index: {}]   ;;  %s17753_s4 = inlined_call_operand.vmem [shape: f32[2,256], index: 4, kind: input, shape index: {}]   ;;  %s17754_s5 = inlined_call_operand.vmem [shape: bf16[256,512], index: 5, kind: input, shape index: {}]   ;;  %s17755_s6 = inlined_call_operand.vmem [shape: f32[2,512], index: 6, kind: input, shape index: {}]   ;;  %s17756_s7 = inlined_call_operand.vmem [shape: bf16[512,1024], index: 7, kind: input, shape index: {}]   ;;  %s17757_s8 = inlined_call_operand.vmem [shape: f32[2,1024], index: 8, kind: input, shape index: {}]   ;;  %s17758_s9 = inlined_call_operand.vmem [shape: bf16[1024,784], index: 9, kind: input, shape index: {}]   ;;  %s17759_s10 = inlined_call_operand.vmem [shape: f32[1,784], index: 10, kind: input, shape index: {}]   ;;  %s17760_s11 = inlined_call_operand.hbm [shape: f32[8,784], index: 11, kind: output, shape index: {}]  }
   0x1   :  { %v10821_v0 = vld [vmem:[%s17750_s1 + $0x38] sm:$0xff]  ;;  %v10820_v1 = vld [vmem:[%s17750_s1 + $0x30] sm:$0xff] }
   0x2   :  { %105 = vmatpush.bf16.msra.mxu0 %v10821_v0 }
   0x3   :  { %16 = vsyncpa [#allocation3], 0  ;;  %v10819_v2 = vld [vmem:[%s17750_s1 + $0x28] sm:$0xff]  ;;  %v10818_v3 = vld [vmem:[%s17750_s1 + $0x20] sm:$0xff]  ;;  %v11727_v10 = vmov 8.0   ;;  %s7615_s15 = sshll.u32 %s17760_s11, 4  ;;  %s7616_s15 = int_to_ptr.hbm [resolvable:$true] %s7615_s15 }
   0x4   :  { %v10817_v4 = vld [vmem:[%s17750_s1 + $0x18] sm:$0xff]  ;;  %v10816_v5 = vld [vmem:[%s17750_s1 + $0x10] sm:$0xff]  ;;  %v10815_v6 = vld [vmem:[%s17750_s1 + $0x8] sm:$0xff]  ;;  %11608 = vrcp.f32 %v11727_v10 }
   0x5   :  { %v10814_v7 = vld [vmem:[%s17750_s1] sm:$0xff]  ;;  %v7715_v30 = vld [vmem:[%s17752_s3 + $0x70] sm:$0xf]  ;;  %v10837_v31 = vld [vmem:[%s17752_s3 + $0x74] sm:$0xf0] }
   0x6   :  { %106 = vmatpush.bf16.msra.mxu0 %v10820_v1  ;;  %v39_v8 = vld [vmem:[%s17749_s0] sm:$0xff]  ;;  %v10836_v32 = vld [vmem:[%s17752_s3 + $0x74] sm:$0xf]  ;;  %v7716_v33 = vor.u32 %v10837_v31, %v7715_v30  ;;  %v7717_v34 = vld [vmem:[%s17752_s3 + $0x78] sm:$0xf0] }
   0x7   :  { %v40_v9 = vpack.c.bf16 %v39_v8, %v39_v8  ;;  %v7707_v35 = vld [vmem:[%s17752_s3 + $0x60] sm:$0xf]  ;;  %v10835_v36 = vld [vmem:[%s17752_s3 + $0x64] sm:$0xf0]  ;;  %v7720_v38 = vor.u32 %v10836_v32, %v7717_v34  ;;  %v10834_v39 = vld [vmem:[%s17752_s3 + $0x64] sm:$0xf] }
   0x8   :  { %v7709_v40 = vld [vmem:[%s17752_s3 + $0x68] sm:$0xf0]  ;;  %299 = vmatpush.bf16.msra.mxu1 %v7716_v33  ;;  %v7708_v41 = vor.u32 %v10835_v36, %v7707_v35  ;;  %v7699_v44 = vld [vmem:[%s17752_s3 + $0x50] sm:$0xf]  ;;  %v10833_v45 = vld [vmem:[%s17752_s3 + $0x54] sm:$0xf0] }
   0x9   :  { %312 = vmatpush.bf16.msra.mxu2 %v7720_v38  ;;  %v7712_v43 = vor.u32 %v10834_v39, %v7709_v40  ;;  %v10832_v46 = vld [vmem:[%s17752_s3 + $0x54] sm:$0xf]  ;;  %v7701_v47 = vld [vmem:[%s17752_s3 + $0x58] sm:$0xf0]  ;;  %v7700_v49 = vor.u32 %v10833_v45, %v7699_v44  ;;  %v7691_v52 = vld [vmem:[%s17752_s3 + $0x40] sm:$0xf] }
   0xa   :  { %107 = vmatpush.bf16.msra.mxu0 %v10819_v2  ;;  %v11609_v11 = vpop.eup %11608  ;;  %v7704_v51 = vor.u32 %v10832_v46, %v7701_v47  ;;  %v10831_v53 = vld [vmem:[%s17752_s3 + $0x44] sm:$0xf0]  ;;  %v10830_v54 = vld [vmem:[%s17752_s3 + $0x44] sm:$0xf]  ;;  %v7693_v55 = vld [vmem:[%s17752_s3 + $0x48] sm:$0xf0] }
   0xb   :  { %v126_v12 = vmul.f32 8.0, %v11609_v11  ;;  %vm130_vm0 = vweird.f32 %v11609_v11  ;;  %v7692_v57 = vor.u32 %v10831_v53, %v7691_v52  ;;  %v7696_v59 = vor.u32 %v10830_v54, %v7693_v55  ;;  %v7683_v60 = vld [vmem:[%s17752_s3 + $0x30] sm:$0xf]  ;;  %v10829_v61 = vld [vmem:[%s17752_s3 + $0x34] sm:$0xf0] }
   0xc   :  { %300 = vmatpush.bf16.msra.mxu1 %v7708_v41  ;;  %v10828_v62 = vld [vmem:[%s17752_s3 + $0x34] sm:$0xf]  ;;  %v7685_v63 = vld [vmem:[%s17752_s3 + $0x38] sm:$0xf0]  ;;  %v7684_v0 = vor.u32 %v10829_v61, %v7683_v60  ;;  %v7675_v2 = vld [vmem:[%s17752_s3 + $0x20] sm:$0xf] }
   0xd   :  { %v127_v13 = vsub.f32 1.0, %v126_v12  ;;  %313 = vmatpush.bf16.msra.mxu2 %v7712_v43  ;;  %v7688_v1 = vor.u32 %v10828_v62, %v7685_v63  ;;  %v10825_v10 = vld [vmem:[%s17752_s3 + $0x14] sm:$0xf0]  ;;  %v10824_v12 = vld [vmem:[%s17752_s3 + $0x14] sm:$0xf] }
   0xe   :  { %108 = vmatpush.bf16.msra.mxu0 %v10818_v3  ;;  %v10827_v3 = vld [vmem:[%s17752_s3 + $0x24] sm:$0xf0] }
   0xf   :  { %v128_v16 = vmul.f32 %v11609_v11, %v127_v13  ;;  %v7669_v13 = vld [vmem:[%s17752_s3 + $0x18] sm:$0xf0] }
  0x10   :  { %301 = vmatpush.bf16.msra.mxu1 %v7700_v49 }
  0x11   :  { %v129_v19 = vadd.f32 %v11609_v11, %v128_v16  ;;  %314 = vmatpush.bf16.msra.mxu2 %v7704_v51 }
  0x12   :  { %109 = vmatpush.bf16.msra.mxu0 %v10817_v4  ;;  %v10826_v4 = vld [vmem:[%s17752_s3 + $0x24] sm:$0xf] }
  0x13   :  { %v11816_v23 = vsel %vm130_vm0, %v11609_v11, %v129_v19  ;;  %v10823_v19 = vld [vmem:[%s17752_s3 + $0x4] sm:$0xf0] }
  0x14   :  { %302 = vmatpush.bf16.msra.mxu1 %v7692_v57 }
  0x15   :  { %315 = vmatpush.bf16.msra.mxu2 %v7696_v59 }
  0x16   :  { %110 = vmatpush.bf16.msra.mxu0 %v10816_v5  ;;  %v7677_v5 = vld [vmem:[%s17752_s3 + $0x28] sm:$0xf0] }
  0x17   :  { %v7680_v8 = vor.u32 %v10826_v4, %v7677_v5 }
  0x18   :  { %303 = vmatpush.bf16.msra.mxu1 %v7684_v0 }
  0x19   :  { %316 = vmatpush.bf16.msra.mxu2 %v7688_v1 }
  0x1a   :  { %111 = vmatpush.bf16.msra.mxu0 %v10815_v6  ;;  %v7676_v6 = vor.u32 %v10827_v3, %v7675_v2 }
  0x1c   :  { %304 = vmatpush.bf16.msra.mxu1 %v7676_v6 }
  0x1d   :  { %317 = vmatpush.bf16.msra.mxu2 %v7680_v8 }
  0x1e   :  { %112 = vmatpush.bf16.msra.mxu0 %v10814_v7 }
  0x21   :  { %113 = vmatmul.bf16.vlgmr.msra.gmra.mxu0 %v40_v9  ;;  %v7667_v9 = vld [vmem:[%s17752_s3 + $0x10] sm:$0xf] }
  0x22   :  { %v7668_v16 = vor.u32 %v10825_v10, %v7667_v9 }
  0x24   :  { %305 = vmatpush.bf16.msra.mxu1 %v7668_v16 }
  0x9e   :  { %v114_v14 = vpop.f32.mrf.mxu0 }
  0x9f   :  { %v119_v15 = vrot.slane %v114_v14, 4 }
  0xa1   :  { %v120_v17 = vadd.f32 %v119_v15, %v114_v14 }
  0xa3   :  { %v121_v18 = vrot.slane %v120_v17, 2 }
  0xa5   :  { %v122_v20 = vadd.f32 %v121_v18, %v120_v17  ;;  %v7672_v17 = vor.u32 %v10824_v12, %v7669_v13  ;;  %v7659_v18 = vld [vmem:[%s17752_s3] sm:$0xf] }
  0xa6   :  { %v116_v21 = vpop.f32.mrf.mxu0 }
  0xa7   :  { %v123_v22 = vrot.slane %v122_v20, 1  ;;  %v10822_v21 = vld [vmem:[%s17752_s3 + $0x4] sm:$0xf]  ;;  %318 = vmatpush.bf16.msra.mxu2 %v7672_v17 }
  0xa9   :  { %v124_v24 = vadd.f32 %v123_v22, %v122_v20  ;;  %v7661_v22 = vld [vmem:[%s17752_s3 + $0x8] sm:$0xf0] }
  0xab   :  { %v132_v25 = vmul.f32 %v11816_v23, %v124_v24 }
  0xad   :  { %v11819_v26 = vsub.f32 %v114_v14, %v132_v25  ;;  %v118_v14 = vld [vmem:[%s17751_s2] sm:$0x3] }
  0xae   :  { %v142_v24 = vperm.slane %v118_v14, 0  ;;  %v156_v31 = vperm.slane %v118_v14, 1 }
  0xaf   :  { %v134_v27 = vmul.f32 %v11819_v26, %v11819_v26 }
  0xb0   :  { %v143_v30 = vmul.f32 %v142_v24, %v11819_v26 }
  0xb1   :  { %v135_v28 = vrot.slane %v134_v27, 4 }
  0xb3   :  { %v136_v29 = vadd.f32 %v135_v28, %v134_v27  ;;  %v7660_v27 = vor.u32 %v10823_v19, %v7659_v18  ;;  %v7664_v28 = vor.u32 %v10822_v21, %v7661_v22 }
  0xb5   :  { %v137_v37 = vrot.slane %v136_v29, 2  ;;  %306 = vmatpush.bf16.msra.mxu1 %v7660_v27  ;;  %319 = vmatpush.bf16.msra.mxu2 %v7664_v28 }
  0xb7   :  { %v138_v42 = vadd.f32 %v137_v37, %v136_v29 }
  0xb9   :  { %v139_v48 = vrot.slane %v138_v42, 1 }
  0xbb   :  { %v140_v50 = vadd.f32 %v139_v48, %v138_v42 }
  0xbd   :  { %v141_v56 = vmul.f32 %v140_v50, %v11816_v23 }
  0xbf   :  { %v144_v58 = vadd.f32 1e-05, %v141_v56 }
  0xc1   :  { %11610 = vrsqrt.f32 %v144_v58  ;;  %vm151_vm2 = vweird.f32 %v144_v58 }
  0xc7   :  { %v11611_v7 = vpop.eup %11610 }
  0xc8   :  { %v146_v11 = vmul.f32 %v11611_v7, %v144_v58  ;;  %vm152_vm1 = vweird.f32 %v11611_v7 }
  0xc9   :  { %vm153_vm3 = vmor %vm151_vm2, %vm152_vm1 }
  0xca   :  { %v147_v15 = vmul.f32 %v11611_v7, %v146_v11 }
  0xcc   :  { %v148_v20 = vmul.f32 0.5, %v147_v15 }
  0xce   :  { %v149_v25 = vsub.f32 1.5, %v148_v20 }
  0xd0   :  { %v150_v29 = vmul.f32 %v11611_v7, %v149_v25 }
  0xd2   :  { %v154_v32 = vsel %vm153_vm3, %v11611_v7, %v150_v29 }
  0xd3   :  { %v155_v33 = vmul.f32 %v154_v32, %v143_v30 }
  0xd5   :  { %v157_v34 = vadd.f32 %v156_v31, %v155_v33 }
  0xd7   :  { %v159_v35 = vmul.f32 0.70710677, %v157_v34  ;;  %v158_v6 = vmul.f32 0.5, %v157_v34 }
  0xd9   :  { %v160_v36 = vmul.f32 %v159_v35, %v159_v35 }
  0xdb   :  { %v161_v37 = vmin.f32 %v160_v36, 16.0 }
  0xdd   :  { %v162_v38 = vmul.f32 2.1237322e-06, %v161_v37  ;;  %v173_v39 = vmul.f32 3.8918573e-05, %v161_v37 }
  0xdf   :  { %v163_v40 = vadd.f32 0.00028619796, %v162_v38  ;;  %v174_v41 = vadd.f32 0.001143296, %v173_v39 }
  0xe1   :  { %v164_v42 = vmul.f32 %v163_v40, %v161_v37  ;;  %v175_v43 = vmul.f32 %v174_v41, %v161_v37 }
  0xe3   :  { %v176_v44 = vadd.f32 0.014752088, %v175_v43  ;;  %v165_v45 = vadd.f32 0.0036580483, %v164_v42  ;;  %v11937_v43 = vld [vmem:[%s17753_s4] sm:$0xf] }
  0xe5   :  { %v177_v46 = vmul.f32 %v176_v44, %v161_v37  ;;  %v166_v47 = vmul.f32 %v165_v45, %v161_v37 }
  0xe7   :  { %v178_v26 = vadd.f32 0.112945676, %v177_v46  ;;  %v167_v50 = vadd.f32 0.05243302, %v166_v47  ;;  %v7837_v46 = vld [vmem:[%s17754_s5 + $0xe0] sm:$0xf] }
  0xe8   :  { %v10866_v47 = vld [vmem:[%s17754_s5 + $0xe4] sm:$0xf] }
  0xe9   :  { %v179_v48 = vmul.f32 %v178_v26, %v161_v37  ;;  %v168_v53 = vmul.f32 %v167_v50, %v161_v37  ;;  %v10868_v26 = vld [vmem:[%s17754_s5 + $0xec] sm:$0xf0] }
  0xea   :  { %v7838_v50 = vor.u32 %v10868_v26, %v7837_v46  ;;  %v391_v26 = vperm.slane %v11937_v43, 1 }
  0xeb   :  { %v180_v49 = vadd.f32 0.4994258, %v179_v48  ;;  %v169_v54 = vadd.f32 0.18741608, %v168_v53  ;;  %v360_v53 = vperm.slane %v11937_v43, 2 }
  0xec   :  { %873 = vmatpush.bf16.msra.mxu3 %v7838_v50 }
  0xed   :  { %v181_v51 = vmul.f32 %v180_v49, %v161_v37  ;;  %v170_v56 = vmul.f32 %v169_v54, %v161_v37 }
  0xef   :  { %v182_v52 = vadd.f32 1.0, %v181_v51  ;;  %v171_v60 = vadd.f32 1.1283791, %v170_v56  ;;  %v7839_v51 = vld [vmem:[%s17754_s5 + $0xf0] sm:$0xf0] }
  0xf0   :  { %v7842_v54 = vor.u32 %v10866_v47, %v7839_v51  ;;  %v7821_v56 = vld [vmem:[%s17754_s5 + $0xc0] sm:$0xf]  ;;  %v12064_v47 = vperm.slane %v360_v53, 0  ;;  %v10848_v53 = vld [vmem:[%s17754_s5 + $0x4c] sm:$0xf0] }
  0xf1   :  { %11612 = vrcp.f32 %v182_v52  ;;  %v194_v59 = vand.u32 2147483648, %v182_v52  ;;  %v192_v62 = vand.u32 2147483647, %v182_v52  ;;  %vm188_vm5 = vweird.f32 %v182_v52 }
  0xf2   :  { %v172_v1 = vmul.f32 %v171_v60, %v159_v35  ;;  %899 = vmatpush.bf16.msrb.mxu1 %v7842_v54  ;;  %v7823_v60 = vld [vmem:[%s17754_s5 + $0xd0] sm:$0xf0] }
  0xf3   :  { %v195_v0 = vor.u32 1.1754944e-38, %v194_v59  ;;  %vm193_vm7 = vcmp.eq.f32.partialorder %v192_v62, 8.507059e+37  ;;  %v10900_v62 = vld [vmem:[%s17754_s5 + $0x1ec] sm:$0xf0] }
  0xf7   :  { %v11613_v55 = vpop.eup %11612 }
  0xf8   :  { %v184_v57 = vmul.f32 %v11613_v55, %v182_v52  ;;  %vm189_vm4 = vweird.f32 %v11613_v55  ;;  %v359_v52 = vperm.slane %v11937_v43, 0 }
  0xf9   :  { %vm190_vm6 = vmor %vm188_vm5, %vm189_vm4 }
  0xfa   :  { %v185_v58 = vsub.f32 1.0, %v184_v57  ;;  %v10864_v57 = vld [vmem:[%s17754_s5 + $0xcc] sm:$0xf0] }
  0xfb   :  { %v7822_v59 = vor.u32 %v10864_v57, %v7821_v56 }
  0xfc   :  { %v186_v61 = vmul.f32 %v11613_v55, %v185_v58  ;;  %v10862_v58 = vld [vmem:[%s17754_s5 + $0xc4] sm:$0xf] }
  0xfd   :  { %874 = vmatpush.bf16.msra.mxu3 %v7822_v59 }
  0xfe   :  { %v187_v63 = vadd.f32 %v11613_v55, %v186_v61  ;;  %v7965_v61 = vld [vmem:[%s17754_s5 + $0x1e0] sm:$0xf] }
 0x100   :  { %v191_v2 = vsel %vm190_vm6, %v11613_v55, %v187_v63 }
 0x101   :  { %v196_v3 = vsel %vm193_vm7, %v195_v0, %v191_v2  ;;  %v7826_v0 = vor.u32 %v10862_v58, %v7823_v60  ;;  %v10898_v2 = vld [vmem:[%s17754_s5 + $0x1e4] sm:$0xf]  ;;  %v7901_v60 = vld [vmem:[%s17754_s5 + $0x160] sm:$0xf] }
 0x102   :  { %v197_v4 = vmul.f32 %v196_v3, %v172_v1  ;;  %v7966_v1 = vor.u32 %v10900_v62, %v7965_v61  ;;  %v7967_v3 = vld [vmem:[%s17754_s5 + $0x1f0] sm:$0xf0]  ;;  %v10884_v61 = vld [vmem:[%s17754_s5 + $0x16c] sm:$0xf0] }
 0x103   :  { %900 = vmatpush.bf16.msrb.mxu1 %v7826_v0  ;;  %v7759_v62 = vld [vmem:[%s17754_s5 + $0x50] sm:$0xf0] }
 0x104   :  { %v7656_v5 = vclamps-f32 %v197_v4, 1.0  ;;  %v7805_v4 = vld [vmem:[%s17754_s5 + $0xa0] sm:$0xf]  ;;  %886 = vmatpush.bf16.msrb.mxu0 %v7966_v1  ;;  %v7903_v0 = vld [vmem:[%s17754_s5 + $0x170] sm:$0xf0] }
 0x106   :  { %v200_v7 = vadd.f32 1.0, %v7656_v5  ;;  %v7970_v5 = vor.u32 %v10898_v2, %v7967_v3 }
 0x108   :  { %v201_v8 = vmul.f32 %v200_v7, %v158_v6  ;;  %v10860_v6 = vld [vmem:[%s17754_s5 + $0xac] sm:$0xf0]  ;;  %v10858_v7 = vld [vmem:[%s17754_s5 + $0xa4] sm:$0xf]  ;;  %912 = vmatpush.bf16.msrb.mxu2 %v7970_v5 }
 0x10a   :  { %v202_v9 = vpack.c.bf16 %v201_v8, %v201_v8  ;;  %v7807_v8 = vld [vmem:[%s17754_s5 + $0xb0] sm:$0xf0] }
 0x10c   :  { %307 = vmatmul.bf16.vlgmr.msra.gmra.mxu1 %v202_v9  ;;  %320 = vmatmul.bf16.vlgmr.msra.gmra.mxu2 %v202_v9 }
 0x189   :  { %v308_v10 = vpop.f32.mrf.mxu1 }
 0x18a   :  { %v326_v11 = vrot.slane %v308_v10, 4 }
 0x18c   :  { %v327_v12 = vadd.f32 %v326_v11, %v308_v10  ;;  %v7949_v11 = vld [vmem:[%s17754_s5 + $0x1c0] sm:$0xf] }
 0x18e   :  { %v328_v13 = vrot.slane %v327_v12, 2 }
 0x18f   :  { %v321_v14 = vpop.f32.mrf.mxu2 }
 0x190   :  { %v329_v15 = vadd.f32 %v328_v13, %v327_v12  ;;  %v332_v16 = vrot.slane %v321_v14, 4  ;;  %v10896_v12 = vld [vmem:[%s17754_s5 + $0x1cc] sm:$0xf0]  ;;  %v7810_v13 = vor.u32 %v10858_v7, %v7807_v8  ;;  %v7902_v7 = vor.u32 %v10884_v61, %v7901_v60  ;;  %v7741_v8 = vld [vmem:[%s17754_s5 + $0x20] sm:$0xf] }
 0x191   :  { %v310_v17 = vpop.f32.mrf.mxu1  ;;  %v7973_v60 = vld [vmem:[%s17754_s5 + $0x1e8] sm:$0xf]  ;;  %v10901_v61 = vld [vmem:[%s17754_s5 + $0x1f4] sm:$0xf0] }
 0x192   :  { %v330_v18 = vrot.slane %v329_v15, 1  ;;  %v333_v19 = vadd.f32 %v332_v16, %v321_v14  ;;  %v7951_v16 = vld [vmem:[%s17754_s5 + $0x1d0] sm:$0xf0]  ;;  %v7789_v17 = vld [vmem:[%s17754_s5 + $0x80] sm:$0xf]  ;;  %901 = vmatpush.bf16.msrb.mxu1 %v7810_v13 }
 0x194   :  { %v331_v20 = vadd.f32 %v330_v18, %v329_v15  ;;  %v334_v21 = vrot.slane %v333_v19, 2  ;;  %v10894_v15 = vld [vmem:[%s17754_s5 + $0x1c4] sm:$0xf] }
 0x196   :  { %v338_v22 = vmul.f32 %v331_v20, %v11816_v23  ;;  %v335_v24 = vadd.f32 %v334_v21, %v333_v19  ;;  %v7954_v19 = vor.u32 %v10894_v15, %v7951_v16  ;;  %v10856_v20 = vld [vmem:[%s17754_s5 + $0x8c] sm:$0xf0]  ;;  %v10854_v21 = vld [vmem:[%s17754_s5 + $0x84] sm:$0xf] }
 0x197   :  { %v323_v25 = vpop.f32.mrf.mxu2  ;;  %v10880_v15 = vld [vmem:[%s17754_s5 + $0x14c] sm:$0xf0] }
 0x198   :  { %v11925_v27 = vsub.f32 %v308_v10, %v338_v22  ;;  %v336_v28 = vrot.slane %v335_v24, 1  ;;  %v7806_v10 = vor.u32 %v10860_v6, %v7805_v4  ;;  %v7791_v22 = vld [vmem:[%s17754_s5 + $0x90] sm:$0xf0]  ;;  %v7933_v25 = vld [vmem:[%s17754_s5 + $0x1a0] sm:$0xf]  ;;  %913 = vmatpush.bf16.msrb.mxu2 %v7954_v19  ;;  %v392_v4 = vperm.slane %v11937_v43, 3 }
 0x199   :  { %v7887_v19 = vld [vmem:[%s17754_s5 + $0x150] sm:$0xf0] }
 0x19a   :  { %v342_v29 = vmul.f32 %v11925_v27, %v11925_v27  ;;  %v337_v30 = vadd.f32 %v336_v28, %v335_v24  ;;  %v10892_v28 = vld [vmem:[%s17754_s5 + $0x1ac] sm:$0xf0]  ;;  %875 = vmatpush.bf16.msra.mxu3 %v7806_v10 }
 0x19b   :  { %v10844_v10 = vld [vmem:[%s17754_s5 + $0x2c] sm:$0xf0] }
 0x19c   :  { %v344_v31 = vrot.slane %v342_v29, 4  ;;  %v339_v32 = vmul.f32 %v337_v30, %v11816_v23  ;;  %v7790_v30 = vor.u32 %v10856_v20, %v7789_v17  ;;  %v7743_v17 = vld [vmem:[%s17754_s5 + $0x30] sm:$0xf0] }
 0x19e   :  { %v345_v33 = vadd.f32 %v344_v31, %v342_v29  ;;  %v11930_v34 = vsub.f32 %v321_v14, %v339_v32  ;;  %v7950_v14 = vor.u32 %v10896_v12, %v7949_v11  ;;  %v10890_v29 = vld [vmem:[%s17754_s5 + $0x1a4] sm:$0xf]  ;;  %v7934_v31 = vor.u32 %v10892_v28, %v7933_v25  ;;  %v7935_v32 = vld [vmem:[%s17754_s5 + $0x1b0] sm:$0xf0]  ;;  %876 = vmatpush.bf16.msra.mxu3 %v7790_v30 }
 0x19f   :  { %v10842_v11 = vld [vmem:[%s17754_s5 + $0x24] sm:$0xf]  ;;  %v7742_v25 = vor.u32 %v10844_v10, %v7741_v8  ;;  %v10861_v8 = vld [vmem:[%s17754_s5 + $0xb4] sm:$0xf0] }
 0x1a0   :  { %v346_v35 = vrot.slane %v345_v33, 2  ;;  %v343_v36 = vmul.f32 %v11930_v34, %v11930_v34  ;;  %887 = vmatpush.bf16.msrb.mxu0 %v7950_v14  ;;  %v7885_v14 = vld [vmem:[%s17754_s5 + $0x140] sm:$0xf]  ;;  %v10838_v30 = vld [vmem:[%s17754_s5 + $0x4] sm:$0xf] }
 0x1a1   :  { %v7886_v28 = vor.u32 %v10880_v15, %v7885_v14  ;;  %v7815_v15 = vld [vmem:[%s17754_s5 + $0xb8] sm:$0xf0] }
 0x1a2   :  { %v347_v37 = vadd.f32 %v346_v35, %v345_v33  ;;  %v350_v38 = vrot.slane %v343_v36, 4  ;;  %v7773_v33 = vld [vmem:[%s17754_s5 + $0x60] sm:$0xf] }
 0x1a4   :  { %v348_v39 = vrot.slane %v347_v37, 1  ;;  %v351_v40 = vadd.f32 %v350_v38, %v343_v36  ;;  %v7794_v36 = vor.u32 %v10854_v21, %v7791_v22  ;;  %v10852_v38 = vld [vmem:[%s17754_s5 + $0x6c] sm:$0xf0]  ;;  %888 = vmatpush.bf16.msrb.mxu0 %v7934_v31  ;;  %v396_v21 = vperm.slane %v392_v4, 1  ;;  %v7725_v22 = vld [vmem:[%s17754_s5] sm:$0xf] }
 0x1a5   :  { %v7774_v51 = vor.u32 %v10852_v38, %v7773_v33  ;;  %v7727_v31 = vld [vmem:[%s17754_s5 + $0x10] sm:$0xf0]  ;;  %v7746_v33 = vor.u32 %v10842_v11, %v7743_v17  ;;  %v10876_v38 = vld [vmem:[%s17754_s5 + $0x12c] sm:$0xf0]  ;;  %v7959_v17 = vld [vmem:[%s17754_s5 + $0x1d8] sm:$0xf0] }
 0x1a6   :  { %v349_v41 = vadd.f32 %v348_v39, %v347_v37  ;;  %v352_v42 = vrot.slane %v351_v40, 2  ;;  %v7938_v37 = vor.u32 %v10890_v29, %v7935_v32  ;;  %v10850_v39 = vld [vmem:[%s17754_s5 + $0x64] sm:$0xf]  ;;  %902 = vmatpush.bf16.msrb.mxu1 %v7794_v36  ;;  %v10840_v29 = vld [vmem:[%s17754_s5 + $0xc] sm:$0xf0] }
 0x1a7   :  { %877 = vmatpush.bf16.msra.mxu3 %v7774_v51  ;;  %v7845_v36 = vld [vmem:[%s17754_s5 + $0xe8] sm:$0xf]  ;;  %v7730_v51 = vor.u32 %v10838_v30, %v7727_v31 }
 0x1a8   :  { %v356_v44 = vmul.f32 %v349_v41, %v11816_v23  ;;  %v353_v45 = vadd.f32 %v352_v42, %v351_v40  ;;  %v7775_v40 = vld [vmem:[%s17754_s5 + $0x70] sm:$0xf0]  ;;  %v7917_v41 = vld [vmem:[%s17754_s5 + $0x180] sm:$0xf]  ;;  %v10888_v42 = vld [vmem:[%s17754_s5 + $0x18c] sm:$0xf0]  ;;  %914 = vmatpush.bf16.msrb.mxu2 %v7938_v37 }
 0x1a9   :  { %v7918_v54 = vor.u32 %v10888_v42, %v7917_v41  ;;  %v7778_v58 = vor.u32 %v10850_v39, %v7775_v40  ;;  %v7869_v37 = vld [vmem:[%s17754_s5 + $0x120] sm:$0xf]  ;;  %v10869_v40 = vld [vmem:[%s17754_s5 + $0xf4] sm:$0xf0]  ;;  %v10867_v41 = vld [vmem:[%s17754_s5 + $0xec] sm:$0xf] }
 0x1aa   :  { %v11949_v48 = vadd.f32 1e-05, %v356_v44  ;;  %v354_v49 = vrot.slane %v353_v45, 1  ;;  %v10886_v44 = vld [vmem:[%s17754_s5 + $0x184] sm:$0xf] }
 0x1ab   :  { %889 = vmatpush.bf16.msrb.mxu0 %v7918_v54  ;;  %903 = vmatpush.bf16.msrb.mxu1 %v7778_v58  ;;  %v7846_v54 = vor.u32 %v10869_v40, %v7845_v36 }
 0x1ac   :  { %11614 = vrsqrt.f32 %v11949_v48  ;;  %v355_v55 = vadd.f32 %v354_v49, %v353_v45  ;;  %v363_v45 = vperm.slane %v359_v52, 0  ;;  %v7919_v49 = vld [vmem:[%s17754_s5 + $0x190] sm:$0xf0]  ;;  %v7757_v52 = vld [vmem:[%s17754_s5 + $0x40] sm:$0xf]  ;;  %vm375_vm9 = vweird.f32 %v11949_v48 }
 0x1ad   :  { %v7922_v59 = vor.u32 %v10886_v44, %v7919_v49  ;;  %v7758_v6 = vor.u32 %v10848_v53, %v7757_v52  ;;  %v7847_v44 = vld [vmem:[%s17754_s5 + $0xf8] sm:$0xf0]  ;;  %v7829_v49 = vld [vmem:[%s17754_s5 + $0xc8] sm:$0xf]  ;;  %v10865_v52 = vld [vmem:[%s17754_s5 + $0xd4] sm:$0xf0] }
 0x1ae   :  { %v357_v63 = vmul.f32 %v355_v55, %v11816_v23  ;;  %v10846_v55 = vld [vmem:[%s17754_s5 + $0x44] sm:$0xf]  ;;  %v365_v5 = vmul.f32 %v363_v45, %v11925_v27  ;;  %v7871_v45 = vld [vmem:[%s17754_s5 + $0x130] sm:$0xf0]  ;;  %v7853_v53 = vld [vmem:[%s17754_s5 + $0x100] sm:$0xf] }
 0x1af   :  { %915 = vmatpush.bf16.msrb.mxu2 %v7922_v59  ;;  %v7762_v12 = vor.u32 %v10846_v55, %v7759_v62  ;;  %878 = vmatpush.bf16.msra.mxu3 %v7758_v6  ;;  %v10872_v55 = vld [vmem:[%s17754_s5 + $0x10c] sm:$0xf0]  ;;  %v10863_v59 = vld [vmem:[%s17754_s5 + $0xcc] sm:$0xf]  ;;  %v7831_v62 = vld [vmem:[%s17754_s5 + $0xd8] sm:$0xf0]  ;;  %v7974_v6 = vor.u32 %v10901_v61, %v7973_v60 }
 0x1b0   :  { %v11994_v9 = vadd.f32 1e-05, %v357_v63  ;;  %v10882_v63 = vld [vmem:[%s17754_s5 + $0x164] sm:$0xf]  ;;  %890 = vmatpush.bf16.msrb.mxu0 %v7902_v7  ;;  %v7854_v2 = vor.u32 %v10872_v55, %v7853_v53  ;;  %v7813_v7 = vld [vmem:[%s17754_s5 + $0xa8] sm:$0xf]  ;;  %v7834_v11 = vor.u32 %v10863_v59, %v7831_v62 }
 0x1b1   :  { %v7906_v13 = vor.u32 %v10882_v63, %v7903_v0  ;;  %904 = vmatpush.bf16.msrb.mxu1 %v7762_v12  ;;  %v10870_v63 = vld [vmem:[%s17754_s5 + $0x104] sm:$0xf]  ;;  %v7855_v0 = vld [vmem:[%s17754_s5 + $0x110] sm:$0xf0]  ;;  %v7957_v12 = vld [vmem:[%s17754_s5 + $0x1c8] sm:$0xf] }
 0x1b2   :  { %v12011_v18 = vpop.eup %11614  ;;  %11616 = vrsqrt.f32 %v11994_v9  ;;  %vm385_vm12 = vweird.f32 %v11994_v9 }
 0x1b3   :  { %v370_v24 = vmul.f32 %v12011_v18, %v11949_v48  ;;  %vm376_vm8 = vweird.f32 %v12011_v18  ;;  %v395_v48 = vperm.slane %v391_v26, 1  ;;  %916 = vmatpush.bf16.msrb.mxu2 %v7906_v13  ;;  %879 = vmatpush.bf16.msra.mxu3 %v7742_v25  ;;  %v7726_v26 = vor.u32 %v10840_v29, %v7725_v22  ;;  %v10897_v13 = vld [vmem:[%s17754_s5 + $0x1d4] sm:$0xf0]  ;;  %v10855_v25 = vld [vmem:[%s17754_s5 + $0x8c] sm:$0xf] }
 0x1b4   :  { %vm12102_vm10 = vmor %vm375_vm9, %vm376_vm8  ;;  %891 = vmatpush.bf16.msrb.mxu0 %v7886_v28  ;;  %v7958_v22 = vor.u32 %v10897_v13, %v7957_v12  ;;  %v7941_v28 = vld [vmem:[%s17754_s5 + $0x1a8] sm:$0xf] }
 0x1b5   :  { %v371_v35 = vmul.f32 %v12011_v18, %v370_v24  ;;  %905 = vmatpush.bf16.msrb.mxu1 %v7746_v33 }
 0x1b7   :  { %v372_v46 = vmul.f32 0.5, %v371_v35  ;;  %880 = vmatpush.bf16.msra.mxu3 %v7726_v26 }
 0x1b8   :  { %v12069_v50 = vpop.eup %11616 }
 0x1b9   :  { %v373_v56 = vsub.f32 1.5, %v372_v46  ;;  %v380_v57 = vmul.f32 %v12069_v50, %v11994_v9  ;;  %vm386_vm11 = vweird.f32 %v12069_v50  ;;  %v366_v9 = vmul.f32 %v12064_v47, %v11930_v34  ;;  %v10874_v34 = vld [vmem:[%s17754_s5 + $0x124] sm:$0xf]  ;;  %906 = vmatpush.bf16.msrb.mxu1 %v7730_v51 }
 0x1ba   :  { %vm387_vm13 = vmor %vm385_vm12, %vm386_vm11  ;;  %v7870_v47 = vor.u32 %v10876_v38, %v7869_v37  ;;  %v7874_v58 = vor.u32 %v10874_v34, %v7871_v45  ;;  %v7799_v37 = vld [vmem:[%s17754_s5 + $0x98] sm:$0xf0] }
 0x1bb   :  { %v374_v1 = vmul.f32 %v12011_v18, %v373_v56  ;;  %v381_v3 = vmul.f32 %v12069_v50, %v380_v57  ;;  %v7850_v57 = vor.u32 %v10867_v41, %v7847_v44  ;;  %925 = vmatpush.bf16.msrb.mxu3 %v7846_v54  ;;  %v10891_v41 = vld [vmem:[%s17754_s5 + $0x1ac] sm:$0xf] }
 0x1bc   :  { %892 = vmatpush.bf16.msrb.mxu0 %v7870_v47  ;;  %v7802_v47 = vor.u32 %v10855_v25, %v7799_v37 }
 0x1bd   :  { %v378_v27 = vsel %vm12102_vm10, %v12011_v18, %v374_v1  ;;  %v382_v43 = vmul.f32 0.5, %v381_v3  ;;  %v10878_v18 = vld [vmem:[%s17754_s5 + $0x144] sm:$0xf]  ;;  %v7975_v3 = vld [vmem:[%s17754_s5 + $0x1f8] sm:$0xf0]  ;;  %951 = vmatpush.bf16.msra.mxu1 %v7850_v57 }
 0x1be   :  { %v389_v16 = vmul.f32 %v378_v27, %v365_v5  ;;  %v7890_v35 = vor.u32 %v10878_v18, %v7887_v19  ;;  %v7830_v5 = vor.u32 %v10865_v52, %v7829_v49  ;;  %v7858_v27 = vor.u32 %v10870_v63, %v7855_v0  ;;  %v7797_v19 = vld [vmem:[%s17754_s5 + $0x88] sm:$0xf] }
 0x1bf   :  { %v383_v20 = vsub.f32 1.5, %v382_v43  ;;  %v10859_v43 = vld [vmem:[%s17754_s5 + $0xac] sm:$0xf] }
 0x1c0   :  { %v12140_v24 = vadd.f32 %v395_v48, %v389_v16  ;;  %917 = vmatpush.bf16.msrb.mxu2 %v7890_v35  ;;  %v10899_v48 = vld [vmem:[%s17754_s5 + $0x1ec] sm:$0xf]  ;;  %893 = vmatpush.bf16.msrb.mxu0 %v7854_v2  ;;  %v7818_v31 = vor.u32 %v10859_v43, %v7815_v15  ;;  %v7927_v15 = vld [vmem:[%s17754_s5 + $0x198] sm:$0xf0] }
 0x1c1   :  { %v384_v32 = vmul.f32 %v12069_v50, %v383_v20  ;;  %v7978_v14 = vor.u32 %v10899_v48, %v7975_v3  ;;  %v10895_v16 = vld [vmem:[%s17754_s5 + $0x1cc] sm:$0xf]  ;;  %v10857_v20 = vld [vmem:[%s17754_s5 + $0x94] sm:$0xf0]  ;;  %926 = vmatpush.bf16.msrb.mxu3 %v7830_v5  ;;  %952 = vmatpush.bf16.msra.mxu1 %v7834_v11  ;;  %v7781_v3 = vld [vmem:[%s17754_s5 + $0x68] sm:$0xf] }
 0x1c2   :  { %v12163_v39 = vmul.f32 0.70710677, %v12140_v24  ;;  %v7962_v36 = vor.u32 %v10895_v16, %v7959_v17  ;;  %v7798_v40 = vor.u32 %v10857_v20, %v7797_v19  ;;  %v10853_v5 = vld [vmem:[%s17754_s5 + $0x74] sm:$0xf0]  ;;  %v7925_v11 = vld [vmem:[%s17754_s5 + $0x188] sm:$0xf] }
 0x1c3   :  { %v388_v42 = vsel %vm387_vm13, %v12069_v50, %v384_v32  ;;  %v10893_v32 = vld [vmem:[%s17754_s5 + $0x1b4] sm:$0xf0]  ;;  %v7765_v16 = vld [vmem:[%s17754_s5 + $0x48] sm:$0xf] }
 0x1c4   :  { %v390_v46 = vmul.f32 %v388_v42, %v366_v9  ;;  %v403_v50 = vmul.f32 %v12163_v39, %v12163_v39  ;;  %918 = vmatpush.bf16.msrb.mxu2 %v7874_v58  ;;  %938 = vmatpush.bf16.msra.mxu0 %v7974_v6  ;;  %v7943_v42 = vld [vmem:[%s17754_s5 + $0x1b8] sm:$0xf0]  ;;  %v7942_v34 = vor.u32 %v10893_v32, %v7941_v28  ;;  %v10851_v6 = vld [vmem:[%s17754_s5 + $0x6c] sm:$0xf] }
 0x1c5   :  { %953 = vmatpush.bf16.msra.mxu1 %v7818_v31  ;;  %v10847_v28 = vld [vmem:[%s17754_s5 + $0x4c] sm:$0xf] }
 0x1c6   :  { %v12199_v56 = vadd.f32 %v396_v21, %v390_v46  ;;  %v12228_v4 = vmin.f32 %v403_v50, 16.0  ;;  %v7814_v21 = vor.u32 %v10861_v8, %v7813_v7  ;;  %v7946_v50 = vor.u32 %v10891_v41, %v7943_v42  ;;  %v7749_v41 = vld [vmem:[%s17754_s5 + $0x28] sm:$0xf]  ;;  %v10845_v42 = vld [vmem:[%s17754_s5 + $0x34] sm:$0xf0] }
 0x1c7   :  { %v7782_v8 = vor.u32 %v10853_v5, %v7781_v3 }
 0x1c8   :  { %v12220_v1 = vmul.f32 0.70710677, %v12199_v56  ;;  %v405_v29 = vmul.f32 2.1237322e-06, %v12228_v4  ;;  %v416_v30 = vmul.f32 3.8918573e-05, %v12228_v4  ;;  %919 = vmatpush.bf16.msrb.mxu2 %v7858_v27  ;;  %927 = vmatpush.bf16.msrb.mxu3 %v7814_v21 }
 0x1c9   :  { %939 = vmatpush.bf16.msra.mxu0 %v7958_v22  ;;  %954 = vmatpush.bf16.msra.mxu1 %v7802_v47  ;;  %v10889_v27 = vld [vmem:[%s17754_s5 + $0x194] sm:$0xf0] }
 0x1ca   :  { %v443_v10 = vmul.f32 %v12220_v1, %v12220_v1  ;;  %v406_v38 = vadd.f32 0.00028619796, %v405_v29  ;;  %v417_v9 = vadd.f32 0.001143296, %v416_v30  ;;  %v7926_v13 = vor.u32 %v10889_v27, %v7925_v11  ;;  %v10849_v21 = vld [vmem:[%s17754_s5 + $0x54] sm:$0xf0] }
 0x1cb   :  { %v7766_v25 = vor.u32 %v10849_v21, %v7765_v16  ;;  %v7767_v29 = vld [vmem:[%s17754_s5 + $0x58] sm:$0xf0]  ;;  %v7861_v27 = vld [vmem:[%s17754_s5 + $0x108] sm:$0xf] }
 0x1cc   :  { %v12256_v18 = vmin.f32 %v443_v10, 16.0  ;;  %964 = vmatpush.bf16.msra.mxu2 %v7978_v14  ;;  %v407_v45 = vmul.f32 %v406_v38, %v12228_v4  ;;  %v418_v46 = vmul.f32 %v417_v9, %v12228_v4  ;;  %928 = vmatpush.bf16.msrb.mxu3 %v7798_v40  ;;  %v7783_v10 = vld [vmem:[%s17754_s5 + $0x78] sm:$0xf0]  ;;  %v10887_v14 = vld [vmem:[%s17754_s5 + $0x18c] sm:$0xf]  ;;  %v7770_v31 = vor.u32 %v10847_v28, %v7767_v29 }
 0x1cd   :  { %940 = vmatpush.bf16.msra.mxu0 %v7942_v34  ;;  %v7786_v12 = vor.u32 %v10851_v6, %v7783_v10  ;;  %v7930_v20 = vor.u32 %v10887_v14, %v7927_v15  ;;  %v10883_v38 = vld [vmem:[%s17754_s5 + $0x16c] sm:$0xf]  ;;  %v7911_v40 = vld [vmem:[%s17754_s5 + $0x178] sm:$0xf0]  ;;  %v10877_v6 = vld [vmem:[%s17754_s5 + $0x134] sm:$0xf0] }
 0x1ce   :  { %v445_v33 = vmul.f32 2.1237322e-06, %v12256_v18  ;;  %v456_v35 = vmul.f32 3.8918573e-05, %v12256_v18  ;;  %v408_v51 = vadd.f32 0.0036580483, %v407_v45  ;;  %v7914_v34 = vor.u32 %v10883_v38, %v7911_v40 }
 0x1cf   :  { %v419_v54 = vadd.f32 0.014752088, %v418_v46  ;;  %955 = vmatpush.bf16.msra.mxu1 %v7786_v12  ;;  %v7750_v45 = vor.u32 %v10845_v42, %v7749_v41  ;;  %v10843_v46 = vld [vmem:[%s17754_s5 + $0x2c] sm:$0xf]  ;;  %v7879_v11 = vld [vmem:[%s17754_s5 + $0x138] sm:$0xf0] }
 0x1d0   :  { %v457_v44 = vadd.f32 0.001143296, %v456_v35  ;;  %v446_v26 = vadd.f32 0.00028619796, %v445_v33  ;;  %965 = vmatpush.bf16.msra.mxu2 %v7962_v36  ;;  %v409_v53 = vmul.f32 %v408_v51, %v12228_v4  ;;  %929 = vmatpush.bf16.msrb.mxu3 %v7782_v8  ;;  %v10885_v33 = vld [vmem:[%s17754_s5 + $0x174] sm:$0xf0] }
 0x1d1   :  { %v420_v55 = vmul.f32 %v419_v54, %v12228_v4  ;;  %941 = vmatpush.bf16.msra.mxu0 %v7926_v13  ;;  %v10881_v51 = vld [vmem:[%s17754_s5 + $0x154] sm:$0xf0]  ;;  %v10879_v54 = vld [vmem:[%s17754_s5 + $0x14c] sm:$0xf]  ;;  %v7863_v14 = vld [vmem:[%s17754_s5 + $0x118] sm:$0xf0] }
 0x1d2   :  { %v458_v49 = vmul.f32 %v457_v44, %v12256_v18  ;;  %v447_v57 = vmul.f32 %v446_v26, %v12256_v18  ;;  %v410_v59 = vadd.f32 0.05243302, %v409_v53  ;;  %v7751_v26 = vld [vmem:[%s17754_s5 + $0x38] sm:$0xf0]  ;;  %v10871_v13 = vld [vmem:[%s17754_s5 + $0x10c] sm:$0xf] }
 0x1d3   :  { %v421_v60 = vadd.f32 0.112945676, %v420_v55  ;;  %956 = vmatpush.bf16.msra.mxu1 %v7770_v31  ;;  %v7895_v53 = vld [vmem:[%s17754_s5 + $0x158] sm:$0xf0]  ;;  %v7733_v55 = vld [vmem:[%s17754_s5 + $0x8] sm:$0xf]  ;;  %v7866_v29 = vor.u32 %v10871_v13, %v7863_v14 }
 0x1d4   :  { %v459_v52 = vadd.f32 0.014752088, %v458_v49  ;;  %966 = vmatpush.bf16.msra.mxu2 %v7946_v50  ;;  %v411_v61 = vmul.f32 %v410_v59, %v12228_v4  ;;  %v448_v63 = vadd.f32 0.0036580483, %v447_v57  ;;  %930 = vmatpush.bf16.msrb.mxu3 %v7766_v25  ;;  %v7754_v49 = vor.u32 %v10843_v46, %v7751_v26  ;;  %v7893_v50 = vld [vmem:[%s17754_s5 + $0x148] sm:$0xf] }
 0x1d5   :  { %v422_v62 = vmul.f32 %v421_v60, %v12228_v4  ;;  %v10841_v57 = vld [vmem:[%s17754_s5 + $0x14] sm:$0xf0]  ;;  %v7894_v60 = vor.u32 %v10881_v51, %v7893_v50  ;;  %v400_v26 = vmul.f32 0.5, %v12199_v56 }
 0x1d6   :  { %v460_v58 = vmul.f32 %v459_v52, %v12256_v18  ;;  %v412_v2 = vadd.f32 0.18741608, %v411_v61  ;;  %v449_v43 = vmul.f32 %v448_v63, %v12256_v18  ;;  %v7898_v61 = vor.u32 %v10879_v54, %v7895_v53 }
 0x1d7   :  { %v423_v48 = vadd.f32 0.4994258, %v422_v62  ;;  %957 = vmatpush.bf16.msra.mxu1 %v7754_v49  ;;  %v10839_v62 = vld [vmem:[%s17754_s5 + $0xc] sm:$0xf] }
 0x1d8   :  { %v461_v0 = vadd.f32 0.112945676, %v460_v58  ;;  %v413_v22 = vmul.f32 %v412_v2, %v12228_v4  ;;  %967 = vmatpush.bf16.msra.mxu2 %v7930_v20  ;;  %v450_v30 = vadd.f32 0.05243302, %v449_v43  ;;  %931 = vmatpush.bf16.msrb.mxu3 %v7750_v45  ;;  %v7735_v2 = vld [vmem:[%s17754_s5 + $0x18] sm:$0xf0] }
 0x1d9   :  { %v424_v7 = vmul.f32 %v423_v48, %v12228_v4  ;;  %v7909_v4 = vld [vmem:[%s17754_s5 + $0x168] sm:$0xf]  ;;  %v7738_v5 = vor.u32 %v10839_v62, %v7735_v2  ;;  %v10873_v43 = vld [vmem:[%s17754_s5 + $0x114] sm:$0xf0] }
 0x1da   :  { %v462_v17 = vmul.f32 %v461_v0, %v12256_v18  ;;  %v12344_v35 = vadd.f32 1.1283791, %v413_v22  ;;  %v7910_v37 = vor.u32 %v10885_v33, %v7909_v4  ;;  %v451_v9 = vmul.f32 %v450_v30, %v12256_v18  ;;  %v7877_v48 = vld [vmem:[%s17754_s5 + $0x128] sm:$0xf] }
 0x1db   :  { %v12325_v19 = vadd.f32 1.0, %v424_v7  ;;  %v7734_v0 = vor.u32 %v10841_v57, %v7733_v55  ;;  %v10875_v7 = vld [vmem:[%s17754_s5 + $0x12c] sm:$0xf]  ;;  %v7878_v10 = vor.u32 %v10877_v6, %v7877_v48  ;;  %958 = vmatpush.bf16.msra.mxu1 %v7738_v5  ;;  %v7862_v22 = vor.u32 %v10873_v43, %v7861_v27 }
 0x1dc   :  { %v463_v32 = vadd.f32 0.4994258, %v462_v17  ;;  %942 = vmatpush.bf16.msra.mxu0 %v7910_v37  ;;  %968 = vmatpush.bf16.msra.mxu2 %v7914_v34  ;;  %v452_v59 = vadd.f32 0.18741608, %v451_v9  ;;  %v7882_v12 = vor.u32 %v10875_v7, %v7879_v11  ;;  %v415_v25 = vmul.f32 %v12344_v35, %v12163_v39 }
 0x1dd   :  { %11618 = vrcp.f32 %v12325_v19  ;;  %v435_v58 = vand.u32 2147483647, %v12325_v19  ;;  %v437_v3 = vand.u32 2147483648, %v12325_v19  ;;  %932 = vmatpush.bf16.msrb.mxu3 %v7734_v0  ;;  %vm431_vm15 = vweird.f32 %v12325_v19 }
 0x1de   :  { %v464_v36 = vmul.f32 %v463_v32, %v12256_v18  ;;  %v453_v20 = vmul.f32 %v452_v59, %v12256_v18  ;;  %v399_v39 = vmul.f32 0.5, %v12140_v24 }
 0x1df   :  { %v438_v17 = vor.u32 1.1754944e-38, %v437_v3  ;;  %vm436_vm1 = vcmp.eq.f32.partialorder %v435_v58, 8.507059e+37 }
 0x1e0   :  { %v12360_v44 = vadd.f32 1.0, %v464_v36  ;;  %943 = vmatpush.bf16.msra.mxu0 %v7894_v60  ;;  %969 = vmatpush.bf16.msra.mxu2 %v7898_v61  ;;  %v454_v4 = vadd.f32 1.1283791, %v453_v20 }
 0x1e2   :  { %11620 = vrcp.f32 %v12360_v44  ;;  %v475_v18 = vand.u32 2147483647, %v12360_v44  ;;  %vm471_vm3 = vweird.f32 %v12360_v44  ;;  %v455_v9 = vmul.f32 %v454_v4, %v12220_v1 }
 0x1e3   :  { %v11619_v47 = vpop.eup %11618 }
 0x1e4   :  { %v427_v52 = vmul.f32 %v11619_v47, %v12325_v19  ;;  %vm432_vm14 = vweird.f32 %v11619_v47  ;;  %944 = vmatpush.bf16.msra.mxu0 %v7878_v10  ;;  %970 = vmatpush.bf16.msra.mxu2 %v7882_v12  ;;  %v477_v19 = vand.u32 2147483648, %v12360_v44  ;;  %vm476_vm5 = vcmp.eq.f32.partialorder %v475_v18, 8.507059e+37 }
 0x1e5   :  { %vm433_vm0 = vmor %vm431_vm15, %vm432_vm14 }
 0x1e6   :  { %v428_v63 = vsub.f32 1.0, %v427_v52  ;;  %v478_v38 = vor.u32 1.1754944e-38, %v477_v19 }
 0x1e8   :  { %v429_v8 = vmul.f32 %v11619_v47, %v428_v63  ;;  %v11621_v15 = vpop.eup %11620  ;;  %945 = vmatpush.bf16.msra.mxu0 %v7862_v22  ;;  %971 = vmatpush.bf16.msra.mxu2 %v7866_v29 }
 0x1e9   :  { %v467_v21 = vmul.f32 %v11621_v15, %v12360_v44  ;;  %vm472_vm2 = vweird.f32 %v11621_v15 }
 0x1ea   :  { %v430_v16 = vadd.f32 %v11619_v47, %v429_v8  ;;  %vm473_vm4 = vmor %vm471_vm3, %vm472_vm2 }
 0x1eb   :  { %v468_v31 = vsub.f32 1.0, %v467_v21 }
 0x1ec   :  { %v434_v28 = vsel %vm433_vm0, %v11619_v47, %v430_v16 }
 0x1ed   :  { %v439_v30 = vsel %vm436_vm1, %v438_v17, %v434_v28  ;;  %v469_v33 = vmul.f32 %v11621_v15, %v468_v31 }
 0x1ee   :  { %v440_v32 = vmul.f32 %v439_v30, %v415_v25 }
 0x1ef   :  { %v470_v37 = vadd.f32 %v11621_v15, %v469_v33 }
 0x1f0   :  { %v7721_v36 = vclamps-f32 %v440_v32, 1.0 }
 0x1f1   :  { %v474_v40 = vsel %vm473_vm4, %v11621_v15, %v470_v37 }
 0x1f2   :  { %v483_v35 = vadd.f32 1.0, %v7721_v36  ;;  %v479_v42 = vsel %vm476_vm5, %v478_v38, %v474_v40 }
 0x1f3   :  { %v480_v34 = vmul.f32 %v479_v42, %v455_v9 }
 0x1f4   :  { %v485_v41 = vmul.f32 %v483_v35, %v399_v39  ;;  %v8209_v39 = vld [vmem:[%s17756_s7 + $0x1c0] sm:$0xf] }
 0x1f5   :  { %v7722_v46 = vclamps-f32 %v480_v34, 1.0  ;;  %v10962_v35 = vld [vmem:[%s17756_s7 + $0x1dc] sm:$0xf0] }
 0x1f6   :  { %v487_v45 = vpack.c.bf16 %v485_v41, %v485_v41  ;;  %v8210_v40 = vor.u32 %v10962_v35, %v8209_v39  ;;  %v11090_v39 = vld [vmem:[%s17756_s7 + $0x5dc] sm:$0xf0] }
 0x1f7   :  { %v484_v47 = vadd.f32 1.0, %v7722_v46 }
 0x1f8   :  { %881 = vmatmul.bf16.vlgmr.msra.gmra.mxu3 %v487_v45  ;;  %907 = vmatmul.bf16.vlgmr.msrb.gmra.mxu1 %v487_v45 }
 0x1f9   :  { %v486_v44 = vmul.f32 %v484_v47, %v400_v26  ;;  %2839 = vmatpush.bf16.msra.mxu3 %v8210_v40 }
 0x1fb   :  { %v488_v49 = vpack.c.bf16 %v486_v44, %v486_v44  ;;  %v8177_v44 = vld [vmem:[%s17756_s7 + $0x180] sm:$0xf] }
 0x1fd   :  { %894 = vmatmul.bf16.vlgmr.msrb.gmra.mxu0 %v488_v49  ;;  %920 = vmatmul.bf16.vlgmr.msrb.gmra.mxu2 %v488_v49 }
 0x208   :  { %933 = vmatmul.bf16.vlgmr.msrb.gmra.mxu3 %v487_v45  ;;  %959 = vmatmul.bf16.vlgmr.msra.gmra.mxu1 %v487_v45 }
 0x20d   :  { %946 = vmatmul.bf16.vlgmr.msra.gmra.mxu0 %v488_v49  ;;  %972 = vmatmul.bf16.vlgmr.msra.gmra.mxu2 %v488_v49  ;;  %v10954_v49 = vld [vmem:[%s17756_s7 + $0x19c] sm:$0xf0] }
 0x275   :  { %v908_v24 = vpop.f32.mrf.mxu1 }
 0x27a   :  { %v895_v50 = vpop.f32.mrf.mxu0 }
 0x27b   :  { %v882_v1 = vpop.f32.mrf.mxu3 }
 0x27c   :  { %v896_v51 = vadd.f32 %v895_v50, %v882_v1  ;;  %v8178_v50 = vor.u32 %v10954_v49, %v8177_v44 }
 0x27d   :  { %v910_v54 = vpop.f32.mrf.mxu1 }
 0x27e   :  { %v978_v52 = vrot.slane %v896_v51, 4  ;;  %2840 = vmatpush.bf16.msra.mxu3 %v8178_v50 }
 0x280   :  { %v979_v53 = vadd.f32 %v978_v52, %v896_v51  ;;  %v921_v55 = vpop.f32.mrf.mxu2  ;;  %v8465_v52 = vld [vmem:[%s17756_s7 + $0x3c0] sm:$0xf] }
 0x281   :  { %v922_v58 = vadd.f32 %v921_v55, %v908_v24 }
 0x282   :  { %v980_v57 = vrot.slane %v979_v53, 2  ;;  %v897_v59 = vpop.f32.mrf.mxu0 }
 0x283   :  { %v884_v56 = vpop.f32.mrf.mxu3  ;;  %v984_v61 = vrot.slane %v922_v58, 4 }
 0x284   :  { %v981_v60 = vadd.f32 %v980_v57, %v979_v53  ;;  %v11026_v53 = vld [vmem:[%s17756_s7 + $0x3dc] sm:$0xf0] }
 0x285   :  { %v960_v62 = vpop.f32.mrf.mxu1  ;;  %v985_v0 = vadd.f32 %v984_v61, %v922_v58  ;;  %v10946_v61 = vld [vmem:[%s17756_s7 + $0x15c] sm:$0xf0] }
 0x286   :  { %v982_v63 = vrot.slane %v981_v60, 1 }
 0x287   :  { %v986_v48 = vrot.slane %v985_v0, 2 }
 0x288   :  { %v983_v2 = vadd.f32 %v982_v63, %v981_v60  ;;  %v923_v3 = vpop.f32.mrf.mxu2  ;;  %v8145_v60 = vld [vmem:[%s17756_s7 + $0x140] sm:$0xf] }
 0x289   :  { %v987_v6 = vadd.f32 %v986_v48, %v985_v0  ;;  %v8146_v63 = vor.u32 %v10946_v61, %v8145_v60  ;;  %v12477_v0 = vld [vmem:[%s17755_s6] sm:$0xff] }
 0x28a   :  { %v1002_v5 = vmul.f32 %v983_v2, %v11816_v23  ;;  %v947_v8 = vpop.f32.mrf.mxu0  ;;  %v8433_v3 = vld [vmem:[%s17756_s7 + $0x380] sm:$0xf] }
 0x28b   :  { %v934_v7 = vpop.f32.mrf.mxu3  ;;  %v988_v11 = vrot.slane %v987_v6, 1  ;;  %2841 = vmatpush.bf16.msra.mxu3 %v8146_v63  ;;  %v8337_v61 = vld [vmem:[%s17756_s7 + $0x2c0] sm:$0xf] }
 0x28c   :  { %v12432_v10 = vsub.f32 %v896_v51, %v1002_v5  ;;  %v948_v27 = vadd.f32 %v947_v8, %v934_v7  ;;  %v11018_v5 = vld [vmem:[%s17756_s7 + $0x39c] sm:$0xf0] }
 0x28d   :  { %v962_v43 = vpop.f32.mrf.mxu1  ;;  %v989_v13 = vadd.f32 %v988_v11, %v987_v6  ;;  %v8434_v7 = vor.u32 %v11018_v5, %v8433_v3  ;;  %v8977_v3 = vld [vmem:[%s17756_s7 + $0x7c0] sm:$0xf] }
 0x28e   :  { %v1010_v12 = vmul.f32 %v12432_v10, %v12432_v10  ;;  %v990_v14 = vrot.slane %v948_v27, 4  ;;  %v10938_v43 = vld [vmem:[%s17756_s7 + $0x11c] sm:$0xf0] }
 0x28f   :  { %v1003_v16 = vmul.f32 %v989_v13, %v11816_v23  ;;  %v11154_v5 = vld [vmem:[%s17756_s7 + $0x7dc] sm:$0xf0] }
 0x290   :  { %v1014_v15 = vrot.slane %v1010_v12, 4  ;;  %v991_v17 = vadd.f32 %v990_v14, %v948_v27  ;;  %v973_v20 = vpop.f32.mrf.mxu2 }
 0x291   :  { %v12437_v22 = vsub.f32 %v922_v58, %v1003_v16  ;;  %v974_v29 = vadd.f32 %v973_v20, %v960_v62  ;;  %v8466_v58 = vor.u32 %v11026_v53, %v8465_v52  ;;  %v8401_v20 = vld [vmem:[%s17756_s7 + $0x340] sm:$0xf]  ;;  %v1108_v52 = vperm.slane %v12477_v0, 3 }
 0x292   :  { %v1015_v21 = vadd.f32 %v1014_v15, %v1010_v12  ;;  %v992_v25 = vrot.slane %v991_v17, 2  ;;  %v949_v30 = vpop.f32.mrf.mxu0  ;;  %v1043_v12 = vperm.slane %v12477_v0, 0  ;;  %v1044_v15 = vperm.slane %v12477_v0, 2 }
 0x293   :  { %v936_v28 = vpop.f32.mrf.mxu3  ;;  %v1011_v32 = vmul.f32 %v12437_v22, %v12437_v22  ;;  %v996_v4 = vrot.slane %v974_v29, 4  ;;  %2852 = vmatpush.bf16.msrb.mxu0 %v8466_v58  ;;  %v11082_v58 = vld [vmem:[%s17756_s7 + $0x59c] sm:$0xf0] }
 0x294   :  { %v1016_v31 = vrot.slane %v1015_v21, 2  ;;  %v993_v19 = vadd.f32 %v992_v25, %v991_v17  ;;  %v1045_v28 = vperm.slane %v12477_v0, 4 }
 0x295   :  { %v1020_v18 = vrot.slane %v1011_v32, 4  ;;  %v997_v37 = vadd.f32 %v996_v4, %v974_v29  ;;  %v8081_v4 = vld [vmem:[%s17756_s7 + $0xc0] sm:$0xf] }
 0x296   :  { %v1017_v33 = vadd.f32 %v1016_v31, %v1015_v21  ;;  %v994_v36 = vrot.slane %v993_v19, 1  ;;  %v11010_v21 = vld [vmem:[%s17756_s7 + $0x35c] sm:$0xf0] }
 0x297   :  { %v1021_v9 = vadd.f32 %v1020_v18, %v1011_v32  ;;  %v998_v42 = vrot.slane %v997_v37, 2  ;;  %2853 = vmatpush.bf16.msrb.mxu0 %v8434_v7  ;;  %v8402_v30 = vor.u32 %v11010_v21, %v8401_v20  ;;  %v1051_v18 = vperm.slane %v1043_v12, 0  ;;  %v11074_v20 = vld [vmem:[%s17756_s7 + $0x55c] sm:$0xf0] }
 0x298   :  { %v1018_v38 = vrot.slane %v1017_v33, 1  ;;  %v995_v41 = vadd.f32 %v994_v36, %v993_v19  ;;  %v975_v34 = vpop.f32.mrf.mxu2 }
 0x299   :  { %v1022_v46 = vrot.slane %v1021_v9, 2  ;;  %v999_v47 = vadd.f32 %v998_v42, %v997_v37  ;;  %v8721_v37 = vld [vmem:[%s17756_s7 + $0x5c0] sm:$0xf]  ;;  %v12533_v34 = vperm.slane %v1044_v15, 0  ;;  %v1055_v12 = vmul.f32 %v1051_v18, %v12432_v10 }
 0x29a   :  { %v1019_v45 = vadd.f32 %v1018_v38, %v1017_v33  ;;  %v1004_v26 = vmul.f32 %v995_v41, %v11816_v23  ;;  %v10930_v33 = vld [vmem:[%s17756_s7 + $0xdc] sm:$0xf0]  ;;  %v8722_v40 = vor.u32 %v11090_v39, %v8721_v37  ;;  %v1116_v10 = vperm.slane %v1108_v52, 1 }
 0x29b   :  { %v1023_v1 = vadd.f32 %v1022_v46, %v1021_v9  ;;  %v1000_v54 = vrot.slane %v999_v47, 1  ;;  %2854 = vmatpush.bf16.msrb.mxu0 %v8402_v30  ;;  %v8082_v36 = vor.u32 %v10930_v33, %v8081_v4  ;;  %v8369_v41 = vld [vmem:[%s17756_s7 + $0x300] sm:$0xf] }
 0x29c   :  { %v1038_v24 = vmul.f32 %v1019_v45, %v11816_v23  ;;  %v12455_v51 = vsub.f32 %v948_v27, %v1004_v26  ;;  %v8113_v27 = vld [vmem:[%s17756_s7 + $0x100] sm:$0xf]  ;;  %v12535_v45 = vperm.slane %v1045_v28, 0  ;;  %2865 = vmatpush.bf16.msrb.mxu1 %v8722_v40 }
 0x29d   :  { %v1024_v57 = vrot.slane %v1023_v1, 1  ;;  %v1001_v59 = vadd.f32 %v1000_v54, %v999_v47  ;;  %v8114_v14 = vor.u32 %v10938_v43, %v8113_v27  ;;  %v11002_v42 = vld [vmem:[%s17756_s7 + $0x31c] sm:$0xf0]  ;;  %v1107_v54 = vperm.slane %v12477_v0, 1 }
 0x29e   :  { %v12463_v55 = vadd.f32 1e-05, %v1038_v24  ;;  %v1012_v56 = vmul.f32 %v12455_v51, %v12455_v51  ;;  %v8370_v26 = vor.u32 %v11002_v42, %v8369_v41  ;;  %v8049_v24 = vld [vmem:[%s17756_s7 + $0x80] sm:$0xf]  ;;  %v8978_v27 = vor.u32 %v11154_v5, %v8977_v3 }
 0x29f   :  { %v1025_v62 = vadd.f32 %v1024_v57, %v1023_v1  ;;  %v1005_v48 = vmul.f32 %v1001_v59, %v11816_v23  ;;  %2842 = vmatpush.bf16.msra.mxu3 %v8114_v14  ;;  %v10922_v1 = vld [vmem:[%s17756_s7 + $0x9c] sm:$0xf0]  ;;  %v1115_v14 = vperm.slane %v1107_v54, 1 }
 0x2a0   :  { %11622 = vrsqrt.f32 %v12463_v55  ;;  %v1026_v2 = vrot.slane %v1012_v56, 4  ;;  %2855 = vmatpush.bf16.msrb.mxu0 %v8370_v26  ;;  %v8050_v53 = vor.u32 %v10922_v1, %v8049_v24  ;;  %v8689_v57 = vld [vmem:[%s17756_s7 + $0x580] sm:$0xf]  ;;  %vm1069_vm7 = vweird.f32 %v12463_v55  ;;  %2878 = vmatpush.bf16.msrb.mxu2 %v8978_v27  ;;  %v10958_v26 = vld [vmem:[%s17756_s7 + $0x1c4] sm:$0xf] }
 0x2a1   :  { %v1039_v6 = vmul.f32 %v1025_v62, %v11816_v23  ;;  %v12487_v11 = vsub.f32 %v974_v29, %v1005_v48  ;;  %v1046_v29 = vperm.slane %v12477_v0, 6  ;;  %v10994_v62 = vld [vmem:[%s17756_s7 + $0x2dc] sm:$0xf0]  ;;  %v8211_v24 = vld [vmem:[%s17756_s7 + $0x1e0] sm:$0xf0] }
 0x2a2   :  { %v1027_v8 = vadd.f32 %v1026_v2, %v1012_v56  ;;  %v8690_v2 = vor.u32 %v11082_v58, %v8689_v57  ;;  %v8338_v48 = vor.u32 %v10994_v62, %v8337_v61  ;;  %v10914_v43 = vld [vmem:[%s17756_s7 + $0x5c] sm:$0xf0]  ;;  %v8214_v52 = vor.u32 %v10958_v26, %v8211_v24 }
 0x2a3   :  { %v12496_v13 = vadd.f32 1e-05, %v1039_v6  ;;  %v1013_v17 = vmul.f32 %v12487_v11, %v12487_v11  ;;  %v12537_v46 = vperm.slane %v1046_v29, 0  ;;  %2843 = vmatpush.bf16.msra.mxu3 %v8082_v36  ;;  %v8305_v29 = vld [vmem:[%s17756_s7 + $0x280] sm:$0xf]  ;;  %v1109_v36 = vperm.slane %v12477_v0, 5 }
 0x2a4   :  { %v1028_v16 = vrot.slane %v1027_v8, 2  ;;  %2866 = vmatpush.bf16.msrb.mxu1 %v8690_v2  ;;  %2856 = vmatpush.bf16.msrb.mxu0 %v8338_v48  ;;  %v10986_v30 = vld [vmem:[%s17756_s7 + $0x29c] sm:$0xf0]  ;;  %v8179_v2 = vld [vmem:[%s17756_s7 + $0x1a0] sm:$0xf0] }
 0x2a5   :  { %11624 = vrsqrt.f32 %v12496_v13  ;;  %v1032_v19 = vrot.slane %v1013_v17, 4  ;;  %v8306_v4 = vor.u32 %v10986_v30, %v8305_v29  ;;  %v11146_v33 = vld [vmem:[%s17756_s7 + $0x79c] sm:$0xf0]  ;;  %vm1079_vm10 = vweird.f32 %v12496_v13 }
 0x2a6   :  { %v12507_v25 = vpop.eup %11622  ;;  %v1029_v32 = vadd.f32 %v1028_v16, %v1027_v8  ;;  %v7985_v39 = vld [vmem:[%s17756_s7] sm:$0xf]  ;;  %v12671_v48 = vperm.slane %v1109_v36, 1 }
 0x2a7   :  { %v1064_v31 = vmul.f32 %v12507_v25, %v12463_v55  ;;  %v1033_v9 = vadd.f32 %v1032_v19, %v1013_v17  ;;  %vm1070_vm6 = vweird.f32 %v12507_v25  ;;  %2844 = vmatpush.bf16.msra.mxu3 %v8050_v53  ;;  %v8017_v55 = vld [vmem:[%s17756_s7 + $0x40] sm:$0xf] }
 0x2a8   :  { %v1030_v38 = vrot.slane %v1029_v32, 1  ;;  %vm1071_vm8 = vmor %vm1069_vm7, %vm1070_vm6  ;;  %v8018_v16 = vor.u32 %v10914_v43, %v8017_v55  ;;  %v8657_v17 = vld [vmem:[%s17756_s7 + $0x540] sm:$0xf]  ;;  %2857 = vmatpush.bf16.msrb.mxu0 %v8306_v4 }
 0x2a9   :  { %v1065_v35 = vmul.f32 %v12507_v25, %v1064_v31  ;;  %v1034_v49 = vrot.slane %v1033_v9, 2  ;;  %v8658_v19 = vor.u32 %v11074_v20, %v8657_v17  ;;  %v8625_v41 = vld [vmem:[%s17756_s7 + $0x500] sm:$0xf]  ;;  %v11022_v20 = vld [vmem:[%s17756_s7 + $0x3c4] sm:$0xf] }
 0x2aa   :  { %v1031_v44 = vadd.f32 %v1030_v38, %v1029_v32  ;;  %v11066_v42 = vld [vmem:[%s17756_s7 + $0x51c] sm:$0xf0] }
 0x2ab   :  { %v1066_v47 = vmul.f32 0.5, %v1065_v35  ;;  %v12545_v50 = vpop.eup %11624  ;;  %v1035_v63 = vadd.f32 %v1034_v49, %v1033_v9  ;;  %2845 = vmatpush.bf16.msra.mxu3 %v8018_v16  ;;  %v10906_v35 = vld [vmem:[%s17756_s7 + $0x1c] sm:$0xf0]  ;;  %2867 = vmatpush.bf16.msrb.mxu1 %v8658_v19  ;;  %v8626_v49 = vor.u32 %v11066_v42, %v8625_v41  ;;  %v8147_v41 = vld [vmem:[%s17756_s7 + $0x160] sm:$0xf0] }
 0x2ac   :  { %v1074_v59 = vmul.f32 %v12545_v50, %v12496_v13  ;;  %v1040_v60 = vmul.f32 %v1031_v44, %v11816_v23  ;;  %vm1080_vm9 = vweird.f32 %v12545_v50  ;;  %v7986_v40 = vor.u32 %v10906_v35, %v7985_v39  ;;  %v8273_v1 = vld [vmem:[%s17756_s7 + $0x240] sm:$0xf] }
 0x2ad   :  { %v1067_v56 = vsub.f32 1.5, %v1066_v47  ;;  %v1036_v15 = vrot.slane %v1035_v63, 1  ;;  %v1056_v47 = vmul.f32 %v12533_v34, %v12437_v22  ;;  %v10978_v54 = vld [vmem:[%s17756_s7 + $0x25c] sm:$0xf0]  ;;  %vm1081_vm11 = vmor %vm1079_vm10, %vm1080_vm9  ;;  %v1110_v34 = vperm.slane %v12477_v0, 7 }
 0x2ae   :  { %v1075_v7 = vmul.f32 %v12545_v50, %v1074_v59  ;;  %v12574_v8 = vadd.f32 1e-05, %v1040_v60  ;;  %v8274_v58 = vor.u32 %v10978_v54, %v8273_v1  ;;  %v11138_v59 = vld [vmem:[%s17756_s7 + $0x75c] sm:$0xf0] }
 0x2af   :  { %v1068_v6 = vmul.f32 %v12507_v25, %v1067_v56  ;;  %v1037_v32 = vadd.f32 %v1036_v15, %v1035_v63  ;;  %2846 = vmatpush.bf16.msra.mxu3 %v7986_v40  ;;  %v8913_v56 = vld [vmem:[%s17756_s7 + $0x740] sm:$0xf]  ;;  %2868 = vmatpush.bf16.msrb.mxu1 %v8626_v49  ;;  %v10950_v63 = vld [vmem:[%s17756_s7 + $0x184] sm:$0xf]  ;;  %v12723_v40 = vmul.f32 %v12537_v46, %v12487_v11 }
 0x2b0   :  { %v1076_v28 = vmul.f32 0.5, %v1075_v7  ;;  %11626 = vrsqrt.f32 %v12574_v8  ;;  %v8593_v60 = vld [vmem:[%s17756_s7 + $0x4c0] sm:$0xf]  ;;  %2858 = vmatpush.bf16.msrb.mxu0 %v8274_v58  ;;  %v8914_v3 = vor.u32 %v11138_v59, %v8913_v56  ;;  %vm1089_vm13 = vweird.f32 %v12574_v8 }
 0x2b1   :  { %v1072_v21 = vsel %vm1071_vm8, %v12507_v25, %v1068_v6  ;;  %v8945_v25 = vld [vmem:[%s17756_s7 + $0x780] sm:$0xf]  ;;  %v1041_v9 = vmul.f32 %v1037_v32, %v11816_v23 }
 0x2b2   :  { %v1103_v31 = vmul.f32 %v1072_v21, %v1055_v12  ;;  %v1077_v18 = vsub.f32 1.5, %v1076_v28  ;;  %v8946_v37 = vor.u32 %v11146_v33, %v8945_v25  ;;  %v11058_v62 = vld [vmem:[%s17756_s7 + $0x4dc] sm:$0xf0]  ;;  %v8182_v12 = vor.u32 %v10950_v63, %v8179_v2  ;;  %v8467_v21 = vld [vmem:[%s17756_s7 + $0x3e0] sm:$0xf0] }
 0x2b3   :  { %v12643_v13 = vadd.f32 1e-05, %v1041_v9  ;;  %2891 = vmatpush.bf16.msrb.mxu3 %v8214_v52  ;;  %v8594_v5 = vor.u32 %v11058_v62, %v8593_v60  ;;  %v8241_v6 = vld [vmem:[%s17756_s7 + $0x200] sm:$0xf]  ;;  %v8470_v19 = vor.u32 %v11022_v20, %v8467_v21  ;;  %v10942_v25 = vld [vmem:[%s17756_s7 + $0x144] sm:$0xf]  ;;  %v1057_v9 = vmul.f32 %v12535_v45, %v12455_v51 }
 0x2b4   :  { %v12613_v38 = vadd.f32 %v1115_v14, %v1103_v31  ;;  %v1078_v44 = vmul.f32 %v12545_v50, %v1077_v18  ;;  %2879 = vmatpush.bf16.msrb.mxu2 %v8946_v37  ;;  %v10970_v7 = vld [vmem:[%s17756_s7 + $0x21c] sm:$0xf0]  ;;  %v12702_v31 = vperm.slane %v1110_v34, 1  ;;  %v8150_v1 = vor.u32 %v10942_v25, %v8147_v41  ;;  %v10934_v52 = vld [vmem:[%s17756_s7 + $0x104] sm:$0xf] }
 0x2b5   :  { %11628 = vrsqrt.f32 %v12643_v13  ;;  %v8881_v14 = vld [vmem:[%s17756_s7 + $0x700] sm:$0xf]  ;;  %v8242_v16 = vor.u32 %v10970_v7, %v8241_v6  ;;  %2869 = vmatpush.bf16.msrb.mxu1 %v8594_v5  ;;  %v11006_v6 = vld [vmem:[%s17756_s7 + $0x344] sm:$0xf]  ;;  %vm1099_vm0 = vweird.f32 %v12643_v13 }
 0x2b6   :  { %v12639_v22 = vmul.f32 0.70710677, %v12613_v38  ;;  %v12646_v53 = vpop.eup %11626  ;;  %v1082_v57 = vsel %vm1081_vm11, %v12545_v50, %v1078_v44  ;;  %v11130_v15 = vld [vmem:[%s17756_s7 + $0x71c] sm:$0xf0]  ;;  %v8435_v44 = vld [vmem:[%s17756_s7 + $0x3a0] sm:$0xf0] }
 0x2b7   :  { %v1104_v61 = vmul.f32 %v1082_v57, %v1056_v47  ;;  %v1084_v50 = vmul.f32 %v12646_v53, %v12574_v8  ;;  %v8882_v17 = vor.u32 %v11130_v15, %v8881_v14  ;;  %v8561_v28 = vld [vmem:[%s17756_s7 + $0x480] sm:$0xf]  ;;  %2892 = vmatpush.bf16.msrb.mxu3 %v8182_v12  ;;  %vm1090_vm12 = vweird.f32 %v12646_v53  ;;  %2859 = vmatpush.bf16.msrb.mxu0 %v8242_v16  ;;  %v11014_v47 = vld [vmem:[%s17756_s7 + $0x384] sm:$0xf] }
 0x2b8   :  { %v1131_v0 = vmul.f32 %v12639_v22, %v12639_v22  ;;  %2880 = vmatpush.bf16.msrb.mxu2 %v8914_v3  ;;  %v11050_v4 = vld [vmem:[%s17756_s7 + $0x49c] sm:$0xf0]  ;;  %vm1091_vm14 = vmor %vm1089_vm13, %vm1090_vm12  ;;  %v8115_v8 = vld [vmem:[%s17756_s7 + $0x120] sm:$0xf0] }
 0x2b9   :  { %v12682_v55 = vadd.f32 %v1116_v10, %v1104_v61  ;;  %v1085_v43 = vmul.f32 %v12646_v53, %v1084_v50  ;;  %v8562_v37 = vor.u32 %v11050_v4, %v8561_v28  ;;  %v8849_v42 = vld [vmem:[%s17756_s7 + $0x6c0] sm:$0xf]  ;;  %v8438_v50 = vor.u32 %v11014_v47, %v8435_v44  ;;  %v8403_v15 = vld [vmem:[%s17756_s7 + $0x360] sm:$0xf0] }
 0x2ba   :  { %v12680_v27 = vmin.f32 %v1131_v0, 16.0  ;;  %v11122_v51 = vld [vmem:[%s17756_s7 + $0x6dc] sm:$0xf0]  ;;  %v8118_v14 = vor.u32 %v10934_v52, %v8115_v8  ;;  %v8406_v25 = vor.u32 %v11006_v6, %v8403_v15  ;;  %v11086_v41 = vld [vmem:[%s17756_s7 + $0x5c4] sm:$0xf] }
 0x2bb   :  { %v1086_v30 = vmul.f32 0.5, %v1085_v43  ;;  %v12705_v32 = vmul.f32 0.70710677, %v12682_v55  ;;  %v12714_v39 = vpop.eup %11628  ;;  %2904 = vmatpush.bf16.msra.mxu0 %v8470_v19  ;;  %2870 = vmatpush.bf16.msrb.mxu1 %v8562_v37  ;;  %v8529_v49 = vld [vmem:[%s17756_s7 + $0x440] sm:$0xf]  ;;  %v8850_v54 = vor.u32 %v11122_v51, %v8849_v42 }
 0x2bc   :  { %v1133_v10 = vmul.f32 2.1237322e-06, %v12680_v27  ;;  %v1144_v29 = vmul.f32 3.8918573e-05, %v12680_v27  ;;  %2881 = vmatpush.bf16.msrb.mxu2 %v8882_v17  ;;  %v1094_v46 = vmul.f32 %v12714_v39, %v12643_v13  ;;  %vm1100_vm15 = vweird.f32 %v12714_v39  ;;  %v11042_v34 = vld [vmem:[%s17756_s7 + $0x45c] sm:$0xf0]  ;;  %2893 = vmatpush.bf16.msrb.mxu3 %v8150_v1 }
 0x2bd   :  { %v1087_v36 = vsub.f32 1.5, %v1086_v30  ;;  %v1171_v35 = vmul.f32 %v12705_v32, %v12705_v32  ;;  %v8817_v62 = vld [vmem:[%s17756_s7 + $0x680] sm:$0xf]  ;;  %v8530_v3 = vor.u32 %v11042_v34, %v8529_v49  ;;  %v10926_v13 = vld [vmem:[%s17756_s7 + $0xc4] sm:$0xf]  ;;  %vm1101_vm1 = vmor %vm1099_vm0, %vm1100_vm15 }
 0x2be   :  { %v1134_v33 = vadd.f32 0.00028619796, %v1133_v10  ;;  %v1145_v18 = vadd.f32 0.001143296, %v1144_v29  ;;  %v1095_v59 = vmul.f32 %v12714_v39, %v1094_v46  ;;  %v11114_v5 = vld [vmem:[%s17756_s7 + $0x69c] sm:$0xf0] }
 0x2bf   :  { %v1088_v11 = vmul.f32 %v12646_v53, %v1087_v36  ;;  %v12748_v24 = vmin.f32 %v1171_v35, 16.0  ;;  %2905 = vmatpush.bf16.msra.mxu0 %v8438_v50  ;;  %2871 = vmatpush.bf16.msrb.mxu1 %v8530_v3  ;;  %v8818_v21 = vor.u32 %v11114_v5, %v8817_v62  ;;  %v8785_v1 = vld [vmem:[%s17756_s7 + $0x640] sm:$0xf]  ;;  %v12852_v3 = vmul.f32 0.5, %v12613_v38  ;;  %v8691_v5 = vld [vmem:[%s17756_s7 + $0x5a0] sm:$0xf0] }
 0x2c0   :  { %v1135_v45 = vmul.f32 %v1134_v33, %v12680_v27  ;;  %v1146_v26 = vmul.f32 %v1145_v18, %v12680_v27  ;;  %2882 = vmatpush.bf16.msrb.mxu2 %v8850_v54  ;;  %v1096_v2 = vmul.f32 0.5, %v1095_v59  ;;  %2894 = vmatpush.bf16.msrb.mxu3 %v8118_v14  ;;  %v11034_v33 = vld [vmem:[%s17756_s7 + $0x41c] sm:$0xf0]  ;;  %v8083_v18 = vld [vmem:[%s17756_s7 + $0xe0] sm:$0xf0] }
 0x2c1   :  { %v1092_v56 = vsel %vm1091_vm14, %v12646_v53, %v1088_v11  ;;  %v1173_v60 = vmul.f32 2.1237322e-06, %v12748_v24  ;;  %v1184_v0 = vmul.f32 3.8918573e-05, %v12748_v24  ;;  %v8723_v11 = vld [vmem:[%s17756_s7 + $0x5e0] sm:$0xf0] }
 0x2c2   :  { %v1136_v57 = vadd.f32 0.0036580483, %v1135_v45  ;;  %v1147_v58 = vadd.f32 0.014752088, %v1146_v26  ;;  %v1105_v61 = vmul.f32 %v1092_v56, %v1057_v9  ;;  %v1097_v20 = vsub.f32 1.5, %v1096_v2 }
 0x2c3   :  { %v1174_v7 = vadd.f32 0.00028619796, %v1173_v60  ;;  %v1185_v43 = vadd.f32 0.001143296, %v1184_v0  ;;  %2906 = vmatpush.bf16.msra.mxu0 %v8406_v25  ;;  %v8086_v26 = vor.u32 %v10926_v13, %v8083_v18  ;;  %v8726_v34 = vor.u32 %v11086_v41, %v8723_v11  ;;  %v8051_v2 = vld [vmem:[%s17756_s7 + $0xa0] sm:$0xf0] }
 0x2c4   :  { %v1137_v53 = vmul.f32 %v1136_v57, %v12680_v27  ;;  %v1148_v63 = vmul.f32 %v1147_v58, %v12680_v27  ;;  %v12780_v12 = vadd.f32 %v12671_v48, %v1105_v61  ;;  %v8497_v48 = vld [vmem:[%s17756_s7 + $0x400] sm:$0xf]  ;;  %v1098_v4 = vmul.f32 %v12714_v39, %v1097_v20  ;;  %2883 = vmatpush.bf16.msrb.mxu2 %v8818_v21  ;;  %v10998_v57 = vld [vmem:[%s17756_s7 + $0x304] sm:$0xf] }
 0x2c5   :  { %v1175_v28 = vmul.f32 %v1174_v7, %v12748_v24  ;;  %v1186_v10 = vmul.f32 %v1185_v43, %v12748_v24  ;;  %v8498_v9 = vor.u32 %v11034_v33, %v8497_v48  ;;  %2895 = vmatpush.bf16.msrb.mxu3 %v8086_v26  ;;  %v8753_v48 = vld [vmem:[%s17756_s7 + $0x600] sm:$0xf]  ;;  %v8339_v33 = vld [vmem:[%s17756_s7 + $0x2e0] sm:$0xf0] }
 0x2c6   :  { %v1138_v16 = vadd.f32 0.05243302, %v1137_v53  ;;  %v1149_v17 = vadd.f32 0.112945676, %v1148_v63  ;;  %v12788_v29 = vmul.f32 0.70710677, %v12780_v12  ;;  %v1102_v45 = vsel %vm1101_vm1, %v12714_v39, %v1098_v4 }
 0x2c7   :  { %v1176_v36 = vadd.f32 0.0036580483, %v1175_v28  ;;  %v1187_v37 = vadd.f32 0.014752088, %v1186_v10  ;;  %v1106_v49 = vmul.f32 %v1102_v45, %v12723_v40  ;;  %2872 = vmatpush.bf16.msrb.mxu1 %v8498_v9  ;;  %v11106_v39 = vld [vmem:[%s17756_s7 + $0x65c] sm:$0xf0] }
 0x2c8   :  { %v1139_v30 = vmul.f32 %v1138_v16, %v12680_v27  ;;  %v1150_v19 = vmul.f32 %v1149_v17, %v12680_v27  ;;  %v1211_v35 = vmul.f32 %v12788_v29, %v12788_v29  ;;  %v8786_v52 = vor.u32 %v11106_v39, %v8785_v1  ;;  %v8371_v40 = vld [vmem:[%s17756_s7 + $0x320] sm:$0xf0]  ;;  %v11098_v25 = vld [vmem:[%s17756_s7 + $0x61c] sm:$0xf0] }
 0x2c9   :  { %v1177_v46 = vmul.f32 %v1176_v36, %v12748_v24  ;;  %v1188_v47 = vmul.f32 %v1187_v37, %v12748_v24  ;;  %v12841_v61 = vadd.f32 %v12702_v31, %v1106_v49  ;;  %v8374_v50 = vor.u32 %v10998_v57, %v8371_v40  ;;  %v11078_v31 = vld [vmem:[%s17756_s7 + $0x584] sm:$0xf] }
 0x2ca   :  { %v1140_v42 = vadd.f32 0.18741608, %v1139_v30  ;;  %v1151_v51 = vadd.f32 0.4994258, %v1150_v19  ;;  %v12819_v44 = vmin.f32 %v1211_v35, 16.0  ;;  %2884 = vmatpush.bf16.msrb.mxu2 %v8786_v52  ;;  %v8694_v4 = vor.u32 %v11078_v31, %v8691_v5 }
 0x2cb   :  { %v1178_v56 = vadd.f32 0.05243302, %v1177_v46  ;;  %v1189_v59 = vadd.f32 0.112945676, %v1188_v47  ;;  %2917 = vmatpush.bf16.msra.mxu1 %v8726_v34  ;;  %2907 = vmatpush.bf16.msra.mxu0 %v8374_v50  ;;  %v12866_v16 = vmul.f32 0.70710677, %v12841_v61  ;;  %v8754_v37 = vor.u32 %v11098_v25, %v8753_v48 }
 0x2cc   :  { %v1152_v54 = vmul.f32 %v1151_v51, %v12680_v27  ;;  %v1141_v58 = vmul.f32 %v1140_v42, %v12680_v27  ;;  %v1213_v8 = vmul.f32 2.1237322e-06, %v12819_v44  ;;  %v1224_v0 = vmul.f32 3.8918573e-05, %v12819_v44  ;;  %v10918_v27 = vld [vmem:[%s17756_s7 + $0x84] sm:$0xf] }
 0x2cd   :  { %v1179_v62 = vmul.f32 %v1178_v56, %v12748_v24  ;;  %v1190_v53 = vmul.f32 %v1189_v59, %v12748_v24  ;;  %v8054_v17 = vor.u32 %v10918_v27, %v8051_v2  ;;  %v1251_v19 = vmul.f32 %v12866_v16, %v12866_v16  ;;  %v11150_v11 = vld [vmem:[%s17756_s7 + $0x7c4] sm:$0xf] }
 0x2ce   :  { %v12837_v60 = vadd.f32 1.0, %v1152_v54  ;;  %v1214_v63 = vadd.f32 0.00028619796, %v1213_v8  ;;  %v12863_v15 = vadd.f32 1.1283791, %v1141_v58  ;;  %2885 = vmatpush.bf16.msrb.mxu2 %v8754_v37 }
 0x2cf   :  { %v1180_v7 = vadd.f32 0.18741608, %v1179_v62  ;;  %v1191_v43 = vadd.f32 0.4994258, %v1190_v53  ;;  %v1225_v38 = vadd.f32 0.001143296, %v1224_v0  ;;  %2896 = vmatpush.bf16.msrb.mxu3 %v8054_v17  ;;  %2918 = vmatpush.bf16.msra.mxu1 %v8694_v4 }
 0x2d0   :  { %11630 = vrcp.f32 %v12837_v60  ;;  %v1165_v6 = vand.u32 2147483648, %v12837_v60  ;;  %v1215_v14 = vmul.f32 %v1214_v63, %v12819_v44  ;;  %v1163_v20 = vand.u32 2147483647, %v12837_v60  ;;  %v8979_v46 = vld [vmem:[%s17756_s7 + $0x7e0] sm:$0xf0] }
 0x2d1   :  { %v1181_v21 = vmul.f32 %v1180_v7, %v12748_v24  ;;  %v1192_v28 = vmul.f32 %v1191_v43, %v12748_v24  ;;  %v1226_v30 = vmul.f32 %v1225_v38, %v12819_v44  ;;  %v10990_v24 = vld [vmem:[%s17756_s7 + $0x2c4] sm:$0xf]  ;;  %v12893_v42 = vmin.f32 %v1251_v19, 16.0 }
 0x2d2   :  { %v1216_v10 = vadd.f32 0.0036580483, %v1215_v14  ;;  %v12886_v13 = vor.u32 1.1754944e-38, %v1165_v6  ;;  %v8342_v51 = vor.u32 %v10990_v24, %v8339_v33  ;;  %vm12896_vm2 = vcmp.eq.f32.partialorder %v1163_v20, 8.507059e+37  ;;  %v10910_v47 = vld [vmem:[%s17756_s7 + $0x44] sm:$0xf] }
 0x2d3   :  { %v12888_v18 = vadd.f32 1.0, %v1192_v28  ;;  %v12891_v9 = vadd.f32 1.1283791, %v1181_v21  ;;  %v1227_v41 = vadd.f32 0.014752088, %v1226_v30  ;;  %vm1159_vm4 = vweird.f32 %v12837_v60 }
 0x2d4   :  { %v1217_v36 = vmul.f32 %v1216_v10, %v12819_v44  ;;  %2908 = vmatpush.bf16.msra.mxu0 %v8342_v51  ;;  %v8019_v1 = vld [vmem:[%s17756_s7 + $0x60] sm:$0xf0]  ;;  %v1253_v52 = vmul.f32 2.1237322e-06, %v12893_v42  ;;  %v1264_v57 = vmul.f32 3.8918573e-05, %v12893_v42  ;;  %v8982_v58 = vor.u32 %v11150_v11, %v8979_v46 }
 0x2d5   :  { %11632 = vrcp.f32 %v12888_v18  ;;  %v11070_v39 = vld [vmem:[%s17756_s7 + $0x544] sm:$0xf]  ;;  %v1228_v34 = vmul.f32 %v1227_v41, %v12819_v44  ;;  %v1203_v40 = vand.u32 2147483647, %v12888_v18  ;;  %v8022_v27 = vor.u32 %v10910_v47, %v8019_v1 }
 0x2d6   :  { %v11631_v35 = vpop.eup %11630  ;;  %v1218_v49 = vadd.f32 0.05243302, %v1217_v36  ;;  %v8659_v56 = vld [vmem:[%s17756_s7 + $0x560] sm:$0xf0]  ;;  %v1254_v50 = vadd.f32 0.00028619796, %v1253_v52  ;;  %2930 = vmatpush.bf16.msra.mxu2 %v8982_v58  ;;  %v1143_v21 = vmul.f32 %v12863_v15, %v12639_v22  ;;  %vm1199_vm8 = vweird.f32 %v12888_v18 }
 0x2d7   :  { %v1155_v45 = vmul.f32 %v11631_v35, %v12837_v60  ;;  %vm1160_vm3 = vweird.f32 %v11631_v35  ;;  %v10982_v59 = vld [vmem:[%s17756_s7 + $0x284] sm:$0xf]  ;;  %v1229_v0 = vadd.f32 0.112945676, %v1228_v34  ;;  %v1265_v62 = vadd.f32 0.001143296, %v1264_v57  ;;  %2897 = vmatpush.bf16.msrb.mxu3 %v8022_v27 }
 0x2d8   :  { %vm12928_vm5 = vmor %vm1159_vm4, %vm1160_vm3  ;;  %v1205_v60 = vand.u32 2147483648, %v12888_v18  ;;  %v1219_v63 = vmul.f32 %v1218_v49, %v12819_v44  ;;  %v8662_v2 = vor.u32 %v11070_v39, %v8659_v56  ;;  %v8307_v31 = vld [vmem:[%s17756_s7 + $0x2a0] sm:$0xf0]  ;;  %v1255_v43 = vmul.f32 %v1254_v50, %v12893_v42  ;;  %v8217_v52 = vld [vmem:[%s17756_s7 + $0x1c8] sm:$0xf] }
 0x2d9   :  { %v1156_v54 = vsub.f32 1.0, %v1155_v45  ;;  %v1230_v7 = vmul.f32 %v1229_v0, %v12819_v44  ;;  %v1266_v14 = vmul.f32 %v1265_v62, %v12893_v42  ;;  %v11142_v38 = vld [vmem:[%s17756_s7 + $0x784] sm:$0xf]  ;;  %v8310_v10 = vor.u32 %v10982_v59, %v8307_v31  ;;  %v10963_v59 = vld [vmem:[%s17756_s7 + $0x1e4] sm:$0xf0] }
 0x2da   :  { %v8947_v17 = vld [vmem:[%s17756_s7 + $0x7a0] sm:$0xf0]  ;;  %2919 = vmatpush.bf16.msra.mxu1 %v8662_v2  ;;  %v1256_v4 = vadd.f32 0.0036580483, %v1255_v43  ;;  %vm12969_vm6 = vcmp.eq.f32.partialorder %v1203_v40, 8.507059e+37  ;;  %v1183_v0 = vmul.f32 %v12891_v9, %v12705_v32  ;;  %v8218_v43 = vor.u32 %v10963_v59, %v8217_v52 }
 0x2db   :  { %v1157_v8 = vmul.f32 %v11631_v35, %v1156_v54  ;;  %v12937_v5 = vpop.eup %11632  ;;  %v10902_v20 = vld [vmem:[%s17756_s7 + $0x4] sm:$0xf]  ;;  %v1231_v15 = vadd.f32 0.4994258, %v1230_v7  ;;  %v1267_v25 = vadd.f32 0.014752088, %v1266_v14  ;;  %2909 = vmatpush.bf16.msra.mxu0 %v8310_v10  ;;  %v8950_v37 = vor.u32 %v11142_v38, %v8947_v17 }
 0x2dc   :  { %v1195_v28 = vmul.f32 %v12937_v5, %v12888_v18  ;;  %v7987_v48 = vld [vmem:[%s17756_s7 + $0x20] sm:$0xf0]  ;;  %v1220_v51 = vadd.f32 0.18741608, %v1219_v63  ;;  %vm1200_vm7 = vweird.f32 %v12937_v5  ;;  %v1257_v39 = vmul.f32 %v1256_v4, %v12893_v42  ;;  %v10955_v17 = vld [vmem:[%s17756_s7 + $0x1a4] sm:$0xf0] }
 0x2dd   :  { %v1158_v6 = vadd.f32 %v11631_v35, %v1157_v8  ;;  %v11062_v30 = vld [vmem:[%s17756_s7 + $0x504] sm:$0xf]  ;;  %v1232_v45 = vmul.f32 %v1231_v15, %v12819_v44  ;;  %2931 = vmatpush.bf16.msra.mxu2 %v8950_v37  ;;  %v7990_v46 = vor.u32 %v10902_v20, %v7987_v48  ;;  %vm1201_vm9 = vmor %vm1199_vm8, %vm1200_vm7  ;;  %v1206_v18 = vor.u32 1.1754944e-38, %v1205_v60 }
 0x2de   :  { %v8627_v19 = vld [vmem:[%s17756_s7 + $0x520] sm:$0xf0]  ;;  %v1196_v33 = vsub.f32 1.0, %v1195_v28  ;;  %v1221_v62 = vmul.f32 %v1220_v51, %v12819_v44  ;;  %v1258_v9 = vadd.f32 0.05243302, %v1257_v39  ;;  %v1124_v37 = vmul.f32 0.5, %v12682_v55 }
 0x2df   :  { %v1162_v22 = vsel %vm12928_vm5, %v11631_v35, %v1158_v6  ;;  %v1268_v35 = vmul.f32 %v1267_v25, %v12893_v42  ;;  %v10974_v11 = vld [vmem:[%s17756_s7 + $0x244] sm:$0xf]  ;;  %v8630_v47 = vor.u32 %v11062_v30, %v8627_v19  ;;  %v12983_v1 = vadd.f32 1.0, %v1232_v45  ;;  %2898 = vmatpush.bf16.msrb.mxu3 %v7990_v46  ;;  %v8473_v25 = vld [vmem:[%s17756_s7 + $0x3c8] sm:$0xf] }
 0x2e0   :  { %v1167_v24 = vsel %vm12896_vm2, %v12886_v13, %v1162_v22  ;;  %v8275_v13 = vld [vmem:[%s17756_s7 + $0x260] sm:$0xf0]  ;;  %v1197_v26 = vmul.f32 %v12937_v5, %v1196_v33  ;;  %v1222_v48 = vadd.f32 1.1283791, %v1221_v62  ;;  %v1259_v4 = vmul.f32 %v1258_v9, %v12893_v42  ;;  %v10947_v55 = vld [vmem:[%s17756_s7 + $0x164] sm:$0xf0] }
 0x2e1   :  { %v1168_v41 = vmul.f32 %v1167_v24, %v1143_v21  ;;  %v1269_v54 = vadd.f32 0.112945676, %v1268_v35  ;;  %2920 = vmatpush.bf16.msra.mxu1 %v8630_v47  ;;  %v8278_v57 = vor.u32 %v10974_v11, %v8275_v13  ;;  %v11134_v40 = vld [vmem:[%s17756_s7 + $0x744] sm:$0xf]  ;;  %11634 = vrcp.f32 %v12983_v1  ;;  %v11027_v24 = vld [vmem:[%s17756_s7 + $0x3e4] sm:$0xf0] }
 0x2e2   :  { %v1198_v34 = vadd.f32 %v12937_v5, %v1197_v26  ;;  %v8915_v58 = vld [vmem:[%s17756_s7 + $0x760] sm:$0xf0]  ;;  %v8153_v35 = vld [vmem:[%s17756_s7 + $0x148] sm:$0xf]  ;;  %v1243_v39 = vand.u32 2147483647, %v12983_v1  ;;  %vm1239_vm11 = vweird.f32 %v12983_v1 }
 0x2e3   :  { %v7979_v49 = vclamps-f32 %v1168_v41, 1.0  ;;  %v11054_v8 = vld [vmem:[%s17756_s7 + $0x4c4] sm:$0xf]  ;;  %v1270_v53 = vmul.f32 %v1269_v54, %v12893_v42  ;;  %2910 = vmatpush.bf16.msra.mxu0 %v8278_v57  ;;  %v8918_v2 = vor.u32 %v11134_v40, %v8915_v58  ;;  %v1245_v54 = vand.u32 2147483648, %v12983_v1  ;;  %v8121_v62 = vld [vmem:[%s17756_s7 + $0x108] sm:$0xf] }
 0x2e4   :  { %v1202_v50 = vsel %vm1201_vm9, %v12937_v5, %v1198_v34  ;;  %v8595_v60 = vld [vmem:[%s17756_s7 + $0x4e0] sm:$0xf0]  ;;  %v1260_v52 = vadd.f32 0.18741608, %v1259_v4  ;;  %v8474_v57 = vor.u32 %v11027_v24, %v8473_v25  ;;  %v8154_v59 = vor.u32 %v10947_v55, %v8153_v35 }
 0x2e5   :  { %v1291_v56 = vadd.f32 1.0, %v7979_v49  ;;  %v10966_v63 = vld [vmem:[%s17756_s7 + $0x204] sm:$0xf]  ;;  %v1207_v44 = vsel %vm12969_vm6, %v1206_v18, %v1202_v50  ;;  %v1271_v7 = vadd.f32 0.4994258, %v1270_v53  ;;  %2932 = vmatpush.bf16.msra.mxu2 %v8918_v2  ;;  %v8598_v38 = vor.u32 %v11054_v8, %v8595_v60 }
 0x2e6   :  { %v8243_v27 = vld [vmem:[%s17756_s7 + $0x220] sm:$0xf0]  ;;  %v1208_v6 = vmul.f32 %v1207_v44, %v1183_v0  ;;  %v8441_v8 = vld [vmem:[%s17756_s7 + $0x388] sm:$0xf]  ;;  %v1246_v44 = vor.u32 1.1754944e-38, %v1245_v54  ;;  %v1261_v9 = vmul.f32 %v1260_v52, %v12893_v42  ;;  %vm1244_vm13 = vcmp.eq.f32.partialorder %v1243_v39, 8.507059e+37 }
 0x2e7   :  { %v1295_v32 = vmul.f32 %v1291_v56, %v12852_v3  ;;  %v11126_v31 = vld [vmem:[%s17756_s7 + $0x704] sm:$0xf]  ;;  %v8185_v3 = vld [vmem:[%s17756_s7 + $0x188] sm:$0xf]  ;;  %v8246_v20 = vor.u32 %v10966_v63, %v8243_v27  ;;  %v1272_v30 = vmul.f32 %v1271_v7, %v12893_v42  ;;  %v13047_v15 = vpop.eup %11634  ;;  %2921 = vmatpush.bf16.msra.mxu1 %v8598_v38  ;;  %v1125_v35 = vmul.f32 0.5, %v12780_v12 }
 0x2e8   :  { %v8883_v5 = vld [vmem:[%s17756_s7 + $0x720] sm:$0xf0]  ;;  %v7980_v10 = vclamps-f32 %v1208_v6, 1.0  ;;  %v1235_v51 = vmul.f32 %v13047_v15, %v12983_v1  ;;  %v8186_v45 = vor.u32 %v10955_v17, %v8185_v3  ;;  %vm1240_vm10 = vweird.f32 %v13047_v15  ;;  %v11019_v0 = vld [vmem:[%s17756_s7 + $0x3a4] sm:$0xf0] }
 0x2e9   :  { %v13032_v14 = vpack.c.bf16 %v1295_v32, %v1295_v32  ;;  %v11046_v21 = vld [vmem:[%s17756_s7 + $0x484] sm:$0xf]  ;;  %v8886_v19 = vor.u32 %v11126_v31, %v8883_v5  ;;  %2911 = vmatpush.bf16.msra.mxu0 %v8246_v20  ;;  %v13069_v13 = vadd.f32 1.0, %v1272_v30  ;;  %v10939_v53 = vld [vmem:[%s17756_s7 + $0x124] sm:$0xf0]  ;;  %vm13111_vm12 = vmor %vm1239_vm11, %vm1240_vm10  ;;  %v8442_v2 = vor.u32 %v11019_v0, %v8441_v8 }
 0x2ea   :  { %v8563_v28 = vld [vmem:[%s17756_s7 + $0x4a0] sm:$0xf0]  ;;  %v1292_v41 = vadd.f32 1.0, %v7980_v10  ;;  %v1236_v49 = vsub.f32 1.0, %v1235_v51  ;;  %v1223_v6 = vmul.f32 %v1222_v48, %v12788_v29  ;;  %v8122_v42 = vor.u32 %v10939_v53, %v8121_v62  ;;  %v11011_v3 = vld [vmem:[%s17756_s7 + $0x364] sm:$0xf0] }
 0x2eb   :  { %v11118_v22 = vld [vmem:[%s17756_s7 + $0x6c4] sm:$0xf]  ;;  %2847 = vmatmul.bf16.vlgmr.msra.gmra.mxu3 %v13032_v14  ;;  %v8566_v33 = vor.u32 %v11046_v21, %v8563_v28  ;;  %2933 = vmatpush.bf16.msra.mxu2 %v8886_v19  ;;  %11636 = vrcp.f32 %v13069_v13  ;;  %v8089_v29 = vld [vmem:[%s17756_s7 + $0xc8] sm:$0xf]  ;;  %v1262_v19 = vadd.f32 1.1283791, %v1261_v9  ;;  %vm1279_vm15 = vweird.f32 %v13069_v13 }
 0x2ec   :  { %v8851_v36 = vld [vmem:[%s17756_s7 + $0x6e0] sm:$0xf0]  ;;  %2943 = vmatpush.bf16.msra.mxu3 %v8218_v43  ;;  %v1296_v47 = vmul.f32 %v1292_v41, %v1124_v37  ;;  %v1237_v18 = vmul.f32 %v13047_v15, %v1236_v49  ;;  %v8409_v43 = vld [vmem:[%s17756_s7 + $0x348] sm:$0xf]  ;;  %v1285_v37 = vand.u32 2147483648, %v13069_v13 }
 0x2ed   :  { %v11038_v11 = vld [vmem:[%s17756_s7 + $0x444] sm:$0xf]  ;;  %v8854_v26 = vor.u32 %v11118_v22, %v8851_v36  ;;  %2922 = vmatpush.bf16.msra.mxu1 %v8566_v33  ;;  %v10931_v20 = vld [vmem:[%s17756_s7 + $0xe4] sm:$0xf0]  ;;  %v1283_v22 = vand.u32 2147483647, %v13069_v13 }
 0x2ee   :  { %v8531_v46 = vld [vmem:[%s17756_s7 + $0x460] sm:$0xf0]  ;;  %v13086_v56 = vpack.c.bf16 %v1296_v47, %v1296_v47  ;;  %v1238_v27 = vadd.f32 %v13047_v15, %v1237_v18  ;;  %v8090_v24 = vor.u32 %v10931_v20, %v8089_v29  ;;  %v8377_v33 = vld [vmem:[%s17756_s7 + $0x308] sm:$0xf]  ;;  %v1286_v52 = vor.u32 1.1754944e-38, %v1285_v37 }
 0x2ef   :  { %v11110_v34 = vld [vmem:[%s17756_s7 + $0x684] sm:$0xf]  ;;  %v8534_v40 = vor.u32 %v11038_v11, %v8531_v46  ;;  %2934 = vmatpush.bf16.msra.mxu2 %v8854_v26  ;;  %v11003_v36 = vld [vmem:[%s17756_s7 + $0x324] sm:$0xf0]  ;;  %v1263_v18 = vmul.f32 %v1262_v19, %v12866_v16  ;;  %vm1284_vm1 = vcmp.eq.f32.partialorder %v1283_v22, 8.507059e+37 }
 0x2f0   :  { %v8819_v58 = vld [vmem:[%s17756_s7 + $0x6a0] sm:$0xf0]  ;;  %2944 = vmatpush.bf16.msra.mxu3 %v8186_v45  ;;  %2860 = vmatmul.bf16.vlgmr.msrb.gmra.mxu0 %v13086_v56  ;;  %v1242_v7 = vsel %vm13111_vm12, %v13047_v15, %v1238_v27  ;;  %v8410_v15 = vor.u32 %v11011_v3, %v8409_v43  ;;  %v8057_v41 = vld [vmem:[%s17756_s7 + $0x88] sm:$0xf]  ;;  %v8378_v47 = vor.u32 %v11003_v36, %v8377_v33  ;;  %v1126_v43 = vmul.f32 0.5, %v12841_v61 }
 0x2f1   :  { %v11030_v50 = vld [vmem:[%s17756_s7 + $0x404] sm:$0xf]  ;;  %v8822_v60 = vor.u32 %v11110_v34, %v8819_v58  ;;  %2956 = vmatpush.bf16.msrb.mxu0 %v8474_v57  ;;  %2923 = vmatpush.bf16.msra.mxu1 %v8534_v40  ;;  %v11637_v38 = vpop.eup %11636  ;;  %v1247_v17 = vsel %vm1244_vm13, %v1246_v44, %v1242_v7  ;;  %v10923_v51 = vld [vmem:[%s17756_s7 + $0xa4] sm:$0xf0] }
 0x2f2   :  { %v8499_v63 = vld [vmem:[%s17756_s7 + $0x420] sm:$0xf0]  ;;  %v1248_v28 = vmul.f32 %v1247_v17, %v1223_v6  ;;  %v1275_v10 = vmul.f32 %v11637_v38, %v13069_v13  ;;  %vm1280_vm14 = vweird.f32 %v11637_v38  ;;  %v8729_v26 = vld [vmem:[%s17756_s7 + $0x5c8] sm:$0xf]  ;;  %v8058_v12 = vor.u32 %v10923_v51, %v8057_v41  ;;  %v11023_v51 = vld [vmem:[%s17756_s7 + $0x3cc] sm:$0xf] }
 0x2f3   :  { %v8502_v31 = vor.u32 %v11030_v50, %v8499_v63  ;;  %v11102_v5 = vld [vmem:[%s17756_s7 + $0x644] sm:$0xf]  ;;  %2935 = vmatpush.bf16.msra.mxu2 %v8822_v60  ;;  %v11091_v46 = vld [vmem:[%s17756_s7 + $0x5e4] sm:$0xf0]  ;;  %vm1281_vm0 = vmor %vm1279_vm15, %vm1280_vm14 }
 0x2f4   :  { %v8787_v1 = vld [vmem:[%s17756_s7 + $0x660] sm:$0xf0]  ;;  %2945 = vmatpush.bf16.msra.mxu3 %v8154_v59  ;;  %v7981_v4 = vclamps-f32 %v1248_v28, 1.0  ;;  %v1276_v25 = vsub.f32 1.0, %v1275_v10  ;;  %v8345_v54 = vld [vmem:[%s17756_s7 + $0x2c8] sm:$0xf]  ;;  %v8730_v57 = vor.u32 %v11091_v46, %v8729_v26 }
 0x2f5   :  { %v8790_v21 = vor.u32 %v11102_v5, %v8787_v1  ;;  %v11094_v48 = vld [vmem:[%s17756_s7 + $0x604] sm:$0xf]  ;;  %2957 = vmatpush.bf16.msrb.mxu0 %v8442_v2  ;;  %2924 = vmatpush.bf16.msra.mxu1 %v8502_v31  ;;  %v10995_v34 = vld [vmem:[%s17756_s7 + $0x2e4] sm:$0xf0]  ;;  %v10959_v5 = vld [vmem:[%s17756_s7 + $0x1cc] sm:$0xf] }
 0x2f6   :  { %v8755_v30 = vld [vmem:[%s17756_s7 + $0x620] sm:$0xf0]  ;;  %v1293_v11 = vadd.f32 1.0, %v7981_v4  ;;  %v1277_v55 = vmul.f32 %v11637_v38, %v1276_v25  ;;  %v8025_v40 = vld [vmem:[%s17756_s7 + $0x48] sm:$0xf]  ;;  %v8346_v62 = vor.u32 %v10995_v34, %v8345_v54 }
 0x2f7   :  { %2936 = vmatpush.bf16.msra.mxu2 %v8790_v21  ;;  %v8758_v45 = vor.u32 %v11094_v48, %v8755_v30  ;;  %v10915_v13 = vld [vmem:[%s17756_s7 + $0x64] sm:$0xf0]  ;;  %v8219_v1 = vld [vmem:[%s17756_s7 + $0x1e8] sm:$0xf0] }
 0x2f8   :  { %2946 = vmatpush.bf16.msra.mxu3 %v8122_v42  ;;  %v1297_v49 = vmul.f32 %v1293_v11, %v1125_v35  ;;  %v1278_v39 = vadd.f32 %v11637_v38, %v1277_v55  ;;  %v8697_v8 = vld [vmem:[%s17756_s7 + $0x588] sm:$0xf]  ;;  %v8026_v60 = vor.u32 %v10915_v13, %v8025_v40  ;;  %v8222_v28 = vor.u32 %v10959_v5, %v8219_v1  ;;  %v10951_v48 = vld [vmem:[%s17756_s7 + $0x18c] sm:$0xf] }
 0x2f9   :  { %2958 = vmatpush.bf16.msrb.mxu0 %v8410_v15  ;;  %v11083_v0 = vld [vmem:[%s17756_s7 + $0x5a4] sm:$0xf0]  ;;  %v8187_v30 = vld [vmem:[%s17756_s7 + $0x1a8] sm:$0xf0] }
 0x2fa   :  { %v13180_v58 = vpack.c.bf16 %v1297_v49, %v1297_v49  ;;  %v1282_v59 = vsel %vm1281_vm0, %v11637_v38, %v1278_v39  ;;  %v8665_v16 = vld [vmem:[%s17756_s7 + $0x548] sm:$0xf]  ;;  %v8698_v32 = vor.u32 %v11083_v0, %v8697_v8  ;;  %v8190_v41 = vor.u32 %v10951_v48, %v8187_v30  ;;  %v10943_v11 = vld [vmem:[%s17756_s7 + $0x14c] sm:$0xf] }
 0x2fb   :  { %2899 = vmatmul.bf16.vlgmr.msrb.gmra.mxu3 %v13032_v14  ;;  %2937 = vmatpush.bf16.msra.mxu2 %v8758_v45  ;;  %v1287_v50 = vsel %vm1284_vm1, %v1286_v52, %v1282_v59  ;;  %v8313_v63 = vld [vmem:[%s17756_s7 + $0x288] sm:$0xf]  ;;  %v8475_v45 = vld [vmem:[%s17756_s7 + $0x3e8] sm:$0xf0] }
 0x2fc   :  { %2947 = vmatpush.bf16.msra.mxu3 %v8090_v24  ;;  %v1288_v53 = vmul.f32 %v1287_v50, %v1263_v18  ;;  %2873 = vmatmul.bf16.vlgmr.msrb.gmra.mxu1 %v13180_v58  ;;  %v10987_v27 = vld [vmem:[%s17756_s7 + $0x2a4] sm:$0xf0]  ;;  %v8155_v55 = vld [vmem:[%s17756_s7 + $0x168] sm:$0xf0]  ;;  %v8478_v39 = vor.u32 %v11023_v51, %v8475_v45 }
 0x2fd   :  { %2959 = vmatpush.bf16.msrb.mxu0 %v8378_v47  ;;  %2969 = vmatpush.bf16.msrb.mxu1 %v8730_v57  ;;  %v11075_v44 = vld [vmem:[%s17756_s7 + $0x564] sm:$0xf0]  ;;  %v8314_v42 = vor.u32 %v10987_v27, %v8313_v63  ;;  %v8158_v34 = vor.u32 %v10943_v11, %v8155_v55  ;;  %v11015_v52 = vld [vmem:[%s17756_s7 + $0x38c] sm:$0xf] }
 0x2fe   :  { %v7993_v9 = vld [vmem:[%s17756_s7 + $0x8] sm:$0xf]  ;;  %v7982_v31 = vclamps-f32 %v1288_v53, 1.0  ;;  %v8666_v20 = vor.u32 %v11075_v44, %v8665_v16  ;;  %v8443_v57 = vld [vmem:[%s17756_s7 + $0x3a8] sm:$0xf0] }
 0x2ff   :  { %v10907_v2 = vld [vmem:[%s17756_s7 + $0x24] sm:$0xf0]  ;;  %v10935_v13 = vld [vmem:[%s17756_s7 + $0x10c] sm:$0xf]  ;;  %v8446_v50 = vor.u32 %v11015_v52, %v8443_v57 }
 0x300   :  { %2948 = vmatpush.bf16.msra.mxu3 %v8058_v12  ;;  %2912 = vmatmul.bf16.vlgmr.msra.gmra.mxu0 %v13086_v56  ;;  %v8985_v6 = vld [vmem:[%s17756_s7 + $0x7c8] sm:$0xf]  ;;  %v1294_v3 = vadd.f32 1.0, %v7982_v31  ;;  %v7994_v38 = vor.u32 %v10907_v2, %v7993_v9  ;;  %v8123_v18 = vld [vmem:[%s17756_s7 + $0x128] sm:$0xf0] }
 0x301   :  { %2960 = vmatpush.bf16.msrb.mxu0 %v8346_v62  ;;  %v11155_v7 = vld [vmem:[%s17756_s7 + $0x7e4] sm:$0xf0]  ;;  %2970 = vmatpush.bf16.msrb.mxu1 %v8698_v32  ;;  %v11007_v16 = vld [vmem:[%s17756_s7 + $0x34c] sm:$0xf] }
 0x302   :  { %v8281_v17 = vld [vmem:[%s17756_s7 + $0x248] sm:$0xf]  ;;  %v1298_v10 = vmul.f32 %v1294_v3, %v1126_v43  ;;  %v8986_v19 = vor.u32 %v11155_v7, %v8985_v6  ;;  %v8411_v63 = vld [vmem:[%s17756_s7 + $0x368] sm:$0xf0] }
 0x303   :  { %v10979_v29 = vld [vmem:[%s17756_s7 + $0x264] sm:$0xf0]  ;;  %v10927_v32 = vld [vmem:[%s17756_s7 + $0xcc] sm:$0xf]  ;;  %v8414_v5 = vor.u32 %v11007_v16, %v8411_v63 }
 0x304   :  { %2949 = vmatpush.bf16.msra.mxu3 %v8026_v60  ;;  %v8633_v21 = vld [vmem:[%s17756_s7 + $0x508] sm:$0xf]  ;;  %v8282_v15 = vor.u32 %v10979_v29, %v8281_v17  ;;  %v13243_v4 = vpack.c.bf16 %v1298_v10, %v1298_v10  ;;  %v8126_v60 = vor.u32 %v10935_v13, %v8123_v18  ;;  %v8091_v44 = vld [vmem:[%s17756_s7 + $0xe8] sm:$0xf0] }
 0x305   :  { %v11067_v61 = vld [vmem:[%s17756_s7 + $0x524] sm:$0xf0]  ;;  %2961 = vmatpush.bf16.msrb.mxu0 %v8314_v42  ;;  %2971 = vmatpush.bf16.msrb.mxu1 %v8666_v20  ;;  %v8094_v7 = vor.u32 %v10927_v32, %v8091_v44  ;;  %v10999_v42 = vld [vmem:[%s17756_s7 + $0x30c] sm:$0xf]  ;;  %v8193_v44 = vld [vmem:[%s17756_s7 + $0x190] sm:$0xf] }
 0x306   :  { %v8953_v22 = vld [vmem:[%s17756_s7 + $0x788] sm:$0xf]  ;;  %v8634_v36 = vor.u32 %v11067_v61, %v8633_v21  ;;  %2886 = vmatmul.bf16.vlgmr.msrb.gmra.mxu2 %v13243_v4  ;;  %v8379_v43 = vld [vmem:[%s17756_s7 + $0x328] sm:$0xf0] }
 0x307   :  { %v11147_v25 = vld [vmem:[%s17756_s7 + $0x7a4] sm:$0xf0]  ;;  %2982 = vmatpush.bf16.msrb.mxu2 %v8986_v19  ;;  %v8059_v17 = vld [vmem:[%s17756_s7 + $0xa8] sm:$0xf0]  ;;  %v8382_v61 = vor.u32 %v10999_v42, %v8379_v43 }
 0x308   :  { %2950 = vmatpush.bf16.msra.mxu3 %v7994_v38  ;;  %v8249_v24 = vld [vmem:[%s17756_s7 + $0x208] sm:$0xf]  ;;  %v8954_v26 = vor.u32 %v11147_v25, %v8953_v22  ;;  %v10919_v38 = vld [vmem:[%s17756_s7 + $0x8c] sm:$0xf] }
 0x309   :  { %v10971_v33 = vld [vmem:[%s17756_s7 + $0x224] sm:$0xf0]  ;;  %2962 = vmatpush.bf16.msrb.mxu0 %v8282_v15  ;;  %2972 = vmatpush.bf16.msrb.mxu1 %v8634_v36  ;;  %v11087_v20 = vld [vmem:[%s17756_s7 + $0x5cc] sm:$0xf]  ;;  %v8062_v30 = vor.u32 %v10919_v38, %v8059_v17 }
 0x30a   :  { %v8601_v37 = vld [vmem:[%s17756_s7 + $0x4c8] sm:$0xf]  ;;  %v8250_v46 = vor.u32 %v10971_v33, %v8249_v24  ;;  %v8731_v21 = vld [vmem:[%s17756_s7 + $0x5e8] sm:$0xf0] }
 0x30b   :  { %v11059_v35 = vld [vmem:[%s17756_s7 + $0x4e4] sm:$0xf0]  ;;  %2951 = vmatmul.bf16.vlgmr.msra.gmra.mxu3 %v13032_v14  ;;  %2983 = vmatpush.bf16.msrb.mxu2 %v8954_v26  ;;  %v10991_v19 = vld [vmem:[%s17756_s7 + $0x2cc] sm:$0xf]  ;;  %v8734_v15 = vor.u32 %v11087_v20, %v8731_v21  ;;  %v10948_v20 = vld [vmem:[%s17756_s7 + $0x16c] sm:$0xf0] }
 0x30c   :  { %2995 = vmatpush.bf16.msrb.mxu3 %v8222_v28  ;;  %v8921_v47 = vld [vmem:[%s17756_s7 + $0x748] sm:$0xf]  ;;  %v8602_v12 = vor.u32 %v11059_v35, %v8601_v37  ;;  %2925 = vmatmul.bf16.vlgmr.msra.gmra.mxu1 %v13180_v58  ;;  %v8347_v22 = vld [vmem:[%s17756_s7 + $0x2e8] sm:$0xf0] }
 0x30d   :  { %v11139_v49 = vld [vmem:[%s17756_s7 + $0x764] sm:$0xf0]  ;;  %2963 = vmatpush.bf16.msrb.mxu0 %v8250_v46  ;;  %v10911_v25 = vld [vmem:[%s17756_s7 + $0x4c] sm:$0xf]  ;;  %v8350_v45 = vor.u32 %v10991_v19, %v8347_v22 }
 0x30e   :  { %v8569_v54 = vld [vmem:[%s17756_s7 + $0x488] sm:$0xf]  ;;  %v8922_v59 = vor.u32 %v11139_v49, %v8921_v47  ;;  %2973 = vmatpush.bf16.msrb.mxu1 %v8602_v12  ;;  %v8027_v24 = vld [vmem:[%s17756_s7 + $0x68] sm:$0xf0] }
 0x30f   :  { %v11051_v40 = vld [vmem:[%s17756_s7 + $0x4a4] sm:$0xf0]  ;;  %v11079_v36 = vld [vmem:[%s17756_s7 + $0x58c] sm:$0xf]  ;;  %v8030_v35 = vor.u32 %v10911_v25, %v8027_v24  ;;  %v8129_v24 = vld [vmem:[%s17756_s7 + $0x110] sm:$0xf] }
 0x310   :  { %2996 = vmatpush.bf16.msrb.mxu3 %v8190_v41  ;;  %v8889_v8 = vld [vmem:[%s17756_s7 + $0x708] sm:$0xf]  ;;  %v8570_v62 = vor.u32 %v11051_v40, %v8569_v54  ;;  %2964 = vmatmul.bf16.vlgmr.msrb.gmra.mxu0 %v13086_v56  ;;  %v8699_v37 = vld [vmem:[%s17756_s7 + $0x5a8] sm:$0xf0]  ;;  %v8225_v54 = vld [vmem:[%s17756_s7 + $0x1d0] sm:$0xf] }
 0x311   :  { %v11131_v0 = vld [vmem:[%s17756_s7 + $0x724] sm:$0xf0]  ;;  %3008 = vmatpush.bf16.msra.mxu0 %v8478_v39  ;;  %2984 = vmatpush.bf16.msrb.mxu2 %v8922_v59  ;;  %v10983_v11 = vld [vmem:[%s17756_s7 + $0x28c] sm:$0xf]  ;;  %v8702_v26 = vor.u32 %v11079_v36, %v8699_v37 }
 0x312   :  { %v8537_v53 = vld [vmem:[%s17756_s7 + $0x448] sm:$0xf]  ;;  %v8890_v9 = vor.u32 %v11131_v0, %v8889_v8  ;;  %2974 = vmatpush.bf16.msrb.mxu1 %v8570_v62  ;;  %v8315_v55 = vld [vmem:[%s17756_s7 + $0x2a8] sm:$0xf0] }
 0x313   :  { %v11043_v27 = vld [vmem:[%s17756_s7 + $0x464] sm:$0xf0]  ;;  %v11071_v46 = vld [vmem:[%s17756_s7 + $0x54c] sm:$0xf]  ;;  %v8318_v13 = vor.u32 %v10983_v11, %v8315_v55 }
 0x314   :  { %2997 = vmatpush.bf16.msrb.mxu3 %v8158_v34  ;;  %v8857_v2 = vld [vmem:[%s17756_s7 + $0x6c8] sm:$0xf]  ;;  %v8538_v1 = vor.u32 %v11043_v27, %v8537_v53  ;;  %v10903_v47 = vld [vmem:[%s17756_s7 + $0xc] sm:$0xf]  ;;  %v10964_v34 = vld [vmem:[%s17756_s7 + $0x1ec] sm:$0xf0] }
 0x315   :  { %v11123_v31 = vld [vmem:[%s17756_s7 + $0x6e4] sm:$0xf0]  ;;  %3009 = vmatpush.bf16.msra.mxu0 %v8446_v50  ;;  %2985 = vmatpush.bf16.msrb.mxu2 %v8890_v9  ;;  %v7995_v49 = vld [vmem:[%s17756_s7 + $0x28] sm:$0xf0]  ;;  %v8226_v62 = vor.u32 %v10964_v34, %v8225_v54  ;;  %v10956_v9 = vld [vmem:[%s17756_s7 + $0x1ac] sm:$0xf0] }
 0x316   :  { %v8505_v6 = vld [vmem:[%s17756_s7 + $0x408] sm:$0xf]  ;;  %v8858_v29 = vor.u32 %v11123_v31, %v8857_v2  ;;  %2975 = vmatpush.bf16.msrb.mxu1 %v8538_v1  ;;  %2938 = vmatmul.bf16.vlgmr.msra.gmra.mxu2 %v13243_v4  ;;  %v8667_v12 = vld [vmem:[%s17756_s7 + $0x568] sm:$0xf0]  ;;  %v7998_v59 = vor.u32 %v10903_v47, %v7995_v49  ;;  %v8097_v47 = vld [vmem:[%s17756_s7 + $0xd0] sm:$0xf] }
 0x317   :  { %v11035_v3 = vld [vmem:[%s17756_s7 + $0x424] sm:$0xf0]  ;;  %v11151_v40 = vld [vmem:[%s17756_s7 + $0x7cc] sm:$0xf]  ;;  %v8670_v50 = vor.u32 %v11071_v46, %v8667_v12  ;;  %v10932_v49 = vld [vmem:[%s17756_s7 + $0xec] sm:$0xf0] }
 0x318   :  { %2998 = vmatpush.bf16.msrb.mxu3 %v8126_v60  ;;  %v8825_v28 = vld [vmem:[%s17756_s7 + $0x688] sm:$0xf]  ;;  %v8506_v48 = vor.u32 %v11035_v3, %v8505_v6  ;;  %v8987_v18 = vld [vmem:[%s17756_s7 + $0x7e8] sm:$0xf0]  ;;  %v8481_v6 = vld [vmem:[%s17756_s7 + $0x3d0] sm:$0xf]  ;;  %v8194_v3 = vor.u32 %v10956_v9, %v8193_v44 }
 0x319   :  { %v11115_v10 = vld [vmem:[%s17756_s7 + $0x6a4] sm:$0xf0]  ;;  %3010 = vmatpush.bf16.msra.mxu0 %v8414_v5  ;;  %2986 = vmatpush.bf16.msrb.mxu2 %v8858_v29  ;;  %v10975_v8 = vld [vmem:[%s17756_s7 + $0x24c] sm:$0xf]  ;;  %v8990_v63 = vor.u32 %v11151_v40, %v8987_v18  ;;  %v8161_v29 = vld [vmem:[%s17756_s7 + $0x150] sm:$0xf]  ;;  %v8098_v18 = vor.u32 %v10932_v49, %v8097_v47 }
 0x31a   :  { %v8826_v33 = vor.u32 %v11115_v10, %v8825_v28  ;;  %v8793_v41 = vld [vmem:[%s17756_s7 + $0x648] sm:$0xf]  ;;  %2976 = vmatpush.bf16.msrb.mxu1 %v8506_v48  ;;  %v8283_v0 = vld [vmem:[%s17756_s7 + $0x268] sm:$0xf0]  ;;  %v8449_v48 = vld [vmem:[%s17756_s7 + $0x390] sm:$0xf] }
 0x31b   :  { %v11107_v51 = vld [vmem:[%s17756_s7 + $0x664] sm:$0xf0]  ;;  %v11063_v60 = vld [vmem:[%s17756_s7 + $0x50c] sm:$0xf]  ;;  %v8286_v32 = vor.u32 %v10975_v8, %v8283_v0  ;;  %v11092_v0 = vld [vmem:[%s17756_s7 + $0x5ec] sm:$0xf0] }
 0x31c   :  { %2999 = vmatpush.bf16.msrb.mxu3 %v8094_v7  ;;  %v8794_v39 = vor.u32 %v11107_v51, %v8793_v41  ;;  %v8761_v52 = vld [vmem:[%s17756_s7 + $0x608] sm:$0xf]  ;;  %v8635_v16 = vld [vmem:[%s17756_s7 + $0x528] sm:$0xf0]  ;;  %v11028_v7 = vld [vmem:[%s17756_s7 + $0x3ec] sm:$0xf0] }
 0x31d   :  { %3011 = vmatpush.bf16.msra.mxu0 %v8382_v61  ;;  %2987 = vmatpush.bf16.msrb.mxu2 %v8826_v33  ;;  %v11099_v57 = vld [vmem:[%s17756_s7 + $0x624] sm:$0xf0]  ;;  %v11143_v27 = vld [vmem:[%s17756_s7 + $0x78c] sm:$0xf]  ;;  %v8638_v1 = vor.u32 %v11063_v60, %v8635_v16  ;;  %v8482_v10 = vor.u32 %v11028_v7, %v8481_v6  ;;  %v10940_v33 = vld [vmem:[%s17756_s7 + $0x12c] sm:$0xf0] }
 0x31e   :  { %3021 = vmatpush.bf16.msra.mxu1 %v8734_v15  ;;  %v8762_v53 = vor.u32 %v11099_v57, %v8761_v52  ;;  %v8955_v2 = vld [vmem:[%s17756_s7 + $0x7a8] sm:$0xf0]  ;;  %v8162_v15 = vor.u32 %v10948_v20, %v8161_v29  ;;  %v8385_v52 = vld [vmem:[%s17756_s7 + $0x310] sm:$0xf]  ;;  %v10952_v47 = vld [vmem:[%s17756_s7 + $0x194] sm:$0xf] }
 0x31f   :  { %2977 = vmatmul.bf16.vlgmr.msrb.gmra.mxu1 %v13180_v58  ;;  %v10967_v31 = vld [vmem:[%s17756_s7 + $0x20c] sm:$0xf]  ;;  %v8958_v38 = vor.u32 %v11143_v27, %v8955_v2  ;;  %v11004_v57 = vld [vmem:[%s17756_s7 + $0x32c] sm:$0xf0]  ;;  %v8195_v49 = vld [vmem:[%s17756_s7 + $0x1b0] sm:$0xf0] }
 0x320   :  { %3000 = vmatpush.bf16.msrb.mxu3 %v8062_v30  ;;  %v8251_v5 = vld [vmem:[%s17756_s7 + $0x228] sm:$0xf0]  ;;  %v11020_v30 = vld [vmem:[%s17756_s7 + $0x3ac] sm:$0xf0]  ;;  %v8386_v16 = vor.u32 %v11004_v57, %v8385_v52  ;;  %v11024_v52 = vld [vmem:[%s17756_s7 + $0x3d4] sm:$0xf] }
 0x321   :  { %3012 = vmatpush.bf16.msra.mxu0 %v8350_v45  ;;  %2988 = vmatpush.bf16.msrb.mxu2 %v8794_v39  ;;  %v11055_v42 = vld [vmem:[%s17756_s7 + $0x4cc] sm:$0xf]  ;;  %v8254_v17 = vor.u32 %v10967_v31, %v8251_v5  ;;  %v8450_v41 = vor.u32 %v11020_v30, %v8449_v48  ;;  %v8417_v45 = vld [vmem:[%s17756_s7 + $0x350] sm:$0xf]  ;;  %v8483_v57 = vld [vmem:[%s17756_s7 + $0x3f0] sm:$0xf0] }
 0x322   :  { %3022 = vmatpush.bf16.msra.mxu1 %v8702_v26  ;;  %v8603_v43 = vld [vmem:[%s17756_s7 + $0x4e8] sm:$0xf0]  ;;  %v8130_v26 = vor.u32 %v10940_v33, %v8129_v24  ;;  %v8353_v27 = vld [vmem:[%s17756_s7 + $0x2d0] sm:$0xf] }
 0x323   :  { %v11135_v21 = vld [vmem:[%s17756_s7 + $0x74c] sm:$0xf]  ;;  %v8606_v61 = vor.u32 %v11055_v42, %v8603_v43  ;;  %v8705_v2 = vld [vmem:[%s17756_s7 + $0x590] sm:$0xf] }
 0x324   :  { %3001 = vmatpush.bf16.msrb.mxu3 %v8030_v35  ;;  %v8923_v28 = vld [vmem:[%s17756_s7 + $0x768] sm:$0xf0]  ;;  %v11012_v35 = vld [vmem:[%s17756_s7 + $0x36c] sm:$0xf0] }
 0x325   :  { %3013 = vmatpush.bf16.msra.mxu0 %v8318_v13  ;;  %2989 = vmatpush.bf16.msrb.mxu2 %v8762_v53  ;;  %v11047_v19 = vld [vmem:[%s17756_s7 + $0x48c] sm:$0xf]  ;;  %v8926_v25 = vor.u32 %v11135_v21, %v8923_v28  ;;  %v8418_v54 = vor.u32 %v11012_v35, %v8417_v45  ;;  %v11084_v5 = vld [vmem:[%s17756_s7 + $0x5ac] sm:$0xf0] }
 0x326   :  { %3023 = vmatpush.bf16.msra.mxu1 %v8670_v50  ;;  %v8571_v22 = vld [vmem:[%s17756_s7 + $0x4a8] sm:$0xf0]  ;;  %v8065_v50 = vld [vmem:[%s17756_s7 + $0x90] sm:$0xf] }
 0x327   :  { %v11127_v36 = vld [vmem:[%s17756_s7 + $0x70c] sm:$0xf]  ;;  %v8574_v51 = vor.u32 %v11047_v19, %v8571_v22  ;;  %v10916_v6 = vld [vmem:[%s17756_s7 + $0x6c] sm:$0xf0] }
 0x328   :  { %3002 = vmatpush.bf16.msrb.mxu3 %v7998_v59  ;;  %2990 = vmatmul.bf16.vlgmr.msrb.gmra.mxu2 %v13243_v4  ;;  %v8891_v37 = vld [vmem:[%s17756_s7 + $0x728] sm:$0xf0]  ;;  %v8737_v59 = vld [vmem:[%s17756_s7 + $0x5d0] sm:$0xf] }
 0x329   :  { %3034 = vmatpush.bf16.msra.mxu2 %v8990_v63  ;;  %3014 = vmatpush.bf16.msra.mxu0 %v8286_v32  ;;  %v11039_v11 = vld [vmem:[%s17756_s7 + $0x44c] sm:$0xf]  ;;  %v8894_v46 = vor.u32 %v11127_v36, %v8891_v37  ;;  %v10996_v32 = vld [vmem:[%s17756_s7 + $0x2ec] sm:$0xf0]  ;;  %v8738_v44 = vor.u32 %v11092_v0, %v8737_v59  ;;  %v10944_v0 = vld [vmem:[%s17756_s7 + $0x154] sm:$0xf] }
 0x32a   :  { %3024 = vmatpush.bf16.msra.mxu1 %v8638_v1  ;;  %v8539_v55 = vld [vmem:[%s17756_s7 + $0x468] sm:$0xf0]  ;;  %v8033_v1 = vld [vmem:[%s17756_s7 + $0x50] sm:$0xf]  ;;  %v8354_v43 = vor.u32 %v10996_v32, %v8353_v27  ;;  %v8451_v27 = vld [vmem:[%s17756_s7 + $0x3b0] sm:$0xf0] }
 0x32b   :  { %3003 = vmatmul.bf16.vlgmr.msrb.gmra.mxu3 %v13032_v14  ;;  %v11119_v39 = vld [vmem:[%s17756_s7 + $0x6cc] sm:$0xf]  ;;  %v8542_v34 = vor.u32 %v11039_v11, %v8539_v55  ;;  %v8034_v21 = vor.u32 %v10916_v6, %v8033_v1  ;;  %v8673_v28 = vld [vmem:[%s17756_s7 + $0x550] sm:$0xf] }
 0x32c   :  { %3047 = vmatpush.bf16.msra.mxu3 %v8226_v62  ;;  %v8859_v12 = vld [vmem:[%s17756_s7 + $0x6e8] sm:$0xf0]  ;;  %v10924_v62 = vld [vmem:[%s17756_s7 + $0xac] sm:$0xf0] }
 0x32d   :  { %3035 = vmatpush.bf16.msra.mxu2 %v8958_v38  ;;  %3015 = vmatpush.bf16.msra.mxu0 %v8254_v17  ;;  %v11031_v40 = vld [vmem:[%s17756_s7 + $0x40c] sm:$0xf]  ;;  %v8862_v8 = vor.u32 %v11119_v39, %v8859_v12  ;;  %v8066_v9 = vor.u32 %v10924_v62, %v8065_v50  ;;  %v10988_v38 = vld [vmem:[%s17756_s7 + $0x2ac] sm:$0xf0]  ;;  %v8706_v17 = vor.u32 %v11084_v5, %v8705_v2  ;;  %v8163_v50 = vld [vmem:[%s17756_s7 + $0x170] sm:$0xf0] }
 0x32e   :  { %3025 = vmatpush.bf16.msra.mxu1 %v8606_v61  ;;  %v8507_v13 = vld [vmem:[%s17756_s7 + $0x428] sm:$0xf0]  ;;  %v11076_v61 = vld [vmem:[%s17756_s7 + $0x56c] sm:$0xf0]  ;;  %v8131_v5 = vld [vmem:[%s17756_s7 + $0x130] sm:$0xf0] }
 0x32f   :  { %v11111_v53 = vld [vmem:[%s17756_s7 + $0x68c] sm:$0xf]  ;;  %v8510_v63 = vor.u32 %v11031_v40, %v8507_v13  ;;  %v8001_v48 = vld [vmem:[%s17756_s7 + $0x10] sm:$0xf]  ;;  %v8674_v37 = vor.u32 %v11076_v61, %v8673_v28  ;;  %v8099_v28 = vld [vmem:[%s17756_s7 + $0xf0] sm:$0xf0] }
 0x330   :  { %3048 = vmatpush.bf16.msra.mxu3 %v8194_v3  ;;  %3016 = vmatmul.bf16.vlgmr.msra.gmra.mxu0 %v13086_v56  ;;  %v8827_v60 = vld [vmem:[%s17756_s7 + $0x6a8] sm:$0xf0]  ;;  %v8321_v3 = vld [vmem:[%s17756_s7 + $0x290] sm:$0xf] }
 0x331   :  { %3060 = vmatpush.bf16.msrb.mxu0 %v8482_v10  ;;  %3036 = vmatpush.bf16.msra.mxu2 %v8926_v25  ;;  %v8830_v31 = vor.u32 %v11111_v53, %v8827_v60  ;;  %v11103_v7 = vld [vmem:[%s17756_s7 + $0x64c] sm:$0xf]  ;;  %v10908_v30 = vld [vmem:[%s17756_s7 + $0x2c] sm:$0xf0]  ;;  %v8322_v22 = vor.u32 %v10988_v38, %v8321_v3  ;;  %v8227_v25 = vld [vmem:[%s17756_s7 + $0x1f0] sm:$0xf0]  ;;  %v8486_v60 = vor.u32 %v11024_v52, %v8483_v57 }
 0x332   :  { %3026 = vmatpush.bf16.msra.mxu1 %v8574_v51  ;;  %v8795_v42 = vld [vmem:[%s17756_s7 + $0x668] sm:$0xf0]  ;;  %v8993_v19 = vld [vmem:[%s17756_s7 + $0x7d0] sm:$0xf]  ;;  %v8419_v3 = vld [vmem:[%s17756_s7 + $0x370] sm:$0xf0] }
 0x333   :  { %v11095_v29 = vld [vmem:[%s17756_s7 + $0x60c] sm:$0xf]  ;;  %v8798_v10 = vor.u32 %v11103_v7, %v8795_v42  ;;  %v11156_v24 = vld [vmem:[%s17756_s7 + $0x7ec] sm:$0xf0]  ;;  %v8035_v52 = vld [vmem:[%s17756_s7 + $0x70] sm:$0xf0] }
 0x334   :  { %3049 = vmatpush.bf16.msra.mxu3 %v8162_v15  ;;  %v8763_v20 = vld [vmem:[%s17756_s7 + $0x628] sm:$0xf0]  ;;  %v10960_v15 = vld [vmem:[%s17756_s7 + $0x1d4] sm:$0xf]  ;;  %v8289_v33 = vld [vmem:[%s17756_s7 + $0x250] sm:$0xf]  ;;  %v8994_v55 = vor.u32 %v11156_v24, %v8993_v19 }
 0x335   :  { %3061 = vmatpush.bf16.msrb.mxu0 %v8450_v41  ;;  %3037 = vmatpush.bf16.msra.mxu2 %v8894_v46  ;;  %v10980_v36 = vld [vmem:[%s17756_s7 + $0x26c] sm:$0xf0]  ;;  %v8002_v41 = vor.u32 %v10908_v30, %v8001_v48  ;;  %v8766_v51 = vor.u32 %v11095_v29, %v8763_v20  ;;  %v8230_v11 = vor.u32 %v10960_v15, %v8227_v25  ;;  %v11000_v19 = vld [vmem:[%s17756_s7 + $0x314] sm:$0xf] }
 0x336   :  { %3027 = vmatpush.bf16.msra.mxu1 %v8542_v34  ;;  %v8641_v45 = vld [vmem:[%s17756_s7 + $0x510] sm:$0xf]  ;;  %v8290_v46 = vor.u32 %v10980_v36, %v8289_v33  ;;  %v11088_v33 = vld [vmem:[%s17756_s7 + $0x5d4] sm:$0xf] }
 0x337   :  { %v11068_v35 = vld [vmem:[%s17756_s7 + $0x52c] sm:$0xf0] }
 0x338   :  { %3050 = vmatpush.bf16.msra.mxu3 %v8130_v26  ;;  %v8961_v26 = vld [vmem:[%s17756_s7 + $0x790] sm:$0xf]  ;;  %v8642_v34 = vor.u32 %v11068_v35, %v8641_v45 }
 0x339   :  { %3062 = vmatpush.bf16.msrb.mxu0 %v8418_v54  ;;  %3038 = vmatpush.bf16.msra.mxu2 %v8862_v8  ;;  %v11148_v39 = vld [vmem:[%s17756_s7 + $0x7ac] sm:$0xf0] }
 0x33a   :  { %3028 = vmatpush.bf16.msra.mxu1 %v8510_v63  ;;  %v8257_v12 = vld [vmem:[%s17756_s7 + $0x210] sm:$0xf]  ;;  %v8962_v59 = vor.u32 %v11148_v39, %v8961_v26  ;;  %v11016_v63 = vld [vmem:[%s17756_s7 + $0x394] sm:$0xf] }
 0x33b   :  { %v10972_v54 = vld [vmem:[%s17756_s7 + $0x22c] sm:$0xf0]  ;;  %v8454_v7 = vor.u32 %v11016_v63, %v8451_v27  ;;  %v10992_v26 = vld [vmem:[%s17756_s7 + $0x2d4] sm:$0xf] }
 0x33c   :  { %3051 = vmatpush.bf16.msra.mxu3 %v8098_v18  ;;  %v8609_v40 = vld [vmem:[%s17756_s7 + $0x4d0] sm:$0xf]  ;;  %v8198_v18 = vor.u32 %v10952_v47, %v8195_v49  ;;  %v8258_v8 = vor.u32 %v10972_v54, %v8257_v12  ;;  %v11080_v39 = vld [vmem:[%s17756_s7 + $0x594] sm:$0xf] }
 0x33d   :  { %3063 = vmatpush.bf16.msrb.mxu0 %v8386_v16  ;;  %3039 = vmatpush.bf16.msra.mxu2 %v8830_v31  ;;  %v11060_v13 = vld [vmem:[%s17756_s7 + $0x4ec] sm:$0xf0]  ;;  %v10936_v31 = vld [vmem:[%s17756_s7 + $0x114] sm:$0xf] }
 0x33e   :  { %3073 = vmatpush.bf16.msrb.mxu1 %v8738_v44  ;;  %v8929_v62 = vld [vmem:[%s17756_s7 + $0x750] sm:$0xf]  ;;  %v8610_v16 = vor.u32 %v11060_v13, %v8609_v40  ;;  %v8134_v29 = vor.u32 %v10936_v31, %v8131_v5  ;;  %v8707_v54 = vld [vmem:[%s17756_s7 + $0x5b0] sm:$0xf0] }
 0x33f   :  { %3029 = vmatmul.bf16.vlgmr.msra.gmra.mxu1 %v13180_v58  ;;  %v11140_v53 = vld [vmem:[%s17756_s7 + $0x76c] sm:$0xf0]  ;;  %v10904_v63 = vld [vmem:[%s17756_s7 + $0x14] sm:$0xf] }
 0x340   :  { %3052 = vmatpush.bf16.msra.mxu3 %v8066_v9  ;;  %v8577_v32 = vld [vmem:[%s17756_s7 + $0x490] sm:$0xf]  ;;  %v8166_v9 = vor.u32 %v10944_v0, %v8163_v50  ;;  %v8930_v2 = vor.u32 %v11140_v53, %v8929_v62  ;;  %v11072_v53 = vld [vmem:[%s17756_s7 + $0x554] sm:$0xf] }
 0x341   :  { %3064 = vmatpush.bf16.msrb.mxu0 %v8354_v43  ;;  %3040 = vmatpush.bf16.msra.mxu2 %v8798_v10  ;;  %v11052_v44 = vld [vmem:[%s17756_s7 + $0x4ac] sm:$0xf0]  ;;  %v11008_v43 = vld [vmem:[%s17756_s7 + $0x354] sm:$0xf] }
 0x342   :  { %3074 = vmatpush.bf16.msrb.mxu1 %v8706_v17  ;;  %v8897_v1 = vld [vmem:[%s17756_s7 + $0x710] sm:$0xf]  ;;  %v8578_v42 = vor.u32 %v11052_v44, %v8577_v32  ;;  %v8422_v48 = vor.u32 %v11008_v43, %v8419_v3  ;;  %v8003_v27 = vld [vmem:[%s17756_s7 + $0x30] sm:$0xf0] }
 0x343   :  { %v11132_v6 = vld [vmem:[%s17756_s7 + $0x72c] sm:$0xf0]  ;;  %v11152_v32 = vld [vmem:[%s17756_s7 + $0x7d4] sm:$0xf] }
 0x344   :  { %3053 = vmatpush.bf16.msra.mxu3 %v8034_v21  ;;  %v8545_v38 = vld [vmem:[%s17756_s7 + $0x450] sm:$0xf]  ;;  %v8898_v20 = vor.u32 %v11132_v6, %v8897_v1  ;;  %v10928_v21 = vld [vmem:[%s17756_s7 + $0xd4] sm:$0xf] }
 0x345   :  { %3065 = vmatpush.bf16.msrb.mxu0 %v8322_v22  ;;  %3041 = vmatpush.bf16.msra.mxu2 %v8766_v51  ;;  %v11044_v17 = vld [vmem:[%s17756_s7 + $0x46c] sm:$0xf0]  ;;  %v8387_v22 = vld [vmem:[%s17756_s7 + $0x330] sm:$0xf0]  ;;  %v8102_v24 = vor.u32 %v10928_v21, %v8099_v28  ;;  %v8201_v21 = vld [vmem:[%s17756_s7 + $0x198] sm:$0xf] }
 0x346   :  { %3075 = vmatpush.bf16.msrb.mxu1 %v8674_v37  ;;  %v8865_v10 = vld [vmem:[%s17756_s7 + $0x6d0] sm:$0xf]  ;;  %v8546_v30 = vor.u32 %v11044_v17, %v8545_v38  ;;  %v8739_v37 = vld [vmem:[%s17756_s7 + $0x5f0] sm:$0xf0]  ;;  %v10957_v28 = vld [vmem:[%s17756_s7 + $0x1b4] sm:$0xf0] }
 0x347   :  { %v11124_v61 = vld [vmem:[%s17756_s7 + $0x6ec] sm:$0xf0]  ;;  %v8067_v51 = vld [vmem:[%s17756_s7 + $0xb0] sm:$0xf0]  ;;  %v8742_v47 = vor.u32 %v11088_v33, %v8739_v37  ;;  %v8169_v37 = vld [vmem:[%s17756_s7 + $0x158] sm:$0xf] }
 0x348   :  { %3054 = vmatpush.bf16.msra.mxu3 %v8002_v41  ;;  %3042 = vmatmul.bf16.vlgmr.msra.gmra.mxu2 %v13243_v4  ;;  %v8513_v15 = vld [vmem:[%s17756_s7 + $0x410] sm:$0xf]  ;;  %v8866_v36 = vor.u32 %v11124_v61, %v8865_v10  ;;  %v10920_v41 = vld [vmem:[%s17756_s7 + $0x94] sm:$0xf] }
 0x349   :  { %3086 = vmatpush.bf16.msrb.mxu2 %v8994_v55  ;;  %3066 = vmatpush.bf16.msrb.mxu0 %v8290_v46  ;;  %v11036_v25 = vld [vmem:[%s17756_s7 + $0x42c] sm:$0xf0]  ;;  %v8355_v46 = vld [vmem:[%s17756_s7 + $0x2f0] sm:$0xf0]  ;;  %v8070_v49 = vor.u32 %v10920_v41, %v8067_v51  ;;  %v10949_v41 = vld [vmem:[%s17756_s7 + $0x174] sm:$0xf0] }
 0x34a   :  { %3076 = vmatpush.bf16.msrb.mxu1 %v8642_v34  ;;  %v8833_v45 = vld [vmem:[%s17756_s7 + $0x690] sm:$0xf]  ;;  %v8514_v55 = vor.u32 %v11036_v25, %v8513_v15  ;;  %v10912_v34 = vld [vmem:[%s17756_s7 + $0x54] sm:$0xf]  ;;  %v8358_v13 = vor.u32 %v10992_v26, %v8355_v46  ;;  %v11021_v26 = vld [vmem:[%s17756_s7 + $0x3b4] sm:$0xf0] }
 0x34b   :  { %3055 = vmatmul.bf16.vlgmr.msra.gmra.mxu3 %v13032_v14  ;;  %v11116_v35 = vld [vmem:[%s17756_s7 + $0x6ac] sm:$0xf0]  ;;  %v8038_v62 = vor.u32 %v10912_v34, %v8035_v52  ;;  %v8995_v31 = vld [vmem:[%s17756_s7 + $0x7f0] sm:$0xf0] }
 0x34c   :  { %3099 = vmatpush.bf16.msrb.mxu3 %v8230_v11  ;;  %v8390_v11 = vor.u32 %v11000_v19, %v8387_v22  ;;  %v8834_v12 = vor.u32 %v11116_v35, %v8833_v45  ;;  %v8801_v57 = vld [vmem:[%s17756_s7 + $0x650] sm:$0xf]  ;;  %v10976_v5 = vld [vmem:[%s17756_s7 + $0x254] sm:$0xf]  ;;  %v8998_v17 = vor.u32 %v11152_v32, %v8995_v31  ;;  %v8489_v19 = vld [vmem:[%s17756_s7 + $0x3d8] sm:$0xf] }
 0x34d   :  { %3087 = vmatpush.bf16.msrb.mxu2 %v8962_v59  ;;  %3067 = vmatpush.bf16.msrb.mxu0 %v8258_v8  ;;  %v11108_v40 = vld [vmem:[%s17756_s7 + $0x66c] sm:$0xf0]  ;;  %v8323_v59 = vld [vmem:[%s17756_s7 + $0x2b0] sm:$0xf0]  ;;  %v8710_v8 = vor.u32 %v11080_v39, %v8707_v54  ;;  %v11029_v22 = vld [vmem:[%s17756_s7 + $0x3f4] sm:$0xf0] }
 0x34e   :  { %3077 = vmatpush.bf16.msrb.mxu1 %v8610_v16  ;;  %v8769_v0 = vld [vmem:[%s17756_s7 + $0x610] sm:$0xf]  ;;  %v8675_v16 = vld [vmem:[%s17756_s7 + $0x570] sm:$0xf0]  ;;  %v8490_v35 = vor.u32 %v11029_v22, %v8489_v19  ;;  %v10941_v54 = vld [vmem:[%s17756_s7 + $0x134] sm:$0xf0] }
 0x34f   :  { %v11100_v50 = vld [vmem:[%s17756_s7 + $0x62c] sm:$0xf0]  ;;  %v8291_v1 = vld [vmem:[%s17756_s7 + $0x270] sm:$0xf0]  ;;  %v8678_v6 = vor.u32 %v11072_v53, %v8675_v16  ;;  %v10933_v53 = vld [vmem:[%s17756_s7 + $0xf4] sm:$0xf0] }
 0x350   :  { %3100 = vmatpush.bf16.msrb.mxu3 %v8198_v18  ;;  %3068 = vmatmul.bf16.vlgmr.msrb.gmra.mxu0 %v13086_v56  ;;  %v10984_v18 = vld [vmem:[%s17756_s7 + $0x294] sm:$0xf]  ;;  %v8393_v32 = vld [vmem:[%s17756_s7 + $0x318] sm:$0xf] }
 0x351   :  { %3112 = vmatpush.bf16.msra.mxu0 %v8486_v60  ;;  %3088 = vmatpush.bf16.msrb.mxu2 %v8930_v2  ;;  %v8802_v60 = vor.u32 %v11108_v40, %v8801_v57  ;;  %v8326_v44 = vor.u32 %v10984_v18, %v8323_v59  ;;  %v10965_v2 = vld [vmem:[%s17756_s7 + $0x1f4] sm:$0xf0]  ;;  %v11064_v43 = vld [vmem:[%s17756_s7 + $0x514] sm:$0xf] }
 0x352   :  { %3078 = vmatpush.bf16.msrb.mxu1 %v8578_v42  ;;  %v8770_v42 = vor.u32 %v11100_v50, %v8769_v0  ;;  %v8643_v3 = vld [vmem:[%s17756_s7 + $0x530] sm:$0xf0]  ;;  %v11013_v18 = vld [vmem:[%s17756_s7 + $0x374] sm:$0xf0] }
 0x353   :  { %v8963_v10 = vld [vmem:[%s17756_s7 + $0x7b0] sm:$0xf0]  ;;  %v11085_v19 = vld [vmem:[%s17756_s7 + $0x5b4] sm:$0xf0] }
 0x354   :  { %3101 = vmatpush.bf16.msrb.mxu3 %v8166_v9  ;;  %v8233_v9 = vld [vmem:[%s17756_s7 + $0x1d8] sm:$0xf]  ;;  %v10968_v61 = vld [vmem:[%s17756_s7 + $0x214] sm:$0xf] }
 0x355   :  { %3113 = vmatpush.bf16.msra.mxu0 %v8454_v7  ;;  %3089 = vmatpush.bf16.msrb.mxu2 %v8898_v20  ;;  %v8006_v7 = vor.u32 %v10904_v63, %v8003_v27  ;;  %v8234_v38 = vor.u32 %v10965_v2, %v8233_v9  ;;  %v8294_v20 = vor.u32 %v10976_v5, %v8291_v1  ;;  %v11056_v15 = vld [vmem:[%s17756_s7 + $0x4d4] sm:$0xf]  ;;  %v8745_v5 = vld [vmem:[%s17756_s7 + $0x5d8] sm:$0xf] }
 0x356   :  { %3079 = vmatpush.bf16.msrb.mxu1 %v8546_v30  ;;  %v8646_v30 = vor.u32 %v11064_v43, %v8643_v3  ;;  %v8611_v25 = vld [vmem:[%s17756_s7 + $0x4f0] sm:$0xf0]  ;;  %v10925_v43 = vld [vmem:[%s17756_s7 + $0xb4] sm:$0xf0] }
 0x357   :  { %v11136_v51 = vld [vmem:[%s17756_s7 + $0x754] sm:$0xf]  ;;  %v8041_v22 = vld [vmem:[%s17756_s7 + $0x58] sm:$0xf] }
 0x358   :  { %3102 = vmatpush.bf16.msrb.mxu3 %v8134_v29  ;;  %v11144_v29 = vld [vmem:[%s17756_s7 + $0x794] sm:$0xf] }
 0x359   :  { %3114 = vmatpush.bf16.msra.mxu0 %v8422_v48  ;;  %3090 = vmatpush.bf16.msrb.mxu2 %v8866_v36  ;;  %v8259_v48 = vld [vmem:[%s17756_s7 + $0x230] sm:$0xf0]  ;;  %v8966_v33 = vor.u32 %v11144_v29, %v8963_v10 }
 0x35a   :  { %3080 = vmatpush.bf16.msrb.mxu1 %v8514_v55  ;;  %v8262_v36 = vor.u32 %v10968_v61, %v8259_v48  ;;  %v8931_v45 = vld [vmem:[%s17756_s7 + $0x770] sm:$0xf0]  ;;  %v8457_v55 = vld [vmem:[%s17756_s7 + $0x398] sm:$0xf] }
 0x35b   :  { %v11048_v46 = vld [vmem:[%s17756_s7 + $0x494] sm:$0xf]  ;;  %v8934_v39 = vor.u32 %v11136_v51, %v8931_v45  ;;  %v8458_v57 = vor.u32 %v11021_v26, %v8457_v55  ;;  %v8713_v48 = vld [vmem:[%s17756_s7 + $0x598] sm:$0xf] }
 0x35c   :  { %3103 = vmatpush.bf16.msrb.mxu3 %v8102_v24  ;;  %v8202_v24 = vor.u32 %v10957_v28, %v8201_v21  ;;  %v11128_v34 = vld [vmem:[%s17756_s7 + $0x714] sm:$0xf]  ;;  %v8361_v21 = vld [vmem:[%s17756_s7 + $0x2d8] sm:$0xf] }
 0x35d   :  { %3115 = vmatpush.bf16.msra.mxu0 %v8390_v11  ;;  %3091 = vmatpush.bf16.msrb.mxu2 %v8834_v12  ;;  %v8614_v11 = vor.u32 %v11056_v15, %v8611_v25  ;;  %v8137_v12 = vld [vmem:[%s17756_s7 + $0x118] sm:$0xf]  ;;  %v8899_v52 = vld [vmem:[%s17756_s7 + $0x730] sm:$0xf0] }
 0x35e   :  { %3125 = vmatpush.bf16.msra.mxu1 %v8742_v47  ;;  %v8579_v47 = vld [vmem:[%s17756_s7 + $0x4b0] sm:$0xf0]  ;;  %v8138_v0 = vor.u32 %v10941_v54, %v8137_v12  ;;  %v8902_v50 = vor.u32 %v11128_v34, %v8899_v52  ;;  %v10997_v28 = vld [vmem:[%s17756_s7 + $0x2f4] sm:$0xf0]  ;;  %v10961_v34 = vld [vmem:[%s17756_s7 + $0x1dc] sm:$0xf] }
 0x35f   :  { %3081 = vmatmul.bf16.vlgmr.msrb.gmra.mxu1 %v13180_v58  ;;  %v8582_v40 = vor.u32 %v11048_v46, %v8579_v47  ;;  %v11040_v59 = vld [vmem:[%s17756_s7 + $0x454] sm:$0xf]  ;;  %v10917_v15 = vld [vmem:[%s17756_s7 + $0x74] sm:$0xf0]  ;;  %v8235_v52 = vld [vmem:[%s17756_s7 + $0x1f8] sm:$0xf0] }
 0x360   :  { %3104 = vmatpush.bf16.msrb.mxu3 %v8070_v49  ;;  %v8170_v49 = vor.u32 %v10949_v41, %v8169_v37  ;;  %v8867_v16 = vld [vmem:[%s17756_s7 + $0x6f0] sm:$0xf0]  ;;  %v10989_v37 = vld [vmem:[%s17756_s7 + $0x2b4] sm:$0xf0]  ;;  %v8714_v41 = vor.u32 %v11085_v19, %v8713_v48  ;;  %v11017_v19 = vld [vmem:[%s17756_s7 + $0x39c] sm:$0xf] }
 0x361   :  { %3116 = vmatpush.bf16.msra.mxu0 %v8358_v13  ;;  %3092 = vmatpush.bf16.msrb.mxu2 %v8802_v60  ;;  %v8425_v13 = vld [vmem:[%s17756_s7 + $0x358] sm:$0xf]  ;;  %v11120_v60 = vld [vmem:[%s17756_s7 + $0x6d4] sm:$0xf] }
 0x362   :  { %3126 = vmatpush.bf16.msra.mxu1 %v8710_v8  ;;  %v8547_v8 = vld [vmem:[%s17756_s7 + $0x470] sm:$0xf0]  ;;  %v8426_v63 = vor.u32 %v11013_v18, %v8425_v13  ;;  %v8870_v1 = vor.u32 %v11120_v60, %v8867_v16  ;;  %v11077_v46 = vld [vmem:[%s17756_s7 + $0x574] sm:$0xf0] }
 0x363   :  { %v8550_v27 = vor.u32 %v11040_v59, %v8547_v8  ;;  %v11032_v9 = vld [vmem:[%s17756_s7 + $0x414] sm:$0xf]  ;;  %v8009_v47 = vld [vmem:[%s17756_s7 + $0x18] sm:$0xf] }
 0x364   :  { %3105 = vmatpush.bf16.msrb.mxu3 %v8038_v62  ;;  %v8105_v62 = vld [vmem:[%s17756_s7 + $0xd8] sm:$0xf]  ;;  %v8515_v2 = vld [vmem:[%s17756_s7 + $0x430] sm:$0xf0] }
 0x365   :  { %3117 = vmatpush.bf16.msra.mxu0 %v8326_v44  ;;  %3093 = vmatpush.bf16.msrb.mxu2 %v8770_v42  ;;  %v11005_v44 = vld [vmem:[%s17756_s7 + $0x334] sm:$0xf0]  ;;  %v8106_v31 = vor.u32 %v10933_v53, %v8105_v62  ;;  %v11112_v3 = vld [vmem:[%s17756_s7 + $0x694] sm:$0xf]  ;;  %v8238_v62 = vor.u32 %v10961_v34, %v8235_v52  ;;  %v10929_v34 = vld [vmem:[%s17756_s7 + $0xdc] sm:$0xf] }
 0x366   :  { %3127 = vmatpush.bf16.msra.mxu1 %v8678_v6  ;;  %v8073_v42 = vld [vmem:[%s17756_s7 + $0x98] sm:$0xf]  ;;  %v8394_v29 = vor.u32 %v11005_v44, %v8393_v32  ;;  %v11104_v25 = vld [vmem:[%s17756_s7 + $0x654] sm:$0xf]  ;;  %v8107_v52 = vld [vmem:[%s17756_s7 + $0xf8] sm:$0xf0] }
 0x367   :  { %v8074_v61 = vor.u32 %v10925_v43, %v8073_v42  ;;  %v11096_v51 = vld [vmem:[%s17756_s7 + $0x614] sm:$0xf]  ;;  %v10981_v13 = vld [vmem:[%s17756_s7 + $0x274] sm:$0xf0] }
 0x368   :  { %3106 = vmatpush.bf16.msrb.mxu3 %v8006_v7  ;;  %3094 = vmatmul.bf16.vlgmr.msrb.gmra.mxu2 %v13243_v4  ;;  %v11093_v7 = vld [vmem:[%s17756_s7 + $0x5f4] sm:$0xf0]  ;;  %v8771_v45 = vld [vmem:[%s17756_s7 + $0x630] sm:$0xf0] }
 0x369   :  { %3138 = vmatpush.bf16.msra.mxu2 %v8998_v17  ;;  %3118 = vmatpush.bf16.msra.mxu0 %v8294_v20  ;;  %v8518_v20 = vor.u32 %v11032_v9, %v8515_v2  ;;  %v8746_v10 = vor.u32 %v11093_v7, %v8745_v5  ;;  %v8774_v8 = vor.u32 %v11096_v51, %v8771_v45  ;;  %v8969_v60 = vld [vmem:[%s17756_s7 + $0x798] sm:$0xf]  ;;  %v11025_v5 = vld [vmem:[%s17756_s7 + $0x3dc] sm:$0xf] }
 0x36a   :  { %3128 = vmatpush.bf16.msra.mxu1 %v8646_v30  ;;  %v11149_v32 = vld [vmem:[%s17756_s7 + $0x7b4] sm:$0xf0] }
 0x36b   :  { %3107 = vmatmul.bf16.vlgmr.msrb.gmra.mxu3 %v13032_v14  ;;  %v8265_v44 = vld [vmem:[%s17756_s7 + $0x218] sm:$0xf] }
 0x36c   :  { %3151 = vmatpush.bf16.msra.mxu3 %v8234_v38  ;;  %v8835_v38 = vld [vmem:[%s17756_s7 + $0x6b0] sm:$0xf0]  ;;  %v10973_v9 = vld [vmem:[%s17756_s7 + $0x234] sm:$0xf0] }
 0x36d   :  { %3139 = vmatpush.bf16.msra.mxu2 %v8966_v33  ;;  %3119 = vmatpush.bf16.msra.mxu0 %v8262_v36  ;;  %v13951_v17 = vpop.f32.mrf.mxu0  ;;  %v8838_v30 = vor.u32 %v11112_v3, %v8835_v38  ;;  %v8362_v33 = vor.u32 %v10997_v28, %v8361_v21  ;;  %v8329_v36 = vld [vmem:[%s17756_s7 + $0x298] sm:$0xf]  ;;  %v8970_v38 = vor.u32 %v11149_v32, %v8969_v60  ;;  %v10945_v21 = vld [vmem:[%s17756_s7 + $0x15c] sm:$0xf] }
 0x36e   :  { %3129 = vmatpush.bf16.msra.mxu1 %v8614_v11  ;;  %v13934_v6 = vpop.f32.mrf.mxu3  ;;  %v8681_v11 = vld [vmem:[%s17756_s7 + $0x558] sm:$0xf]  ;;  %v8330_v54 = vor.u32 %v10989_v37, %v8329_v36  ;;  %v8171_v28 = vld [vmem:[%s17756_s7 + $0x178] sm:$0xf0] }
 0x36f   :  { %v8682_v18 = vor.u32 %v11077_v46, %v8681_v11  ;;  %v8617_v42 = vld [vmem:[%s17756_s7 + $0x4d8] sm:$0xf]  ;;  %v10937_v36 = vld [vmem:[%s17756_s7 + $0x11c] sm:$0xf] }
 0x370   :  { %3152 = vmatpush.bf16.msra.mxu3 %v8202_v24  ;;  %3120 = vmatmul.bf16.vlgmr.msra.gmra.mxu0 %v13086_v56  ;;  %v8803_v24 = vld [vmem:[%s17756_s7 + $0x670] sm:$0xf0]  ;;  %v11061_v43 = vld [vmem:[%s17756_s7 + $0x4f4] sm:$0xf0]  ;;  %v8139_v37 = vld [vmem:[%s17756_s7 + $0x138] sm:$0xf0] }
 0x371   :  { %3164 = vmatpush.bf16.msrb.mxu0 %v8490_v35  ;;  %3140 = vmatpush.bf16.msra.mxu2 %v8934_v39  ;;  %v8042_v35 = vor.u32 %v10917_v15, %v8041_v22  ;;  %v8806_v55 = vor.u32 %v11104_v25, %v8803_v24  ;;  %v9001_v39 = vld [vmem:[%s17756_s7 + $0x7d8] sm:$0xf]  ;;  %v8459_v22 = vld [vmem:[%s17756_s7 + $0x3b8] sm:$0xf0]  ;;  %v8174_v24 = vor.u32 %v10945_v21, %v8171_v28 }
 0x372   :  { %3130 = vmatpush.bf16.msra.mxu1 %v8582_v40  ;;  %v8297_v40 = vld [vmem:[%s17756_s7 + $0x258] sm:$0xf]  ;;  %v8462_v45 = vor.u32 %v11017_v19, %v8459_v22  ;;  %v11089_v60 = vld [vmem:[%s17756_s7 + $0x5dc] sm:$0xf] }
 0x373   :  { %v8298_v16 = vor.u32 %v10981_v13, %v8297_v40  ;;  %v8585_v15 = vld [vmem:[%s17756_s7 + $0x498] sm:$0xf] }
 0x374   :  { %3153 = vmatpush.bf16.msra.mxu3 %v8170_v49  ;;  %v10909_v49 = vld [vmem:[%s17756_s7 + $0x34] sm:$0xf0] }
 0x375   :  { %3165 = vmatpush.bf16.msrb.mxu0 %v8458_v57  ;;  %3141 = vmatpush.bf16.msra.mxu2 %v8902_v50  ;;  %v2863_v12 = vpop.f32.mrf.mxu0  ;;  %v11157_v57 = vld [vmem:[%s17756_s7 + $0x7f4] sm:$0xf0]  ;;  %v8010_v59 = vor.u32 %v10909_v49, %v8009_v47 }
 0x376   :  { %3131 = vmatpush.bf16.msra.mxu1 %v8550_v27  ;;  %v2850_v26 = vpop.f32.mrf.mxu3  ;;  %v11069_v50 = vld [vmem:[%s17756_s7 + $0x534] sm:$0xf0]  ;;  %v9002_v53 = vor.u32 %v11157_v57, %v9001_v39  ;;  %v8203_v27 = vld [vmem:[%s17756_s7 + $0x1b8] sm:$0xf0]  ;;  %v8142_v39 = vor.u32 %v10937_v36, %v8139_v37 }
 0x377   :  { %v11053_v25 = vld [vmem:[%s17756_s7 + $0x4b4] sm:$0xf0]  ;;  %v8427_v26 = vld [vmem:[%s17756_s7 + $0x378] sm:$0xf0] }
 0x378   :  { %3154 = vmatpush.bf16.msra.mxu3 %v8138_v0  ;;  %v8649_v0 = vld [vmem:[%s17756_s7 + $0x518] sm:$0xf]  ;;  %v8586_v11 = vor.u32 %v11053_v25, %v8585_v15 }
 0x379   :  { %3166 = vmatpush.bf16.msrb.mxu0 %v8426_v63  ;;  %3142 = vmatpush.bf16.msra.mxu2 %v8870_v1  ;;  %v10953_v63 = vld [vmem:[%s17756_s7 + $0x19c] sm:$0xf]  ;;  %v14044_v2 = vpop.f32.mrf.mxu1  ;;  %v11133_v51 = vld [vmem:[%s17756_s7 + $0x734] sm:$0xf0] }
 0x37a   :  { %3132 = vmatpush.bf16.msra.mxu1 %v8518_v20  ;;  %v8491_v1 = vld [vmem:[%s17756_s7 + $0x3f8] sm:$0xf0]  ;;  %v8206_v3 = vor.u32 %v10953_v63, %v8203_v27  ;;  %v8266_v20 = vor.u32 %v10973_v9, %v8265_v44  ;;  %v8553_v47 = vld [vmem:[%s17756_s7 + $0x458] sm:$0xf] }
 0x37b   :  { %v8494_v48 = vor.u32 %v11025_v5, %v8491_v1  ;;  %v11045_v49 = vld [vmem:[%s17756_s7 + $0x474] sm:$0xf0]  ;;  %v8075_v63 = vld [vmem:[%s17756_s7 + $0xb8] sm:$0xf0] }
 0x37c   :  { %3155 = vmatpush.bf16.msra.mxu3 %v8106_v31  ;;  %v8650_v31 = vor.u32 %v11069_v50, %v8649_v0  ;;  %v8873_v57 = vld [vmem:[%s17756_s7 + $0x6d8] sm:$0xf]  ;;  %v2862_v0 = vadd.f32 %v13951_v17, %v13934_v6  ;;  %v8747_v6 = vld [vmem:[%s17756_s7 + $0x5f8] sm:$0xf0] }
 0x37d   :  { %3167 = vmatpush.bf16.msrb.mxu0 %v8394_v29  ;;  %3143 = vmatpush.bf16.msra.mxu2 %v8838_v30  ;;  %v14060_v29 = vpop.f32.mrf.mxu0  ;;  %v8618_v30 = vor.u32 %v11061_v43, %v8617_v42  ;;  %v11125_v40 = vld [vmem:[%s17756_s7 + $0x6f4] sm:$0xf0]  ;;  %v10921_v17 = vld [vmem:[%s17756_s7 + $0x9c] sm:$0xf] }
 0x37e   :  { %3177 = vmatpush.bf16.msrb.mxu1 %v8746_v10  ;;  %v14052_v7 = vpop.f32.mrf.mxu3  ;;  %v8937_v10 = vld [vmem:[%s17756_s7 + $0x758] sm:$0xf]  ;;  %v2875_v27 = vadd.f32 %v14044_v2, %v2862_v0  ;;  %v10993_v42 = vld [vmem:[%s17756_s7 + $0x2dc] sm:$0xf] }
 0x37f   :  { %3133 = vmatmul.bf16.vlgmr.msra.gmra.mxu1 %v13180_v58  ;;  %v8521_v50 = vld [vmem:[%s17756_s7 + $0x418] sm:$0xf]  ;;  %v8363_v2 = vld [vmem:[%s17756_s7 + $0x2f8] sm:$0xf0] }
 0x380   :  { %3156 = vmatpush.bf16.msra.mxu3 %v8074_v61  ;;  %v11141_v61 = vld [vmem:[%s17756_s7 + $0x774] sm:$0xf0]  ;;  %v8366_v25 = vor.u32 %v10993_v42, %v8363_v2  ;;  %v8619_v42 = vld [vmem:[%s17756_s7 + $0x4f8] sm:$0xf0] }
 0x381   :  { %3168 = vmatpush.bf16.msrb.mxu0 %v8362_v33  ;;  %3144 = vmatpush.bf16.msra.mxu2 %v8806_v55  ;;  %v8938_v33 = vor.u32 %v11141_v61, %v8937_v10  ;;  %v11009_v55 = vld [vmem:[%s17756_s7 + $0x35c] sm:$0xf]  ;;  %v8841_v32 = vld [vmem:[%s17756_s7 + $0x698] sm:$0xf] }
 0x382   :  { %3178 = vmatpush.bf16.msrb.mxu1 %v8714_v41  ;;  %v8905_v41 = vld [vmem:[%s17756_s7 + $0x718] sm:$0xf]  ;;  %v8430_v13 = vor.u32 %v11009_v55, %v8427_v26  ;;  %v8715_v61 = vld [vmem:[%s17756_s7 + $0x5b8] sm:$0xf0] }
 0x383   :  { %v8906_v12 = vor.u32 %v11133_v51, %v8905_v41  ;;  %v11117_v44 = vld [vmem:[%s17756_s7 + $0x6b4] sm:$0xf0]  ;;  %v10905_v55 = vld [vmem:[%s17756_s7 + $0x1c] sm:$0xf] }
 0x384   :  { %3157 = vmatpush.bf16.msra.mxu3 %v8042_v35  ;;  %v2876_v35 = vpop.f32.mrf.mxu1  ;;  %v8842_v21 = vor.u32 %v11117_v44, %v8841_v32  ;;  %v8809_v22 = vld [vmem:[%s17756_s7 + $0x658] sm:$0xf]  ;;  %v8011_v26 = vld [vmem:[%s17756_s7 + $0x38] sm:$0xf0]  ;;  %v2914_v32 = vadd.f32 %v14060_v29, %v14052_v7 }
 0x385   :  { %3169 = vmatpush.bf16.msrb.mxu0 %v8330_v54  ;;  %3145 = vmatpush.bf16.msra.mxu2 %v8774_v8  ;;  %v2915_v54 = vpop.f32.mrf.mxu0  ;;  %v8395_v8 = vld [vmem:[%s17756_s7 + $0x338] sm:$0xf0]  ;;  %v11109_v15 = vld [vmem:[%s17756_s7 + $0x674] sm:$0xf0] }
 0x386   :  { %3179 = vmatpush.bf16.msrb.mxu1 %v8682_v18  ;;  %v2902_v46 = vpop.f32.mrf.mxu3  ;;  %v8554_v18 = vor.u32 %v11045_v49, %v8553_v47  ;;  %v8777_v41 = vld [vmem:[%s17756_s7 + $0x618] sm:$0xf]  ;;  %v8810_v35 = vor.u32 %v11109_v15, %v8809_v22  ;;  %v11153_v49 = vld [vmem:[%s17756_s7 + $0x7dc] sm:$0xf] }
 0x387   :  { %v11101_v47 = vld [vmem:[%s17756_s7 + $0x634] sm:$0xf0]  ;;  %v11129_v15 = vld [vmem:[%s17756_s7 + $0x71c] sm:$0xf] }
 0x388   :  { %3158 = vmatpush.bf16.msra.mxu3 %v8010_v59  ;;  %3146 = vmatmul.bf16.vlgmr.msra.gmra.mxu2 %v13243_v4  ;;  %v11001_v59 = vld [vmem:[%s17756_s7 + $0x31c] sm:$0xf] }
 0x389   :  { %3190 = vmatpush.bf16.msrb.mxu2 %v9002_v53  ;;  %3170 = vmatpush.bf16.msrb.mxu0 %v8298_v16  ;;  %v8110_v53 = vor.u32 %v10929_v34, %v8107_v52  ;;  %v8874_v16 = vor.u32 %v11125_v40, %v8873_v57  ;;  %v8398_v9 = vor.u32 %v11001_v59, %v8395_v8  ;;  %v9003_v34 = vld [vmem:[%s17756_s7 + $0x7f8] sm:$0xf0] }
 0x38a   :  { %3180 = vmatpush.bf16.msrb.mxu1 %v8650_v31  ;;  %v2887_v31 = vpop.f32.mrf.mxu2  ;;  %v10977_v52 = vld [vmem:[%s17756_s7 + $0x25c] sm:$0xf]  ;;  %v8778_v59 = vor.u32 %v11101_v47, %v8777_v41 }
 0x38b   :  { %3159 = vmatmul.bf16.vlgmr.msra.gmra.mxu3 %v13032_v14  ;;  %v14166_v43 = vadd.f32 %v2887_v31, %v2875_v27  ;;  %v8299_v57 = vld [vmem:[%s17756_s7 + $0x278] sm:$0xf0] }
 0x38c   :  { %3203 = vmatpush.bf16.msrb.mxu3 %v8238_v62  ;;  %v11037_v62 = vld [vmem:[%s17756_s7 + $0x434] sm:$0xf0]  ;;  %v14158_v5 = vpop.f32.mrf.mxu1  ;;  %v8267_v27 = vld [vmem:[%s17756_s7 + $0x238] sm:$0xf0] }
 0x38d   :  { %3191 = vmatpush.bf16.msrb.mxu2 %v8970_v38  ;;  %3171 = vmatpush.bf16.msrb.mxu0 %v8266_v20  ;;  %v8522_v1 = vor.u32 %v11037_v62, %v8521_v50  ;;  %v8078_v38 = vor.u32 %v10921_v17, %v8075_v63  ;;  %v11081_v20 = vld [vmem:[%s17756_s7 + $0x59c] sm:$0xf]  ;;  %v14173_v10 = vpop.f32.mrf.mxu0  ;;  %v3257_v19 = vrot.slane %v14166_v43, 4  ;;  %v8302_v17 = vor.u32 %v10977_v52, %v8299_v57 }
 0x38e   :  { %3181 = vmatpush.bf16.msrb.mxu1 %v8618_v30  ;;  %v14171_v28 = vpop.f32.mrf.mxu3  ;;  %v8043_v30 = vld [vmem:[%s17756_s7 + $0x78] sm:$0xf0]  ;;  %v8718_v37 = vor.u32 %v11081_v20, %v8715_v61 }
 0x38f   :  { %v3258_v36 = vadd.f32 %v3257_v19, %v14166_v43  ;;  %v11065_v50 = vld [vmem:[%s17756_s7 + $0x51c] sm:$0xf] }
 0x390   :  { %3204 = vmatpush.bf16.msrb.mxu3 %v8206_v3  ;;  %3172 = vmatmul.bf16.vlgmr.msrb.gmra.mxu0 %v13086_v56  ;;  %v8750_v3 = vor.u32 %v11089_v60, %v8747_v6  ;;  %v8651_v62 = vld [vmem:[%s17756_s7 + $0x538] sm:$0xf0]  ;;  %v9006_v60 = vor.u32 %v11153_v49, %v9003_v34 }
 0x391   :  { %3216 = vmatpush.bf16.msra.mxu0 %v8494_v48  ;;  %3192 = vmatpush.bf16.msrb.mxu2 %v8938_v33  ;;  %v10913_v48 = vld [vmem:[%s17756_s7 + $0x5c] sm:$0xf]  ;;  %v3259_v46 = vrot.slane %v3258_v36, 2 }
 0x392   :  { %3182 = vmatpush.bf16.msrb.mxu1 %v8586_v11  ;;  %v8331_v33 = vld [vmem:[%s17756_s7 + $0x2b8] sm:$0xf0]  ;;  %v8046_v51 = vor.u32 %v10913_v48, %v8043_v30 }
 0x393   :  { %v8683_v11 = vld [vmem:[%s17756_s7 + $0x578] sm:$0xf0]  ;;  %v3260_v40 = vadd.f32 %v3259_v46, %v3258_v36 }
 0x394   :  { %3205 = vmatpush.bf16.msrb.mxu3 %v8174_v24  ;;  %v10985_v24 = vld [vmem:[%s17756_s7 + $0x29c] sm:$0xf]  ;;  %v2928_v54 = vpop.f32.mrf.mxu1 }
 0x395   :  { %3217 = vmatpush.bf16.msra.mxu0 %v8462_v45  ;;  %3193 = vmatpush.bf16.msrb.mxu2 %v8906_v12  ;;  %v11073_v45 = vld [vmem:[%s17756_s7 + $0x55c] sm:$0xf]  ;;  %v2889_v12 = vpop.f32.mrf.mxu2  ;;  %v2967_v0 = vpop.f32.mrf.mxu0 }
 0x396   :  { %3183 = vmatpush.bf16.msrb.mxu1 %v8554_v18  ;;  %v8014_v18 = vor.u32 %v10905_v55, %v8011_v26  ;;  %v2954_v8 = vpop.f32.mrf.mxu3  ;;  %v8971_v6 = vld [vmem:[%s17756_s7 + $0x7b8] sm:$0xf0] }
 0x397   :  { %v10969_v63 = vld [vmem:[%s17756_s7 + $0x21c] sm:$0xf] }
 0x398   :  { %3206 = vmatpush.bf16.msrb.mxu3 %v8142_v39  ;;  %v8334_v39 = vor.u32 %v10985_v24, %v8331_v33  ;;  %v8270_v7 = vor.u32 %v10969_v63, %v8267_v27  ;;  %v11137_v20 = vld [vmem:[%s17756_s7 + $0x75c] sm:$0xf] }
 0x399   :  { %3218 = vmatpush.bf16.msra.mxu0 %v8430_v13  ;;  %3194 = vmatpush.bf16.msrb.mxu2 %v8874_v16  ;;  %v8686_v13 = vor.u32 %v11073_v45, %v8683_v11  ;;  %v11145_v16 = vld [vmem:[%s17756_s7 + $0x79c] sm:$0xf] }
 0x39a   :  { %3184 = vmatpush.bf16.msrb.mxu1 %v8522_v1  ;;  %v8974_v31 = vor.u32 %v11145_v16, %v8971_v6  ;;  %v11057_v1 = vld [vmem:[%s17756_s7 + $0x4dc] sm:$0xf] }
 0x39b   :  { %v11049_v30 = vld [vmem:[%s17756_s7 + $0x49c] sm:$0xf] }
 0x39c   :  { %3207 = vmatpush.bf16.msrb.mxu3 %v8110_v53  ;;  %v3261_v53 = vrot.slane %v3260_v40, 1  ;;  %v8587_v19 = vld [vmem:[%s17756_s7 + $0x4b8] sm:$0xf0] }
 0x39d   :  { %3219 = vmatpush.bf16.msra.mxu0 %v8398_v9  ;;  %3195 = vmatpush.bf16.msrb.mxu2 %v8842_v21  ;;  %v8654_v9 = vor.u32 %v11065_v50, %v8651_v62  ;;  %v2939_v29 = vpop.f32.mrf.mxu2  ;;  %v8939_v21 = vld [vmem:[%s17756_s7 + $0x778] sm:$0xf0]  ;;  %v8590_v36 = vor.u32 %v11049_v30, %v8587_v19  ;;  %v14335_v30 = vld [vmem:[%s17757_s8] sm:$0xff] }
 0x39e   :  { %3229 = vmatpush.bf16.msra.mxu1 %v8750_v3  ;;  %v3262_v44 = vadd.f32 %v3261_v53, %v3260_v40  ;;  %v2927_v3 = vadd.f32 %v14158_v5, %v2914_v32  ;;  %v8622_v5 = vor.u32 %v11057_v1, %v8619_v42  ;;  %v8555_v41 = vld [vmem:[%s17756_s7 + $0x478] sm:$0xf0] }
 0x39f   :  { %3185 = vmatmul.bf16.vlgmr.msrb.gmra.mxu1 %v13180_v58  ;;  %v11121_v26 = vld [vmem:[%s17756_s7 + $0x6dc] sm:$0xf] }
 0x3a0   :  { %3208 = vmatpush.bf16.msrb.mxu3 %v8078_v38  ;;  %v3305_v2 = vmul.f32 %v3262_v44, %v11816_v23  ;;  %v2978_v38 = vpop.f32.mrf.mxu1  ;;  %v2940_v48 = vadd.f32 %v2939_v29, %v2927_v3  ;;  %v8523_v12 = vld [vmem:[%s17756_s7 + $0x438] sm:$0xf0] }
 0x3a1   :  { %3220 = vmatpush.bf16.msra.mxu0 %v8366_v25  ;;  %3196 = vmatpush.bf16.msrb.mxu2 %v8810_v35  ;;  %v8907_v25 = vld [vmem:[%s17756_s7 + $0x738] sm:$0xf0] }
 0x3a2   :  { %3230 = vmatpush.bf16.msra.mxu1 %v8718_v37  ;;  %v14265_v61 = vsub.f32 %v14166_v43, %v3305_v2  ;;  %v8942_v43 = vor.u32 %v11137_v20, %v8939_v21  ;;  %v11041_v37 = vld [vmem:[%s17756_s7 + $0x45c] sm:$0xf]  ;;  %v8910_v35 = vor.u32 %v11129_v15, %v8907_v25  ;;  %v3387_v15 = vperm.slane %v14335_v30, 0 }
 0x3a3   :  { %v8558_v49 = vor.u32 %v11041_v37, %v8555_v41  ;;  %v11113_v57 = vld [vmem:[%s17756_s7 + $0x69c] sm:$0xf] }
 0x3a4   :  { %3209 = vmatpush.bf16.msrb.mxu3 %v8046_v51  ;;  %v3321_v22 = vmul.f32 %v14265_v61, %v14265_v61  ;;  %v8843_v40 = vld [vmem:[%s17756_s7 + $0x6b8] sm:$0xf0] }
 0x3a5   :  { %3221 = vmatpush.bf16.msra.mxu0 %v8334_v39  ;;  %3197 = vmatpush.bf16.msrb.mxu2 %v8778_v59  ;;  %v2941_v11 = vpop.f32.mrf.mxu2  ;;  %v11033_v39 = vld [vmem:[%s17756_s7 + $0x41c] sm:$0xf]  ;;  %v8846_v53 = vor.u32 %v11113_v57, %v8843_v40  ;;  %v9185_v57 = vld [vmem:[%s17758_s9 + $0x150] sm:$0xf]  ;;  %v11203_v40 = vld [vmem:[%s17758_s9 + $0x168] sm:$0xf0] }
 0x3a6   :  { %3231 = vmatpush.bf16.msra.mxu1 %v8686_v13  ;;  %v3329_v24 = vrot.slane %v3321_v22, 4  ;;  %v8526_v8 = vor.u32 %v11033_v39, %v8523_v12  ;;  %v11097_v1 = vld [vmem:[%s17756_s7 + $0x61c] sm:$0xf] }
 0x3a7   :  { %v8779_v42 = vld [vmem:[%s17756_s7 + $0x638] sm:$0xf0] }
 0x3a8   :  { %3210 = vmatpush.bf16.msrb.mxu3 %v8014_v18  ;;  %3198 = vmatmul.bf16.vlgmr.msrb.gmra.mxu2 %v13243_v4  ;;  %v3330_v51 = vadd.f32 %v3329_v24, %v3321_v22  ;;  %v2980_v55 = vpop.f32.mrf.mxu1  ;;  %v2966_v18 = vadd.f32 %v14173_v10, %v14171_v28  ;;  %v8811_v28 = vld [vmem:[%s17756_s7 + $0x678] sm:$0xf0] }
 0x3a9   :  { %3242 = vmatpush.bf16.msra.mxu2 %v9006_v60  ;;  %3222 = vmatpush.bf16.msra.mxu0 %v8302_v17  ;;  %v11105_v17 = vld [vmem:[%s17756_s7 + $0x65c] sm:$0xf] }
 0x3aa   :  { %3232 = vmatpush.bf16.msra.mxu1 %v8654_v9  ;;  %v3331_v46 = vrot.slane %v3330_v51, 2  ;;  %v2979_v62 = vadd.f32 %v2978_v38, %v2966_v18  ;;  %v8782_v38 = vor.u32 %v11097_v1, %v8779_v42  ;;  %v9186_v18 = vor.u32 %v11203_v40, %v9185_v57 }
 0x3ab   :  { %3211 = vmatmul.bf16.vlgmr.msrb.gmra.mxu3 %v13032_v14  ;;  %v3263_v14 = vrot.slane %v2940_v48, 4 }
 0x3ac   :  { %v3332_v54 = vadd.f32 %v3331_v46, %v3330_v51 }
 0x3ad   :  { %3243 = vmatpush.bf16.msra.mxu2 %v8974_v31  ;;  %3223 = vmatpush.bf16.msra.mxu0 %v8270_v7  ;;  %v3264_v33 = vadd.f32 %v3263_v14, %v2940_v48  ;;  %v14312_v16 = vpop.f32.mrf.mxu0  ;;  %v2991_v6 = vpop.f32.mrf.mxu2  ;;  %v8814_v31 = vor.u32 %v11105_v17, %v8811_v28 }
 0x3ae   :  { %3233 = vmatpush.bf16.msra.mxu1 %v8622_v5  ;;  %v3333_v13 = vrot.slane %v3332_v54, 1  ;;  %v14310_v60 = vpop.f32.mrf.mxu3  ;;  %v2992_v27 = vadd.f32 %v2991_v6, %v2979_v62  ;;  %v3388_v6 = vperm.slane %v14335_v30, 2 }
 0x3af   :  { %v3265_v45 = vrot.slane %v3264_v33, 2 }
 0x3b0   :  { %3224 = vmatmul.bf16.vlgmr.msra.gmra.mxu0 %v13086_v56  ;;  %v8875_v56 = vld [vmem:[%s17756_s7 + $0x6f8] sm:$0xf0]  ;;  %v3334_v0 = vadd.f32 %v3333_v13, %v3332_v54  ;;  %v3269_v9 = vrot.slane %v2992_v27, 4 }
 0x3b1   :  { %3244 = vmatpush.bf16.msra.mxu2 %v8942_v43  ;;  %v3266_v47 = vadd.f32 %v3265_v45, %v3264_v33  ;;  %v8878_v52 = vor.u32 %v11121_v26, %v8875_v56  ;;  %v3403_v45 = vperm.slane %v3387_v15, 0  ;;  %v9213_v26 = vld [vmem:[%s17758_s9 + $0x188] sm:$0xf]  ;;  %v11210_v56 = vld [vmem:[%s17758_s9 + $0x1a0] sm:$0xf0] }
 0x3b2   :  { %3234 = vmatpush.bf16.msra.mxu1 %v8590_v36  ;;  %v3377_v10 = vmul.f32 %v3334_v0, %v11816_v23  ;;  %v3270_v3 = vadd.f32 %v3269_v9, %v2992_v27  ;;  %v9214_v46 = vor.u32 %v11210_v56, %v9213_v26 }
 0x3b3   :  { %v3267_v34 = vrot.slane %v3266_v47, 1  ;;  %v3411_v12 = vmul.f32 %v3403_v45, %v14265_v61 }
 0x3b4   :  { %v3419_v32 = vadd.f32 1e-05, %v3377_v10  ;;  %v3271_v29 = vrot.slane %v3270_v3, 2  ;;  %6739 = vmatpush.bf16.msra.mxu3 %v9214_v46  ;;  %v9437_v46 = vld [vmem:[%s17758_s9 + $0x348] sm:$0xf] }
 0x3b5   :  { %3245 = vmatpush.bf16.msra.mxu2 %v8910_v35  ;;  %v3268_v59 = vadd.f32 %v3267_v34, %v3266_v47  ;;  %v3019_v21 = vpop.f32.mrf.mxu0  ;;  %v3515_v35 = vperm.slane %v14335_v30, 1 }
 0x3b6   :  { %3235 = vmatpush.bf16.msra.mxu1 %v8558_v49  ;;  %11638 = vrsqrt.f32 %v3419_v32  ;;  %v3006_v20 = vpop.f32.mrf.mxu3  ;;  %vm3433_vm3 = vweird.f32 %v3419_v32 }
 0x3b7   :  { %v3306_v50 = vmul.f32 %v3268_v59, %v11816_v23  ;;  %v3531_v54 = vperm.slane %v3515_v35, 1  ;;  %v9101_v35 = vld [vmem:[%s17758_s9 + $0xa8] sm:$0xf] }
 0x3b8   :  { %6740 = vmatpush.bf16.msra.mxu3 %v9186_v18  ;;  %v11175_v18 = vld [vmem:[%s17758_s9 + $0x88] sm:$0xf0] }
 0x3b9   :  { %3246 = vmatpush.bf16.msra.mxu2 %v8878_v52  ;;  %v14321_v63 = vsub.f32 %v2940_v48, %v3306_v50  ;;  %v2993_v48 = vpop.f32.mrf.mxu2  ;;  %v3018_v50 = vadd.f32 %v14312_v16, %v14310_v60  ;;  %v11196_v60 = vld [vmem:[%s17758_s9 + $0x130] sm:$0xf0] }
 0x3ba   :  { %3236 = vmatpush.bf16.msra.mxu1 %v8526_v8  ;;  %v9129_v48 = vld [vmem:[%s17758_s9 + $0xe0] sm:$0xf] }
 0x3bb   :  { %v3322_v44 = vmul.f32 %v14321_v63, %v14321_v63 }
 0x3bc   :  { %v11639_v19 = vpop.eup %11638  ;;  %v3030_v33 = vpop.f32.mrf.mxu1 }
 0x3bd   :  { %3247 = vmatpush.bf16.msra.mxu2 %v8846_v53  ;;  %3237 = vmatmul.bf16.vlgmr.msra.gmra.mxu1 %v13180_v58  ;;  %v3335_v2 = vrot.slane %v3322_v44, 4  ;;  %v3272_v58 = vadd.f32 %v3271_v29, %v3270_v3  ;;  %v3428_v43 = vmul.f32 %v11639_v19, %v3419_v32  ;;  %vm3434_vm2 = vweird.f32 %v11639_v19 }
 0x3be   :  { %vm3435_vm4 = vmor %vm3433_vm3, %vm3434_vm2  ;;  %v3031_v10 = vadd.f32 %v3030_v33, %v3018_v50  ;;  %v3516_v29 = vperm.slane %v14335_v30, 3 }
 0x3bf   :  { %v3336_v7 = vadd.f32 %v3335_v2, %v3322_v44  ;;  %v3273_v14 = vrot.slane %v3272_v58, 1  ;;  %v3429_v36 = vmul.f32 %v11639_v19, %v3428_v43  ;;  %v9157_v44 = vld [vmem:[%s17758_s9 + $0x118] sm:$0xf] }
 0x3c0   :  { %v9158_v1 = vor.u32 %v11196_v60, %v9157_v44 }
 0x3c1   :  { %3248 = vmatpush.bf16.msra.mxu2 %v8814_v31  ;;  %v3337_v5 = vrot.slane %v3336_v7, 2  ;;  %v3274_v24 = vadd.f32 %v3273_v14, %v3272_v58  ;;  %v3430_v51 = vmul.f32 0.5, %v3429_v36 }
 0x3c2   :  { %6741 = vmatpush.bf16.msra.mxu3 %v9158_v1 }
 0x3c3   :  { %v3338_v22 = vadd.f32 %v3337_v5, %v3336_v7  ;;  %v3307_v41 = vmul.f32 %v3274_v24, %v11816_v23  ;;  %v3404_v7 = vperm.slane %v3388_v6, 0  ;;  %v11189_v5 = vld [vmem:[%s17758_s9 + $0xf8] sm:$0xf0]  ;;  %v11259_v6 = vld [vmem:[%s17758_s9 + $0x328] sm:$0xf0] }
 0x3c4   :  { %v3032_v52 = vpop.f32.mrf.mxu1  ;;  %v9130_v14 = vor.u32 %v11189_v5, %v9129_v48  ;;  %v9381_v48 = vld [vmem:[%s17758_s9 + $0x2d8] sm:$0xf]  ;;  %v11252_v5 = vld [vmem:[%s17758_s9 + $0x2f0] sm:$0xf0] }
 0x3c5   :  { %3249 = vmatpush.bf16.msra.mxu2 %v8782_v38  ;;  %v3339_v25 = vrot.slane %v3338_v22, 1  ;;  %v14342_v55 = vsub.f32 %v2992_v27, %v3307_v41  ;;  %v3412_v36 = vmul.f32 %v3404_v7, %v14321_v63  ;;  %v3532_v63 = vperm.slane %v3516_v29, 1  ;;  %v9045_v7 = vld [vmem:[%s17758_s9 + $0x38] sm:$0xf]  ;;  %v11168_v29 = vld [vmem:[%s17758_s9 + $0x50] sm:$0xf0] }
 0x3c6   :  { %6742 = vmatpush.bf16.msra.mxu3 %v9130_v14  ;;  %v9382_v14 = vor.u32 %v11252_v5, %v9381_v48  ;;  %v3390_v48 = vperm.slane %v14335_v30, 6 }
 0x3c7   :  { %v3340_v37 = vadd.f32 %v3339_v25, %v3338_v22  ;;  %v3323_v49 = vmul.f32 %v14342_v55, %v14342_v55 }
 0x3c8   :  { %3250 = vmatmul.bf16.vlgmr.msra.gmra.mxu2 %v13243_v4  ;;  %v3431_v4 = vsub.f32 1.5, %v3430_v51 }
 0x3c9   :  { %v3378_v11 = vmul.f32 %v3340_v37, %v11816_v23  ;;  %v3341_v34 = vrot.slane %v3323_v49, 4 }
 0x3ca   :  { %v3432_v39 = vmul.f32 %v11639_v19, %v3431_v4 }
 0x3cb   :  { %v14350_v47 = vadd.f32 1e-05, %v3378_v11  ;;  %v3342_v8 = vadd.f32 %v3341_v34, %v3323_v49  ;;  %v3043_v31 = vpop.f32.mrf.mxu2  ;;  %v11182_v11 = vld [vmem:[%s17758_s9 + $0xc0] sm:$0xf0] }
 0x3cc   :  { %v3436_v13 = vsel %vm3435_vm4, %v11639_v19, %v3432_v39  ;;  %v14383_v2 = vadd.f32 %v3043_v31, %v3031_v10 }
 0x3cd   :  { %11640 = vrsqrt.f32 %v14350_v47  ;;  %v3507_v59 = vmul.f32 %v3436_v13, %v3411_v12  ;;  %v3343_v0 = vrot.slane %v3342_v8, 2  ;;  %v14373_v32 = vpop.f32.mrf.mxu0  ;;  %vm3443_vm6 = vweird.f32 %v14350_v47  ;;  %v9073_v13 = vld [vmem:[%s17758_s9 + $0x70] sm:$0xf] }
 0x3ce   :  { %v14371_v27 = vpop.f32.mrf.mxu3  ;;  %v3275_v21 = vrot.slane %v14383_v2, 4  ;;  %v9102_v12 = vor.u32 %v11182_v11, %v9101_v35  ;;  %v9074_v50 = vor.u32 %v11175_v18, %v9073_v13  ;;  %v9353_v11 = vld [vmem:[%s17758_s9 + $0x2a0] sm:$0xf] }
 0x3cf   :  { %v14362_v61 = vadd.f32 %v3531_v54, %v3507_v59  ;;  %v3344_v17 = vadd.f32 %v3343_v0, %v3342_v8 }
 0x3d0   :  { %v3276_v15 = vadd.f32 %v3275_v21, %v14383_v2  ;;  %6743 = vmatpush.bf16.msra.mxu3 %v9102_v12  ;;  %v9046_v21 = vor.u32 %v11168_v29, %v9045_v7 }
 0x3d1   :  { %v14367_v53 = vmul.f32 0.70710677, %v14362_v61  ;;  %v3345_v9 = vrot.slane %v3344_v17, 1 }
 0x3d2   :  { %v3277_v41 = vrot.slane %v3276_v15, 2 }
 0x3d3   :  { %v11641_v62 = vpop.eup %11640  ;;  %v3563_v16 = vmul.f32 %v14367_v53, %v14367_v53  ;;  %v3346_v38 = vadd.f32 %v3345_v9, %v3344_v17  ;;  %v3045_v4 = vpop.f32.mrf.mxu2  ;;  %v3389_v9 = vperm.slane %v14335_v30, 4 }
 0x3d4   :  { %v3438_v28 = vmul.f32 %v11641_v62, %v14350_v47  ;;  %vm3444_vm5 = vweird.f32 %v11641_v62  ;;  %v11266_v47 = vld [vmem:[%s17758_s9 + $0x360] sm:$0xf0]  ;;  %v3278_v39 = vadd.f32 %v3277_v41, %v3276_v15  ;;  %6744 = vmatpush.bf16.msra.mxu3 %v9074_v50  ;;  %v9017_v41 = vld [vmem:[%s17758_s9] sm:$0xf] }
 0x3d5   :  { %v14385_v3 = vmin.f32 %v3563_v16, 16.0  ;;  %v3379_v22 = vmul.f32 %v3346_v38, %v11816_v23  ;;  %v3071_v45 = vpop.f32.mrf.mxu0  ;;  %vm3445_vm7 = vmor %vm3443_vm6, %vm3444_vm5  ;;  %v9438_v54 = vor.u32 %v11266_v47, %v9437_v46  ;;  %v11322_v50 = vld [vmem:[%s17758_s9 + $0x520] sm:$0xf0] }
 0x3d6   :  { %v3439_v42 = vmul.f32 %v11641_v62, %v3438_v28  ;;  %v3058_v51 = vpop.f32.mrf.mxu3  ;;  %v3279_v40 = vrot.slane %v3278_v39, 1  ;;  %v3517_v45 = vperm.slane %v14335_v30, 5 }
 0x3d7   :  { %v3565_v58 = vmul.f32 2.1237322e-06, %v14385_v3  ;;  %v3576_v19 = vmul.f32 3.8918573e-05, %v14385_v3  ;;  %v14399_v33 = vadd.f32 1e-05, %v3379_v22  ;;  %6752 = vmatpush.bf16.msrb.mxu0 %v9438_v54 }
 0x3d8   :  { %v3440_v20 = vmul.f32 0.5, %v3439_v42  ;;  %v3280_v17 = vadd.f32 %v3279_v40, %v3278_v39  ;;  %6745 = vmatpush.bf16.msra.mxu3 %v9046_v21  ;;  %v3533_v13 = vperm.slane %v3517_v45, 1  ;;  %v9269_v45 = vld [vmem:[%s17758_s9 + $0x1f8] sm:$0xf] }
 0x3d9   :  { %v3566_v25 = vadd.f32 0.00028619796, %v3565_v58  ;;  %v3577_v24 = vadd.f32 0.001143296, %v3576_v19  ;;  %11642 = vrsqrt.f32 %v14399_v33  ;;  %vm3453_vm9 = vweird.f32 %v14399_v33 }
 0x3da   :  { %v3441_v43 = vsub.f32 1.5, %v3440_v20  ;;  %v3308_v42 = vmul.f32 %v3280_v17, %v11816_v23  ;;  %v3070_v17 = vadd.f32 %v14373_v32, %v14371_v27  ;;  %v11231_v27 = vld [vmem:[%s17758_s9 + $0x248] sm:$0xf0] }
 0x3db   :  { %v3567_v26 = vmul.f32 %v3566_v25, %v14385_v3  ;;  %v3578_v56 = vmul.f32 %v3577_v24, %v14385_v3  ;;  %v3405_v25 = vperm.slane %v3389_v9, 0 }
 0x3dc   :  { %v3442_v37 = vmul.f32 %v11641_v62, %v3441_v43  ;;  %v14435_v28 = vpop.f32.mrf.mxu1  ;;  %v14464_v22 = vsub.f32 %v14383_v2, %v3308_v42  ;;  %v11161_v2 = vld [vmem:[%s17758_s9 + $0x18] sm:$0xf0] }
 0x3dd   :  { %v3568_v34 = vadd.f32 0.0036580483, %v3567_v26  ;;  %v3579_v52 = vadd.f32 0.014752088, %v3578_v56  ;;  %v9018_v35 = vor.u32 %v11161_v2, %v9017_v41  ;;  %v11245_v26 = vld [vmem:[%s17758_s9 + $0x2b8] sm:$0xf0]  ;;  %v3413_v40 = vmul.f32 %v3405_v25, %v14342_v55 }
 0x3de   :  { %v3446_v49 = vsel %vm3445_vm7, %v11641_v62, %v3442_v37  ;;  %v9409_v62 = vld [vmem:[%s17758_s9 + $0x310] sm:$0xf]  ;;  %v3324_v37 = vmul.f32 %v14464_v22, %v14464_v22  ;;  %v9354_v12 = vor.u32 %v11245_v26, %v9353_v11  ;;  %v9661_v55 = vld [vmem:[%s17758_s9 + $0x508] sm:$0xf]  ;;  %v3083_v42 = vadd.f32 %v14435_v28, %v3070_v17 }
 0x3df   :  { %v3508_v57 = vmul.f32 %v3446_v49, %v3412_v36  ;;  %v3569_v59 = vmul.f32 %v3568_v34, %v14385_v3  ;;  %v3580_v8 = vmul.f32 %v3579_v52, %v14385_v3  ;;  %v9410_v10 = vor.u32 %v11259_v6, %v9409_v62  ;;  %v14437_v44 = vpop.eup %11642  ;;  %6746 = vmatpush.bf16.msra.mxu3 %v9018_v35 }
 0x3e0   :  { %v3448_v1 = vmul.f32 %v14437_v44, %v14399_v33  ;;  %vm3454_vm8 = vweird.f32 %v14437_v44  ;;  %v3347_v46 = vrot.slane %v3324_v37, 4  ;;  %v11238_v33 = vld [vmem:[%s17758_s9 + $0x280] sm:$0xf0] }
 0x3e1   :  { %v14427_v0 = vadd.f32 %v3532_v63, %v3508_v57  ;;  %v3570_v60 = vadd.f32 0.05243302, %v3569_v59  ;;  %v3581_v16 = vadd.f32 0.112945676, %v3580_v8  ;;  %6753 = vmatpush.bf16.msrb.mxu0 %v9410_v10  ;;  %vm3455_vm10 = vmor %vm3453_vm9, %vm3454_vm8 }
 0x3e2   :  { %v3449_v19 = vmul.f32 %v14437_v44, %v3448_v1  ;;  %v3348_v57 = vadd.f32 %v3347_v46, %v3324_v37 }
 0x3e3   :  { %v14441_v31 = vmul.f32 0.70710677, %v14427_v0  ;;  %v3571_v38 = vmul.f32 %v3570_v60, %v14385_v3  ;;  %v3582_v20 = vmul.f32 %v3581_v16, %v14385_v3 }
 0x3e4   :  { %v3450_v36 = vmul.f32 0.5, %v3449_v19  ;;  %v3084_v47 = vpop.f32.mrf.mxu1  ;;  %v3349_v6 = vrot.slane %v3348_v57, 2  ;;  %v11315_v19 = vld [vmem:[%s17758_s9 + $0x4e8] sm:$0xf0] }
 0x3e5   :  { %v3603_v58 = vmul.f32 %v14441_v31, %v14441_v31  ;;  %v3572_v43 = vadd.f32 0.18741608, %v3571_v38  ;;  %v3583_v15 = vadd.f32 0.4994258, %v3582_v20  ;;  %6754 = vmatpush.bf16.msrb.mxu0 %v9382_v14  ;;  %v9662_v38 = vor.u32 %v11322_v50, %v9661_v55  ;;  %v9297_v20 = vld [vmem:[%s17758_s9 + $0x230] sm:$0xf] }
 0x3e6   :  { %v3451_v4 = vsub.f32 1.5, %v3450_v36  ;;  %v9298_v5 = vor.u32 %v11231_v27, %v9297_v20 }
 0x3e7   :  { %v14466_v24 = vmin.f32 %v3603_v58, 16.0  ;;  %v3584_v51 = vmul.f32 %v3583_v15, %v14385_v3  ;;  %v3573_v49 = vmul.f32 %v3572_v43, %v14385_v3  ;;  %v9325_v3 = vld [vmem:[%s17758_s9 + $0x268] sm:$0xf]  ;;  %v9633_v58 = vld [vmem:[%s17758_s9 + $0x4d0] sm:$0xf]  ;;  %6765 = vmatpush.bf16.msrb.mxu1 %v9662_v38 }
 0x3e8   :  { %v3452_v52 = vmul.f32 %v14437_v44, %v3451_v4  ;;  %v9326_v9 = vor.u32 %v11238_v33, %v9325_v3 }
 0x3e9   :  { %v3605_v56 = vmul.f32 2.1237322e-06, %v14466_v24  ;;  %v3616_v63 = vmul.f32 3.8918573e-05, %v14466_v24  ;;  %v14488_v39 = vadd.f32 1.0, %v3584_v51  ;;  %6755 = vmatpush.bf16.msrb.mxu0 %v9354_v12 }
 0x3ea   :  { %v3456_v8 = vsel %vm3455_vm10, %v14437_v44, %v3452_v52  ;;  %v3574_v10 = vadd.f32 1.1283791, %v3573_v49  ;;  %v3350_v44 = vadd.f32 %v3349_v6, %v3348_v57  ;;  %v11308_v12 = vld [vmem:[%s17758_s9 + $0x4b0] sm:$0xf0] }
 0x3eb   :  { %v3606_v54 = vadd.f32 0.00028619796, %v3605_v56  ;;  %v3617_v34 = vadd.f32 0.001143296, %v3616_v63  ;;  %11644 = vrcp.f32 %v14488_v39  ;;  %v3509_v62 = vmul.f32 %v3456_v8, %v3413_v40  ;;  %v3095_v28 = vpop.f32.mrf.mxu2  ;;  %v11224_v63 = vld [vmem:[%s17758_s9 + $0x210] sm:$0xf0] }
 0x3ec   :  { %v3595_v43 = vand.u32 2147483647, %v14488_v39  ;;  %v3351_v25 = vrot.slane %v3350_v44, 1  ;;  %v14539_v36 = vadd.f32 %v3095_v28, %v3083_v42  ;;  %v3575_v37 = vmul.f32 %v3574_v10, %v14367_v53  ;;  %v9605_v53 = vld [vmem:[%s17758_s9 + $0x498] sm:$0xf] }
 0x3ed   :  { %v3607_v18 = vmul.f32 %v3606_v54, %v14466_v24  ;;  %v3618_v59 = vmul.f32 %v3617_v34, %v14466_v24  ;;  %v14513_v1 = vadd.f32 %v3533_v13, %v3509_v62  ;;  %v14518_v29 = vpop.f32.mrf.mxu0  ;;  %6756 = vmatpush.bf16.msrb.mxu0 %v9326_v9  ;;  %v9634_v56 = vor.u32 %v11315_v19, %v9633_v58  ;;  %v9577_v58 = vld [vmem:[%s17758_s9 + $0x460] sm:$0xf]  ;;  %v11301_v19 = vld [vmem:[%s17758_s9 + $0x478] sm:$0xf0] }
 0x3ee   :  { %v14516_v7 = vpop.f32.mrf.mxu3  ;;  %v3352_v11 = vadd.f32 %v3351_v25, %v3350_v44  ;;  %v3281_v26 = vrot.slane %v14539_v36, 4  ;;  %v3597_v46 = vand.u32 2147483648, %v14488_v39  ;;  %v9270_v49 = vor.u32 %v11224_v63, %v9269_v45  ;;  %v9549_v45 = vld [vmem:[%s17758_s9 + $0x428] sm:$0xf] }
 0x3ef   :  { %v3608_v60 = vadd.f32 0.0036580483, %v3607_v18  ;;  %v3619_v16 = vadd.f32 0.014752088, %v3618_v59  ;;  %v14537_v15 = vmul.f32 0.70710677, %v14513_v1  ;;  %6766 = vmatpush.bf16.msrb.mxu1 %v9634_v56  ;;  %v9606_v57 = vor.u32 %v11308_v12, %v9605_v53 }
 0x3f0   :  { %v3380_v34 = vmul.f32 %v3352_v11, %v11816_v23  ;;  %v3282_v52 = vadd.f32 %v3281_v26, %v14539_v36  ;;  %vm3591_vm12 = vweird.f32 %v14488_v39  ;;  %vm14570_vm13 = vcmp.eq.f32.partialorder %v3595_v43, 8.507059e+37 }
 0x3f1   :  { %v3609_v32 = vmul.f32 %v3608_v60, %v14466_v24  ;;  %v3620_v21 = vmul.f32 %v3619_v16, %v14466_v24  ;;  %v11645_v14 = vpop.eup %11644  ;;  %v3643_v35 = vmul.f32 %v14537_v15, %v14537_v15  ;;  %6757 = vmatpush.bf16.msrb.mxu0 %v9298_v5  ;;  %v11217_v60 = vld [vmem:[%s17758_s9 + $0x1d8] sm:$0xf0]  ;;  %v3598_v16 = vor.u32 1.1754944e-38, %v3597_v46 }
 0x3f2   :  { %v3587_v41 = vmul.f32 %v11645_v14, %v14488_v39  ;;  %vm3592_vm11 = vweird.f32 %v11645_v14  ;;  %v14568_v59 = vadd.f32 1e-05, %v3380_v34  ;;  %v3283_v17 = vrot.slane %v3282_v52, 2  ;;  %v9241_v39 = vld [vmem:[%s17758_s9 + $0x1c0] sm:$0xf] }
 0x3f3   :  { %v3610_v2 = vadd.f32 0.05243302, %v3609_v32  ;;  %v3621_v51 = vadd.f32 0.112945676, %v3620_v21  ;;  %v14560_v54 = vmin.f32 %v3643_v35, 16.0  ;;  %v3097_v10 = vpop.f32.mrf.mxu2  ;;  %vm3593_vm14 = vmor %vm3591_vm12, %vm3592_vm11  ;;  %6767 = vmatpush.bf16.msrb.mxu1 %v9606_v57  ;;  %v9242_v5 = vor.u32 %v11217_v60, %v9241_v39 }
 0x3f4   :  { %v3588_v4 = vsub.f32 1.0, %v3587_v41  ;;  %11646 = vrsqrt.f32 %v14568_v59  ;;  %v3284_v27 = vadd.f32 %v3283_v17, %v3282_v52  ;;  %v3518_v43 = vperm.slane %v14335_v30, 7  ;;  %v11287_v57 = vld [vmem:[%s17758_s9 + $0x408] sm:$0xf0] }
 0x3f5   :  { %v3622_v47 = vmul.f32 %v3621_v51, %v14466_v24  ;;  %v3611_v13 = vmul.f32 %v3610_v2, %v14466_v24  ;;  %v3645_v33 = vmul.f32 2.1237322e-06, %v14560_v54  ;;  %v3656_v18 = vmul.f32 3.8918573e-05, %v14560_v54  ;;  %v3123_v55 = vpop.f32.mrf.mxu0  ;;  %6758 = vmatpush.bf16.msrb.mxu0 %v9270_v49 }
 0x3f6   :  { %v3589_v40 = vmul.f32 %v11645_v14, %v3588_v4  ;;  %v3110_v8 = vpop.f32.mrf.mxu3  ;;  %v3406_v41 = vperm.slane %v3390_v48, 0  ;;  %v3285_v2 = vrot.slane %v3284_v27, 1  ;;  %v9578_v26 = vor.u32 %v11301_v19, %v9577_v58 }
 0x3f7   :  { %v3623_v3 = vadd.f32 0.4994258, %v3622_v47  ;;  %v3646_v9 = vadd.f32 0.00028619796, %v3645_v33  ;;  %v3657_v44 = vadd.f32 0.001143296, %v3656_v18  ;;  %v3122_v18 = vadd.f32 %v14518_v29, %v14516_v7 }
 0x3f8   :  { %v3590_v50 = vadd.f32 %v11645_v14, %v3589_v40  ;;  %v3612_v38 = vadd.f32 0.18741608, %v3611_v13  ;;  %v3547_v30 = vmul.f32 0.5, %v14362_v61  ;;  %v3286_v53 = vadd.f32 %v3285_v2, %v3284_v27  ;;  %6768 = vmatpush.bf16.msrb.mxu1 %v9578_v26 }
 0x3f9   :  { %v3624_v6 = vmul.f32 %v3623_v3, %v14466_v24  ;;  %v3647_v21 = vmul.f32 %v3646_v9, %v14560_v54  ;;  %v3658_v28 = vmul.f32 %v3657_v44, %v14560_v54  ;;  %6759 = vmatpush.bf16.msrb.mxu0 %v9242_v5  ;;  %v14615_v49 = vperm.slane %v3518_v43, 1  ;;  %v10109_v43 = vld [vmem:[%s17758_s9 + $0x888] sm:$0xf] }
 0x3fa   :  { %v3594_v42 = vsel %vm3593_vm14, %v11645_v14, %v3590_v50  ;;  %v14607_v56 = vpop.eup %11646  ;;  %v3613_v48 = vmul.f32 %v3612_v38, %v14466_v24  ;;  %v3414_v34 = vmul.f32 %v3406_v41, %v14464_v22  ;;  %v3309_v52 = vmul.f32 %v3286_v53, %v11816_v23  ;;  %v9521_v24 = vld [vmem:[%s17758_s9 + $0x3f0] sm:$0xf] }
 0x3fb   :  { %v14583_v20 = vadd.f32 1.0, %v3624_v6  ;;  %v3599_v32 = vsel %vm14570_vm13, %v3598_v16, %v3594_v42  ;;  %v3648_v25 = vadd.f32 0.0036580483, %v3647_v21  ;;  %v3659_v11 = vadd.f32 0.014752088, %v3658_v28 }
 0x3fc   :  { %v3600_v14 = vmul.f32 %v3599_v32, %v3575_v37  ;;  %v14599_v51 = vpop.f32.mrf.mxu1  ;;  %v11294_v37 = vld [vmem:[%s17758_s9 + $0x440] sm:$0xf0]  ;;  %v3458_v47 = vmul.f32 %v14607_v56, %v14568_v59  ;;  %v3614_v22 = vadd.f32 1.1283791, %v3613_v48  ;;  %v14631_v50 = vsub.f32 %v14539_v36, %v3309_v52  ;;  %v9493_v36 = vld [vmem:[%s17758_s9 + $0x3b8] sm:$0xf] }
 0x3fd   :  { %11648 = vrcp.f32 %v14583_v20  ;;  %v3649_v63 = vmul.f32 %v3648_v25, %v14560_v54  ;;  %v3660_v46 = vmul.f32 %v3659_v11, %v14560_v54  ;;  %v9550_v61 = vor.u32 %v11294_v37, %v9549_v45  ;;  %v11280_v16 = vld [vmem:[%s17758_s9 + $0x3d0] sm:$0xf0]  ;;  %v9885_v21 = vld [vmem:[%s17758_s9 + $0x6c8] sm:$0xf]  ;;  %v11434_v25 = vld [vmem:[%s17758_s9 + $0x8a0] sm:$0xf0] }
 0x3fe   :  { %v9007_v35 = vclamps-f32 %v3600_v14, 1.0  ;;  %v3459_v33 = vmul.f32 %v14607_v56, %v3458_v47  ;;  %v3637_v55 = vand.u32 2147483648, %v14583_v20  ;;  %v9522_v10 = vor.u32 %v11287_v57, %v9521_v24  ;;  %v11378_v14 = vld [vmem:[%s17758_s9 + $0x6e0] sm:$0xf0]  ;;  %v9465_v45 = vld [vmem:[%s17758_s9 + $0x380] sm:$0xf] }
 0x3ff   :  { %v3650_v12 = vadd.f32 0.05243302, %v3649_v63  ;;  %v3661_v3 = vadd.f32 0.112945676, %v3660_v46  ;;  %6769 = vmatpush.bf16.msrb.mxu1 %v9550_v61  ;;  %vm3463_vm15 = vweird.f32 %v14568_v59  ;;  %v3325_v7 = vmul.f32 %v14631_v50, %v14631_v50  ;;  %v10081_v57 = vld [vmem:[%s17758_s9 + $0x850] sm:$0xf] }
 0x400   :  { %v3883_v4 = vadd.f32 1.0, %v9007_v35  ;;  %v3460_v17 = vmul.f32 0.5, %v3459_v33  ;;  %v3635_v9 = vand.u32 2147483647, %v14583_v20  ;;  %vm3464_vm0 = vweird.f32 %v14607_v56  ;;  %v11273_v35 = vld [vmem:[%s17758_s9 + $0x398] sm:$0xf0] }
 0x401   :  { %v3662_v6 = vmul.f32 %v3661_v3, %v14560_v54  ;;  %v3651_v60 = vmul.f32 %v3650_v12, %v14560_v54  ;;  %v3638_v27 = vor.u32 1.1754944e-38, %v3637_v55  ;;  %v3353_v32 = vrot.slane %v3325_v7, 4  ;;  %vm3465_vm3 = vmor %vm3463_vm15, %vm3464_vm0 }
 0x402   :  { %v3891_v13 = vmul.f32 %v3883_v4, %v3547_v30  ;;  %v3461_v42 = vsub.f32 1.5, %v3460_v17  ;;  %v3615_v28 = vmul.f32 %v3614_v22, %v14441_v31  ;;  %v9494_v19 = vor.u32 %v11280_v16, %v9493_v36  ;;  %v10053_v17 = vld [vmem:[%s17758_s9 + $0x818] sm:$0xf] }
 0x403   :  { %v11649_v40 = vpop.eup %11648  ;;  %v3663_v44 = vadd.f32 0.4994258, %v3662_v6  ;;  %6770 = vmatpush.bf16.msrb.mxu1 %v9522_v10  ;;  %vm3631_vm2 = vweird.f32 %v14583_v20  ;;  %v3652_v31 = vadd.f32 0.18741608, %v3651_v60  ;;  %v3354_v2 = vadd.f32 %v3353_v32, %v3325_v7  ;;  %v11420_v10 = vld [vmem:[%s17758_s9 + $0x830] sm:$0xf0] }
 0x404   :  { %v3627_v8 = vmul.f32 %v11649_v40, %v14583_v20  ;;  %v14633_v62 = vpack.c.bf16 %v3891_v13, %v3891_v13  ;;  %v3136_v29 = vpop.f32.mrf.mxu1  ;;  %vm3632_vm1 = vweird.f32 %v11649_v40  ;;  %v3462_v58 = vmul.f32 %v14607_v56, %v3461_v42  ;;  %v9801_v32 = vld [vmem:[%s17758_s9 + $0x620] sm:$0xf] }
 0x405   :  { %v3664_v5 = vmul.f32 %v3663_v44, %v14560_v54  ;;  %vm3633_vm4 = vmor %vm3631_vm2, %vm3632_vm1  ;;  %v9886_v26 = vor.u32 %v11378_v14, %v9885_v21  ;;  %v10110_v37 = vor.u32 %v11434_v25, %v10109_v43  ;;  %vm3636_vm5 = vcmp.eq.f32.partialorder %v3635_v9, 8.507059e+37  ;;  %v11357_v21 = vld [vmem:[%s17758_s9 + $0x638] sm:$0xf0]  ;;  %v10025_v43 = vld [vmem:[%s17758_s9 + $0x7e0] sm:$0xf] }
 0x406   :  { %v3628_v39 = vsub.f32 1.0, %v3627_v8  ;;  %6747 = vmatmul.bf16.vlgmr.msra.gmra.mxu3 %v14633_v62  ;;  %v3466_v20 = vsel %vm3465_vm3, %v14607_v56, %v3462_v58  ;;  %v3355_v48 = vrot.slane %v3354_v2, 2  ;;  %v3135_v53 = vadd.f32 %v14599_v51, %v3122_v18  ;;  %v9857_v56 = vld [vmem:[%s17758_s9 + $0x690] sm:$0xf]  ;;  %v11371_v51 = vld [vmem:[%s17758_s9 + $0x6a8] sm:$0xf0] }
 0x407   :  { %v14676_v11 = vadd.f32 1.0, %v3664_v5  ;;  %v3510_v59 = vmul.f32 %v3466_v20, %v3414_v34  ;;  %6771 = vmatpush.bf16.msrb.mxu1 %v9494_v19  ;;  %v9466_v47 = vor.u32 %v11273_v35, %v9465_v45  ;;  %6778 = vmatpush.bf16.msrb.mxu2 %v9886_v26  ;;  %v3653_v34 = vmul.f32 %v3652_v31, %v14560_v54  ;;  %v9829_v54 = vld [vmem:[%s17758_s9 + $0x658] sm:$0xf]  ;;  %v11413_v25 = vld [vmem:[%s17758_s9 + $0x7f8] sm:$0xf0] }
 0x408   :  { %v3629_v38 = vmul.f32 %v11649_v40, %v3628_v39  ;;  %v3356_v61 = vadd.f32 %v3355_v48, %v3354_v2  ;;  %6791 = vmatpush.bf16.msrb.mxu3 %v10110_v37  ;;  %v3548_v3 = vmul.f32 0.5, %v14427_v0  ;;  %v9858_v55 = vor.u32 %v11371_v51, %v9857_v56 }
 0x409   :  { %11650 = vrcp.f32 %v14676_v11  ;;  %v14690_v52 = vadd.f32 %v14615_v49, %v3510_v59  ;;  %v11364_v49 = vld [vmem:[%s17758_s9 + $0x670] sm:$0xf0]  ;;  %v3654_v0 = vadd.f32 1.1283791, %v3653_v34  ;;  %v3675_v36 = vand.u32 2147483647, %v14676_v11 }
 0x40a   :  { %v3630_v41 = vadd.f32 %v11649_v40, %v3629_v38  ;;  %v3357_v22 = vrot.slane %v3356_v61, 1  ;;  %v9830_v7 = vor.u32 %v11364_v49, %v9829_v54  ;;  %v10054_v44 = vor.u32 %v11420_v10, %v10053_v17  ;;  %v9773_v59 = vld [vmem:[%s17758_s9 + $0x5e8] sm:$0xf]  ;;  %v11406_v34 = vld [vmem:[%s17758_s9 + $0x7c0] sm:$0xf0] }
 0x40b   :  { %v3147_v24 = vpop.f32.mrf.mxu2  ;;  %v14711_v18 = vmul.f32 0.70710677, %v14690_v52  ;;  %6772 = vmatpush.bf16.msrb.mxu1 %v9466_v47  ;;  %6779 = vmatpush.bf16.msrb.mxu2 %v9858_v55  ;;  %v9802_v37 = vor.u32 %v11357_v21, %v9801_v32  ;;  %v11350_v47 = vld [vmem:[%s17758_s9 + $0x600] sm:$0xf0]  ;;  %vm3671_vm7 = vweird.f32 %v14676_v11  ;;  %vm14762_vm8 = vcmp.eq.f32.partialorder %v3675_v36, 8.507059e+37 }
 0x40c   :  { %v3634_v30 = vsel %vm3633_vm4, %v11649_v40, %v3630_v41  ;;  %v11427_v40 = vld [vmem:[%s17758_s9 + $0x868] sm:$0xf0]  ;;  %v14701_v13 = vadd.f32 %v3147_v24, %v3135_v53  ;;  %v3358_v16 = vadd.f32 %v3357_v22, %v3356_v61  ;;  %v3655_v22 = vmul.f32 %v3654_v0, %v14537_v15  ;;  %v9969_v15 = vld [vmem:[%s17758_s9 + $0x770] sm:$0xf] }
 0x40d   :  { %v3639_v63 = vsel %vm3636_vm5, %v3638_v27, %v3634_v30  ;;  %v14683_v46 = vpop.f32.mrf.mxu0  ;;  %v10082_v6 = vor.u32 %v11427_v40, %v10081_v57  ;;  %v3683_v60 = vmul.f32 %v14711_v18, %v14711_v18  ;;  %v10026_v30 = vor.u32 %v11413_v25, %v10025_v43  ;;  %v14771_v40 = vld [vmem:[%s17757_s8 + $0x8] sm:$0xff] }
 0x40e   :  { %v14681_v4 = vpop.f32.mrf.mxu3  ;;  %v3640_v12 = vmul.f32 %v3639_v63, %v3615_v28  ;;  %v3287_v8 = vrot.slane %v14701_v13, 4  ;;  %v3677_v28 = vand.u32 2147483648, %v14676_v11  ;;  %v3381_v5 = vmul.f32 %v3358_v16, %v11816_v23  ;;  %v11343_v17 = vld [vmem:[%s17758_s9 + $0x5c8] sm:$0xf0] }
 0x40f   :  { %v11651_v29 = vpop.eup %11650  ;;  %6792 = vmatpush.bf16.msrb.mxu3 %v10082_v6  ;;  %v14725_v27 = vmin.f32 %v3683_v60, 16.0  ;;  %6780 = vmatpush.bf16.msrb.mxu2 %v9830_v7  ;;  %v9745_v6 = vld [vmem:[%s17758_s9 + $0x5b0] sm:$0xf]  ;;  %v11399_v0 = vld [vmem:[%s17758_s9 + $0x788] sm:$0xf0]  ;;  %v3391_v16 = vperm.slane %v14771_v40, 0 }
 0x410   :  { %v9008_v33 = vclamps-f32 %v3640_v12, 1.0  ;;  %v3288_v9 = vadd.f32 %v3287_v8, %v14701_v13  ;;  %v3667_v38 = vmul.f32 %v11651_v29, %v14676_v11  ;;  %v14745_v20 = vadd.f32 1e-05, %v3381_v5  ;;  %v9997_v12 = vld [vmem:[%s17758_s9 + $0x7a8] sm:$0xf] }
 0x411   :  { %v3685_v2 = vmul.f32 2.1237322e-06, %v14725_v27  ;;  %v3696_v45 = vmul.f32 3.8918573e-05, %v14725_v27  ;;  %vm3672_vm6 = vweird.f32 %v11651_v29  ;;  %v3678_v57 = vor.u32 1.1754944e-38, %v3677_v28 }
 0x412   :  { %v3884_v39 = vadd.f32 1.0, %v9008_v33  ;;  %v3289_v58 = vrot.slane %v3288_v9, 2  ;;  %v3668_v31 = vsub.f32 1.0, %v3667_v38  ;;  %11652 = vrsqrt.f32 %v14745_v20  ;;  %vm3673_vm9 = vmor %vm3671_vm7, %vm3672_vm6  ;;  %v9717_v38 = vld [vmem:[%s17758_s9 + $0x578] sm:$0xf] }
 0x413   :  { %v3149_v35 = vpop.f32.mrf.mxu2  ;;  %6793 = vmatpush.bf16.msrb.mxu3 %v10054_v44  ;;  %v3686_v63 = vadd.f32 0.00028619796, %v3685_v2  ;;  %v3697_v53 = vadd.f32 0.001143296, %v3696_v45  ;;  %6781 = vmatpush.bf16.msrb.mxu2 %v9802_v37  ;;  %v9998_v33 = vor.u32 %v11406_v34, %v9997_v12  ;;  %v9746_v44 = vor.u32 %v11343_v17, %v9745_v6  ;;  %v11336_v5 = vld [vmem:[%s17758_s9 + $0x590] sm:$0xf0] }
 0x414   :  { %v3892_v42 = vmul.f32 %v3884_v39, %v3548_v3  ;;  %v3290_v26 = vadd.f32 %v3289_v58, %v3288_v9  ;;  %v3669_v48 = vmul.f32 %v11651_v29, %v3668_v31  ;;  %v9774_v3 = vor.u32 %v11350_v47, %v9773_v59  ;;  %v9689_v59 = vld [vmem:[%s17758_s9 + $0x540] sm:$0xf]  ;;  %v11329_v47 = vld [vmem:[%s17758_s9 + $0x558] sm:$0xf0]  ;;  %v9215_v6 = vld [vmem:[%s17758_s9 + $0x1a4] sm:$0xf0] }
 0x415   :  { %v3175_v14 = vpop.f32.mrf.mxu0  ;;  %v3687_v51 = vmul.f32 %v3686_v63, %v14725_v27  ;;  %v3698_v11 = vmul.f32 %v3697_v53, %v14725_v27  ;;  %v3549_v43 = vmul.f32 0.5, %v14513_v1  ;;  %v3407_v45 = vperm.slane %v3391_v16, 0  ;;  %v9913_v34 = vld [vmem:[%s17758_s9 + $0x700] sm:$0xf] }
 0x416   :  { %v3162_v19 = vpop.f32.mrf.mxu3  ;;  %v14741_v41 = vpack.c.bf16 %v3892_v42, %v3892_v42  ;;  %v3291_v56 = vrot.slane %v3290_v26, 1  ;;  %v3670_v61 = vadd.f32 %v11651_v29, %v3669_v48  ;;  %v9970_v42 = vor.u32 %v11399_v0, %v9969_v15  ;;  %v11392_v14 = vld [vmem:[%s17758_s9 + $0x750] sm:$0xf0] }
 0x417   :  { %6794 = vmatpush.bf16.msrb.mxu3 %v10026_v30  ;;  %v3699_v55 = vadd.f32 0.014752088, %v3698_v11  ;;  %v3688_v39 = vadd.f32 0.0036580483, %v3687_v51  ;;  %6782 = vmatpush.bf16.msrb.mxu2 %v9774_v3  ;;  %v9941_v19 = vld [vmem:[%s17758_s9 + $0x738] sm:$0xf]  ;;  %v9718_v37 = vor.u32 %v11336_v5, %v9717_v38  ;;  %vm3473_vm11 = vweird.f32 %v14745_v20 }
 0x418   :  { %6760 = vmatmul.bf16.vlgmr.msrb.gmra.mxu0 %v14741_v41  ;;  %v3292_v54 = vadd.f32 %v3291_v56, %v3290_v26  ;;  %v3674_v8 = vsel %vm3673_vm9, %v11651_v29, %v3670_v61  ;;  %v14792_v36 = vpop.eup %11652  ;;  %v9942_v30 = vor.u32 %v11392_v14, %v9941_v19  ;;  %v3519_v1 = vperm.slane %v14771_v40, 1  ;;  %v11385_v61 = vld [vmem:[%s17758_s9 + $0x718] sm:$0xf0] }
 0x419   :  { %v3679_v10 = vsel %vm14762_vm8, %v3678_v57, %v3674_v8  ;;  %v3700_v29 = vmul.f32 %v3699_v55, %v14725_v27  ;;  %v3468_v28 = vmul.f32 %v14792_v36, %v14745_v20  ;;  %vm3474_vm10 = vweird.f32 %v14792_v36  ;;  %v10333_v57 = vld [vmem:[%s17758_s9 + $0xa48] sm:$0xf]  ;;  %v11207_v55 = vld [vmem:[%s17758_s9 + $0x18c] sm:$0xf]  ;;  %v10305_v20 = vld [vmem:[%s17758_s9 + $0xa10] sm:$0xf] }
 0x41a   :  { %v3310_v60 = vmul.f32 %v3292_v54, %v11816_v23  ;;  %v3680_v7 = vmul.f32 %v3679_v10, %v3655_v22  ;;  %v11490_v54 = vld [vmem:[%s17758_s9 + $0xa60] sm:$0xf0]  ;;  %v9914_v22 = vor.u32 %v11385_v61, %v9913_v34  ;;  %v9218_v0 = vor.u32 %v11207_v55, %v9215_v6  ;;  %vm3475_vm12 = vmor %vm3473_vm11, %vm3474_vm10  ;;  %v10249_v61 = vld [vmem:[%s17758_s9 + $0x9a0] sm:$0xf] }
 0x41b   :  { %6795 = vmatpush.bf16.msrb.mxu3 %v9998_v33  ;;  %v3701_v21 = vadd.f32 0.112945676, %v3700_v29  ;;  %v3469_v2 = vmul.f32 %v14792_v36, %v3468_v28  ;;  %6783 = vmatpush.bf16.msrb.mxu2 %v9746_v44  ;;  %v9690_v33 = vor.u32 %v11329_v47, %v9689_v59  ;;  %v10334_v8 = vor.u32 %v11490_v54, %v10333_v57  ;;  %v11483_v44 = vld [vmem:[%s17758_s9 + $0xa28] sm:$0xf0]  ;;  %v9187_v28 = vld [vmem:[%s17758_s9 + $0x16c] sm:$0xf0] }
 0x41c   :  { %v14773_v49 = vpop.f32.mrf.mxu1  ;;  %v14796_v9 = vsub.f32 %v14701_v13, %v3310_v60  ;;  %v9009_v32 = vclamps-f32 %v3680_v7, 1.0  ;;  %v3689_v13 = vmul.f32 %v3688_v39, %v14725_v27  ;;  %v3174_v39 = vadd.f32 %v14683_v46, %v14681_v4  ;;  %v11186_v54 = vld [vmem:[%s17758_s9 + $0xe4] sm:$0xf] }
 0x41d   :  { %v3702_v31 = vmul.f32 %v3701_v21, %v14725_v27  ;;  %v3470_v53 = vmul.f32 0.5, %v3469_v2  ;;  %6804 = vmatpush.bf16.msra.mxu0 %v10334_v8  ;;  %v3415_v7 = vmul.f32 %v3407_v45, %v14631_v50  ;;  %v3535_v29 = vperm.slane %v3519_v1, 1  ;;  %v11193_v45 = vld [vmem:[%s17758_s9 + $0x11c] sm:$0xf] }
 0x41e   :  { %v3326_v58 = vmul.f32 %v14796_v9, %v14796_v9  ;;  %v3885_v25 = vadd.f32 1.0, %v9009_v32  ;;  %v3690_v56 = vadd.f32 0.05243302, %v3689_v13  ;;  %v3187_v16 = vadd.f32 %v14773_v49, %v3174_v39  ;;  %v11200_v49 = vld [vmem:[%s17758_s9 + $0x154] sm:$0xf] }
 0x41f   :  { %6796 = vmatpush.bf16.msrb.mxu3 %v9970_v42  ;;  %v3703_v63 = vadd.f32 0.4994258, %v3702_v31  ;;  %v3471_v11 = vsub.f32 1.5, %v3470_v53  ;;  %6784 = vmatpush.bf16.msrb.mxu2 %v9718_v37 }
 0x420   :  { %v3359_v35 = vrot.slane %v3326_v58, 4  ;;  %v3893_v48 = vmul.f32 %v3885_v25, %v3549_v43  ;;  %v3691_v60 = vmul.f32 %v3690_v56, %v14725_v27  ;;  %v10277_v43 = vld [vmem:[%s17758_s9 + $0x9d8] sm:$0xf]  ;;  %v11476_v25 = vld [vmem:[%s17758_s9 + $0x9f0] sm:$0xf0] }
 0x421   :  { %v3704_v51 = vmul.f32 %v3703_v63, %v14725_v27  ;;  %v3472_v10 = vmul.f32 %v14792_v36, %v3471_v11  ;;  %v10278_v2 = vor.u32 %v11476_v25, %v10277_v43 }
 0x422   :  { %v3360_v12 = vadd.f32 %v3359_v35, %v3326_v58  ;;  %v14831_v24 = vpack.c.bf16 %v3893_v48, %v3893_v48  ;;  %v3692_v5 = vadd.f32 0.18741608, %v3691_v60  ;;  %v10306_v58 = vor.u32 %v11483_v44, %v10305_v20  ;;  %v9159_v35 = vld [vmem:[%s17758_s9 + $0x134] sm:$0xf0]  ;;  %v11462_v20 = vld [vmem:[%s17758_s9 + $0x980] sm:$0xf0] }
 0x423   :  { %6797 = vmatpush.bf16.msrb.mxu3 %v9942_v30  ;;  %v14847_v17 = vadd.f32 1.0, %v3704_v51  ;;  %v3476_v50 = vsel %vm3475_vm12, %v14792_v36, %v3472_v10  ;;  %6785 = vmatpush.bf16.msrb.mxu2 %v9690_v33  ;;  %v9190_v36 = vor.u32 %v11200_v49, %v9187_v28  ;;  %v9162_v59 = vor.u32 %v11193_v45, %v9159_v35  ;;  %v11179_v44 = vld [vmem:[%s17758_s9 + $0xac] sm:$0xf] }
 0x424   :  { %v3188_v26 = vpop.f32.mrf.mxu1  ;;  %v3361_v3 = vrot.slane %v3360_v12, 2  ;;  %6773 = vmatmul.bf16.vlgmr.msrb.gmra.mxu1 %v14831_v24  ;;  %v3511_v32 = vmul.f32 %v3476_v50, %v3415_v7  ;;  %6805 = vmatpush.bf16.msra.mxu0 %v10306_v58  ;;  %v3693_v48 = vmul.f32 %v3692_v5, %v14725_v27  ;;  %v11469_v27 = vld [vmem:[%s17758_s9 + $0x9b8] sm:$0xf0] }
 0x425   :  { %11654 = vrcp.f32 %v14847_v17  ;;  %v3717_v1 = vand.u32 2147483648, %v14847_v17  ;;  %v10250_v57 = vor.u32 %v11469_v27, %v10249_v61  ;;  %v3715_v39 = vand.u32 2147483647, %v14847_v17 }
 0x426   :  { %v3362_v15 = vadd.f32 %v3361_v3, %v3360_v12  ;;  %v14879_v19 = vadd.f32 %v3535_v29, %v3511_v32  ;;  %v9131_v3 = vld [vmem:[%s17758_s9 + $0xfc] sm:$0xf0]  ;;  %v3694_v6 = vadd.f32 1.1283791, %v3693_v48  ;;  %vm3711_vm14 = vweird.f32 %v14847_v17  ;;  %v9103_v32 = vld [vmem:[%s17758_s9 + $0xc4] sm:$0xf0] }
 0x427   :  { %6798 = vmatpush.bf16.msrb.mxu3 %v9914_v22  ;;  %v3392_v22 = vperm.slane %v14771_v40, 2  ;;  %v9134_v55 = vor.u32 %v11186_v54, %v9131_v3  ;;  %v3718_v60 = vor.u32 1.1754944e-38, %v3717_v1  ;;  %vm3716_vm0 = vcmp.eq.f32.partialorder %v3715_v39, 8.507059e+37 }
 0x428   :  { %v3363_v42 = vrot.slane %v3362_v15, 1  ;;  %v14896_v37 = vmul.f32 0.70710677, %v14879_v19  ;;  %6806 = vmatpush.bf16.msra.mxu0 %v10278_v2  ;;  %v3695_v5 = vmul.f32 %v3694_v6, %v14711_v18  ;;  %v9106_v58 = vor.u32 %v11179_v44, %v9103_v32  ;;  %v11455_v2 = vld [vmem:[%s17758_s9 + $0x948] sm:$0xf0] }
 0x429   :  { %v11172_v18 = vld [vmem:[%s17758_s9 + $0x74] sm:$0xf]  ;;  %v3408_v35 = vperm.slane %v3392_v22, 0  ;;  %v3550_v48 = vmul.f32 0.5, %v14690_v52  ;;  %v10165_v52 = vld [vmem:[%s17758_s9 + $0x8f8] sm:$0xf] }
 0x42a   :  { %v3364_v13 = vadd.f32 %v3363_v42, %v3362_v15  ;;  %v3723_v47 = vmul.f32 %v14896_v37, %v14896_v37  ;;  %v11165_v22 = vld [vmem:[%s17758_s9 + $0x3c] sm:$0xf]  ;;  %v10137_v44 = vld [vmem:[%s17758_s9 + $0x8c0] sm:$0xf] }
 0x42b   :  { %v3199_v38 = vpop.f32.mrf.mxu2  ;;  %6843 = vmatpush.bf16.msra.mxu3 %v9218_v0  ;;  %v11655_v26 = vpop.eup %11654 }
 0x42c   :  { %v14874_v21 = vadd.f32 %v3199_v38, %v3187_v16  ;;  %v3382_v31 = vmul.f32 %v3364_v13, %v11816_v23  ;;  %v3707_v63 = vmul.f32 %v11655_v26, %v14847_v17  ;;  %v14919_v33 = vmin.f32 %v3723_v47, 16.0  ;;  %6807 = vmatpush.bf16.msra.mxu0 %v10250_v57  ;;  %v10221_v16 = vld [vmem:[%s17758_s9 + $0x968] sm:$0xf]  ;;  %v11448_v57 = vld [vmem:[%s17758_s9 + $0x910] sm:$0xf0] }
 0x42d   :  { %v14862_v46 = vpop.f32.mrf.mxu0  ;;  %vm3712_vm13 = vweird.f32 %v11655_v26  ;;  %v10222_v17 = vor.u32 %v11462_v20, %v10221_v16  ;;  %v10166_v3 = vor.u32 %v11448_v57, %v10165_v52 }
 0x42e   :  { %v14860_v4 = vpop.f32.mrf.mxu3  ;;  %v3293_v14 = vrot.slane %v14874_v21, 4  ;;  %v14901_v53 = vadd.f32 1e-05, %v3382_v31  ;;  %v3708_v51 = vsub.f32 1.0, %v3707_v63  ;;  %v3725_v15 = vmul.f32 2.1237322e-06, %v14919_v33  ;;  %vm3713_vm15 = vmor %vm3711_vm14, %vm3712_vm13 }
 0x42f   :  { %6844 = vmatpush.bf16.msra.mxu3 %v9190_v36  ;;  %v3736_v0 = vmul.f32 3.8918573e-05, %v14919_v33  ;;  %v10193_v31 = vld [vmem:[%s17758_s9 + $0x930] sm:$0xf] }
 0x430   :  { %v3294_v30 = vadd.f32 %v3293_v14, %v14874_v21  ;;  %11656 = vrsqrt.f32 %v14901_v53  ;;  %v3709_v10 = vmul.f32 %v11655_v26, %v3708_v51  ;;  %v3726_v50 = vadd.f32 0.00028619796, %v3725_v15  ;;  %6808 = vmatpush.bf16.msra.mxu0 %v10222_v17 }
 0x431   :  { %v3737_v42 = vadd.f32 0.001143296, %v3736_v0  ;;  %vm3483_vm2 = vweird.f32 %v14901_v53  ;;  %v3416_v17 = vmul.f32 %v3408_v35, %v14796_v9  ;;  %v9439_v35 = vld [vmem:[%s17758_s9 + $0x364] sm:$0xf0] }
 0x432   :  { %v3295_v56 = vrot.slane %v3294_v30, 2  ;;  %v3710_v29 = vadd.f32 %v11655_v26, %v3709_v10  ;;  %v3727_v14 = vmul.f32 %v3726_v50, %v14919_v33  ;;  %v11441_v50 = vld [vmem:[%s17758_s9 + $0x8d8] sm:$0xf0] }
 0x433   :  { %v3201_v11 = vpop.f32.mrf.mxu2  ;;  %6845 = vmatpush.bf16.msra.mxu3 %v9162_v59  ;;  %v3738_v43 = vmul.f32 %v3737_v42, %v14919_v33  ;;  %v9075_v59 = vld [vmem:[%s17758_s9 + $0x8c] sm:$0xf0]  ;;  %v11158_v42 = vld [vmem:[%s17758_s9 + $0x4] sm:$0xf] }
 0x434   :  { %v3296_v8 = vadd.f32 %v3295_v56, %v3294_v30  ;;  %v3714_v13 = vsel %vm3713_vm15, %v11655_v26, %v3710_v29  ;;  %v10194_v30 = vor.u32 %v11455_v2, %v10193_v31  ;;  %v3728_v63 = vadd.f32 0.0036580483, %v3727_v14 }
 0x435   :  { %v3227_v34 = vpop.f32.mrf.mxu0  ;;  %v3719_v36 = vsel %vm3716_vm0, %v3718_v60, %v3714_v13  ;;  %v3739_v1 = vadd.f32 0.014752088, %v3738_v43  ;;  %v9078_v61 = vor.u32 %v11172_v18, %v9075_v59  ;;  %v9019_v13 = vld [vmem:[%s17758_s9 + $0x1c] sm:$0xf0]  ;;  %v3226_v18 = vadd.f32 %v14862_v46, %v14860_v4  ;;  %v10529_v4 = vld [vmem:[%s17758_s9 + $0xbd0] sm:$0xf] }
 0x436   :  { %v3214_v12 = vpop.f32.mrf.mxu3  ;;  %v3297_v7 = vrot.slane %v3296_v8, 1  ;;  %v14940_v28 = vpop.eup %11656  ;;  %v3720_v45 = vmul.f32 %v3719_v36, %v3695_v5  ;;  %v3729_v27 = vmul.f32 %v3728_v63, %v14919_v33  ;;  %6809 = vmatpush.bf16.msra.mxu0 %v10194_v30  ;;  %v10138_v5 = vor.u32 %v11441_v50, %v10137_v44  ;;  %v11546_v36 = vld [vmem:[%s17758_s9 + $0xc20] sm:$0xf0]  ;;  %v11539_v46 = vld [vmem:[%s17758_s9 + $0xbe8] sm:$0xf0] }
 0x437   :  { %6846 = vmatpush.bf16.msra.mxu3 %v9134_v55  ;;  %v3478_v25 = vmul.f32 %v14940_v28, %v14901_v53  ;;  %v3520_v12 = vperm.slane %v14771_v40, 3  ;;  %v3740_v51 = vmul.f32 %v3739_v1, %v14919_v33  ;;  %vm3484_vm1 = vweird.f32 %v14940_v28  ;;  %v10473_v44 = vld [vmem:[%s17758_s9 + $0xb60] sm:$0xf]  ;;  %v11525_v50 = vld [vmem:[%s17758_s9 + $0xb78] sm:$0xf0] }
 0x438   :  { %v3298_v38 = vadd.f32 %v3297_v7, %v3296_v8  ;;  %v9010_v56 = vclamps-f32 %v3720_v45, 1.0  ;;  %v9047_v8 = vld [vmem:[%s17758_s9 + $0x54] sm:$0xf0]  ;;  %v3730_v55 = vadd.f32 0.05243302, %v3729_v27  ;;  %vm14986_vm3 = vmor %vm3483_vm2, %vm3484_vm1  ;;  %v9022_v43 = vor.u32 %v11158_v42, %v9019_v13 }
 0x439   :  { %v3479_v47 = vmul.f32 %v14940_v28, %v3478_v25  ;;  %v3741_v6 = vadd.f32 0.112945676, %v3740_v51  ;;  %v9050_v60 = vor.u32 %v11165_v22, %v9047_v8  ;;  %v3536_v0 = vperm.slane %v3520_v12, 1  ;;  %v11263_v25 = vld [vmem:[%s17758_s9 + $0x34c] sm:$0xf] }
 0x43a   :  { %v14935_v49 = vpop.f32.mrf.mxu1  ;;  %v3311_v26 = vmul.f32 %v3298_v38, %v11816_v23  ;;  %v3886_v54 = vadd.f32 1.0, %v9010_v56  ;;  %v3731_v29 = vmul.f32 %v3730_v55, %v14919_v33  ;;  %6810 = vmatpush.bf16.msra.mxu0 %v10166_v3  ;;  %v9442_v30 = vor.u32 %v11263_v25, %v9439_v35  ;;  %v9411_v51 = vld [vmem:[%s17758_s9 + $0x32c] sm:$0xf0]  ;;  %v11532_v3 = vld [vmem:[%s17758_s9 + $0xbb0] sm:$0xf0] }
 0x43b   :  { %6847 = vmatpush.bf16.msra.mxu3 %v9106_v58  ;;  %v3480_v11 = vmul.f32 0.5, %v3479_v47  ;;  %v3742_v16 = vmul.f32 %v3741_v6, %v14919_v33  ;;  %v10557_v58 = vld [vmem:[%s17758_s9 + $0xc08] sm:$0xf]  ;;  %v3239_v63 = vadd.f32 %v14935_v49, %v3226_v18  ;;  %v10530_v56 = vor.u32 %v11539_v46, %v10529_v4  ;;  %v11256_v49 = vld [vmem:[%s17758_s9 + $0x314] sm:$0xf] }
 0x43c   :  { %v14964_v34 = vsub.f32 %v14874_v21, %v3311_v26  ;;  %v3894_v53 = vmul.f32 %v3886_v54, %v3550_v48  ;;  %v10558_v45 = vor.u32 %v11546_v36, %v10557_v58  ;;  %v3732_v26 = vadd.f32 0.18741608, %v3731_v29  ;;  %v9383_v55 = vld [vmem:[%s17758_s9 + $0x2f4] sm:$0xf0]  ;;  %v11518_v35 = vld [vmem:[%s17758_s9 + $0xb40] sm:$0xf0] }
 0x43d   :  { %v3481_v10 = vsub.f32 1.5, %v3480_v11  ;;  %v3743_v14 = vadd.f32 0.4994258, %v3742_v16  ;;  %v9414_v22 = vor.u32 %v11256_v49, %v9411_v51  ;;  %v10474_v36 = vor.u32 %v11525_v50, %v10473_v44  ;;  %v9327_v4 = vld [vmem:[%s17758_s9 + $0x284] sm:$0xf0] }
 0x43e   :  { %v3327_v21 = vmul.f32 %v14964_v34, %v14964_v34  ;;  %v15002_v38 = vpack.c.bf16 %v3894_v53, %v3894_v53  ;;  %6811 = vmatpush.bf16.msra.mxu0 %v10138_v5  ;;  %6817 = vmatpush.bf16.msra.mxu1 %v10558_v45  ;;  %v3733_v11 = vmul.f32 %v3732_v26, %v14919_v33  ;;  %v11242_v5 = vld [vmem:[%s17758_s9 + $0x2a4] sm:$0xf]  ;;  %v11235_v26 = vld [vmem:[%s17758_s9 + $0x26c] sm:$0xf]  ;;  %v3393_v46 = vperm.slane %v14771_v40, 4 }
 0x43f   :  { %6848 = vmatpush.bf16.msra.mxu3 %v9078_v61  ;;  %v3482_v20 = vmul.f32 %v14940_v28, %v3481_v10 }
 0x440   :  { %v3365_v7 = vrot.slane %v3327_v21, 4  ;;  %6786 = vmatmul.bf16.vlgmr.msrb.gmra.mxu2 %v15002_v38  ;;  %v3409_v44 = vperm.slane %v3393_v46, 0 }
 0x441   :  { %v3486_v9 = vsel %vm14986_vm3, %v14940_v28, %v3482_v20  ;;  %v3744_v28 = vmul.f32 %v3743_v14, %v14919_v33  ;;  %v11249_v33 = vld [vmem:[%s17758_s9 + $0x2dc] sm:$0xf]  ;;  %v9355_v14 = vld [vmem:[%s17758_s9 + $0x2bc] sm:$0xf0] }
 0x442   :  { %v3240_v39 = vpop.f32.mrf.mxu1  ;;  %v3366_v32 = vadd.f32 %v3365_v7, %v3327_v21  ;;  %v3512_v31 = vmul.f32 %v3486_v9, %v3416_v17  ;;  %6856 = vmatpush.bf16.msrb.mxu0 %v9442_v30  ;;  %6818 = vmatpush.bf16.msra.mxu1 %v10530_v56  ;;  %v10501_v21 = vld [vmem:[%s17758_s9 + $0xb98] sm:$0xf]  ;;  %v9386_v53 = vor.u32 %v11249_v33, %v9383_v55 }
 0x443   :  { %6849 = vmatpush.bf16.msra.mxu3 %v9050_v60  ;;  %v15036_v1 = vadd.f32 1.0, %v3744_v28  ;;  %v10502_v8 = vor.u32 %v11532_v3, %v10501_v21  ;;  %v3734_v60 = vadd.f32 1.1283791, %v3733_v11  ;;  %v9330_v56 = vor.u32 %v11235_v26, %v9327_v4  ;;  %v10417_v11 = vld [vmem:[%s17758_s9 + $0xaf0] sm:$0xf] }
 0x444   :  { %v3367_v2 = vrot.slane %v3366_v32, 2  ;;  %v15027_v59 = vadd.f32 %v3536_v0, %v3512_v31  ;;  %v9358_v31 = vor.u32 %v11242_v5, %v9355_v14  ;;  %v9299_v3 = vld [vmem:[%s17758_s9 + $0x24c] sm:$0xf0]  ;;  %v11431_v14 = vld [vmem:[%s17758_s9 + $0x88c] sm:$0xf] }
 0x445   :  { %11658 = vrcp.f32 %v15036_v1  ;;  %v3755_v13 = vand.u32 2147483647, %v15036_v1  ;;  %v3757_v18 = vand.u32 2147483648, %v15036_v1  ;;  %v3735_v49 = vmul.f32 %v3734_v60, %v14896_v37 }
 0x446   :  { %v3368_v48 = vadd.f32 %v3367_v2, %v3366_v32  ;;  %v15042_v12 = vmul.f32 0.70710677, %v15027_v59  ;;  %6857 = vmatpush.bf16.msrb.mxu0 %v9414_v22  ;;  %6819 = vmatpush.bf16.msra.mxu1 %v10502_v8  ;;  %v10445_v2 = vld [vmem:[%s17758_s9 + $0xb28] sm:$0xf]  ;;  %vm3751_vm5 = vweird.f32 %v15036_v1 }
 0x447   :  { %6850 = vmatpush.bf16.msra.mxu3 %v9022_v43  ;;  %vm3756_vm7 = vcmp.eq.f32.partialorder %v3755_v13, 8.507059e+37  ;;  %v3758_v37 = vor.u32 1.1754944e-38, %v3757_v18  ;;  %v10361_v18 = vld [vmem:[%s17758_s9 + $0xa80] sm:$0xf] }
 0x448   :  { %v3369_v61 = vrot.slane %v3368_v48, 1  ;;  %v3763_v52 = vmul.f32 %v15042_v12, %v15042_v12 }
 0x44a   :  { %v3370_v57 = vadd.f32 %v3369_v61, %v3368_v48  ;;  %v15066_v6 = vmin.f32 %v3763_v52, 16.0  ;;  %6858 = vmatpush.bf16.msrb.mxu0 %v9386_v53  ;;  %6820 = vmatpush.bf16.msra.mxu1 %v10474_v36  ;;  %v11511_v52 = vld [vmem:[%s17758_s9 + $0xb08] sm:$0xf0] }
 0x44b   :  { %v3251_v47 = vpop.f32.mrf.mxu2  ;;  %v11659_v29 = vpop.eup %11658  ;;  %v10418_v21 = vor.u32 %v11511_v52, %v10417_v11  ;;  %v10781_v11 = vld [vmem:[%s17758_s9 + $0xdc8] sm:$0xf]  ;;  %v11602_v52 = vld [vmem:[%s17758_s9 + $0xde0] sm:$0xf0] }
 0x44c   :  { %v15044_v27 = vadd.f32 %v3251_v47, %v3239_v63  ;;  %v3383_v10 = vmul.f32 %v3370_v57, %v11816_v23  ;;  %v3765_v15 = vmul.f32 2.1237322e-06, %v15066_v6  ;;  %v3776_v0 = vmul.f32 3.8918573e-05, %v15066_v6  ;;  %v11228_v57 = vld [vmem:[%s17758_s9 + $0x234] sm:$0xf] }
 0x44d   :  { %v3747_v42 = vmul.f32 %v11659_v29, %v15036_v1  ;;  %vm3752_vm4 = vweird.f32 %v11659_v29  ;;  %v10446_v63 = vor.u32 %v11518_v35, %v10445_v2  ;;  %v9302_v60 = vor.u32 %v11228_v57, %v9299_v3 }
 0x44e   :  { %v3299_v54 = vrot.slane %v15044_v27, 4  ;;  %v15072_v7 = vadd.f32 1e-05, %v3383_v10  ;;  %v3766_v17 = vadd.f32 0.00028619796, %v3765_v15  ;;  %6859 = vmatpush.bf16.msrb.mxu0 %v9358_v31  ;;  %vm3753_vm6 = vmor %vm3751_vm5, %vm3752_vm4 }
 0x44f   :  { %v3777_v32 = vadd.f32 0.001143296, %v3776_v0  ;;  %v3748_v9 = vsub.f32 1.0, %v3747_v42  ;;  %6821 = vmatpush.bf16.msra.mxu1 %v10446_v63  ;;  %v11221_v42 = vld [vmem:[%s17758_s9 + $0x1fc] sm:$0xf] }
 0x450   :  { %v3300_v39 = vadd.f32 %v3299_v54, %v15044_v27  ;;  %11660 = vrsqrt.f32 %v15072_v7  ;;  %v3767_v43 = vmul.f32 %v3766_v17, %v15066_v6  ;;  %v9271_v17 = vld [vmem:[%s17758_s9 + $0x214] sm:$0xf0]  ;;  %vm3493_vm9 = vweird.f32 %v15072_v7 }
 0x451   :  { %v3778_v25 = vmul.f32 %v3777_v32, %v15066_v6  ;;  %v3749_v28 = vmul.f32 %v11659_v29, %v3748_v9  ;;  %v10111_v9 = vld [vmem:[%s17758_s9 + $0x8a4] sm:$0xf0] }
 0x452   :  { %v3301_v16 = vrot.slane %v3300_v39, 2  ;;  %v3768_v30 = vadd.f32 0.0036580483, %v3767_v43  ;;  %6860 = vmatpush.bf16.msrb.mxu0 %v9330_v56  ;;  %v9274_v43 = vor.u32 %v11221_v42, %v9271_v17  ;;  %v10083_v56 = vld [vmem:[%s17758_s9 + $0x86c] sm:$0xf0] }
 0x453   :  { %v3253_v20 = vpop.f32.mrf.mxu2  ;;  %v3779_v48 = vadd.f32 0.014752088, %v3778_v25  ;;  %v3750_v61 = vadd.f32 %v11659_v29, %v3749_v28  ;;  %6822 = vmatpush.bf16.msra.mxu1 %v10418_v21  ;;  %v11214_v28 = vld [vmem:[%s17758_s9 + $0x1c4] sm:$0xf]  ;;  %v9663_v21 = vld [vmem:[%s17758_s9 + $0x524] sm:$0xf0] }
 0x454   :  { %v3302_v58 = vadd.f32 %v3301_v16, %v3300_v39  ;;  %v3769_v8 = vmul.f32 %v3768_v30, %v15066_v6  ;;  %v11504_v16 = vld [vmem:[%s17758_s9 + $0xad0] sm:$0xf0]  ;;  %v3551_v20 = vmul.f32 0.5, %v14879_v19  ;;  %v3521_v19 = vperm.slane %v14771_v40, 5  ;;  %v9243_v30 = vld [vmem:[%s17758_s9 + $0x1dc] sm:$0xf0] }
 0x455   :  { %v3780_v51 = vmul.f32 %v3779_v48, %v15066_v6  ;;  %v3754_v22 = vsel %vm3753_vm6, %v11659_v29, %v3750_v61  ;;  %v10389_v29 = vld [vmem:[%s17758_s9 + $0xab8] sm:$0xf]  ;;  %v10114_v61 = vor.u32 %v11431_v14, %v10111_v9  ;;  %v10027_v9 = vld [vmem:[%s17758_s9 + $0x7fc] sm:$0xf0] }
 0x456   :  { %v3303_v45 = vrot.slane %v3302_v58, 1  ;;  %v15117_v54 = vpop.eup %11660  ;;  %v3759_v10 = vsel %vm3756_vm7, %v3758_v37, %v3754_v22  ;;  %v10390_v50 = vor.u32 %v11504_v16, %v10389_v29  ;;  %v3770_v5 = vadd.f32 0.05243302, %v3769_v8  ;;  %6861 = vmatpush.bf16.msrb.mxu0 %v9302_v60  ;;  %v11595_v29 = vld [vmem:[%s17758_s9 + $0xda8] sm:$0xf0] }
 0x457   :  { %v3781_v33 = vadd.f32 0.112945676, %v3780_v51  ;;  %v3488_v55 = vmul.f32 %v15117_v54, %v15072_v7  ;;  %v3760_v53 = vmul.f32 %v3759_v10, %v3735_v49  ;;  %vm3494_vm8 = vweird.f32 %v15117_v54  ;;  %v11312_v16 = vld [vmem:[%s17758_s9 + $0x4d4] sm:$0xf] }
 0x458   :  { %v3304_v47 = vadd.f32 %v3303_v45, %v3302_v58  ;;  %v11497_v45 = vld [vmem:[%s17758_s9 + $0xa98] sm:$0xf0]  ;;  %6823 = vmatpush.bf16.msra.mxu1 %v10390_v50  ;;  %v3771_v63 = vmul.f32 %v3770_v5, %v15066_v6  ;;  %v9246_v51 = vor.u32 %v11214_v28, %v9243_v30  ;;  %v3417_v37 = vmul.f32 %v3409_v44, %v14964_v34  ;;  %vm3495_vm10 = vmor %vm3493_vm9, %vm3494_vm8  ;;  %v11403_v30 = vld [vmem:[%s17758_s9 + $0x7ac] sm:$0xf] }
 0x459   :  { %v3782_v15 = vmul.f32 %v3781_v33, %v15066_v6  ;;  %v3489_v0 = vmul.f32 %v15117_v54, %v3488_v55  ;;  %v9011_v32 = vclamps-f32 %v3760_v53, 1.0  ;;  %v10362_v26 = vor.u32 %v11497_v45, %v10361_v18  ;;  %v11417_v34 = vld [vmem:[%s17758_s9 + $0x81c] sm:$0xf] }
 0x45a   :  { %v3312_v1 = vmul.f32 %v3304_v47, %v11816_v23  ;;  %v11424_v47 = vld [vmem:[%s17758_s9 + $0x854] sm:$0xf]  ;;  %6862 = vmatpush.bf16.msrb.mxu0 %v9274_v43  ;;  %v3537_v7 = vperm.slane %v3521_v19, 1  ;;  %v3772_v8 = vadd.f32 0.18741608, %v3771_v63  ;;  %v10782_v55 = vor.u32 %v11602_v52, %v10781_v11 }
 0x45b   :  { %v3783_v13 = vadd.f32 0.4994258, %v3782_v15  ;;  %v3490_v58 = vmul.f32 0.5, %v3489_v0  ;;  %v3887_v25 = vadd.f32 1.0, %v9011_v32  ;;  %v10086_v53 = vor.u32 %v11424_v47, %v10083_v56  ;;  %v10055_v15 = vld [vmem:[%s17758_s9 + $0x834] sm:$0xf0] }
 0x45c   :  { %v15128_v39 = vsub.f32 %v15044_v27, %v3312_v1  ;;  %v11319_v1 = vld [vmem:[%s17758_s9 + $0x50c] sm:$0xf]  ;;  %6824 = vmatpush.bf16.msra.mxu1 %v10362_v26  ;;  %6830 = vmatpush.bf16.msra.mxu2 %v10782_v55  ;;  %v3773_v17 = vmul.f32 %v3772_v8, %v15066_v6  ;;  %v10725_v19 = vld [vmem:[%s17758_s9 + $0xd58] sm:$0xf]  ;;  %v10697_v47 = vld [vmem:[%s17758_s9 + $0xd20] sm:$0xf] }
 0x45d   :  { %v3784_v31 = vmul.f32 %v3783_v13, %v15066_v6  ;;  %v3491_v2 = vsub.f32 1.5, %v3490_v58  ;;  %v3895_v48 = vmul.f32 %v3887_v25, %v3551_v20  ;;  %v9666_v10 = vor.u32 %v11319_v1, %v9663_v21  ;;  %v9635_v20 = vld [vmem:[%s17758_s9 + $0x4ec] sm:$0xf0]  ;;  %v11305_v6 = vld [vmem:[%s17758_s9 + $0x49c] sm:$0xf] }
 0x45e   :  { %v3328_v27 = vmul.f32 %v15128_v39, %v15128_v39  ;;  %6863 = vmatpush.bf16.msrb.mxu0 %v9246_v51  ;;  %v9638_v50 = vor.u32 %v11312_v16, %v9635_v20  ;;  %v10058_v58 = vor.u32 %v11417_v34, %v10055_v15  ;;  %v9607_v25 = vld [vmem:[%s17758_s9 + $0x4b4] sm:$0xf0]  ;;  %v3774_v45 = vadd.f32 1.1283791, %v3773_v17  ;;  %v11581_v56 = vld [vmem:[%s17758_s9 + $0xd38] sm:$0xf0] }
 0x45f   :  { %v15169_v4 = vadd.f32 1.0, %v3784_v31  ;;  %v3492_v46 = vmul.f32 %v15117_v54, %v3491_v2  ;;  %v15185_v57 = vpack.c.bf16 %v3895_v48, %v3895_v48  ;;  %v9610_v18 = vor.u32 %v11305_v6, %v9607_v25  ;;  %v9999_v48 = vld [vmem:[%s17758_s9 + $0x7c4] sm:$0xf0]  ;;  %v9579_v52 = vld [vmem:[%s17758_s9 + $0x47c] sm:$0xf0] }
 0x460   :  { %v3371_v36 = vrot.slane %v3328_v27, 4  ;;  %6869 = vmatpush.bf16.msrb.mxu1 %v9666_v10  ;;  %v10698_v11 = vor.u32 %v11581_v56, %v10697_v47  ;;  %v11396_v8 = vld [vmem:[%s17758_s9 + $0x774] sm:$0xf]  ;;  %v10002_v55 = vor.u32 %v11403_v30, %v9999_v48  ;;  %v11574_v10 = vld [vmem:[%s17758_s9 + $0xd00] sm:$0xf0]  ;;  %v3522_v47 = vperm.slane %v14771_v40, 7 }
 0x461   :  { %11662 = vrcp.f32 %v15169_v4  ;;  %v3496_v3 = vsel %vm3495_vm10, %v15117_v54, %v3492_v46  ;;  %6799 = vmatmul.bf16.vlgmr.msrb.gmra.mxu3 %v15185_v57  ;;  %v10753_v54 = vld [vmem:[%s17758_s9 + $0xd90] sm:$0xf]  ;;  %v3797_v26 = vand.u32 2147483648, %v15169_v4  ;;  %vm3791_vm12 = vweird.f32 %v15169_v4  ;;  %v11567_v6 = vld [vmem:[%s17758_s9 + $0xcc8] sm:$0xf0] }
 0x462   :  { %v3372_v35 = vadd.f32 %v3371_v36, %v3328_v27  ;;  %v3513_v33 = vmul.f32 %v3496_v3, %v3417_v37  ;;  %6895 = vmatpush.bf16.msrb.mxu3 %v10114_v61  ;;  %v10754_v27 = vor.u32 %v11595_v29, %v10753_v54  ;;  %v11588_v36 = vld [vmem:[%s17758_s9 + $0xd70] sm:$0xf0]  ;;  %v11291_v54 = vld [vmem:[%s17758_s9 + $0x42c] sm:$0xf]  ;;  %v9551_v29 = vld [vmem:[%s17758_s9 + $0x444] sm:$0xf0] }
 0x463   :  { %v10726_v43 = vor.u32 %v11588_v36, %v10725_v19  ;;  %v3798_v1 = vor.u32 1.1754944e-38, %v3797_v26  ;;  %v10641_v36 = vld [vmem:[%s17758_s9 + $0xcb0] sm:$0xf]  ;;  %v11284_v25 = vld [vmem:[%s17758_s9 + $0x3f4] sm:$0xf] }
 0x464   :  { %v3373_v49 = vrot.slane %v3372_v35, 2  ;;  %v15208_v0 = vadd.f32 %v3537_v7, %v3513_v33  ;;  %6831 = vmatpush.bf16.msra.mxu2 %v10754_v27  ;;  %6870 = vmatpush.bf16.msrb.mxu1 %v9638_v50  ;;  %v3775_v33 = vmul.f32 %v3774_v45, %v15042_v12  ;;  %v9971_v12 = vld [vmem:[%s17758_s9 + $0x78c] sm:$0xf0]  ;;  %v9554_v27 = vor.u32 %v11291_v54, %v9551_v29  ;;  %v10335_v26 = vld [vmem:[%s17758_s9 + $0xa64] sm:$0xf0] }
 0x465   :  { %v9974_v19 = vor.u32 %v11396_v8, %v9971_v12  ;;  %v10642_v30 = vor.u32 %v11567_v6, %v10641_v36  ;;  %v11382_v56 = vld [vmem:[%s17758_s9 + $0x704] sm:$0xf]  ;;  %v11277_v8 = vld [vmem:[%s17758_s9 + $0x3bc] sm:$0xf]  ;;  %v3538_v12 = vperm.slane %v3522_v47, 1 }
 0x466   :  { %v3374_v22 = vadd.f32 %v3373_v49, %v3372_v35  ;;  %v15221_v32 = vmul.f32 0.70710677, %v15208_v0  ;;  %6896 = vmatpush.bf16.msrb.mxu3 %v10086_v53  ;;  %v3795_v35 = vand.u32 2147483647, %v15169_v4  ;;  %v11298_v49 = vld [vmem:[%s17758_s9 + $0x464] sm:$0xf] }
 0x467   :  { %v11663_v42 = vpop.eup %11662  ;;  %v9582_v7 = vor.u32 %v11298_v49, %v9579_v52  ;;  %v9221_v49 = vld [vmem:[%s17758_s9 + $0x190] sm:$0xf] }
 0x468   :  { %v3375_v60 = vrot.slane %v3374_v22, 1  ;;  %v3787_v5 = vmul.f32 %v11663_v42, %v15169_v4  ;;  %v3803_v14 = vmul.f32 %v15221_v32, %v15221_v32  ;;  %vm3792_vm11 = vweird.f32 %v11663_v42  ;;  %6832 = vmatpush.bf16.msra.mxu2 %v10726_v43  ;;  %6871 = vmatpush.bf16.msrb.mxu1 %v9610_v18  ;;  %v10669_v4 = vld [vmem:[%s17758_s9 + $0xce8] sm:$0xf]  ;;  %v9943_v43 = vld [vmem:[%s17758_s9 + $0x754] sm:$0xf0] }
 0x469   :  { %vm3793_vm13 = vmor %vm3791_vm12, %vm3792_vm11  ;;  %vm3796_vm14 = vcmp.eq.f32.partialorder %v3795_v35, 8.507059e+37  ;;  %v3552_v18 = vmul.f32 0.5, %v15027_v59  ;;  %v11487_v35 = vld [vmem:[%s17758_s9 + $0xa4c] sm:$0xf]  ;;  %v9915_v59 = vld [vmem:[%s17758_s9 + $0x71c] sm:$0xf0] }
 0x46a   :  { %v3376_v44 = vadd.f32 %v3375_v60, %v3374_v22  ;;  %v3788_v31 = vsub.f32 1.0, %v3787_v5  ;;  %v15249_v28 = vmin.f32 %v3803_v14, 16.0  ;;  %6897 = vmatpush.bf16.msrb.mxu3 %v10058_v58  ;;  %v3394_v22 = vperm.slane %v14771_v40, 6  ;;  %v11389_v5 = vld [vmem:[%s17758_s9 + $0x73c] sm:$0xf] }
 0x46b   :  { %v11480_v40 = vld [vmem:[%s17758_s9 + $0xa14] sm:$0xf]  ;;  %v9918_v54 = vor.u32 %v11382_v56, %v9915_v59  ;;  %v9859_v47 = vld [vmem:[%s17758_s9 + $0x6ac] sm:$0xf0] }
 0x46c   :  { %v3384_v13 = vmul.f32 %v3376_v44, %v11816_v23  ;;  %v11410_v23 = vld [vmem:[%s17758_s9 + $0x7e4] sm:$0xf]  ;;  %v3789_v63 = vmul.f32 %v11663_v42, %v3788_v31  ;;  %v3805_v61 = vmul.f32 2.1237322e-06, %v15249_v28  ;;  %v3816_v51 = vmul.f32 3.8918573e-05, %v15249_v28  ;;  %6833 = vmatpush.bf16.msra.mxu2 %v10698_v11  ;;  %6872 = vmatpush.bf16.msrb.mxu1 %v9582_v7 }
 0x46d   :  { %v10030_v46 = vor.u32 %v11410_v23, %v10027_v9  ;;  %v10670_v44 = vor.u32 %v11574_v10, %v10669_v4  ;;  %v3410_v58 = vperm.slane %v3394_v22, 0  ;;  %v9523_v31 = vld [vmem:[%s17758_s9 + $0x40c] sm:$0xf0]  ;;  %v10613_v7 = vld [vmem:[%s17758_s9 + $0xc78] sm:$0xf]  ;;  %v10338_v22 = vor.u32 %v11487_v35, %v10335_v26 }
 0x46e   :  { %v15245_v2 = vadd.f32 1e-05, %v3384_v13  ;;  %v3790_v37 = vadd.f32 %v11663_v42, %v3789_v63  ;;  %v3806_v21 = vadd.f32 0.00028619796, %v3805_v61  ;;  %v3817_v3 = vadd.f32 0.001143296, %v3816_v51 }
 0x46f   :  { %6898 = vmatpush.bf16.msrb.mxu3 %v10030_v46  ;;  %v9526_v48 = vor.u32 %v11284_v25, %v9523_v31  ;;  %v11211_v61 = vld [vmem:[%s17758_s9 + $0x1a8] sm:$0xf0]  ;;  %v10307_v51 = vld [vmem:[%s17758_s9 + $0xa2c] sm:$0xf0]  ;;  %v9165_v35 = vld [vmem:[%s17758_s9 + $0x120] sm:$0xf] }
 0x470   :  { %11664 = vrsqrt.f32 %v15245_v2  ;;  %v3794_v34 = vsel %vm3793_vm13, %v11663_v42, %v3790_v37  ;;  %v3807_v53 = vmul.f32 %v3806_v21, %v15249_v28  ;;  %v3818_v15 = vmul.f32 %v3817_v3, %v15249_v28  ;;  %6834 = vmatpush.bf16.msra.mxu2 %v10670_v44  ;;  %6873 = vmatpush.bf16.msrb.mxu1 %v9554_v27  ;;  %v11270_v44 = vld [vmem:[%s17758_s9 + $0x384] sm:$0xf]  ;;  %v11197_v26 = vld [vmem:[%s17758_s9 + $0x138] sm:$0xf0] }
 0x471   :  { %v3799_v60 = vsel %vm3796_vm14, %v3798_v1, %v3794_v34  ;;  %6851 = vmatmul.bf16.vlgmr.msra.gmra.mxu3 %v14633_v62  ;;  %v9946_v37 = vor.u32 %v11389_v5, %v9943_v43  ;;  %v11560_v1 = vld [vmem:[%s17758_s9 + $0xc90] sm:$0xf0]  ;;  %vm3503_vm0 = vweird.f32 %v15245_v2  ;;  %v9222_v29 = vor.u32 %v11211_v61, %v9221_v49 }
 0x472   :  { %v3800_v20 = vmul.f32 %v3799_v60, %v3775_v33  ;;  %v3808_v50 = vadd.f32 0.0036580483, %v3807_v53  ;;  %v3819_v42 = vadd.f32 0.014752088, %v3818_v15  ;;  %v9495_v33 = vld [vmem:[%s17758_s9 + $0x3d4] sm:$0xf0]  ;;  %v3418_v60 = vmul.f32 %v3410_v58, %v15128_v39 }
 0x473   :  { %6899 = vmatpush.bf16.msrb.mxu3 %v10002_v55  ;;  %v10614_v55 = vor.u32 %v11560_v1, %v10613_v7  ;;  %v9498_v4 = vor.u32 %v11277_v8, %v9495_v33  ;;  %v11553_v39 = vld [vmem:[%s17758_s9 + $0xc58] sm:$0xf0]  ;;  %v11204_v5 = vld [vmem:[%s17758_s9 + $0x170] sm:$0xf0]  ;;  %v9166_v61 = vor.u32 %v11197_v26, %v9165_v35 }
 0x474   :  { %v9012_v13 = vclamps-f32 %v3800_v20, 1.0  ;;  %v3809_v14 = vmul.f32 %v3808_v50, %v15249_v28  ;;  %v3820_v23 = vmul.f32 %v3819_v42, %v15249_v28  ;;  %6835 = vmatpush.bf16.msra.mxu2 %v10642_v30  ;;  %6874 = vmatpush.bf16.msrb.mxu1 %v9526_v48  ;;  %v10585_v20 = vld [vmem:[%s17758_s9 + $0xc40] sm:$0xf]  ;;  %v11466_v48 = vld [vmem:[%s17758_s9 + $0x9a4] sm:$0xf] }
 0x475   :  { %v10586_v36 = vor.u32 %v11553_v39, %v10585_v20  ;;  %v11361_v7 = vld [vmem:[%s17758_s9 + $0x65c] sm:$0xf] }
 0x476   :  { %v15296_v16 = vpop.eup %11664  ;;  %v3888_v45 = vadd.f32 1.0, %v9012_v13  ;;  %v3821_v63 = vadd.f32 0.112945676, %v3820_v23  ;;  %v3810_v52 = vadd.f32 0.05243302, %v3809_v14 }
 0x477   :  { %v3498_v17 = vmul.f32 %v15296_v16, %v15245_v2  ;;  %vm3504_vm15 = vweird.f32 %v15296_v16  ;;  %6900 = vmatpush.bf16.msrb.mxu3 %v9974_v19  ;;  %v10310_v2 = vor.u32 %v11480_v40, %v10307_v51  ;;  %v9467_v13 = vld [vmem:[%s17758_s9 + $0x39c] sm:$0xf0]  ;;  %v11473_v19 = vld [vmem:[%s17758_s9 + $0x9dc] sm:$0xf]  ;;  %v11375_v14 = vld [vmem:[%s17758_s9 + $0x6cc] sm:$0xf] }
 0x478   :  { %v3896_v11 = vmul.f32 %v3888_v45, %v3552_v18  ;;  %v3822_v21 = vmul.f32 %v3821_v63, %v15249_v28  ;;  %vm15369_vm1 = vmor %vm3503_vm0, %vm3504_vm15  ;;  %v3811_v27 = vmul.f32 %v3810_v52, %v15249_v28  ;;  %6836 = vmatpush.bf16.msra.mxu2 %v10614_v55  ;;  %6875 = vmatpush.bf16.msrb.mxu1 %v9498_v4  ;;  %v10251_v63 = vld [vmem:[%s17758_s9 + $0x9bc] sm:$0xf0]  ;;  %v9137_v51 = vld [vmem:[%s17758_s9 + $0xe8] sm:$0xf] }
 0x479   :  { %v3499_v9 = vmul.f32 %v15296_v16, %v3498_v17  ;;  %v9193_v17 = vld [vmem:[%s17758_s9 + $0x158] sm:$0xf]  ;;  %v9470_v6 = vor.u32 %v11270_v44, %v9467_v13  ;;  %v10254_v40 = vor.u32 %v11466_v48, %v10251_v63  ;;  %v11459_v52 = vld [vmem:[%s17758_s9 + $0x96c] sm:$0xf] }
 0x47a   :  { %v15362_v34 = vpack.c.bf16 %v3896_v11, %v3896_v11  ;;  %v3823_v10 = vadd.f32 0.4994258, %v3822_v21  ;;  %v3812_v31 = vadd.f32 0.18741608, %v3811_v27  ;;  %v9194_v18 = vor.u32 %v11204_v5, %v9193_v17  ;;  %v11190_v11 = vld [vmem:[%s17758_s9 + $0x100] sm:$0xf0] }
 0x47b   :  { %v3500_v46 = vmul.f32 0.5, %v3499_v9  ;;  %6901 = vmatpush.bf16.msrb.mxu3 %v9946_v37  ;;  %v9887_v9 = vld [vmem:[%s17758_s9 + $0x6e4] sm:$0xf0]  ;;  %v15459_v21 = vld [vmem:[%s17759_s10] sm:$0x7f]  ;;  %v9138_v55 = vor.u32 %v11190_v11, %v9137_v51 }
 0x47c   :  { %6812 = vmatmul.bf16.vlgmr.msra.gmra.mxu0 %v15362_v34  ;;  %v3824_v50 = vmul.f32 %v3823_v10, %v15249_v28  ;;  %v9890_v25 = vor.u32 %v11375_v14, %v9887_v9  ;;  %6837 = vmatpush.bf16.msra.mxu2 %v10586_v36  ;;  %v3813_v49 = vmul.f32 %v3812_v31, %v15249_v28  ;;  %v10223_v28 = vld [vmem:[%s17758_s9 + $0x984] sm:$0xf0]  ;;  %v9109_v10 = vld [vmem:[%s17758_s9 + $0xb0] sm:$0xf]  ;;  %v9803_v17 = vld [vmem:[%s17758_s9 + $0x63c] sm:$0xf0] }
 0x47d   :  { %v3501_v3 = vsub.f32 1.5, %v3500_v46  ;;  %6908 = vmatpush.bf16.msra.mxu0 %v10338_v22  ;;  %6876 = vmatpush.bf16.msrb.mxu1 %v9470_v6  ;;  %v11368_v46 = vld [vmem:[%s17758_s9 + $0x694] sm:$0xf]  ;;  %v9081_v36 = vld [vmem:[%s17758_s9 + $0x78] sm:$0xf] }
 0x47e   :  { %v15406_v23 = vadd.f32 1.0, %v3824_v50  ;;  %v9862_v59 = vor.u32 %v11368_v46, %v9859_v47  ;;  %v3814_v15 = vadd.f32 1.1283791, %v3813_v49  ;;  %v4421_v50 = vperm.slane %v15459_v21, 0  ;;  %v11176_v6 = vld [vmem:[%s17758_s9 + $0x90] sm:$0xf0] }
 0x47f   :  { %v3502_v53 = vmul.f32 %v15296_v16, %v3501_v3  ;;  %6902 = vmatpush.bf16.msrb.mxu3 %v9918_v54  ;;  %v9831_v3 = vld [vmem:[%s17758_s9 + $0x674] sm:$0xf0]  ;;  %v10226_v54 = vor.u32 %v11459_v52, %v10223_v28  ;;  %v11445_v14 = vld [vmem:[%s17758_s9 + $0x8fc] sm:$0xf]  ;;  %v9082_v49 = vor.u32 %v11176_v6, %v9081_v36  ;;  %v11340_v51 = vld [vmem:[%s17758_s9 + $0x5b4] sm:$0xf] }
 0x480   :  { %11666 = vrcp.f32 %v15406_v23  ;;  %6882 = vmatpush.bf16.msrb.mxu2 %v9890_v25  ;;  %v3837_v27 = vand.u32 2147483648, %v15406_v23  ;;  %vm3831_vm3 = vweird.f32 %v15406_v23  ;;  %v3815_v35 = vmul.f32 %v3814_v15, %v15221_v32  ;;  %v9747_v11 = vld [vmem:[%s17758_s9 + $0x5cc] sm:$0xf0]  ;;  %v10139_v21 = vld [vmem:[%s17758_s9 + $0x8dc] sm:$0xf0] }
 0x481   :  { %v3506_v42 = vsel %vm15369_vm1, %v15296_v16, %v3502_v53  ;;  %v10279_v16 = vld [vmem:[%s17758_s9 + $0x9f4] sm:$0xf0]  ;;  %6909 = vmatpush.bf16.msra.mxu0 %v10310_v2  ;;  %v11452_v53 = vld [vmem:[%s17758_s9 + $0x934] sm:$0xf]  ;;  %v9834_v2 = vor.u32 %v11361_v7, %v9831_v3  ;;  %v11162_v15 = vld [vmem:[%s17758_s9 + $0x20] sm:$0xf0] }
 0x482   :  { %v3514_v58 = vmul.f32 %v3506_v42, %v3418_v60  ;;  %v10282_v45 = vor.u32 %v11473_v19, %v10279_v16  ;;  %6903 = vmatmul.bf16.vlgmr.msrb.gmra.mxu3 %v15185_v57  ;;  %v11183_v60 = vld [vmem:[%s17758_s9 + $0xc8] sm:$0xf0]  ;;  %v11354_v42 = vld [vmem:[%s17758_s9 + $0x624] sm:$0xf]  ;;  %v3838_v26 = vor.u32 1.1754944e-38, %v3837_v27  ;;  %v3553_v27 = vmul.f32 0.5, %v15208_v0 }
 0x483   :  { %6947 = vmatpush.bf16.msra.mxu3 %v9222_v29  ;;  %v10195_v29 = vld [vmem:[%s17758_s9 + $0x94c] sm:$0xf0]  ;;  %v9110_v19 = vor.u32 %v11183_v60, %v9109_v10  ;;  %v9806_v9 = vor.u32 %v11354_v42, %v9803_v17  ;;  %v11326_v6 = vld [vmem:[%s17758_s9 + $0x544] sm:$0xf] }
 0x484   :  { %v15411_v43 = vadd.f32 %v3538_v12, %v3514_v58  ;;  %6883 = vmatpush.bf16.msrb.mxu2 %v9862_v59  ;;  %v3835_v12 = vand.u32 2147483647, %v15406_v23  ;;  %v10198_v16 = vor.u32 %v11452_v53, %v10195_v29  ;;  %v9025_v53 = vld [vmem:[%s17758_s9 + $0x8] sm:$0xf] }
 0x485   :  { %6910 = vmatpush.bf16.msra.mxu0 %v10282_v45  ;;  %v11347_v45 = vld [vmem:[%s17758_s9 + $0x5ec] sm:$0xf] }
 0x486   :  { %v15421_v30 = vmul.f32 0.70710677, %v15411_v43  ;;  %v11667_v1 = vpop.eup %11666  ;;  %vm3836_vm5 = vcmp.eq.f32.partialorder %v3835_v12, 8.507059e+37  ;;  %v11543_v12 = vld [vmem:[%s17758_s9 + $0xc0c] sm:$0xf] }
 0x487   :  { %6948 = vmatpush.bf16.msra.mxu3 %v9194_v18  ;;  %v3827_v22 = vmul.f32 %v11667_v1, %v15406_v23  ;;  %vm3832_vm2 = vweird.f32 %v11667_v1  ;;  %v10167_v18 = vld [vmem:[%s17758_s9 + $0x914] sm:$0xf0]  ;;  %v9775_v23 = vld [vmem:[%s17758_s9 + $0x604] sm:$0xf0] }
 0x488   :  { %v3843_v56 = vmul.f32 %v15421_v30, %v15421_v30  ;;  %6884 = vmatpush.bf16.msrb.mxu2 %v9834_v2  ;;  %vm3833_vm4 = vmor %vm3831_vm3, %vm3832_vm2  ;;  %v9778_v59 = vor.u32 %v11347_v45, %v9775_v23  ;;  %v10089_v23 = vld [vmem:[%s17758_s9 + $0x858] sm:$0xf] }
 0x489   :  { %v6748_v4 = vpop.f32.mrf.mxu3  ;;  %6911 = vmatpush.bf16.msra.mxu0 %v10254_v40  ;;  %v3828_v20 = vsub.f32 1.0, %v3827_v22  ;;  %v11169_v40 = vld [vmem:[%s17758_s9 + $0x58] sm:$0xf0] }
 0x48a   :  { %v15448_v37 = vmin.f32 %v3843_v56, 16.0  ;;  %v9053_v56 = vld [vmem:[%s17758_s9 + $0x40] sm:$0xf]  ;;  %v6749_v7 = vadd.f32 %v6748_v4, %v4421_v50 }
 0x48b   :  { %6949 = vmatpush.bf16.msra.mxu3 %v9166_v61  ;;  %v3829_v5 = vmul.f32 %v11667_v1, %v3828_v20  ;;  %v10170_v61 = vor.u32 %v11445_v14, %v10167_v18  ;;  %v9054_v29 = vor.u32 %v11169_v40, %v9053_v56  ;;  %v10117_v20 = vld [vmem:[%s17758_s9 + $0x890] sm:$0xf]  ;;  %v9026_v14 = vor.u32 %v11162_v15, %v9025_v53  ;;  %v9389_v56 = vld [vmem:[%s17758_s9 + $0x2e0] sm:$0xf] }
 0x48c   :  { %v3845_v8 = vmul.f32 2.1237322e-06, %v15448_v37  ;;  %v3856_v33 = vmul.f32 3.8918573e-05, %v15448_v37  ;;  %6864 = vmatmul.bf16.vlgmr.msrb.gmra.mxu0 %v14741_v41  ;;  %6885 = vmatpush.bf16.msrb.mxu2 %v9806_v9 }
 0x48d   :  { %6912 = vmatpush.bf16.msra.mxu0 %v10226_v54  ;;  %v3830_v25 = vadd.f32 %v11667_v1, %v3829_v5  ;;  %v10559_v54 = vld [vmem:[%s17758_s9 + $0xc24] sm:$0xf0]  ;;  %v11435_v5 = vld [vmem:[%s17758_s9 + $0x8a8] sm:$0xf0] }
 0x48e   :  { %v3846_v39 = vadd.f32 0.00028619796, %v3845_v8  ;;  %v3857_v44 = vadd.f32 0.001143296, %v3856_v33  ;;  %v9445_v8 = vld [vmem:[%s17758_s9 + $0x350] sm:$0xf]  ;;  %v10562_v9 = vor.u32 %v11543_v12, %v10559_v54 }
 0x48f   :  { %6950 = vmatpush.bf16.msra.mxu3 %v9138_v55  ;;  %v3834_v63 = vsel %vm3833_vm4, %v11667_v1, %v3830_v25  ;;  %v11438_v1 = vld [vmem:[%s17758_s9 + $0x8c4] sm:$0xf]  ;;  %v11267_v33 = vld [vmem:[%s17758_s9 + $0x368] sm:$0xf0]  ;;  %v9750_v55 = vor.u32 %v11340_v51, %v9747_v11  ;;  %v11536_v25 = vld [vmem:[%s17758_s9 + $0xbd4] sm:$0xf] }
 0x490   :  { %v3847_v13 = vmul.f32 %v3846_v39, %v15448_v37  ;;  %v3858_v58 = vmul.f32 %v3857_v44, %v15448_v37  ;;  %v3839_v32 = vsel %vm3836_vm5, %v3838_v26, %v3834_v63  ;;  %6886 = vmatpush.bf16.msrb.mxu2 %v9778_v59  ;;  %v10142_v2 = vor.u32 %v11438_v1, %v10139_v21  ;;  %v11333_v39 = vld [vmem:[%s17758_s9 + $0x57c] sm:$0xf]  ;;  %v9719_v44 = vld [vmem:[%s17758_s9 + $0x594] sm:$0xf0]  ;;  %v10531_v26 = vld [vmem:[%s17758_s9 + $0xbec] sm:$0xf0] }
 0x491   :  { %v6750_v47 = vpop.f32.mrf.mxu3  ;;  %6913 = vmatpush.bf16.msra.mxu0 %v10198_v16  ;;  %v3840_v52 = vmul.f32 %v3839_v32, %v3815_v35  ;;  %v9446_v17 = vor.u32 %v11267_v33, %v9445_v8  ;;  %v9722_v16 = vor.u32 %v11333_v39, %v9719_v44  ;;  %v10118_v35 = vor.u32 %v11435_v5, %v10117_v20  ;;  %v11253_v59 = vld [vmem:[%s17758_s9 + $0x2f8] sm:$0xf0]  ;;  %v10503_v51 = vld [vmem:[%s17758_s9 + $0xbb4] sm:$0xf0]  ;;  %v9361_v1 = vld [vmem:[%s17758_s9 + $0x2a8] sm:$0xf] }
 0x492   :  { %v3859_v31 = vadd.f32 0.014752088, %v3858_v58  ;;  %v3848_v48 = vadd.f32 0.0036580483, %v3847_v13  ;;  %v9417_v58 = vld [vmem:[%s17758_s9 + $0x318] sm:$0xf]  ;;  %v9390_v11 = vor.u32 %v11253_v59, %v9389_v56 }
 0x493   :  { %6951 = vmatpush.bf16.msra.mxu3 %v9110_v19  ;;  %v9013_v4 = vclamps-f32 %v3840_v52, 1.0  ;;  %v11260_v19 = vld [vmem:[%s17758_s9 + $0x330] sm:$0xf0]  ;;  %v10061_v52 = vld [vmem:[%s17758_s9 + $0x820] sm:$0xf] }
 0x494   :  { %v3860_v46 = vmul.f32 %v3859_v31, %v15448_v37  ;;  %v3849_v3 = vmul.f32 %v3848_v48, %v15448_v37  ;;  %6887 = vmatpush.bf16.msrb.mxu2 %v9750_v55  ;;  %v9691_v31 = vld [vmem:[%s17758_s9 + $0x55c] sm:$0xf0]  ;;  %v9418_v48 = vor.u32 %v11260_v19, %v9417_v58  ;;  %v11428_v47 = vld [vmem:[%s17758_s9 + $0x870] sm:$0xf0]  ;;  %v11246_v21 = vld [vmem:[%s17758_s9 + $0x2c0] sm:$0xf0] }
 0x495   :  { %v6761_v22 = vpop.f32.mrf.mxu0  ;;  %6914 = vmatpush.bf16.msra.mxu0 %v10170_v61  ;;  %v3889_v50 = vadd.f32 1.0, %v9013_v4  ;;  %v9694_v32 = vor.u32 %v11326_v6, %v9691_v31  ;;  %v11529_v61 = vld [vmem:[%s17758_s9 + $0xb9c] sm:$0xf]  ;;  %v10090_v40 = vor.u32 %v11428_v47, %v10089_v23  ;;  %v11522_v33 = vld [vmem:[%s17758_s9 + $0xb64] sm:$0xf]  ;;  %v9362_v4 = vor.u32 %v11246_v21, %v9361_v1 }
 0x496   :  { %v3861_v28 = vadd.f32 0.112945676, %v3860_v46  ;;  %v15539_v60 = vadd.f32 %v6761_v22, %v6749_v7  ;;  %v3850_v13 = vadd.f32 0.05243302, %v3849_v3  ;;  %v10506_v3 = vor.u32 %v11529_v61, %v10503_v51  ;;  %v10475_v55 = vld [vmem:[%s17758_s9 + $0xb7c] sm:$0xf0] }
 0x497   :  { %6952 = vmatpush.bf16.msra.mxu3 %v9082_v49  ;;  %v3897_v36 = vmul.f32 %v3889_v50, %v3553_v27  ;;  %v10534_v49 = vor.u32 %v11536_v25, %v10531_v26  ;;  %v11414_v54 = vld [vmem:[%s17758_s9 + $0x800] sm:$0xf0]  ;;  %v10478_v44 = vor.u32 %v11522_v33, %v10475_v55  ;;  %v10447_v27 = vld [vmem:[%s17758_s9 + $0xb44] sm:$0xf0]  ;;  %v10005_v50 = vld [vmem:[%s17758_s9 + $0x7b0] sm:$0xf] }
 0x498   :  { %v3862_v10 = vmul.f32 %v3861_v28, %v15448_v37  ;;  %v3851_v63 = vmul.f32 %v3850_v13, %v15448_v37  ;;  %6888 = vmatpush.bf16.msrb.mxu2 %v9722_v16  ;;  %v11421_v28 = vld [vmem:[%s17758_s9 + $0x838] sm:$0xf0]  ;;  %v11407_v5 = vld [vmem:[%s17758_s9 + $0x7c8] sm:$0xf0]  ;;  %v9305_v13 = vld [vmem:[%s17758_s9 + $0x238] sm:$0xf] }
 0x499   :  { %6915 = vmatpush.bf16.msra.mxu0 %v10142_v2  ;;  %v15582_v18 = vpack.c.bf16 %v3897_v36, %v3897_v36  ;;  %v10062_v8 = vor.u32 %v11421_v28, %v10061_v52  ;;  %v11239_v2 = vld [vmem:[%s17758_s9 + $0x288] sm:$0xf0]  ;;  %v11232_v36 = vld [vmem:[%s17758_s9 + $0x250] sm:$0xf0]  ;;  %v10006_v31 = vor.u32 %v11407_v5, %v10005_v50  ;;  %v11225_v47 = vld [vmem:[%s17758_s9 + $0x218] sm:$0xf0] }
 0x49a   :  { %v3863_v42 = vadd.f32 0.4994258, %v3862_v10  ;;  %v3852_v7 = vadd.f32 0.18741608, %v3851_v63  ;;  %v10033_v10 = vld [vmem:[%s17758_s9 + $0x7e8] sm:$0xf] }
 0x49b   :  { %6953 = vmatpush.bf16.msra.mxu3 %v9054_v29  ;;  %6825 = vmatmul.bf16.vlgmr.msra.gmra.mxu1 %v15582_v18  ;;  %v9333_v29 = vld [vmem:[%s17758_s9 + $0x270] sm:$0xf]  ;;  %v11400_v26 = vld [vmem:[%s17758_s9 + $0x790] sm:$0xf0]  ;;  %v10391_v61 = vld [vmem:[%s17758_s9 + $0xad4] sm:$0xf0] }
 0x49c   :  { %v3864_v0 = vmul.f32 %v3863_v42, %v15448_v37  ;;  %6916 = vmatmul.bf16.vlgmr.msra.gmra.mxu0 %v15362_v34  ;;  %6921 = vmatpush.bf16.msra.mxu1 %v10562_v9  ;;  %v3853_v53 = vmul.f32 %v3852_v7, %v15448_v37  ;;  %v11515_v37 = vld [vmem:[%s17758_s9 + $0xb2c] sm:$0xf]  ;;  %v10419_v9 = vld [vmem:[%s17758_s9 + $0xb0c] sm:$0xf0]  ;;  %v9949_v51 = vld [vmem:[%s17758_s9 + $0x740] sm:$0xf] }
 0x49d   :  { %6960 = vmatpush.bf16.msrb.mxu0 %v9446_v17  ;;  %v6763_v46 = vpop.f32.mrf.mxu0  ;;  %6889 = vmatpush.bf16.msrb.mxu2 %v9694_v32  ;;  %v9334_v17 = vor.u32 %v11239_v2, %v9333_v29  ;;  %v10450_v6 = vor.u32 %v11515_v37, %v10447_v27  ;;  %v9249_v28 = vld [vmem:[%s17758_s9 + $0x1c8] sm:$0xf]  ;;  %v11218_v7 = vld [vmem:[%s17758_s9 + $0x1e0] sm:$0xf0]  ;;  %v10341_v21 = vld [vmem:[%s17758_s9 + $0xa50] sm:$0xf] }
 0x49e   :  { %v15584_v45 = vadd.f32 1.0, %v3864_v0  ;;  %v3854_v58 = vadd.f32 1.1283791, %v3853_v53  ;;  %v9277_v46 = vld [vmem:[%s17758_s9 + $0x200] sm:$0xf] }
 0x49f   :  { %6954 = vmatpush.bf16.msra.mxu3 %v9026_v14  ;;  %v11508_v14 = vld [vmem:[%s17758_s9 + $0xaf4] sm:$0xf]  ;;  %v11494_v1 = vld [vmem:[%s17758_s9 + $0xa84] sm:$0xf]  ;;  %v11599_v55 = vld [vmem:[%s17758_s9 + $0xdcc] sm:$0xf] }
 0x4a0   :  { %11668 = vrcp.f32 %v15584_v45  ;;  %6922 = vmatpush.bf16.msra.mxu1 %v10534_v49  ;;  %v3877_v42 = vand.u32 2147483648, %v15584_v45  ;;  %v3875_v16 = vand.u32 2147483647, %v15584_v45  ;;  %vm3871_vm7 = vweird.f32 %v15584_v45  ;;  %v10363_v53 = vld [vmem:[%s17758_s9 + $0xa9c] sm:$0xf0] }
 0x4a1   :  { %6961 = vmatpush.bf16.msrb.mxu0 %v9418_v48  ;;  %v6774_v12 = vpop.f32.mrf.mxu1  ;;  %v3855_v48 = vmul.f32 %v3854_v58, %v15421_v30  ;;  %v10422_v32 = vor.u32 %v11508_v14, %v10419_v9  ;;  %v11501_v30 = vld [vmem:[%s17758_s9 + $0xabc] sm:$0xf]  ;;  %v9669_v29 = vld [vmem:[%s17758_s9 + $0x510] sm:$0xf]  ;;  %v11323_v2 = vld [vmem:[%s17758_s9 + $0x528] sm:$0xf0] }
 0x4a2   :  { %6955 = vmatmul.bf16.vlgmr.msra.gmra.mxu3 %v14633_v62  ;;  %v15645_v20 = vadd.f32 %v6774_v12, %v15539_v60  ;;  %v10034_v60 = vor.u32 %v11414_v54, %v10033_v10  ;;  %v3878_v25 = vor.u32 1.1754944e-38, %v3877_v42  ;;  %vm3876_vm9 = vcmp.eq.f32.partialorder %v3875_v16, 8.507059e+37  ;;  %v11386_v12 = vld [vmem:[%s17758_s9 + $0x720] sm:$0xf0]  ;;  %v9223_v27 = vld [vmem:[%s17758_s9 + $0x1ac] sm:$0xf0] }
 0x4a3   :  { %6999 = vmatpush.bf16.msrb.mxu3 %v10118_v35  ;;  %v9306_v35 = vor.u32 %v11232_v36, %v9305_v13  ;;  %v10394_v33 = vor.u32 %v11501_v30, %v10391_v61  ;;  %v10313_v50 = vld [vmem:[%s17758_s9 + $0xa18] sm:$0xf]  ;;  %v11484_v42 = vld [vmem:[%s17758_s9 + $0xa30] sm:$0xf0]  ;;  %v10755_v13 = vld [vmem:[%s17758_s9 + $0xdac] sm:$0xf0] }
 0x4a4   :  { %6923 = vmatpush.bf16.msra.mxu1 %v10506_v3  ;;  %v11491_v3 = vld [vmem:[%s17758_s9 + $0xa68] sm:$0xf0]  ;;  %v11592_v5 = vld [vmem:[%s17758_s9 + $0xd94] sm:$0xf]  ;;  %v9641_v36 = vld [vmem:[%s17758_s9 + $0x4d8] sm:$0xf] }
 0x4a5   :  { %6962 = vmatpush.bf16.msrb.mxu0 %v9390_v11  ;;  %v11393_v11 = vld [vmem:[%s17758_s9 + $0x758] sm:$0xf0]  ;;  %v10342_v37 = vor.u32 %v11491_v3, %v10341_v21  ;;  %v10758_v9 = vor.u32 %v11592_v5, %v10755_v13  ;;  %v10257_v30 = vld [vmem:[%s17758_s9 + $0x9a8] sm:$0xf]  ;;  %v11578_v61 = vld [vmem:[%s17758_s9 + $0xd24] sm:$0xf] }
 0x4a6   :  { %v11669_v22 = vpop.eup %11668  ;;  %v9950_v10 = vor.u32 %v11393_v11, %v9949_v51  ;;  %v11201_v14 = vld [vmem:[%s17758_s9 + $0x15c] sm:$0xf]  ;;  %v11187_v21 = vld [vmem:[%s17758_s9 + $0xec] sm:$0xf]  ;;  %v9139_v3 = vld [vmem:[%s17758_s9 + $0x104] sm:$0xf0] }
 0x4a7   :  { %7000 = vmatpush.bf16.msrb.mxu3 %v10090_v40  ;;  %v3867_v15 = vmul.f32 %v11669_v22, %v15584_v45  ;;  %vm3872_vm6 = vweird.f32 %v11669_v22  ;;  %v9977_v45 = vld [vmem:[%s17758_s9 + $0x778] sm:$0xf]  ;;  %v9278_v40 = vor.u32 %v11225_v47, %v9277_v46  ;;  %v11309_v46 = vld [vmem:[%s17758_s9 + $0x4b8] sm:$0xf0]  ;;  %v11288_v13 = vld [vmem:[%s17758_s9 + $0x410] sm:$0xf0] }
 0x4a8   :  { %6924 = vmatpush.bf16.msra.mxu1 %v10478_v44  ;;  %vm3873_vm8 = vmor %vm3871_vm7, %vm3872_vm6  ;;  %v9978_v49 = vor.u32 %v11400_v26, %v9977_v45  ;;  %v11585_v45 = vld [vmem:[%s17758_s9 + $0xd5c] sm:$0xf]  ;;  %v10727_v26 = vld [vmem:[%s17758_s9 + $0xd74] sm:$0xf0] }
 0x4a9   :  { %v3868_v39 = vsub.f32 1.0, %v3867_v15  ;;  %6963 = vmatpush.bf16.msrb.mxu0 %v9362_v4  ;;  %v6776_v63 = vpop.f32.mrf.mxu1  ;;  %v10783_v4 = vld [vmem:[%s17758_s9 + $0xde4] sm:$0xf0]  ;;  %v9250_v15 = vor.u32 %v11218_v7, %v9249_v28  ;;  %v11302_v28 = vld [vmem:[%s17758_s9 + $0x480] sm:$0xf0] }
 0x4aa   :  { %v10786_v44 = vor.u32 %v11599_v55, %v10783_v4  ;;  %v9613_v63 = vld [vmem:[%s17758_s9 + $0x4a0] sm:$0xf]  ;;  %v11463_v55 = vld [vmem:[%s17758_s9 + $0x988] sm:$0xf0]  ;;  %v9529_v5 = vld [vmem:[%s17758_s9 + $0x3f8] sm:$0xf] }
 0x4ab   :  { %7001 = vmatpush.bf16.msrb.mxu3 %v10062_v8  ;;  %v3869_v19 = vmul.f32 %v11669_v22, %v3868_v39  ;;  %6877 = vmatmul.bf16.vlgmr.msrb.gmra.mxu1 %v14831_v24  ;;  %v11208_v39 = vld [vmem:[%s17758_s9 + $0x194] sm:$0xf]  ;;  %v9614_v51 = vor.u32 %v11309_v46, %v9613_v63  ;;  %v11550_v63 = vld [vmem:[%s17758_s9 + $0xc44] sm:$0xf]  ;;  %v10587_v46 = vld [vmem:[%s17758_s9 + $0xc5c] sm:$0xf0] }
 0x4ac   :  { %6925 = vmatpush.bf16.msra.mxu1 %v10450_v6  ;;  %v9226_v16 = vor.u32 %v11208_v39, %v9223_v27  ;;  %v10314_v6 = vor.u32 %v11484_v42, %v10313_v50  ;;  %v10201_v39 = vld [vmem:[%s17758_s9 + $0x938] sm:$0xf] }
 0x4ad   :  { %v3870_v0 = vadd.f32 %v11669_v22, %v3869_v19  ;;  %6964 = vmatpush.bf16.msrb.mxu0 %v9334_v17  ;;  %v10366_v17 = vor.u32 %v11494_v1, %v10363_v53  ;;  %v9670_v19 = vor.u32 %v11323_v2, %v9669_v29  ;;  %v9557_v53 = vld [vmem:[%s17758_s9 + $0x430] sm:$0xf]  ;;  %v11564_v2 = vld [vmem:[%s17758_s9 + $0xcb4] sm:$0xf] }
 0x4ae   :  { %v9111_v29 = vld [vmem:[%s17758_s9 + $0xcc] sm:$0xf0] }
 0x4af   :  { %7002 = vmatpush.bf16.msrb.mxu3 %v10034_v60  ;;  %v3874_v23 = vsel %vm3873_vm8, %v11669_v22, %v3870_v0  ;;  %v3554_v22 = vmul.f32 0.5, %v15411_v43  ;;  %v9921_v43 = vld [vmem:[%s17758_s9 + $0x708] sm:$0xf]  ;;  %v11316_v0 = vld [vmem:[%s17758_s9 + $0x4f0] sm:$0xf0] }
 0x4b0   :  { %v3879_v56 = vsel %vm3876_vm9, %v3878_v25, %v3874_v23  ;;  %6926 = vmatpush.bf16.msra.mxu1 %v10422_v32  ;;  %v9922_v58 = vor.u32 %v11386_v12, %v9921_v43  ;;  %v9195_v25 = vld [vmem:[%s17758_s9 + $0x174] sm:$0xf0]  ;;  %v9167_v32 = vld [vmem:[%s17758_s9 + $0x13c] sm:$0xf0] }
 0x4b1   :  { %v3880_v59 = vmul.f32 %v3879_v56, %v3855_v48  ;;  %6965 = vmatpush.bf16.msrb.mxu0 %v9306_v35  ;;  %v11477_v35 = vld [vmem:[%s17758_s9 + $0x9f8] sm:$0xf0]  ;;  %v9642_v48 = vor.u32 %v11316_v0, %v9641_v36  ;;  %v9198_v23 = vor.u32 %v11201_v14, %v9195_v25  ;;  %v11194_v56 = vld [vmem:[%s17758_s9 + $0x124] sm:$0xf]  ;;  %v10615_v0 = vld [vmem:[%s17758_s9 + $0xc94] sm:$0xf0] }
 0x4b2   :  { %v9170_v11 = vor.u32 %v11194_v56, %v9167_v32  ;;  %v11557_v36 = vld [vmem:[%s17758_s9 + $0xc7c] sm:$0xf]  ;;  %v11442_v56 = vld [vmem:[%s17758_s9 + $0x8e0] sm:$0xf0] }
 0x4b3   :  { %7003 = vmatpush.bf16.msrb.mxu3 %v10006_v31  ;;  %v9014_v52 = vclamps-f32 %v3880_v59, 1.0  ;;  %v10285_v31 = vld [vmem:[%s17758_s9 + $0x9e0] sm:$0xf]  ;;  %v10730_v59 = vor.u32 %v11585_v45, %v10727_v26  ;;  %v11449_v14 = vld [vmem:[%s17758_s9 + $0x918] sm:$0xf0]  ;;  %v10618_v26 = vor.u32 %v11557_v36, %v10615_v0 }
 0x4b4   :  { %6927 = vmatpush.bf16.msra.mxu1 %v10394_v33  ;;  %v10286_v47 = vor.u32 %v11477_v35, %v10285_v31  ;;  %v10229_v33 = vld [vmem:[%s17758_s9 + $0x970] sm:$0xf]  ;;  %v9501_v31 = vld [vmem:[%s17758_s9 + $0x3c0] sm:$0xf]  ;;  %v11281_v35 = vld [vmem:[%s17758_s9 + $0x3d8] sm:$0xf0] }
 0x4b5   :  { %v3890_v8 = vadd.f32 1.0, %v9014_v52  ;;  %6966 = vmatpush.bf16.msrb.mxu0 %v9278_v40  ;;  %v10699_v40 = vld [vmem:[%s17758_s9 + $0xd3c] sm:$0xf0]  ;;  %v9585_v52 = vld [vmem:[%s17758_s9 + $0x468] sm:$0xf]  ;;  %v10230_v12 = vor.u32 %v11463_v55, %v10229_v33 }
 0x4b6   :  { %v10702_v1 = vor.u32 %v11578_v61, %v10699_v40  ;;  %v9586_v4 = vor.u32 %v11302_v28, %v9585_v52  ;;  %v11166_v45 = vld [vmem:[%s17758_s9 + $0x44] sm:$0xf]  ;;  %v11264_v61 = vld [vmem:[%s17758_s9 + $0x354] sm:$0xf]  ;;  %v9447_v40 = vld [vmem:[%s17758_s9 + $0x36c] sm:$0xf0] }
 0x4b7   :  { %7004 = vmatpush.bf16.msrb.mxu3 %v9978_v49  ;;  %v3898_v54 = vmul.f32 %v3890_v8, %v3554_v22  ;;  %v11470_v49 = vld [vmem:[%s17758_s9 + $0x9c0] sm:$0xf0]  ;;  %v11571_v22 = vld [vmem:[%s17758_s9 + $0xcec] sm:$0xf]  ;;  %v10671_v8 = vld [vmem:[%s17758_s9 + $0xd04] sm:$0xf0]  ;;  %v9450_v33 = vor.u32 %v11264_v61, %v9447_v40 }
 0x4b8   :  { %6928 = vmatpush.bf16.msra.mxu1 %v10366_v17  ;;  %v10258_v7 = vor.u32 %v11470_v49, %v10257_v30  ;;  %v10674_v43 = vor.u32 %v11571_v22, %v10671_v8  ;;  %v9502_v30 = vor.u32 %v11281_v35, %v9501_v31  ;;  %v11379_v49 = vld [vmem:[%s17758_s9 + $0x6e8] sm:$0xf0]  ;;  %v11274_v52 = vld [vmem:[%s17758_s9 + $0x3a0] sm:$0xf0]  ;;  %v11432_v55 = vld [vmem:[%s17758_s9 + $0x894] sm:$0xf] }
 0x4b9   :  { %v15749_v60 = vpack.c.bf16 %v3898_v54, %v3898_v54  ;;  %6967 = vmatpush.bf16.msrb.mxu0 %v9250_v15  ;;  %v11295_v15 = vld [vmem:[%s17758_s9 + $0x448] sm:$0xf0]  ;;  %v11180_v54 = vld [vmem:[%s17758_s9 + $0xb4] sm:$0xf]  ;;  %v11250_v36 = vld [vmem:[%s17758_s9 + $0x2e4] sm:$0xf] }
 0x4ba   :  { %v9558_v50 = vor.u32 %v11295_v15, %v9557_v53  ;;  %v9114_v17 = vor.u32 %v11180_v54, %v9111_v29  ;;  %v11159_v28 = vld [vmem:[%s17758_s9 + $0xc] sm:$0xf]  ;;  %v10537_v54 = vld [vmem:[%s17758_s9 + $0xbd8] sm:$0xf]  ;;  %v9391_v0 = vld [vmem:[%s17758_s9 + $0x2fc] sm:$0xf0] }
 0x4bb   :  { %7005 = vmatpush.bf16.msrb.mxu3 %v9950_v10  ;;  %6838 = vmatmul.bf16.vlgmr.msra.gmra.mxu2 %v15749_v60  ;;  %v9142_v10 = vor.u32 %v11187_v21, %v9139_v3  ;;  %v9027_v21 = vld [vmem:[%s17758_s9 + $0x24] sm:$0xf0]  ;;  %v10565_v3 = vld [vmem:[%s17758_s9 + $0xc10] sm:$0xf]  ;;  %v11547_v22 = vld [vmem:[%s17758_s9 + $0xc28] sm:$0xf0]  ;;  %v9394_v31 = vor.u32 %v11250_v36, %v9391_v0 }
 0x4bc   :  { %6934 = vmatpush.bf16.msra.mxu2 %v10786_v44  ;;  %6968 = vmatmul.bf16.vlgmr.msrb.gmra.mxu0 %v14741_v41  ;;  %v11456_v44 = vld [vmem:[%s17758_s9 + $0x950] sm:$0xf0]  ;;  %v9030_v53 = vor.u32 %v11159_v28, %v9027_v21  ;;  %v10566_v15 = vor.u32 %v11547_v22, %v10565_v3  ;;  %v9809_v35 = vld [vmem:[%s17758_s9 + $0x628] sm:$0xf]  ;;  %v11351_v61 = vld [vmem:[%s17758_s9 + $0x608] sm:$0xf0] }
 0x4bd   :  { %7012 = vmatpush.bf16.msra.mxu0 %v10342_v37  ;;  %6973 = vmatpush.bf16.msrb.mxu1 %v9670_v19  ;;  %v10643_v37 = vld [vmem:[%s17758_s9 + $0xccc] sm:$0xf0]  ;;  %v10202_v19 = vor.u32 %v11456_v44, %v10201_v39  ;;  %v9419_v39 = vld [vmem:[%s17758_s9 + $0x334] sm:$0xf0]  ;;  %v11425_v44 = vld [vmem:[%s17758_s9 + $0x85c] sm:$0xf] }
 0x4be   :  { %6929 = vmatmul.bf16.vlgmr.msra.gmra.mxu1 %v15582_v18  ;;  %v10453_v40 = vld [vmem:[%s17758_s9 + $0xb30] sm:$0xf]  ;;  %v11330_v36 = vld [vmem:[%s17758_s9 + $0x560] sm:$0xf0] }
 0x4bf   :  { %7006 = vmatpush.bf16.msrb.mxu3 %v9922_v58  ;;  %v10646_v58 = vor.u32 %v11564_v2, %v10643_v37  ;;  %v11540_v2 = vld [vmem:[%s17758_s9 + $0xbf0] sm:$0xf0]  ;;  %v11257_v37 = vld [vmem:[%s17758_s9 + $0x31c] sm:$0xf]  ;;  %v9335_v28 = vld [vmem:[%s17758_s9 + $0x28c] sm:$0xf0] }
 0x4c0   :  { %6935 = vmatpush.bf16.msra.mxu2 %v10758_v9  ;;  %v9530_v9 = vor.u32 %v11288_v13, %v9529_v5  ;;  %v9422_v5 = vor.u32 %v11257_v37, %v9419_v39  ;;  %v9837_v13 = vld [vmem:[%s17758_s9 + $0x660] sm:$0xf] }
 0x4c1   :  { %7013 = vmatpush.bf16.msra.mxu0 %v10314_v6  ;;  %6974 = vmatpush.bf16.msrb.mxu1 %v9642_v48  ;;  %v10173_v6 = vld [vmem:[%s17758_s9 + $0x900] sm:$0xf] }
 0x4c2   :  { %7007 = vmatmul.bf16.vlgmr.msrb.gmra.mxu3 %v15185_v57  ;;  %v10174_v48 = vor.u32 %v11449_v14, %v10173_v6  ;;  %v11418_v6 = vld [vmem:[%s17758_s9 + $0x824] sm:$0xf]  ;;  %v10063_v14 = vld [vmem:[%s17758_s9 + $0x83c] sm:$0xf0] }
 0x4c3   :  { %7051 = vmatpush.bf16.msra.mxu3 %v9226_v16  ;;  %v6787_v27 = vpop.f32.mrf.mxu2  ;;  %v9083_v16 = vld [vmem:[%s17758_s9 + $0x94] sm:$0xf0] }
 0x4c4   :  { %6936 = vmatpush.bf16.msra.mxu2 %v10730_v59  ;;  %v15858_v42 = vadd.f32 %v6787_v27, %v15645_v20  ;;  %v11173_v20 = vld [vmem:[%s17758_s9 + $0x7c] sm:$0xf]  ;;  %v9893_v59 = vld [vmem:[%s17758_s9 + $0x6d0] sm:$0xf]  ;;  %v10091_v27 = vld [vmem:[%s17758_s9 + $0x874] sm:$0xf0] }
 0x4c5   :  { %7014 = vmatpush.bf16.msra.mxu0 %v10286_v47  ;;  %6975 = vmatpush.bf16.msrb.mxu1 %v9614_v51  ;;  %v9086_v25 = vor.u32 %v11173_v20, %v9083_v16  ;;  %v10145_v47 = vld [vmem:[%s17758_s9 + $0x8c8] sm:$0xf]  ;;  %v9894_v8 = vor.u32 %v11379_v49, %v9893_v59  ;;  %v10094_v20 = vor.u32 %v11425_v44, %v10091_v27  ;;  %v11533_v16 = vld [vmem:[%s17758_s9 + $0xbb8] sm:$0xf0]  ;;  %v9781_v49 = vld [vmem:[%s17758_s9 + $0x5f0] sm:$0xf] }
 0x4c6   :  { %v9782_v21 = vor.u32 %v11351_v61, %v9781_v49  ;;  %v9725_v44 = vld [vmem:[%s17758_s9 + $0x580] sm:$0xf]  ;;  %v11337_v27 = vld [vmem:[%s17758_s9 + $0x598] sm:$0xf0]  ;;  %v9229_v61 = vld [vmem:[%s17758_s9 + $0x198] sm:$0xf] }
 0x4c7   :  { %7052 = vmatpush.bf16.msra.mxu3 %v9198_v23  ;;  %v9055_v23 = vld [vmem:[%s17758_s9 + $0x5c] sm:$0xf0] }
 0x4c8   :  { %6937 = vmatpush.bf16.msra.mxu2 %v10702_v1  ;;  %v9058_v51 = vor.u32 %v11166_v45, %v9055_v23  ;;  %v10146_v1 = vor.u32 %v11442_v56, %v10145_v47  ;;  %v11358_v45 = vld [vmem:[%s17758_s9 + $0x640] sm:$0xf0]  ;;  %v11411_v47 = vld [vmem:[%s17758_s9 + $0x7ec] sm:$0xf]  ;;  %v10035_v56 = vld [vmem:[%s17758_s9 + $0x804] sm:$0xf0] }
 0x4c9   :  { %7015 = vmatpush.bf16.msra.mxu0 %v10258_v7  ;;  %6976 = vmatpush.bf16.msrb.mxu1 %v9586_v4  ;;  %v10590_v7 = vor.u32 %v11550_v63, %v10587_v46  ;;  %v10119_v4 = vld [vmem:[%s17758_s9 + $0x8ac] sm:$0xf0]  ;;  %v11526_v23 = vld [vmem:[%s17758_s9 + $0xb80] sm:$0xf0]  ;;  %v11243_v63 = vld [vmem:[%s17758_s9 + $0x2ac] sm:$0xf]  ;;  %v9810_v59 = vor.u32 %v11358_v45, %v9809_v35 }
 0x4ca   :  { %v10122_v29 = vor.u32 %v11432_v55, %v10119_v4  ;;  %v9363_v46 = vld [vmem:[%s17758_s9 + $0x2c4] sm:$0xf0]  ;;  %v10425_v55 = vld [vmem:[%s17758_s9 + $0xaf8] sm:$0xf]  ;;  %v11383_v45 = vld [vmem:[%s17758_s9 + $0x70c] sm:$0xf] }
 0x4cb   :  { %7053 = vmatpush.bf16.msra.mxu3 %v9170_v11  ;;  %6890 = vmatmul.bf16.vlgmr.msrb.gmra.mxu2 %v15002_v38  ;;  %v6789_v32 = vpop.f32.mrf.mxu2  ;;  %v9473_v11 = vld [vmem:[%s17758_s9 + $0x388] sm:$0xf] }
 0x4cc   :  { %6938 = vmatpush.bf16.msra.mxu2 %v10674_v43  ;;  %v9865_v43 = vld [vmem:[%s17758_s9 + $0x698] sm:$0xf]  ;;  %v9251_v35 = vld [vmem:[%s17758_s9 + $0x1e4] sm:$0xf0] }
 0x4cd   :  { %7016 = vmatpush.bf16.msra.mxu0 %v10230_v12  ;;  %6977 = vmatpush.bf16.msrb.mxu1 %v9558_v50  ;;  %v11372_v12 = vld [vmem:[%s17758_s9 + $0x6b0] sm:$0xf0] }
 0x4ce   :  { %v9866_v50 = vor.u32 %v11372_v12, %v9865_v43  ;;  %v11397_v43 = vld [vmem:[%s17758_s9 + $0x77c] sm:$0xf]  ;;  %v9979_v12 = vld [vmem:[%s17758_s9 + $0x794] sm:$0xf0] }
 0x4cf   :  { %7054 = vmatpush.bf16.msra.mxu3 %v9142_v10  ;;  %v9474_v10 = vor.u32 %v11274_v52, %v9473_v11  ;;  %v11519_v11 = vld [vmem:[%s17758_s9 + $0xb48] sm:$0xf0]  ;;  %v11236_v52 = vld [vmem:[%s17758_s9 + $0x274] sm:$0xf] }
 0x4d0   :  { %6939 = vmatpush.bf16.msra.mxu2 %v10646_v58  ;;  %v11365_v58 = vld [vmem:[%s17758_s9 + $0x678] sm:$0xf0]  ;;  %v10454_v3 = vor.u32 %v11519_v11, %v10453_v40  ;;  %v9338_v22 = vor.u32 %v11236_v52, %v9335_v28  ;;  %v11212_v40 = vld [vmem:[%s17758_s9 + $0x1b0] sm:$0xf0] }
 0x4d1   :  { %7017 = vmatpush.bf16.msra.mxu0 %v10202_v19  ;;  %6978 = vmatpush.bf16.msrb.mxu1 %v9530_v9  ;;  %v10509_v19 = vld [vmem:[%s17758_s9 + $0xba0] sm:$0xf]  ;;  %v9838_v9 = vor.u32 %v11365_v58, %v9837_v13  ;;  %v11390_v58 = vld [vmem:[%s17758_s9 + $0x744] sm:$0xf] }
 0x4d2   :  { %v9279_v13 = vld [vmem:[%s17758_s9 + $0x21c] sm:$0xf0] }
 0x4d3   :  { %7055 = vmatpush.bf16.msra.mxu3 %v9114_v17  ;;  %v10538_v17 = vor.u32 %v11540_v2, %v10537_v54 }
 0x4d4   :  { %6940 = vmatpush.bf16.msra.mxu2 %v10618_v26  ;;  %v10481_v26 = vld [vmem:[%s17758_s9 + $0xb68] sm:$0xf] }
 0x4d5   :  { %7018 = vmatpush.bf16.msra.mxu0 %v10174_v48  ;;  %6979 = vmatpush.bf16.msrb.mxu1 %v9502_v30  ;;  %v10066_v48 = vor.u32 %v11418_v6, %v10063_v14  ;;  %v10482_v32 = vor.u32 %v11526_v23, %v10481_v26  ;;  %v9366_v30 = vor.u32 %v11243_v63, %v9363_v46  ;;  %v10369_v14 = vld [vmem:[%s17758_s9 + $0xa88] sm:$0xf]  ;;  %v11603_v23 = vld [vmem:[%s17758_s9 + $0xde8] sm:$0xf0]  ;;  %v11320_v63 = vld [vmem:[%s17758_s9 + $0x514] sm:$0xf] }
 0x4d6   :  { %v9923_v26 = vld [vmem:[%s17758_s9 + $0x724] sm:$0xf0] }
 0x4d7   :  { %7056 = vmatpush.bf16.msra.mxu3 %v9086_v25  ;;  %v10510_v25 = vor.u32 %v11533_v16, %v10509_v19  ;;  %v9951_v19 = vld [vmem:[%s17758_s9 + $0x75c] sm:$0xf0]  ;;  %v9697_v16 = vld [vmem:[%s17758_s9 + $0x548] sm:$0xf] }
 0x4d8   :  { %6941 = vmatpush.bf16.msra.mxu2 %v10590_v7  ;;  %v11404_v7 = vld [vmem:[%s17758_s9 + $0x7b4] sm:$0xf] }
 0x4d9   :  { %7019 = vmatpush.bf16.msra.mxu0 %v10146_v1  ;;  %6980 = vmatpush.bf16.msrb.mxu1 %v9474_v10  ;;  %v10007_v1 = vld [vmem:[%s17758_s9 + $0x7cc] sm:$0xf0]  ;;  %v11512_v10 = vld [vmem:[%s17758_s9 + $0xb10] sm:$0xf0] }
 0x4da   :  { %v10010_v4 = vor.u32 %v11404_v7, %v10007_v1  ;;  %v10426_v37 = vor.u32 %v11512_v10, %v10425_v55  ;;  %v10761_v7 = vld [vmem:[%s17758_s9 + $0xd98] sm:$0xf]  ;;  %v11596_v1 = vld [vmem:[%s17758_s9 + $0xdb0] sm:$0xf0]  ;;  %v9201_v55 = vld [vmem:[%s17758_s9 + $0x160] sm:$0xf] }
 0x4db   :  { %7057 = vmatpush.bf16.msra.mxu3 %v9058_v51  ;;  %6942 = vmatmul.bf16.vlgmr.msra.gmra.mxu2 %v15749_v60  ;;  %v10038_v51 = vor.u32 %v11411_v47, %v10035_v56  ;;  %v9698_v47 = vor.u32 %v11330_v36, %v9697_v16  ;;  %v9671_v56 = vld [vmem:[%s17758_s9 + $0x52c] sm:$0xf0]  ;;  %v10762_v10 = vor.u32 %v11596_v1, %v10761_v7  ;;  %v11299_v16 = vld [vmem:[%s17758_s9 + $0x46c] sm:$0xf]  ;;  %v9531_v1 = vld [vmem:[%s17758_s9 + $0x414] sm:$0xf0] }
 0x4dc   :  { %6986 = vmatpush.bf16.msrb.mxu2 %v9894_v8  ;;  %7020 = vmatmul.bf16.vlgmr.msra.gmra.mxu0 %v15362_v34  ;;  %v9753_v8 = vld [vmem:[%s17758_s9 + $0x5b8] sm:$0xf]  ;;  %v9674_v52 = vor.u32 %v11320_v63, %v9671_v56  ;;  %v11460_v56 = vld [vmem:[%s17758_s9 + $0x974] sm:$0xf] }
 0x4dd   :  { %7064 = vmatpush.bf16.msrb.mxu0 %v9450_v33  ;;  %7025 = vmatpush.bf16.msra.mxu1 %v10566_v15  ;;  %v11344_v33 = vld [vmem:[%s17758_s9 + $0x5d0] sm:$0xf0]  ;;  %v9307_v15 = vld [vmem:[%s17758_s9 + $0x254] sm:$0xf0] }
 0x4de   :  { %6981 = vmatmul.bf16.vlgmr.msrb.gmra.mxu1 %v14831_v24 }
 0x4df   :  { %7058 = vmatpush.bf16.msra.mxu3 %v9030_v53  ;;  %v11229_v53 = vld [vmem:[%s17758_s9 + $0x23c] sm:$0xf] }
 0x4e0   :  { %6987 = vmatpush.bf16.msrb.mxu2 %v9866_v50  ;;  %v9310_v39 = vor.u32 %v11229_v53, %v9307_v15  ;;  %v10397_v50 = vld [vmem:[%s17758_s9 + $0xac0] sm:$0xf] }
 0x4e1   :  { %7026 = vmatpush.bf16.msra.mxu1 %v10538_v17  ;;  %7065 = vmatpush.bf16.msrb.mxu0 %v9422_v5  ;;  %v9982_v17 = vor.u32 %v11397_v43, %v9979_v12  ;;  %v11222_v5 = vld [vmem:[%s17758_s9 + $0x204] sm:$0xf]  ;;  %v10733_v43 = vld [vmem:[%s17758_s9 + $0xd60] sm:$0xf]  ;;  %v11589_v12 = vld [vmem:[%s17758_s9 + $0xd78] sm:$0xf0] }
 0x4e2   :  { %7059 = vmatmul.bf16.vlgmr.msra.gmra.mxu3 %v14633_v62  ;;  %v9282_v6 = vor.u32 %v11222_v5, %v9279_v13 }
 0x4e3   :  { %7103 = vmatpush.bf16.msrb.mxu3 %v10122_v29  ;;  %v9754_v29 = vor.u32 %v11344_v33, %v9753_v8  ;;  %v11481_v8 = vld [vmem:[%s17758_s9 + $0xa1c] sm:$0xf]  ;;  %v10315_v33 = vld [vmem:[%s17758_s9 + $0xa34] sm:$0xf0] }
 0x4e4   :  { %6988 = vmatpush.bf16.msrb.mxu2 %v9838_v9  ;;  %v6800_v54 = vpop.f32.mrf.mxu3  ;;  %v11498_v9 = vld [vmem:[%s17758_s9 + $0xaa0] sm:$0xf0]  ;;  %v10318_v15 = vor.u32 %v11481_v8, %v10315_v33  ;;  %v11177_v8 = vld [vmem:[%s17758_s9 + $0x98] sm:$0xf0] }
 0x4e5   :  { %7027 = vmatpush.bf16.msra.mxu1 %v10510_v25  ;;  %7066 = vmatpush.bf16.msrb.mxu0 %v9394_v31  ;;  %v16070_v2 = vadd.f32 %v6800_v54, %v15858_v42  ;;  %v11505_v42 = vld [vmem:[%s17758_s9 + $0xad8] sm:$0xf0]  ;;  %v11215_v25 = vld [vmem:[%s17758_s9 + $0x1cc] sm:$0xf]  ;;  %v9954_v31 = vor.u32 %v11390_v58, %v9951_v19  ;;  %v11306_v54 = vld [vmem:[%s17758_s9 + $0x4a4] sm:$0xf] }
 0x4e6   :  { %v10398_v0 = vor.u32 %v11505_v42, %v10397_v50  ;;  %v9254_v49 = vor.u32 %v11215_v25, %v9251_v35  ;;  %v9173_v50 = vld [vmem:[%s17758_s9 + $0x128] sm:$0xf]  ;;  %v10734_v42 = vor.u32 %v11589_v12, %v10733_v43  ;;  %v11191_v25 = vld [vmem:[%s17758_s9 + $0x108] sm:$0xf0]  ;;  %v16275_v33 = vld [vmem:[%s17759_s10] sm:$0x7f] }
 0x4e7   :  { %7104 = vmatpush.bf16.msrb.mxu3 %v10094_v20  ;;  %v9726_v20 = vor.u32 %v11337_v27, %v9725_v44  ;;  %v11474_v44 = vld [vmem:[%s17758_s9 + $0x9e4] sm:$0xf]  ;;  %v10287_v27 = vld [vmem:[%s17758_s9 + $0x9fc] sm:$0xf0]  ;;  %v10705_v19 = vld [vmem:[%s17758_s9 + $0xd28] sm:$0xf] }
 0x4e8   :  { %6989 = vmatpush.bf16.msrb.mxu2 %v9810_v59  ;;  %v11488_v59 = vld [vmem:[%s17758_s9 + $0xa54] sm:$0xf]  ;;  %v10290_v13 = vor.u32 %v11474_v44, %v10287_v27  ;;  %v11561_v43 = vld [vmem:[%s17758_s9 + $0xc98] sm:$0xf0]  ;;  %v11278_v12 = vld [vmem:[%s17758_s9 + $0x3c4] sm:$0xf] }
 0x4e9   :  { %7028 = vmatpush.bf16.msra.mxu1 %v10482_v32  ;;  %7067 = vmatpush.bf16.msrb.mxu0 %v9366_v30  ;;  %v10343_v32 = vld [vmem:[%s17758_s9 + $0xa6c] sm:$0xf0]  ;;  %v10370_v30 = vor.u32 %v11498_v9, %v10369_v14  ;;  %v10259_v14 = vld [vmem:[%s17758_s9 + $0x9c4] sm:$0xf0]  ;;  %v11446_v44 = vld [vmem:[%s17758_s9 + $0x904] sm:$0xf] }
 0x4ea   :  { %v10346_v28 = vor.u32 %v11488_v59, %v10343_v32  ;;  %v9145_v9 = vld [vmem:[%s17758_s9 + $0xf0] sm:$0xf]  ;;  %v9117_v32 = vld [vmem:[%s17758_s9 + $0xb8] sm:$0xf]  ;;  %v10175_v27 = vld [vmem:[%s17758_s9 + $0x91c] sm:$0xf0] }
 0x4eb   :  { %7105 = vmatpush.bf16.msrb.mxu3 %v10066_v48  ;;  %v10789_v48 = vld [vmem:[%s17758_s9 + $0xdd0] sm:$0xf] }
 0x4ec   :  { %6990 = vmatpush.bf16.msrb.mxu2 %v9782_v21  ;;  %v6802_v46 = vpop.f32.mrf.mxu3  ;;  %v10790_v11 = vor.u32 %v11603_v23, %v10789_v48  ;;  %v11313_v21 = vld [vmem:[%s17758_s9 + $0x4dc] sm:$0xf]  ;;  %v11575_v48 = vld [vmem:[%s17758_s9 + $0xd08] sm:$0xf0]  ;;  %v11292_v23 = vld [vmem:[%s17758_s9 + $0x434] sm:$0xf] }
 0x4ed   :  { %7029 = vmatpush.bf16.msra.mxu1 %v10454_v3  ;;  %7068 = vmatpush.bf16.msrb.mxu0 %v9338_v22  ;;  %v9230_v3 = vor.u32 %v11212_v40, %v9229_v61  ;;  %v9643_v22 = vld [vmem:[%s17758_s9 + $0x4f4] sm:$0xf0]  ;;  %v9146_v46 = vor.u32 %v11191_v25, %v9145_v9  ;;  %v10231_v59 = vld [vmem:[%s17758_s9 + $0x98c] sm:$0xf0]  ;;  %v10147_v25 = vld [vmem:[%s17758_s9 + $0x8e4] sm:$0xf0] }
 0x4ee   :  { %v9646_v53 = vor.u32 %v11313_v21, %v9643_v22  ;;  %v10234_v40 = vor.u32 %v11460_v56, %v10231_v59  ;;  %v11453_v21 = vld [vmem:[%s17758_s9 + $0x93c] sm:$0xf]  ;;  %v9089_v22 = vld [vmem:[%s17758_s9 + $0x80] sm:$0xf] }
 0x4ef   :  { %7106 = vmatpush.bf16.msrb.mxu3 %v10038_v51  ;;  %v9926_v51 = vor.u32 %v11383_v45, %v9923_v26  ;;  %v10677_v26 = vld [vmem:[%s17758_s9 + $0xcf0] sm:$0xf] }
 0x4f0   :  { %6991 = vmatpush.bf16.msrb.mxu2 %v9754_v29 }
 0x4f1   :  { %7030 = vmatpush.bf16.msra.mxu1 %v10426_v37  ;;  %7069 = vmatpush.bf16.msrb.mxu0 %v9310_v39  ;;  %v9615_v39 = vld [vmem:[%s17758_s9 + $0x4bc] sm:$0xf0] }
 0x4f2   :  { %v9618_v5 = vor.u32 %v11306_v54, %v9615_v39  ;;  %v9503_v39 = vld [vmem:[%s17758_s9 + $0x3dc] sm:$0xf0] }
 0x4f3   :  { %7107 = vmatpush.bf16.msrb.mxu3 %v10010_v4  ;;  %v11205_v4 = vld [vmem:[%s17758_s9 + $0x178] sm:$0xf0] }
 0x4f4   :  { %6992 = vmatpush.bf16.msrb.mxu2 %v9726_v20  ;;  %v16177_v29 = vpop.f32.mrf.mxu3  ;;  %v9202_v37 = vor.u32 %v11205_v4, %v9201_v55  ;;  %v11582_v20 = vld [vmem:[%s17758_s9 + $0xd40] sm:$0xf0]  ;;  %v4422_v55 = vperm.slane %v16275_v33, 1 }
 0x4f5   :  { %7031 = vmatpush.bf16.msra.mxu1 %v10398_v0  ;;  %7070 = vmatpush.bf16.msrb.mxu0 %v9282_v6  ;;  %v9587_v0 = vld [vmem:[%s17758_s9 + $0x484] sm:$0xf0]  ;;  %v11467_v6 = vld [vmem:[%s17758_s9 + $0x9ac] sm:$0xf] }
 0x4f6   :  { %v9590_v35 = vor.u32 %v11299_v16, %v9587_v0  ;;  %v10262_v45 = vor.u32 %v11467_v6, %v10259_v14  ;;  %v10178_v16 = vor.u32 %v11446_v44, %v10175_v27  ;;  %v11271_v0 = vld [vmem:[%s17758_s9 + $0x38c] sm:$0xf]  ;;  %v10511_v44 = vld [vmem:[%s17758_s9 + $0xbbc] sm:$0xf0]  ;;  %v9397_v27 = vld [vmem:[%s17758_s9 + $0x2e8] sm:$0xf] }
 0x4f7   :  { %7108 = vmatpush.bf16.msrb.mxu3 %v9982_v17  ;;  %v11198_v17 = vld [vmem:[%s17758_s9 + $0x140] sm:$0xf0]  ;;  %v11439_v6 = vld [vmem:[%s17758_s9 + $0x8cc] sm:$0xf] }
 0x4f8   :  { %6993 = vmatpush.bf16.msrb.mxu2 %v9698_v47  ;;  %v9174_v36 = vor.u32 %v11198_v17, %v9173_v50  ;;  %v9559_v47 = vld [vmem:[%s17758_s9 + $0x44c] sm:$0xf0]  ;;  %v9061_v50 = vld [vmem:[%s17758_s9 + $0x48] sm:$0xf]  ;;  %v11170_v17 = vld [vmem:[%s17758_s9 + $0x60] sm:$0xf0]  ;;  %v10150_v59 = vor.u32 %v11439_v6, %v10147_v25 }
 0x4f9   :  { %7032 = vmatpush.bf16.msra.mxu1 %v10370_v30  ;;  %7071 = vmatpush.bf16.msrb.mxu0 %v9254_v49  ;;  %v16198_v58 = vpop.f32.mrf.mxu0  ;;  %v11184_v30 = vld [vmem:[%s17758_s9 + $0xd0] sm:$0xf0]  ;;  %v10678_v49 = vor.u32 %v11575_v48, %v10677_v26  ;;  %v9562_v61 = vor.u32 %v11292_v23, %v9559_v47  ;;  %v9062_v14 = vor.u32 %v11170_v17, %v9061_v50  ;;  %v9895_v26 = vld [vmem:[%s17758_s9 + $0x6ec] sm:$0xf0]  ;;  %v11254_v50 = vld [vmem:[%s17758_s9 + $0x300] sm:$0xf0] }
 0x4fa   :  { %v9118_v7 = vor.u32 %v11184_v30, %v9117_v32  ;;  %v11544_v48 = vld [vmem:[%s17758_s9 + $0xc14] sm:$0xf]  ;;  %v10125_v32 = vld [vmem:[%s17758_s9 + $0x898] sm:$0xf]  ;;  %v10069_v17 = vld [vmem:[%s17758_s9 + $0x828] sm:$0xf] }
 0x4fb   :  { %7109 = vmatpush.bf16.msrb.mxu3 %v9954_v31  ;;  %6994 = vmatmul.bf16.vlgmr.msrb.gmra.mxu2 %v15002_v38  ;;  %v10706_v31 = vor.u32 %v11582_v20, %v10705_v19  ;;  %v11554_v19 = vld [vmem:[%s17758_s9 + $0xc60] sm:$0xf0]  ;;  %v9506_v20 = vor.u32 %v11278_v12, %v9503_v39  ;;  %v11268_v47 = vld [vmem:[%s17758_s9 + $0x370] sm:$0xf0]  ;;  %v9839_v12 = vld [vmem:[%s17758_s9 + $0x67c] sm:$0xf0] }
 0x4fc   :  { %7038 = vmatpush.bf16.msra.mxu2 %v10790_v11  ;;  %7033 = vmatmul.bf16.vlgmr.msra.gmra.mxu1 %v15582_v18  ;;  %v6854_v63 = vpop.f32.mrf.mxu3  ;;  %v10649_v11 = vld [vmem:[%s17758_s9 + $0xcb8] sm:$0xf]  ;;  %v11436_v30 = vld [vmem:[%s17758_s9 + $0x8b0] sm:$0xf0]  ;;  %v9369_v6 = vld [vmem:[%s17758_s9 + $0x2b0] sm:$0xf] }
 0x4fd   :  { %7077 = vmatpush.bf16.msrb.mxu1 %v9674_v52  ;;  %7116 = vmatpush.bf16.msra.mxu0 %v10346_v28  ;;  %v11568_v52 = vld [vmem:[%s17758_s9 + $0xcd0] sm:$0xf0]  ;;  %v11285_v28 = vld [vmem:[%s17758_s9 + $0x3fc] sm:$0xf]  ;;  %v10567_v63 = vld [vmem:[%s17758_s9 + $0xc2c] sm:$0xf0] }
 0x4fe   :  { %7072 = vmatmul.bf16.vlgmr.msrb.gmra.mxu0 %v14741_v41  ;;  %v10650_v4 = vor.u32 %v11568_v52, %v10649_v11  ;;  %v11369_v52 = vld [vmem:[%s17758_s9 + $0x69c] sm:$0xf] }
 0x4ff   :  { %7110 = vmatpush.bf16.msrb.mxu3 %v9926_v51 }
 0x500   :  { %7039 = vmatpush.bf16.msra.mxu2 %v10762_v10  ;;  %v9534_v10 = vor.u32 %v11285_v28, %v9531_v1  ;;  %v9867_v28 = vld [vmem:[%s17758_s9 + $0x6b4] sm:$0xf0]  ;;  %v10126_v1 = vor.u32 %v11436_v30, %v10125_v32  ;;  %v11240_v30 = vld [vmem:[%s17758_s9 + $0x290] sm:$0xf0] }
 0x501   :  { %7078 = vmatpush.bf16.msrb.mxu1 %v9646_v53  ;;  %7117 = vmatpush.bf16.msra.mxu0 %v10318_v15  ;;  %v6815_v51 = vpop.f32.mrf.mxu0  ;;  %v10621_v15 = vld [vmem:[%s17758_s9 + $0xc80] sm:$0xf]  ;;  %v9341_v32 = vld [vmem:[%s17758_s9 + $0x278] sm:$0xf] }
 0x502   :  { %7111 = vmatmul.bf16.vlgmr.msrb.gmra.mxu3 %v15185_v57  ;;  %v10570_v51 = vor.u32 %v11544_v48, %v10567_v63  ;;  %v11348_v63 = vld [vmem:[%s17758_s9 + $0x5f4] sm:$0xf] }
 0x503   :  { %7155 = vmatpush.bf16.msra.mxu3 %v9230_v3  ;;  %v10203_v3 = vld [vmem:[%s17758_s9 + $0x954] sm:$0xf0] }
 0x504   :  { %7040 = vmatpush.bf16.msra.mxu2 %v10734_v42  ;;  %v10206_v53 = vor.u32 %v11453_v21, %v10203_v3  ;;  %v6853_v42 = vadd.f32 %v16177_v29, %v4422_v55  ;;  %v9475_v29 = vld [vmem:[%s17758_s9 + $0x3a4] sm:$0xf0]  ;;  %v10539_v21 = vld [vmem:[%s17758_s9 + $0xbf4] sm:$0xf0]  ;;  %v9425_v3 = vld [vmem:[%s17758_s9 + $0x320] sm:$0xf] }
 0x505   :  { %7079 = vmatpush.bf16.msrb.mxu1 %v9618_v5  ;;  %7118 = vmatpush.bf16.msra.mxu0 %v10290_v13  ;;  %v16287_v54 = vpop.f32.mrf.mxu3  ;;  %v10622_v5 = vor.u32 %v11561_v43, %v10621_v15  ;;  %v10593_v13 = vld [vmem:[%s17758_s9 + $0xc48] sm:$0xf]  ;;  %v9478_v56 = vor.u32 %v11271_v0, %v9475_v29  ;;  %v10097_v55 = vld [vmem:[%s17758_s9 + $0x860] sm:$0xf]  ;;  %v11362_v43 = vld [vmem:[%s17758_s9 + $0x664] sm:$0xf] }
 0x506   :  { %v10594_v23 = vor.u32 %v11554_v19, %v10593_v13  ;;  %v9398_v19 = vor.u32 %v11254_v50, %v9397_v27  ;;  %v10483_v29 = vld [vmem:[%s17758_s9 + $0xb84] sm:$0xf0]  ;;  %v10399_v50 = vld [vmem:[%s17758_s9 + $0xadc] sm:$0xf0] }
 0x507   :  { %7156 = vmatpush.bf16.msra.mxu3 %v9202_v37  ;;  %v9090_v37 = vor.u32 %v11177_v8, %v9089_v22  ;;  %v11261_v22 = vld [vmem:[%s17758_s9 + $0x338] sm:$0xf0] }
 0x508   :  { %7041 = vmatpush.bf16.msra.mxu2 %v10706_v31  ;;  %v9033_v31 = vld [vmem:[%s17758_s9 + $0x10] sm:$0xf]  ;;  %v9426_v15 = vor.u32 %v11261_v22, %v9425_v3  ;;  %v9313_v3 = vld [vmem:[%s17758_s9 + $0x240] sm:$0xf]  ;;  %v11233_v22 = vld [vmem:[%s17758_s9 + $0x258] sm:$0xf0] }
 0x509   :  { %7080 = vmatpush.bf16.msrb.mxu1 %v9590_v35  ;;  %7119 = vmatpush.bf16.msra.mxu0 %v10262_v45  ;;  %v11163_v35 = vld [vmem:[%s17758_s9 + $0x28] sm:$0xf0]  ;;  %v11376_v45 = vld [vmem:[%s17758_s9 + $0x6d4] sm:$0xf] }
 0x50b   :  { %7157 = vmatpush.bf16.msra.mxu3 %v9174_v36  ;;  %v6865_v36 = vpop.f32.mrf.mxu0 }
 0x50c   :  { %7042 = vmatpush.bf16.msra.mxu2 %v10678_v49  ;;  %v16320_v9 = vadd.f32 %v6865_v36, %v6853_v42  ;;  %v11422_v42 = vld [vmem:[%s17758_s9 + $0x840] sm:$0xf0]  ;;  %v11523_v36 = vld [vmem:[%s17758_s9 + $0xb6c] sm:$0xf] }
 0x50d   :  { %7081 = vmatpush.bf16.msrb.mxu1 %v9562_v61  ;;  %7120 = vmatpush.bf16.msra.mxu0 %v10234_v40  ;;  %v6906_v49 = vpop.f32.mrf.mxu3  ;;  %v9034_v61 = vor.u32 %v11163_v35, %v9033_v31  ;;  %v9898_v40 = vor.u32 %v11376_v45, %v9895_v26  ;;  %v10070_v0 = vor.u32 %v11422_v42, %v10069_v17  ;;  %v10041_v35 = vld [vmem:[%s17758_s9 + $0x7f0] sm:$0xf]  ;;  %v11415_v45 = vld [vmem:[%s17758_s9 + $0x808] sm:$0xf0]  ;;  %v9285_v17 = vld [vmem:[%s17758_s9 + $0x208] sm:$0xf] }
 0x50e   :  { %v10486_v48 = vor.u32 %v11523_v36, %v10483_v29  ;;  %v10013_v49 = vld [vmem:[%s17758_s9 + $0x7b8] sm:$0xf]  ;;  %v11226_v42 = vld [vmem:[%s17758_s9 + $0x220] sm:$0xf0]  ;;  %v11495_v29 = vld [vmem:[%s17758_s9 + $0xa8c] sm:$0xf] }
 0x50f   :  { %7158 = vmatpush.bf16.msra.mxu3 %v9146_v46  ;;  %v9453_v46 = vld [vmem:[%s17758_s9 + $0x358] sm:$0xf] }
 0x510   :  { %7043 = vmatpush.bf16.msra.mxu2 %v10650_v4  ;;  %v9454_v11 = vor.u32 %v11268_v47, %v9453_v46  ;;  %v11429_v4 = vld [vmem:[%s17758_s9 + $0x878] sm:$0xf0]  ;;  %v9783_v46 = vld [vmem:[%s17758_s9 + $0x60c] sm:$0xf0]  ;;  %v11516_v47 = vld [vmem:[%s17758_s9 + $0xb34] sm:$0xf] }
 0x511   :  { %7082 = vmatpush.bf16.msrb.mxu1 %v9534_v10  ;;  %7121 = vmatpush.bf16.msra.mxu0 %v10206_v53  ;;  %v9870_v10 = vor.u32 %v11369_v52, %v9867_v28  ;;  %v10098_v39 = vor.u32 %v11429_v4, %v10097_v55  ;;  %v11341_v52 = vld [vmem:[%s17758_s9 + $0x5bc] sm:$0xf]  ;;  %v9755_v28 = vld [vmem:[%s17758_s9 + $0x5d4] sm:$0xf0]  ;;  %v9985_v4 = vld [vmem:[%s17758_s9 + $0x780] sm:$0xf] }
 0x513   :  { %7159 = vmatpush.bf16.msra.mxu3 %v9118_v7  ;;  %v11537_v7 = vld [vmem:[%s17758_s9 + $0xbdc] sm:$0xf]  ;;  %v6867_v8 = vpop.f32.mrf.mxu0 }
 0x514   :  { %7044 = vmatpush.bf16.msra.mxu2 %v10622_v5  ;;  %v10542_v53 = vor.u32 %v11537_v7, %v10539_v21  ;;  %v9842_v5 = vor.u32 %v11362_v43, %v9839_v12  ;;  %v11509_v7 = vld [vmem:[%s17758_s9 + $0xafc] sm:$0xf]  ;;  %v10427_v21 = vld [vmem:[%s17758_s9 + $0xb14] sm:$0xf0]  ;;  %v9314_v12 = vor.u32 %v11233_v22, %v9313_v3  ;;  %v9649_v22 = vld [vmem:[%s17758_s9 + $0x4e0] sm:$0xf] }
 0x515   :  { %7083 = vmatpush.bf16.msrb.mxu1 %v9506_v20  ;;  %7122 = vmatpush.bf16.msra.mxu0 %v10178_v16  ;;  %v11355_v20 = vld [vmem:[%s17758_s9 + $0x62c] sm:$0xf]  ;;  %v9811_v16 = vld [vmem:[%s17758_s9 + $0x644] sm:$0xf0]  ;;  %v10430_v43 = vor.u32 %v11509_v7, %v10427_v21  ;;  %v11593_v21 = vld [vmem:[%s17758_s9 + $0xd9c] sm:$0xf] }
 0x516   :  { %v9814_v26 = vor.u32 %v11355_v20, %v9811_v16  ;;  %v11327_v20 = vld [vmem:[%s17758_s9 + $0x54c] sm:$0xf]  ;;  %v9699_v16 = vld [vmem:[%s17758_s9 + $0x564] sm:$0xf0]  ;;  %v10763_v3 = vld [vmem:[%s17758_s9 + $0xdb4] sm:$0xf0] }
 0x517   :  { %7160 = vmatpush.bf16.msra.mxu3 %v9090_v37  ;;  %v11530_v37 = vld [vmem:[%s17758_s9 + $0xba4] sm:$0xf] }
 0x518   :  { %7045 = vmatpush.bf16.msra.mxu2 %v10594_v23  ;;  %v10514_v13 = vor.u32 %v11530_v37, %v10511_v44  ;;  %v16425_v25 = vpop.f32.mrf.mxu1  ;;  %v11334_v37 = vld [vmem:[%s17758_s9 + $0x584] sm:$0xf] }
 0x519   :  { %7084 = vmatpush.bf16.msrb.mxu1 %v9478_v56  ;;  %7123 = vmatpush.bf16.msra.mxu0 %v10150_v59  ;;  %v10042_v56 = vor.u32 %v11415_v45, %v10041_v35  ;;  %v10455_v59 = vld [vmem:[%s17758_s9 + $0xb4c] sm:$0xf0]  ;;  %v11502_v44 = vld [vmem:[%s17758_s9 + $0xac4] sm:$0xf]  ;;  %v11219_v45 = vld [vmem:[%s17758_s9 + $0x1e8] sm:$0xf0] }
 0x51a   :  { %v10402_v36 = vor.u32 %v11502_v44, %v10399_v50  ;;  %v11586_v50 = vld [vmem:[%s17758_s9 + $0xd64] sm:$0xf] }
 0x51b   :  { %7161 = vmatpush.bf16.msra.mxu3 %v9062_v14  ;;  %7046 = vmatmul.bf16.vlgmr.msra.gmra.mxu2 %v15749_v60  ;;  %v11247_v14 = vld [vmem:[%s17758_s9 + $0x2c8] sm:$0xf0]  ;;  %v16427_v31 = vpop.f32.mrf.mxu0 }
 0x51c   :  { %7090 = vmatpush.bf16.msrb.mxu2 %v9898_v40  ;;  %7085 = vmatmul.bf16.vlgmr.msrb.gmra.mxu1 %v14831_v24  ;;  %v9370_v23 = vor.u32 %v11247_v14, %v9369_v6  ;;  %v9786_v40 = vor.u32 %v11348_v63, %v9783_v46  ;;  %v10371_v6 = vld [vmem:[%s17758_s9 + $0xaa4] sm:$0xf0]  ;;  %v9257_v14 = vld [vmem:[%s17758_s9 + $0x1d0] sm:$0xf]  ;;  %v11600_v63 = vld [vmem:[%s17758_s9 + $0xdd4] sm:$0xf] }
 0x51d   :  { %7129 = vmatpush.bf16.msra.mxu1 %v10570_v51  ;;  %7168 = vmatpush.bf16.msrb.mxu0 %v9454_v11  ;;  %v10458_v51 = vor.u32 %v11516_v47, %v10455_v59  ;;  %v9342_v11 = vor.u32 %v11240_v30, %v9341_v32  ;;  %v10791_v46 = vld [vmem:[%s17758_s9 + $0xdec] sm:$0xf0]  ;;  %v9677_v47 = vld [vmem:[%s17758_s9 + $0x518] sm:$0xf]  ;;  %v11324_v59 = vld [vmem:[%s17758_s9 + $0x530] sm:$0xf0] }
 0x51e   :  { %7124 = vmatmul.bf16.vlgmr.msra.gmra.mxu0 %v15362_v34  ;;  %v10349_v32 = vld [vmem:[%s17758_s9 + $0xa58] sm:$0xf]  ;;  %v11492_v30 = vld [vmem:[%s17758_s9 + $0xa70] sm:$0xf0]  ;;  %v9678_v7 = vor.u32 %v11324_v59, %v9677_v47  ;;  %v6814_v47 = vadd.f32 %v16198_v58, %v16070_v2 }
 0x51f   :  { %7162 = vmatpush.bf16.msra.mxu3 %v9034_v61  ;;  %v11408_v61 = vld [vmem:[%s17758_s9 + $0x7d0] sm:$0xf0] }
 0x520   :  { %7091 = vmatpush.bf16.msrb.mxu2 %v9870_v10  ;;  %v6828_v8 = vpop.f32.mrf.mxu1  ;;  %v11401_v10 = vld [vmem:[%s17758_s9 + $0x798] sm:$0xf0]  ;;  %v11188_v59 = vld [vmem:[%s17758_s9 + $0xf4] sm:$0xf] }
 0x521   :  { %7130 = vmatpush.bf16.msra.mxu1 %v10542_v53  ;;  %7169 = vmatpush.bf16.msrb.mxu0 %v9426_v15  ;;  %v9758_v53 = vor.u32 %v11341_v52, %v9755_v28  ;;  %v9986_v27 = vor.u32 %v11401_v10, %v9985_v4  ;;  %v10794_v28 = vor.u32 %v11600_v63, %v10791_v46  ;;  %v10321_v4 = vld [vmem:[%s17758_s9 + $0xa20] sm:$0xf]  ;;  %v11485_v10 = vld [vmem:[%s17758_s9 + $0xa38] sm:$0xf0]  ;;  %v10265_v63 = vld [vmem:[%s17758_s9 + $0x9b0] sm:$0xf] }
 0x522   :  { %7163 = vmatmul.bf16.vlgmr.msra.gmra.mxu3 %v14633_v62  ;;  %v11471_v46 = vld [vmem:[%s17758_s9 + $0x9c8] sm:$0xf0]  ;;  %v11572_v58 = vld [vmem:[%s17758_s9 + $0xcf4] sm:$0xf] }
 0x523   :  { %7207 = vmatpush.bf16.msrb.mxu3 %v10126_v1  ;;  %v10014_v1 = vor.u32 %v11408_v61, %v10013_v49  ;;  %v6919_v55 = vpop.f32.mrf.mxu0  ;;  %v10374_v61 = vor.u32 %v11495_v29, %v10371_v6  ;;  %v10266_v2 = vor.u32 %v11471_v46, %v10265_v63  ;;  %v11551_v63 = vld [vmem:[%s17758_s9 + $0xc4c] sm:$0xf]  ;;  %v10595_v46 = vld [vmem:[%s17758_s9 + $0xc64] sm:$0xf0] }
 0x524   :  { %7092 = vmatpush.bf16.msrb.mxu2 %v9842_v5  ;;  %v9957_v5 = vld [vmem:[%s17758_s9 + $0x748] sm:$0xf]  ;;  %v11317_v55 = vld [vmem:[%s17758_s9 + $0x4f8] sm:$0xf0] }
 0x525   :  { %7131 = vmatpush.bf16.msra.mxu1 %v10514_v13  ;;  %7170 = vmatpush.bf16.msrb.mxu0 %v9398_v19  ;;  %v16483_v15 = vpop.f32.mrf.mxu3  ;;  %v11394_v13 = vld [vmem:[%s17758_s9 + $0x760] sm:$0xf0]  ;;  %v9650_v44 = vor.u32 %v11317_v55, %v9649_v22  ;;  %v9119_v22 = vld [vmem:[%s17758_s9 + $0xd4] sm:$0xf0]  ;;  %v11565_v55 = vld [vmem:[%s17758_s9 + $0xcbc] sm:$0xf] }
 0x526   :  { %v9958_v35 = vor.u32 %v11394_v13, %v9957_v5  ;;  %v11310_v5 = vld [vmem:[%s17758_s9 + $0x4c0] sm:$0xf0]  ;;  %v10293_v13 = vld [vmem:[%s17758_s9 + $0x9e8] sm:$0xf] }
 0x527   :  { %7208 = vmatpush.bf16.msrb.mxu3 %v10098_v39  ;;  %v9727_v39 = vld [vmem:[%s17758_s9 + $0x59c] sm:$0xf0] }
 0x528   :  { %7093 = vmatpush.bf16.msrb.mxu2 %v9814_v26  ;;  %v9730_v19 = vor.u32 %v11334_v37, %v9727_v39  ;;  %v9929_v26 = vld [vmem:[%s17758_s9 + $0x710] sm:$0xf]  ;;  %v10766_v37 = vor.u32 %v11593_v21, %v10763_v3  ;;  %v11181_v3 = vld [vmem:[%s17758_s9 + $0xbc] sm:$0xf] }
 0x529   :  { %7132 = vmatpush.bf16.msra.mxu1 %v10486_v48  ;;  %7171 = vmatpush.bf16.msrb.mxu0 %v9370_v23  ;;  %v11387_v48 = vld [vmem:[%s17758_s9 + $0x728] sm:$0xf0]  ;;  %v16533_v23 = vpop.f32.mrf.mxu1 }
 0x52a   :  { %v9930_v52 = vor.u32 %v11387_v48, %v9929_v26 }
 0x52b   :  { %7209 = vmatpush.bf16.msrb.mxu3 %v10070_v0  ;;  %v9286_v0 = vor.u32 %v11226_v42, %v9285_v17  ;;  %v10735_v17 = vld [vmem:[%s17758_s9 + $0xd7c] sm:$0xf0] }
 0x52c   :  { %7094 = vmatpush.bf16.msrb.mxu2 %v9786_v40  ;;  %v9258_v40 = vor.u32 %v11219_v45, %v9257_v14  ;;  %v11579_v14 = vld [vmem:[%s17758_s9 + $0xd2c] sm:$0xf]  ;;  %v9593_v45 = vld [vmem:[%s17758_s9 + $0x470] sm:$0xf] }
 0x52d   :  { %7133 = vmatpush.bf16.msra.mxu1 %v10458_v51  ;;  %7172 = vmatpush.bf16.msrb.mxu0 %v9342_v11  ;;  %v6958_v49 = vpop.f32.mrf.mxu3  ;;  %v11209_v51 = vld [vmem:[%s17758_s9 + $0x19c] sm:$0xf]  ;;  %v9231_v11 = vld [vmem:[%s17758_s9 + $0x1b4] sm:$0xf0] }
 0x52e   :  { %v9234_v8 = vor.u32 %v11209_v51, %v9231_v11  ;;  %v6827_v49 = vadd.f32 %v16425_v25, %v6814_v47  ;;  %v10679_v51 = vld [vmem:[%s17758_s9 + $0xd0c] sm:$0xf0]  ;;  %v9565_v11 = vld [vmem:[%s17758_s9 + $0x438] sm:$0xf] }
 0x52f   :  { %7210 = vmatpush.bf16.msrb.mxu3 %v10042_v56  ;;  %v9702_v56 = vor.u32 %v11327_v20, %v9699_v16  ;;  %v11195_v20 = vld [vmem:[%s17758_s9 + $0x12c] sm:$0xf]  ;;  %v9175_v16 = vld [vmem:[%s17758_s9 + $0x144] sm:$0xf0]  ;;  %v9481_v47 = vld [vmem:[%s17758_s9 + $0x390] sm:$0xf] }
 0x530   :  { %7095 = vmatpush.bf16.msrb.mxu2 %v9758_v53  ;;  %v11202_v53 = vld [vmem:[%s17758_s9 + $0x164] sm:$0xf]  ;;  %v9178_v26 = vor.u32 %v11195_v20, %v9175_v16 }
 0x531   :  { %7134 = vmatpush.bf16.msra.mxu1 %v10430_v43  ;;  %7173 = vmatpush.bf16.msrb.mxu0 %v9314_v12  ;;  %v9203_v43 = vld [vmem:[%s17758_s9 + $0x17c] sm:$0xf0]  ;;  %v4423_v12 = vperm.slane %v16275_v33, 2  ;;  %v6880_v39 = vpop.f32.mrf.mxu1  ;;  %v9621_v33 = vld [vmem:[%s17758_s9 + $0x4a8] sm:$0xf] }
 0x532   :  { %v9206_v42 = vor.u32 %v11202_v53, %v9203_v43  ;;  %v9622_v29 = vor.u32 %v11310_v5, %v9621_v33  ;;  %v10651_v43 = vld [vmem:[%s17758_s9 + $0xcd4] sm:$0xf0]  ;;  %v9091_v33 = vld [vmem:[%s17758_s9 + $0x9c] sm:$0xf0]  ;;  %v11558_v16 = vld [vmem:[%s17758_s9 + $0xc84] sm:$0xf] }
 0x533   :  { %7211 = vmatpush.bf16.msrb.mxu3 %v10014_v1  ;;  %v10350_v1 = vor.u32 %v11492_v30, %v10349_v32  ;;  %v9147_v32 = vld [vmem:[%s17758_s9 + $0x10c] sm:$0xf0]  ;;  %v10654_v5 = vor.u32 %v11565_v55, %v10651_v43  ;;  %v6879_v55 = vadd.f32 %v16533_v23, %v16320_v9  ;;  %v10127_v43 = vld [vmem:[%s17758_s9 + $0x8b4] sm:$0xf0]  ;;  %v9873_v9 = vld [vmem:[%s17758_s9 + $0x6a0] sm:$0xf] }
 0x534   :  { %7096 = vmatpush.bf16.msrb.mxu2 %v9730_v19  ;;  %v11478_v19 = vld [vmem:[%s17758_s9 + $0xa00] sm:$0xf0]  ;;  %v9150_v25 = vor.u32 %v11188_v59, %v9147_v32  ;;  %v11373_v23 = vld [vmem:[%s17758_s9 + $0x6b8] sm:$0xf0] }
 0x535   :  { %7135 = vmatpush.bf16.msra.mxu1 %v10402_v36  ;;  %7174 = vmatpush.bf16.msrb.mxu0 %v9286_v0  ;;  %v10738_v36 = vor.u32 %v11586_v50, %v10735_v17  ;;  %v6957_v0 = vadd.f32 %v16483_v15, %v4423_v12  ;;  %v10294_v6 = vor.u32 %v11478_v19, %v10293_v13  ;;  %v11303_v15 = vld [vmem:[%s17758_s9 + $0x488] sm:$0xf0]  ;;  %v9537_v12 = vld [vmem:[%s17758_s9 + $0x400] sm:$0xf]  ;;  %v11457_v50 = vld [vmem:[%s17758_s9 + $0x958] sm:$0xf0] }
 0x536   :  { %v11174_v17 = vld [vmem:[%s17758_s9 + $0x84] sm:$0xf] }
 0x537   :  { %7212 = vmatpush.bf16.msrb.mxu3 %v9986_v27  ;;  %v10322_v27 = vor.u32 %v11485_v10, %v10321_v4 }
 0x538   :  { %7097 = vmatpush.bf16.msrb.mxu2 %v9702_v56 }
 0x539   :  { %7136 = vmatpush.bf16.msra.mxu1 %v10374_v61  ;;  %7175 = vmatpush.bf16.msrb.mxu0 %v9258_v40  ;;  %v6969_v48 = vpop.f32.mrf.mxu0  ;;  %v9594_v40 = vor.u32 %v11303_v15, %v9593_v45  ;;  %v11450_v45 = vld [vmem:[%s17758_s9 + $0x920] sm:$0xf0] }
 0x53a   :  { %v16633_v56 = vadd.f32 %v6969_v48, %v6957_v0  ;;  %v9509_v0 = vld [vmem:[%s17758_s9 + $0x3c8] sm:$0xf] }
 0x53b   :  { %7213 = vmatpush.bf16.msrb.mxu3 %v9958_v35  ;;  %7098 = vmatmul.bf16.vlgmr.msrb.gmra.mxu2 %v15002_v38  ;;  %v10707_v35 = vld [vmem:[%s17758_s9 + $0xd44] sm:$0xf0]  ;;  %v16642_v61 = vpop.f32.mrf.mxu1 }
 0x53c   :  { %7142 = vmatpush.bf16.msra.mxu2 %v10794_v28  ;;  %7137 = vmatmul.bf16.vlgmr.msra.gmra.mxu1 %v15582_v18  ;;  %v10710_v30 = vor.u32 %v11579_v14, %v10707_v35  ;;  %v11296_v28 = vld [vmem:[%s17758_s9 + $0x450] sm:$0xf0]  ;;  %v11282_v14 = vld [vmem:[%s17758_s9 + $0x3e0] sm:$0xf0]  ;;  %v10181_v35 = vld [vmem:[%s17758_s9 + $0x908] sm:$0xf] }
 0x53d   :  { %7181 = vmatpush.bf16.msrb.mxu1 %v9678_v7  ;;  %7220 = vmatpush.bf16.msra.mxu0 %v10350_v1  ;;  %v10237_v7 = vld [vmem:[%s17758_s9 + $0x978] sm:$0xf]  ;;  %v11464_v1 = vld [vmem:[%s17758_s9 + $0x990] sm:$0xf0]  ;;  %v9566_v10 = vor.u32 %v11296_v28, %v9565_v11  ;;  %v9063_v48 = vld [vmem:[%s17758_s9 + $0x64] sm:$0xf0]  ;;  %v9510_v32 = vor.u32 %v11282_v14, %v9509_v0 }
 0x53e   :  { %7176 = vmatmul.bf16.vlgmr.msrb.gmra.mxu0 %v14741_v41  ;;  %v10238_v53 = vor.u32 %v11464_v1, %v10237_v7  ;;  %v11160_v11 = vld [vmem:[%s17758_s9 + $0x14] sm:$0xf]  ;;  %v10573_v7 = vld [vmem:[%s17758_s9 + $0xc18] sm:$0xf] }
 0x53f   :  { %7214 = vmatpush.bf16.msrb.mxu3 %v9930_v52  ;;  %v6839_v52 = vpop.f32.mrf.mxu2  ;;  %v11380_v28 = vld [vmem:[%s17758_s9 + $0x6f0] sm:$0xf0] }
 0x540   :  { %7143 = vmatpush.bf16.msra.mxu2 %v10766_v37  ;;  %v6840_v21 = vadd.f32 %v6839_v52, %v6827_v49  ;;  %v9122_v37 = vor.u32 %v11181_v3, %v9119_v22  ;;  %v11275_v49 = vld [vmem:[%s17758_s9 + $0x3a8] sm:$0xf0]  ;;  %v9901_v52 = vld [vmem:[%s17758_s9 + $0x6d8] sm:$0xf]  ;;  %v11548_v3 = vld [vmem:[%s17758_s9 + $0xc30] sm:$0xf0] }
 0x541   :  { %7182 = vmatpush.bf16.msrb.mxu1 %v9650_v44  ;;  %7221 = vmatpush.bf16.msra.mxu0 %v10322_v27  ;;  %v6971_v39 = vpop.f32.mrf.mxu0  ;;  %v11289_v44 = vld [vmem:[%s17758_s9 + $0x418] sm:$0xf0]  ;;  %v10209_v27 = vld [vmem:[%s17758_s9 + $0x940] sm:$0xf] }
 0x542   :  { %7215 = vmatmul.bf16.vlgmr.msrb.gmra.mxu3 %v15185_v57  ;;  %v10807_v4 = vmul.f32 -1.442695, %v6840_v21  ;;  %v9538_v19 = vor.u32 %v11289_v44, %v9537_v12  ;;  %v10210_v20 = vor.u32 %v11457_v50, %v10209_v27  ;;  %v10598_v21 = vor.u32 %v11551_v63, %v10595_v46  ;;  %v11265_v22 = vld [vmem:[%s17758_s9 + $0x35c] sm:$0xf]  ;;  %v11251_v63 = vld [vmem:[%s17758_s9 + $0x2ec] sm:$0xf] }
 0x543   :  { %7259 = vmatpush.bf16.msra.mxu3 %v9234_v8  ;;  %v10682_v8 = vor.u32 %v11572_v58, %v10679_v51  ;;  %v6932_v13 = vpop.f32.mrf.mxu1  ;;  %v10574_v44 = vor.u32 %v11548_v3, %v10573_v7  ;;  %v9399_v46 = vld [vmem:[%s17758_s9 + $0x304] sm:$0xf0]  ;;  %v10489_v7 = vld [vmem:[%s17758_s9 + $0xb70] sm:$0xf]  ;;  %v11244_v3 = vld [vmem:[%s17758_s9 + $0x2b4] sm:$0xf] }
 0x544   :  { %7144 = vmatpush.bf16.msra.mxu2 %v10738_v36  ;;  %11670 = vpow2.f32 %v10807_v4  ;;  %v10623_v36 = vld [vmem:[%s17758_s9 + $0xc9c] sm:$0xf0]  ;;  %v9482_v4 = vor.u32 %v11275_v49, %v9481_v47  ;;  %v11258_v13 = vld [vmem:[%s17758_s9 + $0x324] sm:$0xf] }
 0x545   :  { %7183 = vmatpush.bf16.msrb.mxu1 %v9622_v29  ;;  %7222 = vmatpush.bf16.msra.mxu0 %v10294_v6  ;;  %v9094_v29 = vor.u32 %v11174_v17, %v9091_v33  ;;  %v10626_v15 = vor.u32 %v11558_v16, %v10623_v36  ;;  %v10545_v17 = vld [vmem:[%s17758_s9 + $0xbe0] sm:$0xf]  ;;  %v11426_v16 = vld [vmem:[%s17758_s9 + $0x864] sm:$0xf] }
 0x546   :  { %v10099_v36 = vld [vmem:[%s17758_s9 + $0x87c] sm:$0xf0] }
 0x547   :  { %7260 = vmatpush.bf16.msra.mxu3 %v9206_v42  ;;  %v16692_v42 = vpop.f32.mrf.mxu3  ;;  %v6841_v6 = vpop.f32.mrf.mxu2 }
 0x548   :  { %7145 = vmatpush.bf16.msra.mxu2 %v10710_v30  ;;  %v10182_v30 = vor.u32 %v11450_v45, %v10181_v35  ;;  %v9845_v6 = vld [vmem:[%s17758_s9 + $0x668] sm:$0xf]  ;;  %v11366_v45 = vld [vmem:[%s17758_s9 + $0x680] sm:$0xf0] }
 0x549   :  { %7184 = vmatpush.bf16.msrb.mxu1 %v9594_v40  ;;  %7223 = vmatpush.bf16.msra.mxu0 %v10266_v2  ;;  %v10153_v40 = vld [vmem:[%s17758_s9 + $0x8d0] sm:$0xf]  ;;  %v11443_v2 = vld [vmem:[%s17758_s9 + $0x8e8] sm:$0xf0]  ;;  %v9846_v49 = vor.u32 %v11366_v45, %v9845_v6  ;;  %v9761_v6 = vld [vmem:[%s17758_s9 + $0x5c0] sm:$0xf] }
 0x54a   :  { %v11671_v59 = vpop.eup %11670 }
 0x54b   :  { %7261 = vmatpush.bf16.msra.mxu3 %v9178_v26  ;;  %v11167_v26 = vld [vmem:[%s17758_s9 + $0x4c] sm:$0xf]  ;;  %v16736_v58 = vadd.f32 1.0, %v11671_v59 }
 0x54c   :  { %7146 = vmatpush.bf16.msra.mxu2 %v10682_v8  ;;  %v9066_v51 = vor.u32 %v11167_v26, %v9063_v48  ;;  %v9455_v8 = vld [vmem:[%s17758_s9 + $0x374] sm:$0xf0]  ;;  %v10517_v26 = vld [vmem:[%s17758_s9 + $0xba8] sm:$0xf]  ;;  %v11534_v48 = vld [vmem:[%s17758_s9 + $0xbc0] sm:$0xf0] }
 0x54d   :  { %7185 = vmatpush.bf16.msrb.mxu1 %v9566_v10  ;;  %7224 = vmatpush.bf16.msra.mxu0 %v10238_v53  ;;  %11672 = vrcp.f32 %v16736_v58  ;;  %v10154_v10 = vor.u32 %v11443_v2, %v10153_v40  ;;  %v11433_v53 = vld [vmem:[%s17758_s9 + $0x89c] sm:$0xf]  ;;  %v9458_v27 = vor.u32 %v11265_v22, %v9455_v8  ;;  %v11419_v59 = vld [vmem:[%s17758_s9 + $0x82c] sm:$0xf]  ;;  %v10518_v40 = vor.u32 %v11534_v48, %v10517_v26  ;;  %v9371_v22 = vld [vmem:[%s17758_s9 + $0x2cc] sm:$0xf0] }
 0x54e   :  { %v10130_v33 = vor.u32 %v11433_v53, %v10127_v43  ;;  %vm7500_vm11 = vweird.f32 %v16736_v58  ;;  %v11513_v26 = vld [vmem:[%s17758_s9 + $0xb18] sm:$0xf0]  ;;  %v9315_v48 = vld [vmem:[%s17758_s9 + $0x25c] sm:$0xf0] }
 0x54f   :  { %7262 = vmatpush.bf16.msra.mxu3 %v9150_v25  ;;  %v9035_v25 = vld [vmem:[%s17758_s9 + $0x2c] sm:$0xf0]  ;;  %v7010_v1 = vpop.f32.mrf.mxu3  ;;  %v6891_v39 = vpop.f32.mrf.mxu2 }
 0x550   :  { %7147 = vmatpush.bf16.msra.mxu2 %v10654_v5  ;;  %v9038_v12 = vor.u32 %v11160_v11, %v9035_v25  ;;  %v6892_v50 = vadd.f32 %v6891_v39, %v6879_v55  ;;  %v11541_v5 = vld [vmem:[%s17758_s9 + $0xbf8] sm:$0xf0]  ;;  %v11359_v11 = vld [vmem:[%s17758_s9 + $0x648] sm:$0xf0]  ;;  %v9789_v39 = vld [vmem:[%s17758_s9 + $0x5f8] sm:$0xf] }
 0x551   :  { %7186 = vmatpush.bf16.msrb.mxu1 %v9538_v19  ;;  %7225 = vmatpush.bf16.msra.mxu0 %v10210_v20  ;;  %v9427_v19 = vld [vmem:[%s17758_s9 + $0x33c] sm:$0xf0]  ;;  %v10546_v14 = vor.u32 %v11541_v5, %v10545_v17  ;;  %v11527_v1 = vld [vmem:[%s17758_s9 + $0xb88] sm:$0xf0]  ;;  %v11520_v5 = vld [vmem:[%s17758_s9 + $0xb50] sm:$0xf0] }
 0x552   :  { %v16790_v20 = vadd.f32 %v16287_v54, %v6892_v50  ;;  %v9430_v35 = vor.u32 %v11258_v13, %v9427_v19  ;;  %v11352_v50 = vld [vmem:[%s17758_s9 + $0x610] sm:$0xf0]  ;;  %v11237_v13 = vld [vmem:[%s17758_s9 + $0x27c] sm:$0xf]  ;;  %v9343_v19 = vld [vmem:[%s17758_s9 + $0x294] sm:$0xf0] }
 0x553   :  { %7263 = vmatpush.bf16.msra.mxu3 %v9122_v37  ;;  %v9902_v37 = vor.u32 %v11380_v28, %v9901_v52  ;;  %v16798_v0 = vpop.eup %11672  ;;  %v7504_v52 = vand.u32 2147483647, %v16736_v58  ;;  %v9402_v28 = vor.u32 %v11251_v63, %v9399_v46 }
 0x554   :  { %7148 = vmatpush.bf16.msra.mxu2 %v10626_v15  ;;  %v7496_v54 = vmul.f32 %v16798_v0, %v16736_v58  ;;  %v10102_v15 = vor.u32 %v11426_v16, %v10099_v36  ;;  %vm7501_vm10 = vweird.f32 %v16798_v0  ;;  %v9790_v16 = vor.u32 %v11352_v50, %v9789_v39  ;;  %v11384_v50 = vld [vmem:[%s17758_s9 + $0x714] sm:$0xf] }
 0x555   :  { %7187 = vmatpush.bf16.msrb.mxu1 %v9510_v32  ;;  %7226 = vmatpush.bf16.msra.mxu0 %v10182_v30  ;;  %v10071_v32 = vld [vmem:[%s17758_s9 + $0x844] sm:$0xf0]  ;;  %v7506_v30 = vand.u32 2147483648, %v16736_v58  ;;  %vm16864_vm12 = vmor %vm7500_vm11, %vm7501_vm10  ;;  %vm7505_vm13 = vcmp.eq.f32.partialorder %v7504_v52, 8.507059e+37 }
 0x556   :  { %v7497_v47 = vsub.f32 1.0, %v7496_v54  ;;  %v11345_v54 = vld [vmem:[%s17758_s9 + $0x5d8] sm:$0xf0] }
 0x557   :  { %7264 = vmatpush.bf16.msra.mxu3 %v9094_v29  ;;  %v9874_v29 = vor.u32 %v11373_v23, %v9873_v9  ;;  %v6893_v2 = vpop.f32.mrf.mxu2  ;;  %v7507_v43 = vor.u32 1.1754944e-38, %v7506_v30  ;;  %v10461_v9 = vld [vmem:[%s17758_s9 + $0xb38] sm:$0xf]  ;;  %v6918_v23 = vadd.f32 %v16427_v31, %v16790_v20  ;;  %v11405_v31 = vld [vmem:[%s17758_s9 + $0x7bc] sm:$0xf]  ;;  %v9762_v30 = vor.u32 %v11345_v54, %v9761_v6 }
 0x558   :  { %7149 = vmatpush.bf16.msra.mxu2 %v10598_v21  ;;  %v7498_v25 = vmul.f32 %v16798_v0, %v7497_v47  ;;  %v10074_v21 = vor.u32 %v11419_v59, %v10071_v32  ;;  %v10015_v20 = vld [vmem:[%s17758_s9 + $0x7d4] sm:$0xf0]  ;;  %v10462_v36 = vor.u32 %v11520_v5, %v10461_v9  ;;  %v11398_v47 = vld [vmem:[%s17758_s9 + $0x784] sm:$0xf]  ;;  %v9987_v59 = vld [vmem:[%s17758_s9 + $0x79c] sm:$0xf0] }
 0x559   :  { %7188 = vmatpush.bf16.msrb.mxu1 %v9482_v4  ;;  %7227 = vmatpush.bf16.msra.mxu0 %v10154_v10  ;;  %v16854_v55 = vpop.f32.mrf.mxu0  ;;  %v11412_v4 = vld [vmem:[%s17758_s9 + $0x7f4] sm:$0xf]  ;;  %v10043_v10 = vld [vmem:[%s17758_s9 + $0x80c] sm:$0xf0]  ;;  %v9990_v52 = vor.u32 %v11398_v47, %v9987_v59  ;;  %v11321_v5 = vld [vmem:[%s17758_s9 + $0x51c] sm:$0xf] }
 0x55a   :  { %v7499_v8 = vadd.f32 %v16798_v0, %v7498_v25  ;;  %v10405_v25 = vld [vmem:[%s17758_s9 + $0xac8] sm:$0xf]  ;;  %v9931_v9 = vld [vmem:[%s17758_s9 + $0x72c] sm:$0xf0]  ;;  %v11213_v6 = vld [vmem:[%s17758_s9 + $0x1b8] sm:$0xf0] }
 0x55b   :  { %7265 = vmatpush.bf16.msra.mxu3 %v9066_v51  ;;  %7150 = vmatmul.bf16.vlgmr.msra.gmra.mxu2 %v15749_v60  ;;  %v9817_v51 = vld [vmem:[%s17758_s9 + $0x630] sm:$0xf]  ;;  %v9651_v47 = vld [vmem:[%s17758_s9 + $0x4fc] sm:$0xf0]  ;;  %v11482_v59 = vld [vmem:[%s17758_s9 + $0xa24] sm:$0xf] }
 0x55c   :  { %7194 = vmatpush.bf16.msrb.mxu2 %v9902_v37  ;;  %7189 = vmatmul.bf16.vlgmr.msrb.gmra.mxu1 %v14831_v24  ;;  %v9818_v58 = vor.u32 %v11359_v11, %v9817_v51  ;;  %v10490_v37 = vor.u32 %v11527_v1, %v10489_v7  ;;  %v11338_v11 = vld [vmem:[%s17758_s9 + $0x5a0] sm:$0xf0]  ;;  %v11223_v7 = vld [vmem:[%s17758_s9 + $0x20c] sm:$0xf]  ;;  %v9287_v1 = vld [vmem:[%s17758_s9 + $0x224] sm:$0xf0] }
 0x55d   :  { %7233 = vmatpush.bf16.msra.mxu1 %v10574_v44  ;;  %7272 = vmatpush.bf16.msrb.mxu0 %v9458_v27  ;;  %v7503_v44 = vsel %vm16864_vm12, %v16798_v0, %v7499_v8  ;;  %v9374_v27 = vor.u32 %v11244_v3, %v9371_v22  ;;  %v9346_v0 = vor.u32 %v11237_v13, %v9343_v19  ;;  %v9959_v3 = vld [vmem:[%s17758_s9 + $0x764] sm:$0xf0]  ;;  %v9705_v8 = vld [vmem:[%s17758_s9 + $0x550] sm:$0xf]  ;;  %v9679_v19 = vld [vmem:[%s17758_s9 + $0x534] sm:$0xf0] }
 0x55e   :  { %7228 = vmatmul.bf16.vlgmr.msra.gmra.mxu0 %v15362_v34  ;;  %v7508_v17 = vsel %vm7505_vm13, %v7507_v43, %v7503_v44  ;;  %v9290_v53 = vor.u32 %v11223_v7, %v9287_v1  ;;  %v10377_v43 = vld [vmem:[%s17758_s9 + $0xa90] sm:$0xf]  ;;  %v9623_v7 = vld [vmem:[%s17758_s9 + $0x4c4] sm:$0xf0]  ;;  %v11475_v1 = vld [vmem:[%s17758_s9 + $0x9ec] sm:$0xf] }
 0x55f   :  { %7266 = vmatpush.bf16.msra.mxu3 %v9038_v12  ;;  %v16868_v12 = vpop.f32.mrf.mxu1  ;;  %7600 = vst [vmem:[#allocation2] sm:$0xff] %v7508_v17  ;;  %v6943_v45 = vpop.f32.mrf.mxu2  ;;  %v10797_v17 = vld [vmem:[%s17758_s9 + $0xdd8] sm:$0xf] }
 0x560   :  { %7195 = vmatpush.bf16.msrb.mxu2 %v9874_v29  ;;  %v6931_v29 = vadd.f32 %v16642_v61, %v6918_v23  ;;  %v11230_v61 = vld [vmem:[%s17758_s9 + $0x244] sm:$0xf] }
 0x561   :  { %7234 = vmatpush.bf16.msra.mxu1 %v10546_v14  ;;  %7273 = vmatpush.bf16.msrb.mxu0 %v9430_v35  ;;  %v10433_v14 = vld [vmem:[%s17758_s9 + $0xb00] sm:$0xf]  ;;  %v10018_v35 = vor.u32 %v11405_v31, %v10015_v20  ;;  %v7023_v46 = vpop.f32.mrf.mxu0  ;;  %v9318_v51 = vor.u32 %v11230_v61, %v9315_v48  ;;  %v11489_v31 = vld [vmem:[%s17758_s9 + $0xa5c] sm:$0xf]  ;;  %v10351_v20 = vld [vmem:[%s17758_s9 + $0xa74] sm:$0xf0] }
 0x562   :  { %7267 = vmatmul.bf16.vlgmr.msra.gmra.mxu3 %v14633_v62  ;;  %v6944_v63 = vadd.f32 %v6943_v45, %v6931_v29  ;;  %v10434_v2 = vor.u32 %v11513_v26, %v10433_v14  ;;  %v9237_v29 = vld [vmem:[%s17758_s9 + $0x1a0] sm:$0xf]  ;;  %v9934_v14 = vor.u32 %v11384_v50, %v9931_v9  ;;  %v9682_v45 = vor.u32 %v11321_v5, %v9679_v19  ;;  %v11597_v48 = vld [vmem:[%s17758_s9 + $0xdb8] sm:$0xf0]  ;;  %v9595_v50 = vld [vmem:[%s17758_s9 + $0x48c] sm:$0xf0] }
 0x563   :  { %7311 = vmatpush.bf16.msrb.mxu3 %v10130_v33  ;;  %v10046_v33 = vor.u32 %v11412_v4, %v10043_v10  ;;  %v11331_v4 = vld [vmem:[%s17758_s9 + $0x568] sm:$0xf0]  ;;  %v10354_v26 = vor.u32 %v11489_v31, %v10351_v20  ;;  %v10769_v61 = vld [vmem:[%s17758_s9 + $0xda0] sm:$0xf]  ;;  %v9238_v46 = vor.u32 %v11213_v6, %v9237_v29  ;;  %v11468_v9 = vld [vmem:[%s17758_s9 + $0x9b4] sm:$0xf] }
 0x564   :  { %7196 = vmatpush.bf16.msrb.mxu2 %v9846_v49  ;;  %v9733_v49 = vld [vmem:[%s17758_s9 + $0x588] sm:$0xf]  ;;  %v9706_v13 = vor.u32 %v11331_v4, %v9705_v8  ;;  %v9181_v8 = vld [vmem:[%s17758_s9 + $0x130] sm:$0xf]  ;;  %v11199_v4 = vld [vmem:[%s17758_s9 + $0x148] sm:$0xf0] }
 0x565   :  { %7235 = vmatpush.bf16.msra.mxu1 %v10518_v40  ;;  %7274 = vmatpush.bf16.msrb.mxu0 %v9402_v28  ;;  %v10808_v40 = vmul.f32 -1.442695, %v6944_v63  ;;  %v11506_v28 = vld [vmem:[%s17758_s9 + $0xae0] sm:$0xf0]  ;;  %v9734_v22 = vor.u32 %v11338_v11, %v9733_v49  ;;  %v10741_v11 = vld [vmem:[%s17758_s9 + $0xd68] sm:$0xf] }
 0x566   :  { %v10406_v10 = vor.u32 %v11506_v28, %v10405_v25  ;;  %v11314_v63 = vld [vmem:[%s17758_s9 + $0x4e4] sm:$0xf]  ;;  %v11192_v19 = vld [vmem:[%s17758_s9 + $0x110] sm:$0xf0] }
 0x567   :  { %7312 = vmatpush.bf16.msrb.mxu3 %v10102_v15  ;;  %v16918_v15 = vpop.f32.mrf.mxu3  ;;  %v6984_v32 = vpop.f32.mrf.mxu1  ;;  %11674 = vpow2.f32 %v10808_v40  ;;  %v11206_v49 = vld [vmem:[%s17758_s9 + $0x180] sm:$0xf0]  ;;  %v10770_v40 = vor.u32 %v11597_v48, %v10769_v61  ;;  %v9567_v48 = vld [vmem:[%s17758_s9 + $0x454] sm:$0xf0] }
 0x568   :  { %7197 = vmatpush.bf16.msrb.mxu2 %v9818_v58  ;;  %v11499_v58 = vld [vmem:[%s17758_s9 + $0xaa8] sm:$0xf0]  ;;  %v6945_v44 = vpop.f32.mrf.mxu2  ;;  %v10323_v32 = vld [vmem:[%s17758_s9 + $0xa3c] sm:$0xf0]  ;;  %v11590_v25 = vld [vmem:[%s17758_s9 + $0xd80] sm:$0xf0] }
 0x569   :  { %7236 = vmatpush.bf16.msra.mxu1 %v10490_v37  ;;  %7275 = vmatpush.bf16.msrb.mxu0 %v9374_v27  ;;  %v11216_v37 = vld [vmem:[%s17758_s9 + $0x1d4] sm:$0xf]  ;;  %v9259_v27 = vld [vmem:[%s17758_s9 + $0x1ec] sm:$0xf0] }
 0x56b   :  { %7313 = vmatpush.bf16.msrb.mxu3 %v10074_v21  ;;  %v11391_v21 = vld [vmem:[%s17758_s9 + $0x74c] sm:$0xf] }
 0x56c   :  { %7198 = vmatpush.bf16.msrb.mxu2 %v9790_v16  ;;  %v9962_v39 = vor.u32 %v11391_v21, %v9959_v3  ;;  %v10295_v21 = vld [vmem:[%s17758_s9 + $0xa04] sm:$0xf0]  ;;  %v17047_v3 = vld [vmem:[%s17759_s10] sm:$0x7f] }
 0x56d   :  { %7237 = vmatpush.bf16.msra.mxu1 %v10462_v36  ;;  %7276 = vmatpush.bf16.msrb.mxu0 %v9346_v0  ;;  %v11675_v16 = vpop.eup %11674  ;;  %v10378_v36 = vor.u32 %v11499_v58, %v10377_v43  ;;  %v9262_v0 = vor.u32 %v11216_v37, %v9259_v27  ;;  %v10713_v43 = vld [vmem:[%s17758_s9 + $0xd30] sm:$0xf]  ;;  %v11583_v58 = vld [vmem:[%s17758_s9 + $0xd48] sm:$0xf0]  ;;  %v11300_v37 = vld [vmem:[%s17758_s9 + $0x474] sm:$0xf]  ;;  %v10298_v27 = vor.u32 %v11475_v1, %v10295_v21 }
 0x56e   :  { %v16998_v54 = vadd.f32 1.0, %v11675_v16  ;;  %v9539_v1 = vld [vmem:[%s17758_s9 + $0x41c] sm:$0xf0]  ;;  %v11454_v21 = vld [vmem:[%s17758_s9 + $0x944] sm:$0xf] }
 0x56f   :  { %7314 = vmatpush.bf16.msrb.mxu3 %v10046_v33  ;;  %v7062_v23 = vpop.f32.mrf.mxu3  ;;  %v11604_v33 = vld [vmem:[%s17758_s9 + $0xdf0] sm:$0xf0] }
 0x570   :  { %7199 = vmatpush.bf16.msrb.mxu2 %v9762_v30  ;;  %11676 = vrcp.f32 %v16998_v54  ;;  %v9209_v30 = vld [vmem:[%s17758_s9 + $0x168] sm:$0xf]  ;;  %v10267_v23 = vld [vmem:[%s17758_s9 + $0x9cc] sm:$0xf0]  ;;  %v7521_v31 = vand.u32 2147483648, %v16998_v54  ;;  %vm7515_vm15 = vweird.f32 %v16998_v54 }
 0x571   :  { %7238 = vmatpush.bf16.msra.mxu1 %v10434_v2  ;;  %7277 = vmatpush.bf16.msrb.mxu0 %v9318_v51  ;;  %v9654_v2 = vor.u32 %v11314_v63, %v9651_v47  ;;  %v10326_v51 = vor.u32 %v11482_v59, %v10323_v32  ;;  %v9210_v28 = vor.u32 %v11206_v49, %v9209_v30  ;;  %v11461_v63 = vld [vmem:[%s17758_s9 + $0x97c] sm:$0xf]  ;;  %v9125_v59 = vld [vmem:[%s17758_s9 + $0xc0] sm:$0xf] }
 0x572   :  { %v10270_v29 = vor.u32 %v11468_v9, %v10267_v23  ;;  %v11185_v32 = vld [vmem:[%s17758_s9 + $0xd8] sm:$0xf0]  ;;  %v6983_v30 = vadd.f32 %v16868_v12, %v16633_v56  ;;  %v7522_v49 = vor.u32 1.1754944e-38, %v7521_v31  ;;  %v11286_v12 = vld [vmem:[%s17758_s9 + $0x404] sm:$0xf] }
 0x573   :  { %7315 = vmatpush.bf16.msrb.mxu3 %v10018_v35  ;;  %v10798_v35 = vor.u32 %v11604_v33, %v10797_v17  ;;  %v9182_v17 = vor.u32 %v11199_v4, %v9181_v8  ;;  %v11569_v56 = vld [vmem:[%s17758_s9 + $0xcd8] sm:$0xf0]  ;;  %v9097_v4 = vld [vmem:[%s17758_s9 + $0x88] sm:$0xf]  ;;  %v10601_v31 = vld [vmem:[%s17758_s9 + $0xc50] sm:$0xf] }
 0x574   :  { %7200 = vmatpush.bf16.msrb.mxu2 %v9734_v22  ;;  %v4424_v22 = vperm.slane %v17047_v3, 3  ;;  %v9511_v23 = vld [vmem:[%s17758_s9 + $0x3e4] sm:$0xf0] }
 0x575   :  { %7239 = vmatpush.bf16.msra.mxu1 %v10406_v10  ;;  %7278 = vmatpush.bf16.msrb.mxu0 %v9290_v53  ;;  %v10742_v53 = vor.u32 %v11590_v25, %v10741_v11 }
 0x576   :  { %v17058_v10 = vpop.eup %11676  ;;  %v7061_v33 = vadd.f32 %v16918_v15, %v4424_v22  ;;  %v10685_v15 = vld [vmem:[%s17758_s9 + $0xcf8] sm:$0xf]  ;;  %v10211_v22 = vld [vmem:[%s17758_s9 + $0x95c] sm:$0xf0] }
 0x577   :  { %7316 = vmatpush.bf16.msrb.mxu3 %v9990_v52  ;;  %v11307_v52 = vld [vmem:[%s17758_s9 + $0x4ac] sm:$0xf]  ;;  %vm7516_vm14 = vweird.f32 %v17058_v10 }
 0x578   :  { %7201 = vmatpush.bf16.msrb.mxu2 %v9706_v13  ;;  %v9626_v44 = vor.u32 %v11307_v52, %v9623_v7  ;;  %v9153_v13 = vld [vmem:[%s17758_s9 + $0xf8] sm:$0xf]  ;;  %vm7517_vm0 = vmor %vm7515_vm15, %vm7516_vm14 }
 0x579   :  { %7240 = vmatpush.bf16.msra.mxu1 %v10378_v36  ;;  %7279 = vmatpush.bf16.msrb.mxu0 %v9262_v0  ;;  %v17089_v20 = vpop.f32.mrf.mxu1  ;;  %v10714_v36 = vor.u32 %v11583_v58, %v10713_v43  ;;  %v9598_v0 = vor.u32 %v11300_v37, %v9595_v50  ;;  %v9154_v61 = vor.u32 %v11192_v19, %v9153_v13  ;;  %v11562_v50 = vld [vmem:[%s17758_s9 + $0xca0] sm:$0xf0]  ;;  %v11171_v13 = vld [vmem:[%s17758_s9 + $0x68] sm:$0xf0] }
 0x57b   :  { %7317 = vmatpush.bf16.msrb.mxu3 %v9962_v39  ;;  %7202 = vmatmul.bf16.vlgmr.msrb.gmra.mxu2 %v15002_v38  ;;  %v7511_v39 = vmul.f32 %v17058_v10, %v16998_v54  ;;  %v7073_v16 = vpop.f32.mrf.mxu0 }
 0x57c   :  { %7246 = vmatpush.bf16.msra.mxu2 %v10798_v35  ;;  %7241 = vmatmul.bf16.vlgmr.msra.gmra.mxu1 %v15582_v18  ;;  %v17097_v35 = vadd.f32 %v7073_v16, %v7061_v33  ;;  %v10183_v33 = vld [vmem:[%s17758_s9 + $0x924] sm:$0xf0]  ;;  %v11555_v16 = vld [vmem:[%s17758_s9 + $0xc68] sm:$0xf0] }
 0x57d   :  { %7285 = vmatpush.bf16.msrb.mxu1 %v9682_v45  ;;  %7324 = vmatpush.bf16.msra.mxu0 %v10354_v26  ;;  %v7512_v5 = vsub.f32 1.0, %v7511_v39  ;;  %v11576_v45 = vld [vmem:[%s17758_s9 + $0xd10] sm:$0xf0]  ;;  %v11293_v26 = vld [vmem:[%s17758_s9 + $0x43c] sm:$0xf]  ;;  %v9542_v39 = vor.u32 %v11286_v12, %v9539_v1 }
 0x57e   :  { %7280 = vmatmul.bf16.vlgmr.msrb.gmra.mxu0 %v14741_v41  ;;  %v6995_v25 = vpop.f32.mrf.mxu2  ;;  %v11538_v1 = vld [vmem:[%s17758_s9 + $0xbe4] sm:$0xf] }
 0x57f   :  { %7318 = vmatpush.bf16.msrb.mxu3 %v9934_v14  ;;  %v7513_v6 = vmul.f32 %v17058_v10, %v7512_v5  ;;  %v7519_v14 = vand.u32 2147483647, %v16998_v54  ;;  %v10657_v54 = vld [vmem:[%s17758_s9 + $0xcc0] sm:$0xf]  ;;  %v6996_v7 = vadd.f32 %v6995_v25, %v6983_v30  ;;  %v9069_v5 = vld [vmem:[%s17758_s9 + $0x50] sm:$0xf] }
 0x580   :  { %7247 = vmatpush.bf16.msra.mxu2 %v10770_v40  ;;  %v10686_v40 = vor.u32 %v11576_v45, %v10685_v15  ;;  %v10658_v37 = vor.u32 %v11569_v56, %v10657_v54  ;;  %v11272_v15 = vld [vmem:[%s17758_s9 + $0x394] sm:$0xf]  ;;  %v9070_v45 = vor.u32 %v11171_v13, %v9069_v5  ;;  %v10575_v30 = vld [vmem:[%s17758_s9 + $0xc34] sm:$0xf0]  ;;  %v10077_v5 = vld [vmem:[%s17758_s9 + $0x830] sm:$0xf] }
 0x581   :  { %7286 = vmatpush.bf16.msrb.mxu1 %v9654_v2  ;;  %7325 = vmatpush.bf16.msra.mxu0 %v10326_v51  ;;  %v7514_v47 = vadd.f32 %v17058_v10, %v7513_v6  ;;  %vm7520_vm1 = vcmp.eq.f32.partialorder %v7519_v14, 8.507059e+37  ;;  %v9570_v51 = vor.u32 %v11293_v26, %v9567_v48  ;;  %v7036_v43 = vpop.f32.mrf.mxu1  ;;  %v9483_v6 = vld [vmem:[%s17758_s9 + $0x3ac] sm:$0xf0]  ;;  %v11440_v14 = vld [vmem:[%s17758_s9 + $0x8d4] sm:$0xf] }
 0x582   :  { %7319 = vmatmul.bf16.vlgmr.msrb.gmra.mxu3 %v15185_v57  ;;  %v10155_v26 = vld [vmem:[%s17758_s9 + $0x8ec] sm:$0xf0]  ;;  %v11164_v48 = vld [vmem:[%s17758_s9 + $0x30] sm:$0xf0]  ;;  %v9486_v54 = vor.u32 %v11272_v15, %v9483_v6  ;;  %v10105_v43 = vld [vmem:[%s17758_s9 + $0x868] sm:$0xf] }
 0x583   :  { %7363 = vmatpush.bf16.msra.mxu3 %v9238_v46  ;;  %v10239_v46 = vld [vmem:[%s17758_s9 + $0x994] sm:$0xf0]  ;;  %v7518_v2 = vsel %vm7517_vm0, %v17058_v10, %v7514_v47  ;;  %v11178_v10 = vld [vmem:[%s17758_s9 + $0xa0] sm:$0xf0]  ;;  %v7075_v58 = vpop.f32.mrf.mxu0  ;;  %v11423_v13 = vld [vmem:[%s17758_s9 + $0x848] sm:$0xf0] }
 0x584   :  { %7248 = vmatpush.bf16.msra.mxu2 %v10742_v53  ;;  %v10242_v11 = vor.u32 %v11461_v63, %v10239_v46  ;;  %v7523_v52 = vsel %vm7520_vm1, %v7522_v49, %v7518_v2  ;;  %v17154_v53 = vadd.f32 %v16692_v42, %v6996_v7  ;;  %v11279_v42 = vld [vmem:[%s17758_s9 + $0x3cc] sm:$0xf]  ;;  %v9098_v9 = vor.u32 %v11178_v10, %v9097_v4  ;;  %v11377_v46 = vld [vmem:[%s17758_s9 + $0x6dc] sm:$0xf]  ;;  %v9903_v47 = vld [vmem:[%s17758_s9 + $0x6f4] sm:$0xf0] }
 0x585   :  { %7287 = vmatpush.bf16.msrb.mxu1 %v9626_v44  ;;  %7326 = vmatpush.bf16.msra.mxu0 %v10298_v27  ;;  %7601 = vst [vmem:[#allocation2 + $0x8] sm:$0xff] %v7523_v52  ;;  %v17145_v8 = vpop.f32.mrf.mxu3  ;;  %v10214_v44 = vor.u32 %v11454_v21, %v10211_v22  ;;  %v10629_v27 = vld [vmem:[%s17758_s9 + $0xc88] sm:$0xf]  ;;  %v9461_v49 = vld [vmem:[%s17758_s9 + $0x360] sm:$0xf]  ;;  %v10158_v2 = vor.u32 %v11440_v14, %v10155_v26 }
 0x586   :  { %v10630_v19 = vor.u32 %v11562_v50, %v10629_v27  ;;  %v9906_v56 = vor.u32 %v11377_v46, %v9903_v47  ;;  %v9875_v7 = vld [vmem:[%s17758_s9 + $0x6bc] sm:$0xf0]  ;;  %v9433_v4 = vld [vmem:[%s17758_s9 + $0x328] sm:$0xf]  ;;  %v11262_v10 = vld [vmem:[%s17758_s9 + $0x340] sm:$0xf0]  ;;  %v7022_v46 = vadd.f32 %v16854_v55, %v17154_v53 }
 0x587   :  { %7364 = vmatpush.bf16.msra.mxu3 %v9210_v28  ;;  %v9126_v28 = vor.u32 %v11185_v32, %v9125_v59  ;;  %v11545_v59 = vld [vmem:[%s17758_s9 + $0xc1c] sm:$0xf]  ;;  %v10602_v32 = vor.u32 %v11555_v16, %v10601_v31  ;;  %v10547_v22 = vld [vmem:[%s17758_s9 + $0xbfc] sm:$0xf0]  ;;  %v11430_v58 = vld [vmem:[%s17758_s9 + $0x880] sm:$0xf0] }
 0x588   :  { %7249 = vmatpush.bf16.msra.mxu2 %v10714_v36  ;;  %v9514_v36 = vor.u32 %v11279_v42, %v9511_v23  ;;  %v10578_v12 = vor.u32 %v11545_v59, %v10575_v30  ;;  %v11363_v27 = vld [vmem:[%s17758_s9 + $0x66c] sm:$0xf]  ;;  %v9847_v50 = vld [vmem:[%s17758_s9 + $0x684] sm:$0xf0]  ;;  %v10491_v15 = vld [vmem:[%s17758_s9 + $0xb8c] sm:$0xf0] }
 0x589   :  { %7288 = vmatpush.bf16.msrb.mxu1 %v9598_v0  ;;  %7327 = vmatpush.bf16.msra.mxu0 %v10270_v29  ;;  %v6997_v29 = vpop.f32.mrf.mxu2  ;;  %v11531_v42 = vld [vmem:[%s17758_s9 + $0xbac] sm:$0xf]  ;;  %v10519_v23 = vld [vmem:[%s17758_s9 + $0xbc4] sm:$0xf0]  ;;  %v9377_v6 = vld [vmem:[%s17758_s9 + $0x2b8] sm:$0xf] }
 0x58a   :  { %v10522_v31 = vor.u32 %v11531_v42, %v10519_v23  ;;  %v11524_v29 = vld [vmem:[%s17758_s9 + $0xb74] sm:$0xf]  ;;  %v9791_v30 = vld [vmem:[%s17758_s9 + $0x614] sm:$0xf0]  ;;  %v9349_v53 = vld [vmem:[%s17758_s9 + $0x280] sm:$0xf] }
 0x58b   :  { %7365 = vmatpush.bf16.msra.mxu3 %v9182_v17  ;;  %v11447_v17 = vld [vmem:[%s17758_s9 + $0x90c] sm:$0xf]  ;;  %v11248_v14 = vld [vmem:[%s17758_s9 + $0x2d0] sm:$0xf0]  ;;  %v10494_v47 = vor.u32 %v11524_v29, %v10491_v15  ;;  %v10463_v55 = vld [vmem:[%s17758_s9 + $0xb54] sm:$0xf0] }
 0x58c   :  { %7250 = vmatpush.bf16.msra.mxu2 %v10686_v40  ;;  %v10186_v0 = vor.u32 %v11447_v17, %v10183_v33  ;;  %v11269_v40 = vld [vmem:[%s17758_s9 + $0x378] sm:$0xf0]  ;;  %v9405_v17 = vld [vmem:[%s17758_s9 + $0x2f0] sm:$0xf]  ;;  %v11255_v33 = vld [vmem:[%s17758_s9 + $0x308] sm:$0xf0]  ;;  %v9378_v59 = vor.u32 %v11248_v14, %v9377_v6 }
 0x58d   :  { %7289 = vmatpush.bf16.msrb.mxu1 %v9570_v51  ;;  %7328 = vmatpush.bf16.msra.mxu0 %v10242_v11  ;;  %v7114_v63 = vpop.f32.mrf.mxu3  ;;  %v10133_v51 = vld [vmem:[%s17758_s9 + $0x8a0] sm:$0xf]  ;;  %v11437_v11 = vld [vmem:[%s17758_s9 + $0x8b8] sm:$0xf0]  ;;  %v9462_v52 = vor.u32 %v11269_v40, %v9461_v49  ;;  %v9406_v16 = vor.u32 %v11255_v33, %v9405_v17  ;;  %v11416_v26 = vld [vmem:[%s17758_s9 + $0x810] sm:$0xf0] }
 0x58e   :  { %v10134_v21 = vor.u32 %v11437_v11, %v10133_v51  ;;  %v11517_v49 = vld [vmem:[%s17758_s9 + $0xb3c] sm:$0xf]  ;;  %v11335_v23 = vld [vmem:[%s17758_s9 + $0x58c] sm:$0xf]  ;;  %v9735_v17 = vld [vmem:[%s17758_s9 + $0x5a4] sm:$0xf0] }
 0x58f   :  { %7366 = vmatpush.bf16.msra.mxu3 %v9154_v61  ;;  %v9041_v61 = vld [vmem:[%s17758_s9 + $0x18] sm:$0xf]  ;;  %v11409_v51 = vld [vmem:[%s17758_s9 + $0x7d8] sm:$0xf0]  ;;  %v11503_v33 = vld [vmem:[%s17758_s9 + $0xacc] sm:$0xf] }
 0x590   :  { %7251 = vmatpush.bf16.msra.mxu2 %v10658_v37  ;;  %v9042_v25 = vor.u32 %v11164_v48, %v9041_v61  ;;  %v11328_v29 = vld [vmem:[%s17758_s9 + $0x554] sm:$0xf] }
 0x591   :  { %7290 = vmatpush.bf16.msrb.mxu1 %v9542_v39  ;;  %7329 = vmatpush.bf16.msra.mxu0 %v10214_v44  ;;  %v10550_v39 = vor.u32 %v11538_v1, %v10547_v22  ;;  %v9434_v44 = vor.u32 %v11262_v10, %v9433_v4  ;;  %v11510_v1 = vld [vmem:[%s17758_s9 + $0xb04] sm:$0xf]  ;;  %v10435_v22 = vld [vmem:[%s17758_s9 + $0xb1c] sm:$0xf0]  ;;  %v9321_v4 = vld [vmem:[%s17758_s9 + $0x248] sm:$0xf] }
 0x592   :  { %v11234_v10 = vld [vmem:[%s17758_s9 + $0x260] sm:$0xf0]  ;;  %v10438_v42 = vor.u32 %v11510_v1, %v10435_v22  ;;  %v9657_v22 = vld [vmem:[%s17758_s9 + $0x4e8] sm:$0xf] }
 0x593   :  { %7367 = vmatpush.bf16.msra.mxu3 %v9126_v28  ;;  %v11370_v28 = vld [vmem:[%s17758_s9 + $0x6a4] sm:$0xf] }
 0x594   :  { %7252 = vmatpush.bf16.msra.mxu2 %v10630_v19  ;;  %v9878_v37 = vor.u32 %v11370_v28, %v9875_v7  ;;  %v9850_v19 = vor.u32 %v11363_v27, %v9847_v50  ;;  %v11342_v28 = vld [vmem:[%s17758_s9 + $0x5c4] sm:$0xf]  ;;  %v9763_v7 = vld [vmem:[%s17758_s9 + $0x5dc] sm:$0xf0] }
 0x595   :  { %7291 = vmatpush.bf16.msrb.mxu1 %v9514_v36  ;;  %7330 = vmatpush.bf16.msra.mxu0 %v10186_v0  ;;  %v11356_v36 = vld [vmem:[%s17758_s9 + $0x634] sm:$0xf]  ;;  %v9819_v0 = vld [vmem:[%s17758_s9 + $0x64c] sm:$0xf0]  ;;  %v9766_v50 = vor.u32 %v11342_v28, %v9763_v7 }
 0x596   :  { %v9822_v63 = vor.u32 %v11356_v36, %v9819_v0  ;;  %v11395_v36 = vld [vmem:[%s17758_s9 + $0x768] sm:$0xf0]  ;;  %v9738_v0 = vor.u32 %v11335_v23, %v9735_v17  ;;  %v10301_v23 = vld [vmem:[%s17758_s9 + $0x9f0] sm:$0xf] }
 0x597   :  { %7368 = vmatpush.bf16.msra.mxu3 %v9098_v9  ;;  %v10106_v9 = vor.u32 %v11430_v58, %v10105_v43  ;;  %v9993_v58 = vld [vmem:[%s17758_s9 + $0x788] sm:$0xf]  ;;  %v11479_v17 = vld [vmem:[%s17758_s9 + $0xa08] sm:$0xf0] }
 0x598   :  { %7253 = vmatpush.bf16.msra.mxu2 %v10602_v32  ;;  %v11349_v32 = vld [vmem:[%s17758_s9 + $0x5fc] sm:$0xf] }
 0x599   :  { %7292 = vmatpush.bf16.msrb.mxu1 %v9486_v54  ;;  %7331 = vmatpush.bf16.msra.mxu0 %v10158_v2  ;;  %v17304_v61 = vpop.f32.mrf.mxu1  ;;  %v11241_v54 = vld [vmem:[%s17758_s9 + $0x298] sm:$0xf0]  ;;  %v10021_v2 = vld [vmem:[%s17758_s9 + $0x7c0] sm:$0xf]  ;;  %v9794_v11 = vor.u32 %v11349_v32, %v9791_v30  ;;  %v11388_v32 = vld [vmem:[%s17758_s9 + $0x730] sm:$0xf0] }
 0x59b   :  { %7369 = vmatpush.bf16.msra.mxu3 %v9070_v45  ;;  %7254 = vmatmul.bf16.vlgmr.msra.gmra.mxu2 %v15749_v60  ;;  %v10049_v45 = vld [vmem:[%s17758_s9 + $0x7f8] sm:$0xf]  ;;  %v17306_v48 = vpop.f32.mrf.mxu0 }
 0x59c   :  { %7298 = vmatpush.bf16.msrb.mxu2 %v9906_v56  ;;  %7293 = vmatmul.bf16.vlgmr.msrb.gmra.mxu1 %v14831_v24  ;;  %v10050_v40 = vor.u32 %v11416_v26, %v10049_v45  ;;  %v10466_v56 = vor.u32 %v11517_v49, %v10463_v55  ;;  %v11496_v45 = vld [vmem:[%s17758_s9 + $0xa94] sm:$0xf]  ;;  %v10379_v26 = vld [vmem:[%s17758_s9 + $0xaac] sm:$0xf0]  ;;  %v11601_v49 = vld [vmem:[%s17758_s9 + $0xddc] sm:$0xf] }
 0x59d   :  { %7337 = vmatpush.bf16.msra.mxu1 %v10578_v12  ;;  %7376 = vmatpush.bf16.msrb.mxu0 %v9462_v52  ;;  %v9350_v12 = vor.u32 %v11241_v54, %v9349_v53  ;;  %v9685_v55 = vld [vmem:[%s17758_s9 + $0x520] sm:$0xf] }
 0x59e   :  { %7332 = vmatmul.bf16.vlgmr.msra.gmra.mxu0 %v15362_v34  ;;  %v7047_v52 = vpop.f32.mrf.mxu2 }
 0x59f   :  { %7370 = vmatpush.bf16.msra.mxu3 %v9042_v25  ;;  %v7035_v25 = vadd.f32 %v17089_v20, %v7022_v46 }
 0x5a0   :  { %7299 = vmatpush.bf16.msrb.mxu2 %v9878_v37  ;;  %v11402_v37 = vld [vmem:[%s17758_s9 + $0x7a0] sm:$0xf0] }
 0x5a1   :  { %7338 = vmatpush.bf16.msra.mxu1 %v10550_v39  ;;  %7377 = vmatpush.bf16.msrb.mxu0 %v9434_v44  ;;  %v7048_v20 = vadd.f32 %v7047_v52, %v7035_v25  ;;  %v7088_v44 = vpop.f32.mrf.mxu1 }
 0x5a2   :  { %7371 = vmatmul.bf16.vlgmr.msra.gmra.mxu3 %v14633_v62  ;;  %v10078_v62 = vor.u32 %v11423_v13, %v10077_v5  ;;  %v9994_v5 = vor.u32 %v11402_v37, %v9993_v58  ;;  %v10407_v13 = vld [vmem:[%s17758_s9 + $0xae4] sm:$0xf0]  ;;  %v11486_v58 = vld [vmem:[%s17758_s9 + $0xa40] sm:$0xf0] }
 0x5a3   :  { %7415 = vmatpush.bf16.msrb.mxu3 %v10134_v21  ;;  %v10022_v21 = vor.u32 %v11409_v51, %v10021_v2  ;;  %v10809_v39 = vmul.f32 -1.442695, %v7048_v20  ;;  %v7127_v27 = vpop.f32.mrf.mxu0  ;;  %v10410_v15 = vor.u32 %v11503_v33, %v10407_v13  ;;  %v11325_v2 = vld [vmem:[%s17758_s9 + $0x538] sm:$0xf0]  ;;  %v10357_v51 = vld [vmem:[%s17758_s9 + $0xa60] sm:$0xf] }
 0x5a4   :  { %7300 = vmatpush.bf16.msrb.mxu2 %v9850_v19  ;;  %v9293_v19 = vld [vmem:[%s17758_s9 + $0x210] sm:$0xf]  ;;  %v9686_v7 = vor.u32 %v11325_v2, %v9685_v55  ;;  %v10771_v20 = vld [vmem:[%s17758_s9 + $0xdbc] sm:$0xf0]  ;;  %v11587_v27 = vld [vmem:[%s17758_s9 + $0xd6c] sm:$0xf] }
 0x5a5   :  { %7339 = vmatpush.bf16.msra.mxu1 %v10522_v31  ;;  %7378 = vmatpush.bf16.msrb.mxu0 %v9406_v16  ;;  %v17353_v43 = vpop.f32.mrf.mxu3  ;;  %11678 = vpow2.f32 %v10809_v39  ;;  %v11227_v31 = vld [vmem:[%s17758_s9 + $0x228] sm:$0xf0]  ;;  %v9965_v16 = vld [vmem:[%s17758_s9 + $0x750] sm:$0xf]  ;;  %v11465_v2 = vld [vmem:[%s17758_s9 + $0x998] sm:$0xf0] }
 0x5a6   :  { %v9294_v6 = vor.u32 %v11227_v31, %v9293_v19  ;;  %v7049_v14 = vpop.f32.mrf.mxu2  ;;  %v9966_v46 = vor.u32 %v11395_v36, %v9965_v16  ;;  %v11580_v31 = vld [vmem:[%s17758_s9 + $0xd34] sm:$0xf]  ;;  %v10302_v36 = vor.u32 %v11479_v17, %v10301_v23  ;;  %v11283_v23 = vld [vmem:[%s17758_s9 + $0x3e8] sm:$0xf0]  ;;  %v10189_v17 = vld [vmem:[%s17758_s9 + $0x910] sm:$0xf] }
 0x5a7   :  { %7416 = vmatpush.bf16.msrb.mxu3 %v10106_v9  ;;  %v9322_v9 = vor.u32 %v11234_v10, %v9321_v4  ;;  %v11318_v4 = vld [vmem:[%s17758_s9 + $0x500] sm:$0xf0]  ;;  %v10329_v10 = vld [vmem:[%s17758_s9 + $0xa28] sm:$0xf] }
 0x5a8   :  { %7301 = vmatpush.bf16.msrb.mxu2 %v9822_v63  ;;  %v9265_v63 = vld [vmem:[%s17758_s9 + $0x1d8] sm:$0xf]  ;;  %v9658_v39 = vor.u32 %v11318_v4, %v9657_v22  ;;  %v10330_v44 = vor.u32 %v11486_v58, %v10329_v10  ;;  %v10217_v22 = vld [vmem:[%s17758_s9 + $0x948] sm:$0xf]  ;;  %v11458_v4 = vld [vmem:[%s17758_s9 + $0x960] sm:$0xf0] }
 0x5a9   :  { %7340 = vmatpush.bf16.msra.mxu1 %v10494_v47  ;;  %7379 = vmatpush.bf16.msrb.mxu0 %v9378_v59  ;;  %v11220_v47 = vld [vmem:[%s17758_s9 + $0x1f0] sm:$0xf0]  ;;  %v9937_v59 = vld [vmem:[%s17758_s9 + $0x718] sm:$0xf] }
 0x5aa   :  { %v9938_v52 = vor.u32 %v11388_v32, %v9937_v59 }
 0x5ab   :  { %7417 = vmatpush.bf16.msrb.mxu3 %v10078_v62  ;;  %v9707_v62 = vld [vmem:[%s17758_s9 + $0x56c] sm:$0xf0]  ;;  %v11679_v53 = vpop.eup %11678 }
 0x5ac   :  { %7302 = vmatpush.bf16.msrb.mxu2 %v9794_v11  ;;  %v9710_v54 = vor.u32 %v11328_v29, %v9707_v62  ;;  %v11493_v11 = vld [vmem:[%s17758_s9 + $0xa78] sm:$0xf0]  ;;  %v17427_v25 = vadd.f32 1.0, %v11679_v53  ;;  %v10273_v62 = vld [vmem:[%s17758_s9 + $0x9b8] sm:$0xf] }
 0x5ad   :  { %7341 = vmatpush.bf16.msra.mxu1 %v10466_v56  ;;  %7380 = vmatpush.bf16.msrb.mxu0 %v9350_v12  ;;  %v7166_v30 = vpop.f32.mrf.mxu3  ;;  %v10382_v56 = vor.u32 %v11496_v45, %v10379_v26  ;;  %v9266_v12 = vor.u32 %v11220_v47, %v9265_v63  ;;  %v10358_v1 = vor.u32 %v11493_v11, %v10357_v51  ;;  %v11297_v53 = vld [vmem:[%s17758_s9 + $0x458] sm:$0xf0] }
 0x5ae   :  { %11680 = vrcp.f32 %v17427_v25  ;;  %v7534_v26 = vand.u32 2147483647, %v17427_v25  ;;  %vm7530_vm3 = vweird.f32 %v17427_v25  ;;  %v7087_v11 = vadd.f32 %v17304_v61, %v17097_v35  ;;  %v9545_v35 = vld [vmem:[%s17758_s9 + $0x408] sm:$0xf]  ;;  %v11290_v61 = vld [vmem:[%s17758_s9 + $0x420] sm:$0xf0] }
 0x5af   :  { %7418 = vmatpush.bf16.msrb.mxu3 %v10050_v40  ;;  %v10799_v40 = vld [vmem:[%s17758_s9 + $0xdf4] sm:$0xf0] }
 0x5b0   :  { %7303 = vmatpush.bf16.msrb.mxu2 %v9766_v50  ;;  %v10802_v28 = vor.u32 %v11601_v49, %v10799_v40  ;;  %v10743_v50 = vld [vmem:[%s17758_s9 + $0xd84] sm:$0xf0]  ;;  %v11573_v49 = vld [vmem:[%s17758_s9 + $0xcfc] sm:$0xf]  ;;  %v9573_v40 = vld [vmem:[%s17758_s9 + $0x440] sm:$0xf] }
 0x5b1   :  { %7342 = vmatpush.bf16.msra.mxu1 %v10438_v42  ;;  %7381 = vmatpush.bf16.msrb.mxu0 %v9322_v9  ;;  %v9629_v42 = vld [vmem:[%s17758_s9 + $0x4b0] sm:$0xf]  ;;  %v11311_v9 = vld [vmem:[%s17758_s9 + $0x4c8] sm:$0xf0]  ;;  %v10746_v19 = vor.u32 %v11587_v27, %v10743_v50  ;;  %vm7535_vm5 = vcmp.eq.f32.partialorder %v7534_v26, 8.507059e+37  ;;  %v9546_v27 = vor.u32 %v11290_v61, %v9545_v35  ;;  %v10218_v50 = vor.u32 %v11458_v4, %v10217_v22 }
 0x5b2   :  { %v9630_v16 = vor.u32 %v11311_v9, %v9629_v42  ;;  %v11559_v42 = vld [vmem:[%s17758_s9 + $0xc8c] sm:$0xf]  ;;  %v10631_v9 = vld [vmem:[%s17758_s9 + $0xca4] sm:$0xf0]  ;;  %v9797_v61 = vld [vmem:[%s17758_s9 + $0x600] sm:$0xf] }
 0x5b3   :  { %7419 = vmatpush.bf16.msrb.mxu3 %v10022_v21  ;;  %v11594_v21 = vld [vmem:[%s17758_s9 + $0xda4] sm:$0xf]  ;;  %v11353_v22 = vld [vmem:[%s17758_s9 + $0x618] sm:$0xf0]  ;;  %v10469_v4 = vld [vmem:[%s17758_s9 + $0xb40] sm:$0xf] }
 0x5b4   :  { %7304 = vmatpush.bf16.msrb.mxu2 %v9738_v0  ;;  %v10774_v37 = vor.u32 %v11594_v21, %v10771_v20  ;;  %v11681_v33 = vpop.eup %11680  ;;  %v10715_v0 = vld [vmem:[%s17758_s9 + $0xd4c] sm:$0xf0]  ;;  %v10659_v21 = vld [vmem:[%s17758_s9 + $0xcdc] sm:$0xf0] }
 0x5b5   :  { %7343 = vmatpush.bf16.msra.mxu1 %v10410_v15  ;;  %7382 = vmatpush.bf16.msrb.mxu0 %v9294_v6  ;;  %v7526_v13 = vmul.f32 %v11681_v33, %v17427_v25  ;;  %v11472_v15 = vld [vmem:[%s17758_s9 + $0x9d0] sm:$0xf0]  ;;  %v7536_v6 = vand.u32 2147483648, %v17427_v25  ;;  %vm7531_vm2 = vweird.f32 %v11681_v33  ;;  %v10718_v47 = vor.u32 %v11580_v31, %v10715_v0  ;;  %v9489_v0 = vld [vmem:[%s17758_s9 + $0x398] sm:$0xf] }
 0x5b6   :  { %v10274_v30 = vor.u32 %v11472_v15, %v10273_v62  ;;  %vm7532_vm4 = vmor %vm7530_vm3, %vm7531_vm2  ;;  %v9909_v62 = vld [vmem:[%s17758_s9 + $0x6e0] sm:$0xf] }
 0x5b7   :  { %7420 = vmatpush.bf16.msrb.mxu3 %v9994_v5  ;;  %v4425_v5 = vperm.slane %v17047_v3, 4  ;;  %v7527_v29 = vsub.f32 1.0, %v7526_v13  ;;  %v7537_v51 = vor.u32 1.1754944e-38, %v7536_v6  ;;  %v11552_v13 = vld [vmem:[%s17758_s9 + $0xc54] sm:$0xf] }
 0x5b8   :  { %7305 = vmatpush.bf16.msrb.mxu2 %v9710_v54  ;;  %v10245_v54 = vld [vmem:[%s17758_s9 + $0x980] sm:$0xf]  ;;  %v11381_v6 = vld [vmem:[%s17758_s9 + $0x6f8] sm:$0xf0] }
 0x5b9   :  { %7344 = vmatpush.bf16.msra.mxu1 %v10382_v56  ;;  %7383 = vmatpush.bf16.msrb.mxu0 %v9266_v12  ;;  %v7165_v14 = vadd.f32 %v17353_v43, %v4425_v5  ;;  %v7528_v45 = vmul.f32 %v11681_v33, %v7527_v29  ;;  %v17493_v63 = vpop.f32.mrf.mxu1  ;;  %v10687_v43 = vld [vmem:[%s17758_s9 + $0xd14] sm:$0xf0]  ;;  %v11566_v12 = vld [vmem:[%s17758_s9 + $0xcc4] sm:$0xf]  ;;  %v10634_v5 = vor.u32 %v11559_v42, %v10631_v9  ;;  %v11444_v29 = vld [vmem:[%s17758_s9 + $0x8f0] sm:$0xf0] }
 0x5ba   :  { %v10690_v25 = vor.u32 %v11573_v49, %v10687_v43  ;;  %v9881_v49 = vld [vmem:[%s17758_s9 + $0x6a8] sm:$0xf]  ;;  %v11374_v43 = vld [vmem:[%s17758_s9 + $0x6c0] sm:$0xf0] }
 0x5bb   :  { %7421 = vmatpush.bf16.msrb.mxu3 %v9966_v46  ;;  %7306 = vmatmul.bf16.vlgmr.msrb.gmra.mxu2 %v15002_v38  ;;  %v7177_v46 = vpop.f32.mrf.mxu0  ;;  %v7529_v55 = vadd.f32 %v11681_v33, %v7528_v45  ;;  %v11549_v45 = vld [vmem:[%s17758_s9 + $0xc38] sm:$0xf0]  ;;  %v10441_v42 = vld [vmem:[%s17758_s9 + $0xb08] sm:$0xf]  ;;  %v11514_v9 = vld [vmem:[%s17758_s9 + $0xb20] sm:$0xf0] }
 0x5bc   :  { %7350 = vmatpush.bf16.msra.mxu2 %v10802_v28  ;;  %7345 = vmatmul.bf16.vlgmr.msra.gmra.mxu1 %v15582_v18  ;;  %v17495_v59 = vadd.f32 %v7177_v46, %v7165_v14  ;;  %v9574_v28 = vor.u32 %v11297_v53, %v9573_v40  ;;  %v10581_v14 = vld [vmem:[%s17758_s9 + $0xc20] sm:$0xf]  ;;  %v10553_v40 = vld [vmem:[%s17758_s9 + $0xbe8] sm:$0xf]  ;;  %v9882_v53 = vor.u32 %v11374_v43, %v9881_v49 }
 0x5bd   :  { %7389 = vmatpush.bf16.msrb.mxu1 %v9686_v7  ;;  %7428 = vmatpush.bf16.msra.mxu0 %v10358_v1  ;;  %v7533_v56 = vsel %vm7532_vm4, %v11681_v33, %v7529_v55  ;;  %v10246_v7 = vor.u32 %v11465_v2, %v10245_v54  ;;  %v11451_v33 = vld [vmem:[%s17758_s9 + $0x928] sm:$0xf0]  ;;  %v11542_v55 = vld [vmem:[%s17758_s9 + $0xc00] sm:$0xf0]  ;;  %v9853_v2 = vld [vmem:[%s17758_s9 + $0x670] sm:$0xf] }
 0x5be   :  { %7384 = vmatmul.bf16.vlgmr.msrb.gmra.mxu0 %v14741_v41  ;;  %v9601_v41 = vld [vmem:[%s17758_s9 + $0x478] sm:$0xf]  ;;  %v7099_v1 = vpop.f32.mrf.mxu2  ;;  %v10190_v31 = vor.u32 %v11451_v33, %v10189_v17  ;;  %v10554_v54 = vor.u32 %v11542_v55, %v10553_v40  ;;  %v10777_v43 = vld [vmem:[%s17758_s9 + $0xda8] sm:$0xf]  ;;  %v11598_v40 = vld [vmem:[%s17758_s9 + $0xdc0] sm:$0xf0] }
 0x5bf   :  { %7422 = vmatpush.bf16.msrb.mxu3 %v9938_v52  ;;  %v7538_v52 = vsel %vm7535_vm5, %v7537_v51, %v7533_v56  ;;  %v7100_v20 = vadd.f32 %v7099_v1, %v7087_v11  ;;  %v11367_v51 = vld [vmem:[%s17758_s9 + $0x688] sm:$0xf0]  ;;  %v10525_v11 = vld [vmem:[%s17758_s9 + $0xbb0] sm:$0xf]  ;;  %v10778_v55 = vor.u32 %v11598_v40, %v10777_v43  ;;  %vm7606_vm5 = vcmask 130048  }
 0x5c0   :  { %7351 = vmatpush.bf16.msra.mxu2 %v10774_v37  ;;  %7602 = vst [vmem:[#allocation2 + $0x10] sm:$0xff] %v7538_v52  ;;  %v11535_v56 = vld [vmem:[%s17758_s9 + $0xbc8] sm:$0xf0]  ;;  %v9825_v52 = vld [vmem:[%s17758_s9 + $0x638] sm:$0xf] }
 0x5c1   :  { %7390 = vmatpush.bf16.msrb.mxu1 %v9658_v39  ;;  %7429 = vmatpush.bf16.msra.mxu0 %v10330_v44  ;;  %v17540_v58 = vadd.f32 %v17145_v8, %v7100_v20  ;;  %v7140_v37 = vpop.f32.mrf.mxu1  ;;  %v10662_v44 = vor.u32 %v11566_v12, %v10659_v21  ;;  %v9517_v8 = vld [vmem:[%s17758_s9 + $0x3d0] sm:$0xf]  ;;  %v10526_v12 = vor.u32 %v11535_v56, %v10525_v11 }
 0x5c2   :  { %7423 = vmatmul.bf16.vlgmr.msrb.gmra.mxu3 %v15185_v57  ;;  %v11304_v57 = vld [vmem:[%s17758_s9 + $0x490] sm:$0xf0]  ;;  %v11521_v37 = vld [vmem:[%s17758_s9 + $0xb58] sm:$0xf0] }
 0x5c3   :  { %v9602_v32 = vor.u32 %v11304_v57, %v9601_v41  ;;  %v7179_v39 = vpop.f32.mrf.mxu0  ;;  %v11276_v41 = vld [vmem:[%s17758_s9 + $0x3b0] sm:$0xf0]  ;;  %v10161_v57 = vld [vmem:[%s17758_s9 + $0x8d8] sm:$0xf]  ;;  %v7126_v20 = vadd.f32 %v17306_v48, %v17540_v58  ;;  %v9769_v48 = vld [vmem:[%s17758_s9 + $0x5c8] sm:$0xf] }
 0x5c4   :  { %7352 = vmatpush.bf16.msra.mxu2 %v10746_v19  ;;  %v9518_v19 = vor.u32 %v11283_v23, %v9517_v8  ;;  %v9490_v46 = vor.u32 %v11276_v41, %v9489_v0  ;;  %v9798_v39 = vor.u32 %v11353_v22, %v9797_v61  ;;  %v11577_v61 = vld [vmem:[%s17758_s9 + $0xd18] sm:$0xf0] }
 0x5c5   :  { %7391 = vmatpush.bf16.msrb.mxu1 %v9630_v16  ;;  %7430 = vmatpush.bf16.msra.mxu0 %v10302_v36  ;;  %v17537_v10 = vpop.f32.mrf.mxu3  ;;  %v10603_v36 = vld [vmem:[%s17758_s9 + $0xc6c] sm:$0xf0] }
 0x5c6   :  { %v7101_v16 = vpop.f32.mrf.mxu2  ;;  %v10606_v26 = vor.u32 %v11552_v13, %v10603_v36  ;;  %v10442_v13 = vor.u32 %v11514_v9, %v10441_v42  ;;  %v11507_v36 = vld [vmem:[%s17758_s9 + $0xae8] sm:$0xf0] }
 0x5c7   :  { %v10413_v16 = vld [vmem:[%s17758_s9 + $0xad0] sm:$0xf] }
 0x5c8   :  { %7353 = vmatpush.bf16.msra.mxu2 %v10718_v47  ;;  %v10162_v47 = vor.u32 %v11444_v29, %v10161_v57  ;;  %v10414_v41 = vor.u32 %v11507_v36, %v10413_v16  ;;  %v9713_v57 = vld [vmem:[%s17758_s9 + $0x558] sm:$0xf] }
 0x5c9   :  { %7392 = vmatpush.bf16.msrb.mxu1 %v9602_v32  ;;  %7431 = vmatpush.bf16.msra.mxu0 %v10274_v30  ;;  %v9910_v32 = vor.u32 %v11381_v6, %v9909_v62  ;;  %v10582_v30 = vor.u32 %v11549_v45, %v10581_v14  ;;  %v11332_v62 = vld [vmem:[%s17758_s9 + $0x570] sm:$0xf0]  ;;  %v10805_v14 = vld [vmem:[%s17758_s9 + $0xde0] sm:$0xf]  ;;  %v11605_v45 = vld [vmem:[%s17758_s9 + $0xdf8] sm:$0xf0] }
 0x5ca   :  { %v11500_v6 = vld [vmem:[%s17758_s9 + $0xab0] sm:$0xf0]  ;;  %v10806_v49 = vor.u32 %v11605_v45, %v10805_v14 }
 0x5cc   :  { %7354 = vmatpush.bf16.msra.mxu2 %v10690_v25  ;;  %v9854_v25 = vor.u32 %v11367_v51, %v9853_v2  ;;  %v4426_v51 = vperm.slane %v17047_v3, 5 }
 0x5cd   :  { %7393 = vmatpush.bf16.msrb.mxu1 %v9574_v28  ;;  %7432 = vmatpush.bf16.msra.mxu0 %v10246_v7  ;;  %v7218_v15 = vpop.f32.mrf.mxu3  ;;  %v11360_v28 = vld [vmem:[%s17758_s9 + $0x650] sm:$0xf0]  ;;  %v10497_v7 = vld [vmem:[%s17758_s9 + $0xb78] sm:$0xf] }
 0x5ce   :  { %v9826_v21 = vor.u32 %v11360_v28, %v9825_v52  ;;  %v10385_v15 = vld [vmem:[%s17758_s9 + $0xa98] sm:$0xf] }
 0x5d0   :  { %7355 = vmatpush.bf16.msra.mxu2 %v10662_v44  ;;  %v10470_v44 = vor.u32 %v11521_v37, %v10469_v4 }
 0x5d1   :  { %7394 = vmatpush.bf16.msrb.mxu1 %v9546_v27  ;;  %7433 = vmatpush.bf16.msra.mxu0 %v10218_v50  ;;  %v7139_v27 = vadd.f32 %v17493_v63, %v7126_v20  ;;  %v11346_v50 = vld [vmem:[%s17758_s9 + $0x5e0] sm:$0xf0] }
 0x5d4   :  { %7356 = vmatpush.bf16.msra.mxu2 %v10634_v5  ;;  %v9770_v5 = vor.u32 %v11346_v50, %v9769_v48  ;;  %v11570_v48 = vld [vmem:[%s17758_s9 + $0xce0] sm:$0xf0] }
 0x5d5   :  { %7395 = vmatpush.bf16.msrb.mxu1 %v9518_v19  ;;  %7434 = vmatpush.bf16.msra.mxu0 %v10190_v31  ;;  %v9741_v19 = vld [vmem:[%s17758_s9 + $0x590] sm:$0xf]  ;;  %v11339_v31 = vld [vmem:[%s17758_s9 + $0x5a8] sm:$0xf0] }
 0x5d6   :  { %v9742_v0 = vor.u32 %v11339_v31, %v9741_v19 }
 0x5d8   :  { %7357 = vmatpush.bf16.msra.mxu2 %v10606_v26 }
 0x5d9   :  { %7396 = vmatpush.bf16.msrb.mxu1 %v9490_v46  ;;  %7435 = vmatpush.bf16.msra.mxu0 %v10162_v47  ;;  %v9714_v47 = vor.u32 %v11332_v62, %v9713_v57 }
 0x5db   :  { %7358 = vmatmul.bf16.vlgmr.msra.gmra.mxu2 %v15749_v60  ;;  %v17631_v1 = vpop.f32.mrf.mxu0 }
 0x5dc   :  { %7402 = vmatpush.bf16.msrb.mxu2 %v9910_v32  ;;  %7397 = vmatmul.bf16.vlgmr.msrb.gmra.mxu1 %v14831_v24  ;;  %v11528_v24 = vld [vmem:[%s17758_s9 + $0xb90] sm:$0xf0]  ;;  %v10386_v32 = vor.u32 %v11500_v6, %v10385_v15 }
 0x5dd   :  { %7441 = vmatpush.bf16.msra.mxu1 %v10582_v30  ;;  %7436 = vmatmul.bf16.vlgmr.msra.gmra.mxu0 %v15362_v34  ;;  %v17629_v34 = vpop.f32.mrf.mxu1  ;;  %v10498_v35 = vor.u32 %v11528_v24, %v10497_v7 }
 0x5de   :  { %v7151_v58 = vpop.f32.mrf.mxu2 }
 0x5df   :  { %v7152_v8 = vadd.f32 %v7151_v58, %v7139_v27  ;;  %v10665_v27 = vld [vmem:[%s17758_s9 + $0xcc8] sm:$0xf] }
 0x5e0   :  { %7403 = vmatpush.bf16.msrb.mxu2 %v9882_v53  ;;  %v10749_v53 = vld [vmem:[%s17758_s9 + $0xd70] sm:$0xf] }
 0x5e1   :  { %7442 = vmatpush.bf16.msra.mxu1 %v10554_v54  ;;  %v10810_v63 = vmul.f32 -1.442695, %v7152_v8  ;;  %v11591_v54 = vld [vmem:[%s17758_s9 + $0xd88] sm:$0xf0]  ;;  %v10666_v8 = vor.u32 %v11570_v48, %v10665_v27 }
 0x5e2   :  { %v10750_v11 = vor.u32 %v11591_v54, %v10749_v53 }
 0x5e3   :  { %v7231_v33 = vpop.f32.mrf.mxu0  ;;  %11682 = vpow2.f32 %v10810_v63  ;;  %v10637_v63 = vld [vmem:[%s17758_s9 + $0xc90] sm:$0xf] }
 0x5e4   :  { %7404 = vmatpush.bf16.msrb.mxu2 %v9854_v25  ;;  %v10721_v25 = vld [vmem:[%s17758_s9 + $0xd38] sm:$0xf] }
 0x5e5   :  { %7443 = vmatpush.bf16.msra.mxu1 %v10526_v12  ;;  %v7268_v23 = vpop.f32.mrf.mxu3  ;;  %v7192_v17 = vpop.f32.mrf.mxu1  ;;  %v11584_v12 = vld [vmem:[%s17758_s9 + $0xd50] sm:$0xf0] }
 0x5e6   :  { %v7153_v29 = vpop.f32.mrf.mxu2  ;;  %v7269_v7 = vadd.f32 %v7268_v23, %v4426_v51  ;;  %v11563_v17 = vld [vmem:[%s17758_s9 + $0xca8] sm:$0xf0] }
 0x5e7   :  { %v10638_v33 = vor.u32 %v11563_v17, %v10637_v63 }
 0x5e8   :  { %7405 = vmatpush.bf16.msrb.mxu2 %v9826_v21 }
 0x5e9   :  { %7444 = vmatpush.bf16.msra.mxu1 %v10498_v35  ;;  %v11683_v46 = vpop.eup %11682  ;;  %v10693_v35 = vld [vmem:[%s17758_s9 + $0xd00] sm:$0xf] }
 0x5ea   :  { %v7491_v30 = vadd.f32 1.0, %v11683_v46  ;;  %v10694_v37 = vor.u32 %v11577_v61, %v10693_v35 }
 0x5ec   :  { %7406 = vmatpush.bf16.msrb.mxu2 %v9798_v39  ;;  %11684 = vrcp.f32 %v7491_v30  ;;  %v7551_v28 = vand.u32 2147483648, %v7491_v30  ;;  %v7549_v24 = vand.u32 2147483647, %v7491_v30  ;;  %vm7545_vm7 = vweird.f32 %v7491_v30 }
 0x5ed   :  { %7445 = vmatpush.bf16.msra.mxu1 %v10470_v44  ;;  %v7270_v26 = vpop.f32.mrf.mxu3  ;;  %v7191_v39 = vadd.f32 %v17629_v34, %v17495_v59 }
 0x5ee   :  { %v7552_v4 = vor.u32 1.1754944e-38, %v7551_v28  ;;  %vm7550_vm9 = vcmp.eq.f32.partialorder %v7549_v24, 8.507059e+37 }
 0x5f0   :  { %7407 = vmatpush.bf16.msrb.mxu2 %v9770_v5  ;;  %v10609_v5 = vld [vmem:[%s17758_s9 + $0xc58] sm:$0xf] }
 0x5f1   :  { %7446 = vmatpush.bf16.msra.mxu1 %v10442_v13 }
 0x5f2   :  { %v11685_v2 = vpop.eup %11684 }
 0x5f3   :  { %v7541_v56 = vmul.f32 %v11685_v2, %v7491_v30  ;;  %vm7546_vm6 = vweird.f32 %v11685_v2 }
 0x5f4   :  { %7408 = vmatpush.bf16.msrb.mxu2 %v9742_v0  ;;  %vm7547_vm8 = vmor %vm7545_vm7, %vm7546_vm6 }
 0x5f5   :  { %7447 = vmatpush.bf16.msra.mxu1 %v10414_v41  ;;  %v7542_v52 = vsub.f32 1.0, %v7541_v56 }
 0x5f8   :  { %7409 = vmatpush.bf16.msrb.mxu2 %v9714_v47 }
 0x5f9   :  { %7448 = vmatpush.bf16.msra.mxu1 %v10386_v32  ;;  %v7242_v3 = vpop.f32.mrf.mxu1 }
 0x5fb   :  { %7410 = vmatmul.bf16.vlgmr.msrb.gmra.mxu2 %v15002_v38  ;;  %v10722_v38 = vor.u32 %v11584_v12, %v10721_v25  ;;  %v7281_v21 = vpop.f32.mrf.mxu0 }
 0x5fc   :  { %7454 = vmatpush.bf16.msra.mxu2 %v10806_v49  ;;  %7449 = vmatmul.bf16.vlgmr.msra.gmra.mxu1 %v15582_v18  ;;  %v7543_v18 = vmul.f32 %v11685_v2, %v7542_v52  ;;  %v17717_v20 = vadd.f32 %v7281_v21, %v7269_v7 }
 0x5fe   :  { %v7544_v22 = vadd.f32 %v11685_v2, %v7543_v18  ;;  %v7203_v50 = vpop.f32.mrf.mxu2 }
 0x5ff   :  { %v7204_v42 = vadd.f32 %v7203_v50, %v7191_v39 }
 0x600   :  { %7455 = vmatpush.bf16.msra.mxu2 %v10778_v55  ;;  %v7548_v44 = vsel %vm7547_vm8, %v11685_v2, %v7544_v22 }
 0x601   :  { %v7553_v58 = vsel %vm7550_vm9, %v7552_v4, %v7548_v44  ;;  %v7217_v23 = vadd.f32 %v17537_v10, %v7204_v42  ;;  %v7244_v59 = vpop.f32.mrf.mxu1  ;;  %v11556_v10 = vld [vmem:[%s17758_s9 + $0xc70] sm:$0xf0] }
 0x602   :  { %7603 = vst [vmem:[#allocation2 + $0x18] sm:$0xff] %v7553_v58  ;;  %v10610_v31 = vor.u32 %v11556_v10, %v10609_v5 }
 0x603   :  { %v7283_v34 = vpop.f32.mrf.mxu0  ;;  %v7230_v0 = vadd.f32 %v17631_v1, %v7217_v23 }
 0x604   :  { %7456 = vmatpush.bf16.msra.mxu2 %v10750_v11 }
 0x605   :  { %v7320_v9 = vpop.f32.mrf.mxu3  ;;  %v7243_v41 = vadd.f32 %v7242_v3, %v7230_v0 }
 0x606   :  { %v7205_v13 = vpop.f32.mrf.mxu2 }
 0x608   :  { %7457 = vmatpush.bf16.msra.mxu2 %v10722_v38 }
 0x60c   :  { %7458 = vmatpush.bf16.msra.mxu2 %v10694_v37 }
 0x60d   :  { %v7322_v19 = vpop.f32.mrf.mxu3 }
 0x610   :  { %7459 = vmatpush.bf16.msra.mxu2 %v10666_v8 }
 0x614   :  { %7460 = vmatpush.bf16.msra.mxu2 %v10638_v33 }
 0x618   :  { %7461 = vmatpush.bf16.msra.mxu2 %v10610_v31 }
 0x619   :  { %v7294_v16 = vpop.f32.mrf.mxu1 }
 0x61a   :  { %v7295_v25 = vadd.f32 %v7294_v16, %v17717_v20 }
 0x61b   :  { %7462 = vmatmul.bf16.vlgmr.msra.gmra.mxu2 %v15749_v60  ;;  %v7333_v36 = vpop.f32.mrf.mxu0  ;;  %v11700_v60 = vld [vmem:[%s17759_s10] sm:$0x7f]  ;;  %s11728_s10 = smov [#allocation2]  }
 0x61c   :  { %v4427_v30 = vperm.slane %v11700_v60, 6  ;;  %s7613_s5 = sshll.u32 %s11728_s10, 4  ;;  %s7614_s5 = int_to_ptr.vmem [resolvable:$true] %s7613_s5 }
 0x61e   :  { %v7255_v57 = vpop.f32.mrf.mxu2 }
 0x61f   :  { %v7256_v29 = vadd.f32 %v7255_v57, %v7243_v41 }
 0x621   :  { %v10811_v15 = vmul.f32 -1.442695, %v7256_v29  ;;  %v7296_v6 = vpop.f32.mrf.mxu1 }
 0x623   :  { %v7335_v14 = vpop.f32.mrf.mxu0  ;;  %11686 = vpow2.f32 %v10811_v15 }
 0x625   :  { %v7372_v62 = vpop.f32.mrf.mxu3 }
 0x626   :  { %v7257_v45 = vpop.f32.mrf.mxu2  ;;  %v7373_v40 = vadd.f32 %v7372_v62, %v4427_v30 }
 0x629   :  { %v11687_v46 = vpop.eup %11686 }
 0x62a   :  { %v7492_v47 = vadd.f32 1.0, %v11687_v46 }
 0x62c   :  { %11688 = vrcp.f32 %v7492_v47  ;;  %v7566_v43 = vand.u32 2147483648, %v7492_v47  ;;  %v7564_v54 = vand.u32 2147483647, %v7492_v47  ;;  %vm7560_vm11 = vweird.f32 %v7492_v47 }
 0x62d   :  { %v7374_v26 = vpop.f32.mrf.mxu3 }
 0x62e   :  { %v7567_v56 = vor.u32 1.1754944e-38, %v7566_v43  ;;  %vm7565_vm13 = vcmp.eq.f32.partialorder %v7564_v54, 8.507059e+37 }
 0x632   :  { %v11689_v32 = vpop.eup %11688 }
 0x633   :  { %v7556_v1 = vmul.f32 %v11689_v32, %v7492_v47  ;;  %vm7561_vm10 = vweird.f32 %v11689_v32 }
 0x634   :  { %vm7562_vm12 = vmor %vm7560_vm11, %vm7561_vm10 }
 0x635   :  { %v7557_v49 = vsub.f32 1.0, %v7556_v1 }
 0x637   :  { %v7558_v53 = vmul.f32 %v11689_v32, %v7557_v49 }
 0x639   :  { %v7346_v55 = vpop.f32.mrf.mxu1  ;;  %v7559_v11 = vadd.f32 %v11689_v32, %v7558_v53 }
 0x63b   :  { %v7385_v2 = vpop.f32.mrf.mxu0  ;;  %v7563_v12 = vsel %vm7562_vm12, %v11689_v32, %v7559_v11 }
 0x63c   :  { %v7386_v51 = vadd.f32 %v7385_v2, %v7373_v40  ;;  %v7568_v52 = vsel %vm7565_vm13, %v7567_v56, %v7563_v12 }
 0x63d   :  { %7604 = vst [vmem:[#allocation2 + $0x20] sm:$0xff] %v7568_v52 }
 0x63e   :  { %v7307_v28 = vpop.f32.mrf.mxu2 }
 0x63f   :  { %v7308_v7 = vadd.f32 %v7307_v28, %v7295_v25 }
 0x641   :  { %v7348_v18 = vpop.f32.mrf.mxu1  ;;  %v7321_v24 = vadd.f32 %v7320_v9, %v7308_v7 }
 0x643   :  { %v7387_v3 = vpop.f32.mrf.mxu0  ;;  %v7334_v4 = vadd.f32 %v7333_v36, %v7321_v24 }
 0x645   :  { %v7424_v38 = vpop.f32.mrf.mxu3  ;;  %v7347_v37 = vadd.f32 %v7346_v55, %v7334_v4 }
 0x646   :  { %v7309_v21 = vpop.f32.mrf.mxu2 }
 0x64d   :  { %v7426_v35 = vpop.f32.mrf.mxu3 }
 0x659   :  { %v7398_v61 = vpop.f32.mrf.mxu1 }
 0x65a   :  { %v7437_v22 = vpop.f32.mrf.mxu0  ;;  %v7399_v10 = vadd.f32 %v7398_v61, %v7386_v51 }
 0x65e   :  { %v7359_v39 = vpop.f32.mrf.mxu2 }
 0x65f   :  { %v7360_v44 = vadd.f32 %v7359_v39, %v7347_v37 }
 0x661   :  { %v10812_v27 = vmul.f32 -1.442695, %v7360_v44  ;;  %v7400_v20 = vpop.f32.mrf.mxu1 }
 0x662   :  { %v7439_v48 = vpop.f32.mrf.mxu0 }
 0x663   :  { %11690 = vpow2.f32 %v10812_v27 }
 0x666   :  { %v7361_v58 = vpop.f32.mrf.mxu2 }
 0x669   :  { %v11691_v50 = vpop.eup %11690 }
 0x66a   :  { %v7493_v42 = vadd.f32 1.0, %v11691_v50 }
 0x66c   :  { %11692 = vrcp.f32 %v7493_v42  ;;  %v7581_v59 = vand.u32 2147483648, %v7493_v42  ;;  %v7579_v17 = vand.u32 2147483647, %v7493_v42  ;;  %vm7575_vm15 = vweird.f32 %v7493_v42 }
 0x66e   :  { %v7582_v5 = vor.u32 1.1754944e-38, %v7581_v59  ;;  %vm7580_vm1 = vcmp.eq.f32.partialorder %v7579_v17, 8.507059e+37 }
 0x672   :  { %v11693_v8 = vpop.eup %11692 }
 0x673   :  { %v7571_v23 = vmul.f32 %v11693_v8, %v7493_v42  ;;  %vm7576_vm14 = vweird.f32 %v11693_v8 }
 0x674   :  { %vm7577_vm0 = vmor %vm7575_vm15, %vm7576_vm14 }
 0x675   :  { %v7572_v9 = vsub.f32 1.0, %v7571_v23 }
 0x677   :  { %v7573_v63 = vmul.f32 %v11693_v8, %v7572_v9 }
 0x679   :  { %v7450_v34 = vpop.f32.mrf.mxu1  ;;  %v7574_v33 = vadd.f32 %v11693_v8, %v7573_v63 }
 0x67b   :  { %v7578_v13 = vsel %vm7577_vm0, %v11693_v8, %v7574_v33 }
 0x67c   :  { %v7583_v19 = vsel %vm7580_vm1, %v7582_v5, %v7578_v13 }
 0x67d   :  { %7605 = vst [vmem:[#allocation2 + $0x28] sm:$0xff] %v7583_v19 }
 0x67e   :  { %v7411_v31 = vpop.f32.mrf.mxu2 }
 0x67f   :  { %v7412_v16 = vadd.f32 %v7411_v31, %v7399_v10 }
 0x681   :  { %v7452_v36 = vpop.f32.mrf.mxu1  ;;  %v7425_v0 = vadd.f32 %v7424_v38, %v7412_v16 }
 0x683   :  { %v7438_v57 = vadd.f32 %v7437_v22, %v7425_v0 }
 0x685   :  { %v7451_v29 = vadd.f32 %v7450_v34, %v7438_v57 }
 0x686   :  { %v7413_v41 = vpop.f32.mrf.mxu2 }
 0x69e   :  { %v7463_v62 = vpop.f32.mrf.mxu2 }
 0x69f   :  { %v7464_v15 = vadd.f32 %v7463_v62, %v7451_v29 }
 0x6a1   :  { %v10813_v6 = vmul.f32 -1.442695, %v7464_v15 }
 0x6a3   :  { %11694 = vpow2.f32 %v10813_v6 }
 0x6a6   :  { %v7465_v14 = vpop.f32.mrf.mxu2 }
 0x6a9   :  { %v11695_v45 = vpop.eup %11694 }
 0x6aa   :  { %v7494_v26 = vadd.f32 1.0, %v11695_v45 }
 0x6ac   :  { %11696 = vrcp.f32 %v7494_v26  ;;  %v7596_v60 = vand.u32 2147483648, %v7494_v26  ;;  %v7594_v1 = vand.u32 2147483647, %v7494_v26  ;;  %vm7590_vm3 = vweird.f32 %v7494_v26 }
 0x6ae   :  { %v7597_v43 = vor.u32 1.1754944e-38, %v7596_v60  ;;  %vm7595_vm6 = vcmp.eq.f32.partialorder %v7594_v1, 8.507059e+37 }
 0x6b2   :  { %v11697_v46 = vpop.eup %11696 }
 0x6b3   :  { %v7586_v47 = vmul.f32 %v11697_v46, %v7494_v26  ;;  %vm7591_vm2 = vweird.f32 %v11697_v46 }
 0x6b4   :  { %vm7592_vm4 = vmor %vm7590_vm3, %vm7591_vm2 }
 0x6b5   :  { %v7587_v32 = vsub.f32 1.0, %v7586_v47 }
 0x6b7   :  { %v7588_v30 = vmul.f32 %v11697_v46, %v7587_v32 }
 0x6b9   :  { %v7589_v49 = vadd.f32 %v11697_v46, %v7588_v30 }
 0x6bb   :  { %v7593_v40 = vsel %vm7592_vm4, %v11697_v46, %v7589_v49 }
 0x6bc   :  { %v7598_v55 = vsel %vm7595_vm6, %v7597_v43, %v7593_v40 }
 0x6bd   :  { %7607 = vst.msk [vmem:[#allocation2 + $0x30] sm:$0xff] %vm7606_vm5, %v7598_v55 }
 0x6be   :  { %7618 = dma.vmem_to_hbm [thread:$0]  %s7614_s5, 896, %s7616_s15, [#allocation3]  }
 0x6bf   :  { %11725 = dma.done.wait [#allocation3], 896  }
 0x6c0   :  { %11726 = vsyncadd [#allocation3], 4294966400 }
 0x6c1   :  { %7623 = vsyncpa [#allocation3], 1 }

</bundles_post_ra>
